<compile_context>
chip_gen: v7x
topology: tpu7x:2x2x1
jax: 0.10.0
libtpu: 0.0.40
codegen_flags: <defaults>
</compile_context>

<pallas_src>
import functools

import jax
import jax.numpy as jnp
from jax import lax
from jax.experimental import pallas as pl
from jax.experimental.pallas import tpu as pltpu


def _patch_embed_kernel(x_ref, w_ref, b_ref, o_ref, *, stride, ksize, row_tile):
    # x_ref : (S*S, Hq, Wq, Cin) space-to-depth, zero-padded input of ONE batch element.
    #         plane p = ry*S + rx holds x_pad[S*qy + ry, S*qx + rx, :] at [qy, qx, :].
    # w_ref : (K, K, Cin, Cout)  conv weight with BatchNorm scale folded in (lane = Cout)
    # b_ref : (1, 1, Cout)       conv bias with BatchNorm shift folded in
    # o_ref : (1, Hout, Wout, Cout)
    S, K = stride, ksize
    _, Hout, Wout, Cout = o_ref.shape
    Cin = x_ref.shape[-1]

    bias = b_ref[0].astype(jnp.float32)                       # (1, Cout)

    r0 = 0
    while r0 < Hout:                                          # static row tiling
        th = min(row_tile, Hout - r0)
        acc = jnp.broadcast_to(bias, (th, Wout, Cout)).astype(jnp.float32)
        for ky in range(K):
            qy0, ry = divmod(ky, S)
            for kx in range(K):
                qx0, rx = divmod(kx, S)
                # Contiguous window thanks to the space-to-depth layout: no strided
                # VMEM reads, only the (th, Wout, Cin) window is live per tap.
                patch = x_ref[ry * S + rx,
                              pl.ds(r0 + qy0, th),
                              pl.ds(qx0, Wout), :].astype(jnp.float32)
                # in_ch is tiny: VPU broadcast-MAC over lanes beats a K=Cin MXU matmul.
                for c in range(Cin):
                    w_row = w_ref[ky, kx, c:c + 1, :].astype(jnp.float32)   # (1, Cout)
                    acc = acc + patch[:, :, c:c + 1] * w_row
        o_ref[0, pl.ds(r0, th), :, :] = acc.astype(o_ref.dtype)
        r0 += th


def overlap_patch_embed(x_nchw, conv_w, conv_b, bn_gamma, bn_beta, bn_mean, bn_var,
                        *, stride=4, eps=1e-5):
    """x_nchw: (N, Cin, H, W). conv_w: (Cout, Cin, K, K), conv_b: (Cout,).
    BatchNorm params/stats: (Cout,) each. Returns (out_nchw, Hout, Wout)."""
    N, Cin, H, W = x_nchw.shape
    Cout, _, K, _ = conv_w.shape
    P = K // 2
    Hout = (H + 2 * P - K) // stride + 1
    Wout = (W + 2 * P - K) // stride + 1
    Hq = Hout + (K - 1) // stride
    Wq = Wout + (K - 1) // stride
    Hp, Wp = stride * Hq, stride * Wq

    # ---- host-side layout plumbing (done once, no compute hoisted) ----
    # NCHW -> NHWC, zero-pad, then space-to-depth so every conv tap in the kernel is
    # a contiguous window.
    x = jnp.transpose(x_nchw, (0, 2, 3, 1))                                  # NHWC
    x_pad = jnp.zeros((N, Hp, Wp, Cin), x.dtype).at[:, P:P + H, P:P + W, :].set(x)
    x_s2d = (x_pad.reshape(N, Hq, stride, Wq, stride, Cin)
                  .transpose(0, 2, 4, 1, 3, 5)
                  .reshape(N * stride * stride, Hq, Wq, Cin))

    # ---- fold inference-mode BatchNorm into the conv weight / bias ----
    # TODO(synk): training-mode BatchNorm (batch statistics + running-stat update) is
    #             not implemented; inference-mode running stats are used.
    scale = bn_gamma / jnp.sqrt(bn_var + eps)                                # (Cout,)
    w_k = jnp.transpose(conv_w, (2, 3, 1, 0)) * scale                        # (K,K,Cin,Cout)
    b_k = ((conv_b - bn_mean) * scale + bn_beta).reshape(1, 1, Cout)

    row_tile = Hout if Hout <= 8 else 8
    kernel = functools.partial(_patch_embed_kernel, stride=stride, ksize=K,
                               row_tile=row_tile)

    out = pl.pallas_call(
        kernel,
        out_shape=jax.ShapeDtypeStruct((N, Hout, Wout, Cout), x.dtype),
        grid_spec=pltpu.PrefetchScalarGridSpec(
            num_scalar_prefetch=0,
            grid=(N,),
            in_specs=[
                pl.BlockSpec((stride * stride, Hq, Wq, Cin), lambda n: (n, 0, 0, 0)),
                pl.BlockSpec((K, K, Cin, Cout), lambda n: (0, 0, 0, 0)),
                pl.BlockSpec((1, 1, Cout), lambda n: (0, 0, 0)),
            ],
            out_specs=pl.BlockSpec((1, Hout, Wout, Cout), lambda n: (n, 0, 0, 0)),
        ),
        compiler_params=pltpu.CompilerParams(
            dimension_semantics=("parallel",),
        ),
    )(x_s2d, w_k, b_k)

    return jnp.transpose(out, (0, 3, 1, 2)), Hout, Wout                      # NCHW


def overlap_patch_embed_ref(x, conv_w, conv_b, gamma, beta, mean, var,
                            *, stride=4, eps=1e-5):
    """Pure-JAX reference (NCHW) of conv + inference-mode BatchNorm."""
    K = conv_w.shape[-1]
    P = K // 2
    y = lax.conv_general_dilated(
        x, conv_w, (stride, stride), [(P, P), (P, P)],
        dimension_numbers=('NCHW', 'OIHW', 'NCHW')) + conv_b[None, :, None, None]
    inv = gamma / jnp.sqrt(var + eps)
    y = (y - mean[None, :, None, None]) * inv[None, :, None, None] \
        + beta[None, :, None, None]
    return y, y.shape[2], y.shape[3]


if __name__ == "__main__":
    N, Cin, H, W = 2, 3, 16, 16
    Cout, K, stride = 128, 7, 4

    keys = jax.random.split(jax.random.PRNGKey(0), 7)
    conv_w = jax.random.normal(keys[0], (Cout, Cin, K, K), jnp.float32) * 0.1
    conv_b = jax.random.normal(keys[1], (Cout,), jnp.float32) * 0.1
    gamma = jax.random.uniform(keys[2], (Cout,), jnp.float32, 0.5, 1.5)
    beta = jax.random.normal(keys[3], (Cout,), jnp.float32) * 0.1
    mean = jax.random.normal(keys[4], (Cout,), jnp.float32) * 0.1
    var = jax.random.uniform(keys[5], (Cout,), jnp.float32, 0.5, 1.5)
    x = jax.random.normal(keys[6], (N, Cin, H, W), jnp.float32)

    out, Ho, Wo = overlap_patch_embed(x, conv_w, conv_b, gamma, beta, mean, var,
                                      stride=stride)
    out = jax.block_until_ready(out)

    ref, Ho_r, Wo_r = overlap_patch_embed_ref(x, conv_w, conv_b, gamma, beta, mean,
                                              var, stride=stride)
    ref = jax.block_until_ready(ref)

    assert (Ho, Wo) == (Ho_r, Wo_r) == (4, 4)
    assert out.shape == ref.shape == (N, Cout, Ho, Wo)
    max_err = float(jnp.max(jnp.abs(out - ref)))
    assert max_err < 1e-3, f"mismatch vs reference: {max_err}"
    print("KERNEL_OK")
</pallas_src>

<mosaic_0001>
module attributes {stable_mosaic.version = 11 : i64} {
  func.func @_patch_embed_kernel(%arg0: i32, %arg1: memref<16x5x5x3xf32, #tpu.memory_space<vmem>>, %arg2: memref<7x7x3x128xf32, #tpu.memory_space<vmem>>, %arg3: memref<1x1x128xf32, #tpu.memory_space<vmem>>, %arg4: memref<1x4x4x128xf32, #tpu.memory_space<vmem>>) attributes {dimension_semantics = [#tpu.dimension_semantics<parallel>], iteration_bounds = array<i64: 2>, scalar_prefetch = 0 : i64, scratch_operands = 0 : i64, tpu.core_type = #tpu.core_type<tc>, window_params = [{transform_indices = @transform_0, window_bounds = array<i64: 16, 5, 5, 3>}, {pipeline_mode = #tpu.pipeline_mode<synchronous>, transform_indices = @transform_1, window_bounds = array<i64: 7, 7, 3, 128>}, {pipeline_mode = #tpu.pipeline_mode<synchronous>, transform_indices = @transform_2, window_bounds = array<i64: 1, 1, 128>}, {transform_indices = @transform_3, window_bounds = array<i64: 1, 4, 4, 128>}]} {
    %c0 = arith.constant 0 : index
    %c0_0 = arith.constant 0 : index
    %c0_1 = arith.constant 0 : index
    %0 = vector.load %arg3[%c0, %c0_0, %c0_1] : memref<1x1x128xf32, #tpu.memory_space<vmem>>, vector<1x1x128xf32>
    %1 = vector.shape_cast %0 : vector<1x1x128xf32> to vector<1x128xf32>
    %2 = vector.shape_cast %1 : vector<1x128xf32> to vector<1x1x128xf32>
    %3 = vector.broadcast %2 : vector<1x1x128xf32> to vector<4x4x128xf32>
    %c0_2 = arith.constant 0 : index
    %c0_3 = arith.constant 0 : index
    %c0_4 = arith.constant 0 : index
    %c0_5 = arith.constant 0 : index
    %4 = vector.load %arg1[%c0_2, %c0_3, %c0_4, %c0_5] : memref<16x5x5x3xf32, #tpu.memory_space<vmem>>, vector<1x4x4x3xf32>
    %5 = vector.shape_cast %4 : vector<1x4x4x3xf32> to vector<4x4x3xf32>
    %c0_6 = arith.constant 0 : index
    %c0_7 = arith.constant 0 : index
    %c0_8 = arith.constant 0 : index
    %c0_9 = arith.constant 0 : index
    %6 = vector.load %arg2[%c0_6, %c0_7, %c0_8, %c0_9] : memref<7x7x3x128xf32, #tpu.memory_space<vmem>>, vector<1x1x1x128xf32>
    %7 = vector.shape_cast %6 : vector<1x1x1x128xf32> to vector<1x128xf32>
    %8 = vector.extract_strided_slice %5 {offsets = [0, 0, 0], sizes = [4, 4, 1], strides = [1, 1, 1]} : vector<4x4x3xf32> to vector<4x4x1xf32>
    %9 = vector.shape_cast %7 : vector<1x128xf32> to vector<1x1x128xf32>
    %10 = vector.broadcast %8 : vector<4x4x1xf32> to vector<4x4x128xf32>
    %11 = vector.broadcast %9 : vector<1x1x128xf32> to vector<4x4x128xf32>
    %12 = arith.mulf %10, %11 : vector<4x4x128xf32>
    %13 = arith.addf %3, %12 : vector<4x4x128xf32>
    %c0_10 = arith.constant 0 : index
    %c0_11 = arith.constant 0 : index
    %c1 = arith.constant 1 : index
    %c0_12 = arith.constant 0 : index
    %14 = vector.load %arg2[%c0_10, %c0_11, %c1, %c0_12] : memref<7x7x3x128xf32, #tpu.memory_space<vmem>>, vector<1x1x1x128xf32>
    %15 = vector.shape_cast %14 : vector<1x1x1x128xf32> to vector<1x128xf32>
    %16 = vector.extract_strided_slice %5 {offsets = [0, 0, 1], sizes = [4, 4, 1], strides = [1, 1, 1]} : vector<4x4x3xf32> to vector<4x4x1xf32>
    %17 = vector.shape_cast %15 : vector<1x128xf32> to vector<1x1x128xf32>
    %18 = vector.broadcast %16 : vector<4x4x1xf32> to vector<4x4x128xf32>
    %19 = vector.broadcast %17 : vector<1x1x128xf32> to vector<4x4x128xf32>
    %20 = arith.mulf %18, %19 : vector<4x4x128xf32>
    %21 = arith.addf %13, %20 : vector<4x4x128xf32>
    %c0_13 = arith.constant 0 : index
    %c0_14 = arith.constant 0 : index
    %c2 = arith.constant 2 : index
    %c0_15 = arith.constant 0 : index
    %22 = vector.load %arg2[%c0_13, %c0_14, %c2, %c0_15] : memref<7x7x3x128xf32, #tpu.memory_space<vmem>>, vector<1x1x1x128xf32>
    %23 = vector.shape_cast %22 : vector<1x1x1x128xf32> to vector<1x128xf32>
    %24 = vector.extract_strided_slice %5 {offsets = [0, 0, 2], sizes = [4, 4, 1], strides = [1, 1, 1]} : vector<4x4x3xf32> to vector<4x4x1xf32>
    %25 = vector.shape_cast %23 : vector<1x128xf32> to vector<1x1x128xf32>
    %26 = vector.broadcast %24 : vector<4x4x1xf32> to vector<4x4x128xf32>
    %27 = vector.broadcast %25 : vector<1x1x128xf32> to vector<4x4x128xf32>
    %28 = arith.mulf %26, %27 : vector<4x4x128xf32>
    %29 = arith.addf %21, %28 : vector<4x4x128xf32>
    %c1_16 = arith.constant 1 : index
    %c0_17 = arith.constant 0 : index
    %c0_18 = arith.constant 0 : index
    %c0_19 = arith.constant 0 : index
    %30 = vector.load %arg1[%c1_16, %c0_17, %c0_18, %c0_19] : memref<16x5x5x3xf32, #tpu.memory_space<vmem>>, vector<1x4x4x3xf32>
    %31 = vector.shape_cast %30 : vector<1x4x4x3xf32> to vector<4x4x3xf32>
    %c0_20 = arith.constant 0 : index
    %c1_21 = arith.constant 1 : index
    %c0_22 = arith.constant 0 : index
    %c0_23 = arith.constant 0 : index
    %32 = vector.load %arg2[%c0_20, %c1_21, %c0_22, %c0_23] : memref<7x7x3x128xf32, #tpu.memory_space<vmem>>, vector<1x1x1x128xf32>
    %33 = vector.shape_cast %32 : vector<1x1x1x128xf32> to vector<1x128xf32>
    %34 = vector.extract_strided_slice %31 {offsets = [0, 0, 0], sizes = [4, 4, 1], strides = [1, 1, 1]} : vector<4x4x3xf32> to vector<4x4x1xf32>
    %35 = vector.shape_cast %33 : vector<1x128xf32> to vector<1x1x128xf32>
    %36 = vector.broadcast %34 : vector<4x4x1xf32> to vector<4x4x128xf32>
    %37 = vector.broadcast %35 : vector<1x1x128xf32> to vector<4x4x128xf32>
    %38 = arith.mulf %36, %37 : vector<4x4x128xf32>
    %39 = arith.addf %29, %38 : vector<4x4x128xf32>
    %c0_24 = arith.constant 0 : index
    %c1_25 = arith.constant 1 : index
    %c1_26 = arith.constant 1 : index
    %c0_27 = arith.constant 0 : index
    %40 = vector.load %arg2[%c0_24, %c1_25, %c1_26, %c0_27] : memref<7x7x3x128xf32, #tpu.memory_space<vmem>>, vector<1x1x1x128xf32>
    %41 = vector.shape_cast %40 : vector<1x1x1x128xf32> to vector<1x128xf32>
    %42 = vector.extract_strided_slice %31 {offsets = [0, 0, 1], sizes = [4, 4, 1], strides = [1, 1, 1]} : vector<4x4x3xf32> to vector<4x4x1xf32>
    %43 = vector.shape_cast %41 : vector<1x128xf32> to vector<1x1x128xf32>
    %44 = vector.broadcast %42 : vector<4x4x1xf32> to vector<4x4x128xf32>
    %45 = vector.broadcast %43 : vector<1x1x128xf32> to vector<4x4x128xf32>
    %46 = arith.mulf %44, %45 : vector<4x4x128xf32>
    %47 = arith.addf %39, %46 : vector<4x4x128xf32>
    %c0_28 = arith.constant 0 : index
    %c1_29 = arith.constant 1 : index
    %c2_30 = arith.constant 2 : index
    %c0_31 = arith.constant 0 : index
    %48 = vector.load %arg2[%c0_28, %c1_29, %c2_30, %c0_31] : memref<7x7x3x128xf32, #tpu.memory_space<vmem>>, vector<1x1x1x128xf32>
    %49 = vector.shape_cast %48 : vector<1x1x1x128xf32> to vector<1x128xf32>
    %50 = vector.extract_strided_slice %31 {offsets = [0, 0, 2], sizes = [4, 4, 1], strides = [1, 1, 1]} : vector<4x4x3xf32> to vector<4x4x1xf32>
    %51 = vector.shape_cast %49 : vector<1x128xf32> to vector<1x1x128xf32>
    %52 = vector.broadcast %50 : vector<4x4x1xf32> to vector<4x4x128xf32>
    %53 = vector.broadcast %51 : vector<1x1x128xf32> to vector<4x4x128xf32>
    %54 = arith.mulf %52, %53 : vector<4x4x128xf32>
    %55 = arith.addf %47, %54 : vector<4x4x128xf32>
    %c2_32 = arith.constant 2 : index
    %c0_33 = arith.constant 0 : index
    %c0_34 = arith.constant 0 : index
    %c0_35 = arith.constant 0 : index
    %56 = vector.load %arg1[%c2_32, %c0_33, %c0_34, %c0_35] : memref<16x5x5x3xf32, #tpu.memory_space<vmem>>, vector<1x4x4x3xf32>
    %57 = vector.shape_cast %56 : vector<1x4x4x3xf32> to vector<4x4x3xf32>
    %c0_36 = arith.constant 0 : index
    %c2_37 = arith.constant 2 : index
    %c0_38 = arith.constant 0 : index
    %c0_39 = arith.constant 0 : index
    %58 = vector.load %arg2[%c0_36, %c2_37, %c0_38, %c0_39] : memref<7x7x3x128xf32, #tpu.memory_space<vmem>>, vector<1x1x1x128xf32>
    %59 = vector.shape_cast %58 : vector<1x1x1x128xf32> to vector<1x128xf32>
    %60 = vector.extract_strided_slice %57 {offsets = [0, 0, 0], sizes = [4, 4, 1], strides = [1, 1, 1]} : vector<4x4x3xf32> to vector<4x4x1xf32>
    %61 = vector.shape_cast %59 : vector<1x128xf32> to vector<1x1x128xf32>
    %62 = vector.broadcast %60 : vector<4x4x1xf32> to vector<4x4x128xf32>
    %63 = vector.broadcast %61 : vector<1x1x128xf32> to vector<4x4x128xf32>
    %64 = arith.mulf %62, %63 : vector<4x4x128xf32>
    %65 = arith.addf %55, %64 : vector<4x4x128xf32>
    %c0_40 = arith.constant 0 : index
    %c2_41 = arith.constant 2 : index
    %c1_42 = arith.constant 1 : index
    %c0_43 = arith.constant 0 : index
    %66 = vector.load %arg2[%c0_40, %c2_41, %c1_42, %c0_43] : memref<7x7x3x128xf32, #tpu.memory_space<vmem>>, vector<1x1x1x128xf32>
    %67 = vector.shape_cast %66 : vector<1x1x1x128xf32> to vector<1x128xf32>
    %68 = vector.extract_strided_slice %57 {offsets = [0, 0, 1], sizes = [4, 4, 1], strides = [1, 1, 1]} : vector<4x4x3xf32> to vector<4x4x1xf32>
    %69 = vector.shape_cast %67 : vector<1x128xf32> to vector<1x1x128xf32>
    %70 = vector.broadcast %68 : vector<4x4x1xf32> to vector<4x4x128xf32>
    %71 = vector.broadcast %69 : vector<1x1x128xf32> to vector<4x4x128xf32>
    %72 = arith.mulf %70, %71 : vector<4x4x128xf32>
    %73 = arith.addf %65, %72 : vector<4x4x128xf32>
    %c0_44 = arith.constant 0 : index
    %c2_45 = arith.constant 2 : index
    %c2_46 = arith.constant 2 : index
    %c0_47 = arith.constant 0 : index
    %74 = vector.load %arg2[%c0_44, %c2_45, %c2_46, %c0_47] : memref<7x7x3x128xf32, #tpu.memory_space<vmem>>, vector<1x1x1x128xf32>
    %75 = vector.shape_cast %74 : vector<1x1x1x128xf32> to vector<1x128xf32>
    %76 = vector.extract_strided_slice %57 {offsets = [0, 0, 2], sizes = [4, 4, 1], strides = [1, 1, 1]} : vector<4x4x3xf32> to vector<4x4x1xf32>
    %77 = vector.shape_cast %75 : vector<1x128xf32> to vector<1x1x128xf32>
    %78 = vector.broadcast %76 : vector<4x4x1xf32> to vector<4x4x128xf32>
    %79 = vector.broadcast %77 : vector<1x1x128xf32> to vector<4x4x128xf32>
    %80 = arith.mulf %78, %79 : vector<4x4x128xf32>
    %81 = arith.addf %73, %80 : vector<4x4x128xf32>
    %c3 = arith.constant 3 : index
    %c0_48 = arith.constant 0 : index
    %c0_49 = arith.constant 0 : index
    %c0_50 = arith.constant 0 : index
    %82 = vector.load %arg1[%c3, %c0_48, %c0_49, %c0_50] : memref<16x5x5x3xf32, #tpu.memory_space<vmem>>, vector<1x4x4x3xf32>
    %83 = vector.shape_cast %82 : vector<1x4x4x3xf32> to vector<4x4x3xf32>
    %c0_51 = arith.constant 0 : index
    %c3_52 = arith.constant 3 : index
    %c0_53 = arith.constant 0 : index
    %c0_54 = arith.constant 0 : index
    %84 = vector.load %arg2[%c0_51, %c3_52, %c0_53, %c0_54] : memref<7x7x3x128xf32, #tpu.memory_space<vmem>>, vector<1x1x1x128xf32>
    %85 = vector.shape_cast %84 : vector<1x1x1x128xf32> to vector<1x128xf32>
    %86 = vector.extract_strided_slice %83 {offsets = [0, 0, 0], sizes = [4, 4, 1], strides = [1, 1, 1]} : vector<4x4x3xf32> to vector<4x4x1xf32>
    %87 = vector.shape_cast %85 : vector<1x128xf32> to vector<1x1x128xf32>
    %88 = vector.broadcast %86 : vector<4x4x1xf32> to vector<4x4x128xf32>
    %89 = vector.broadcast %87 : vector<1x1x128xf32> to vector<4x4x128xf32>
    %90 = arith.mulf %88, %89 : vector<4x4x128xf32>
    %91 = arith.addf %81, %90 : vector<4x4x128xf32>
    %c0_55 = arith.constant 0 : index
    %c3_56 = arith.constant 3 : index
    %c1_57 = arith.constant 1 : index
    %c0_58 = arith.constant 0 : index
    %92 = vector.load %arg2[%c0_55, %c3_56, %c1_57, %c0_58] : memref<7x7x3x128xf32, #tpu.memory_space<vmem>>, vector<1x1x1x128xf32>
    %93 = vector.shape_cast %92 : vector<1x1x1x128xf32> to vector<1x128xf32>
    %94 = vector.extract_strided_slice %83 {offsets = [0, 0, 1], sizes = [4, 4, 1], strides = [1, 1, 1]} : vector<4x4x3xf32> to vector<4x4x1xf32>
    %95 = vector.shape_cast %93 : vector<1x128xf32> to vector<1x1x128xf32>
    %96 = vector.broadcast %94 : vector<4x4x1xf32> to vector<4x4x128xf32>
    %97 = vector.broadcast %95 : vector<1x1x128xf32> to vector<4x4x128xf32>
    %98 = arith.mulf %96, %97 : vector<4x4x128xf32>
    %99 = arith.addf %91, %98 : vector<4x4x128xf32>
    %c0_59 = arith.constant 0 : index
    %c3_60 = arith.constant 3 : index
    %c2_61 = arith.constant 2 : index
    %c0_62 = arith.constant 0 : index
    %100 = vector.load %arg2[%c0_59, %c3_60, %c2_61, %c0_62] : memref<7x7x3x128xf32, #tpu.memory_space<vmem>>, vector<1x1x1x128xf32>
    %101 = vector.shape_cast %100 : vector<1x1x1x128xf32> to vector<1x128xf32>
    %102 = vector.extract_strided_slice %83 {offsets = [0, 0, 2], sizes = [4, 4, 1], strides = [1, 1, 1]} : vector<4x4x3xf32> to vector<4x4x1xf32>
    %103 = vector.shape_cast %101 : vector<1x128xf32> to vector<1x1x128xf32>
    %104 = vector.broadcast %102 : vector<4x4x1xf32> to vector<4x4x128xf32>
    %105 = vector.broadcast %103 : vector<1x1x128xf32> to vector<4x4x128xf32>
    %106 = arith.mulf %104, %105 : vector<4x4x128xf32>
    %107 = arith.addf %99, %106 : vector<4x4x128xf32>
    %c0_63 = arith.constant 0 : index
    %c0_64 = arith.constant 0 : index
    %c1_65 = arith.constant 1 : index
    %c0_66 = arith.constant 0 : index
    %108 = vector.load %arg1[%c0_63, %c0_64, %c1_65, %c0_66] : memref<16x5x5x3xf32, #tpu.memory_space<vmem>>, vector<1x4x4x3xf32>
    %109 = vector.shape_cast %108 : vector<1x4x4x3xf32> to vector<4x4x3xf32>
    %c0_67 = arith.constant 0 : index
    %c4 = arith.constant 4 : index
    %c0_68 = arith.constant 0 : index
    %c0_69 = arith.constant 0 : index
    %110 = vector.load %arg2[%c0_67, %c4, %c0_68, %c0_69] : memref<7x7x3x128xf32, #tpu.memory_space<vmem>>, vector<1x1x1x128xf32>
    %111 = vector.shape_cast %110 : vector<1x1x1x128xf32> to vector<1x128xf32>
    %112 = vector.extract_strided_slice %109 {offsets = [0, 0, 0], sizes = [4, 4, 1], strides = [1, 1, 1]} : vector<4x4x3xf32> to vector<4x4x1xf32>
    %113 = vector.shape_cast %111 : vector<1x128xf32> to vector<1x1x128xf32>
    %114 = vector.broadcast %112 : vector<4x4x1xf32> to vector<4x4x128xf32>
    %115 = vector.broadcast %113 : vector<1x1x128xf32> to vector<4x4x128xf32>
    %116 = arith.mulf %114, %115 : vector<4x4x128xf32>
    %117 = arith.addf %107, %116 : vector<4x4x128xf32>
    %c0_70 = arith.constant 0 : index
    %c4_71 = arith.constant 4 : index
    %c1_72 = arith.constant 1 : index
    %c0_73 = arith.constant 0 : index
    %118 = vector.load %arg2[%c0_70, %c4_71, %c1_72, %c0_73] : memref<7x7x3x128xf32, #tpu.memory_space<vmem>>, vector<1x1x1x128xf32>
    %119 = vector.shape_cast %118 : vector<1x1x1x128xf32> to vector<1x128xf32>
    %120 = vector.extract_strided_slice %109 {offsets = [0, 0, 1], sizes = [4, 4, 1], strides = [1, 1, 1]} : vector<4x4x3xf32> to vector<4x4x1xf32>
    %121 = vector.shape_cast %119 : vector<1x128xf32> to vector<1x1x128xf32>
    %122 = vector.broadcast %120 : vector<4x4x1xf32> to vector<4x4x128xf32>
    %123 = vector.broadcast %121 : vector<1x1x128xf32> to vector<4x4x128xf32>
    %124 = arith.mulf %122, %123 : vector<4x4x128xf32>
    %125 = arith.addf %117, %124 : vector<4x4x128xf32>
    %c0_74 = arith.constant 0 : index
    %c4_75 = arith.constant 4 : index
    %c2_76 = arith.constant 2 : index
    %c0_77 = arith.constant 0 : index
    %126 = vector.load %arg2[%c0_74, %c4_75, %c2_76, %c0_77] : memref<7x7x3x128xf32, #tpu.memory_space<vmem>>, vector<1x1x1x128xf32>
    %127 = vector.shape_cast %126 : vector<1x1x1x128xf32> to vector<1x128xf32>
    %128 = vector.extract_strided_slice %109 {offsets = [0, 0, 2], sizes = [4, 4, 1], strides = [1, 1, 1]} : vector<4x4x3xf32> to vector<4x4x1xf32>
    %129 = vector.shape_cast %127 : vector<1x128xf32> to vector<1x1x128xf32>
    %130 = vector.broadcast %128 : vector<4x4x1xf32> to vector<4x4x128xf32>
    %131 = vector.broadcast %129 : vector<1x1x128xf32> to vector<4x4x128xf32>
    %132 = arith.mulf %130, %131 : vector<4x4x128xf32>
    %133 = arith.addf %125, %132 : vector<4x4x128xf32>
    %c1_78 = arith.constant 1 : index
    %c0_79 = arith.constant 0 : index
    %c1_80 = arith.constant 1 : index
    %c0_81 = arith.constant 0 : index
    %134 = vector.load %arg1[%c1_78, %c0_79, %c1_80, %c0_81] : memref<16x5x5x3xf32, #tpu.memory_space<vmem>>, vector<1x4x4x3xf32>
    %135 = vector.shape_cast %134 : vector<1x4x4x3xf32> to vector<4x4x3xf32>
    %c0_82 = arith.constant 0 : index
    %c5 = arith.constant 5 : index
    %c0_83 = arith.constant 0 : index
    %c0_84 = arith.constant 0 : index
    %136 = vector.load %arg2[%c0_82, %c5, %c0_83, %c0_84] : memref<7x7x3x128xf32, #tpu.memory_space<vmem>>, vector<1x1x1x128xf32>
    %137 = vector.shape_cast %136 : vector<1x1x1x128xf32> to vector<1x128xf32>
    %138 = vector.extract_strided_slice %135 {offsets = [0, 0, 0], sizes = [4, 4, 1], strides = [1, 1, 1]} : vector<4x4x3xf32> to vector<4x4x1xf32>
    %139 = vector.shape_cast %137 : vector<1x128xf32> to vector<1x1x128xf32>
    %140 = vector.broadcast %138 : vector<4x4x1xf32> to vector<4x4x128xf32>
    %141 = vector.broadcast %139 : vector<1x1x128xf32> to vector<4x4x128xf32>
    %142 = arith.mulf %140, %141 : vector<4x4x128xf32>
    %143 = arith.addf %133, %142 : vector<4x4x128xf32>
    %c0_85 = arith.constant 0 : index
    %c5_86 = arith.constant 5 : index
    %c1_87 = arith.constant 1 : index
    %c0_88 = arith.constant 0 : index
    %144 = vector.load %arg2[%c0_85, %c5_86, %c1_87, %c0_88] : memref<7x7x3x128xf32, #tpu.memory_space<vmem>>, vector<1x1x1x128xf32>
    %145 = vector.shape_cast %144 : vector<1x1x1x128xf32> to vector<1x128xf32>
    %146 = vector.extract_strided_slice %135 {offsets = [0, 0, 1], sizes = [4, 4, 1], strides = [1, 1, 1]} : vector<4x4x3xf32> to vector<4x4x1xf32>
    %147 = vector.shape_cast %145 : vector<1x128xf32> to vector<1x1x128xf32>
    %148 = vector.broadcast %146 : vector<4x4x1xf32> to vector<4x4x128xf32>
    %149 = vector.broadcast %147 : vector<1x1x128xf32> to vector<4x4x128xf32>
    %150 = arith.mulf %148, %149 : vector<4x4x128xf32>
    %151 = arith.addf %143, %150 : vector<4x4x128xf32>
    %c0_89 = arith.constant 0 : index
    %c5_90 = arith.constant 5 : index
    %c2_91 = arith.constant 2 : index
    %c0_92 = arith.constant 0 : index
    %152 = vector.load %arg2[%c0_89, %c5_90, %c2_91, %c0_92] : memref<7x7x3x128xf32, #tpu.memory_space<vmem>>, vector<1x1x1x128xf32>
    %153 = vector.shape_cast %152 : vector<1x1x1x128xf32> to vector<1x128xf32>
    %154 = vector.extract_strided_slice %135 {offsets = [0, 0, 2], sizes = [4, 4, 1], strides = [1, 1, 1]} : vector<4x4x3xf32> to vector<4x4x1xf32>
    %155 = vector.shape_cast %153 : vector<1x128xf32> to vector<1x1x128xf32>
    %156 = vector.broadcast %154 : vector<4x4x1xf32> to vector<4x4x128xf32>
    %157 = vector.broadcast %155 : vector<1x1x128xf32> to vector<4x4x128xf32>
    %158 = arith.mulf %156, %157 : vector<4x4x128xf32>
    %159 = arith.addf %151, %158 : vector<4x4x128xf32>
    %c2_93 = arith.constant 2 : index
    %c0_94 = arith.constant 0 : index
    %c1_95 = arith.constant 1 : index
    %c0_96 = arith.constant 0 : index
    %160 = vector.load %arg1[%c2_93, %c0_94, %c1_95, %c0_96] : memref<16x5x5x3xf32, #tpu.memory_space<vmem>>, vector<1x4x4x3xf32>
    %161 = vector.shape_cast %160 : vector<1x4x4x3xf32> to vector<4x4x3xf32>
    %c0_97 = arith.constant 0 : index
    %c6 = arith.constant 6 : index
    %c0_98 = arith.constant 0 : index
    %c0_99 = arith.constant 0 : index
    %162 = vector.load %arg2[%c0_97, %c6, %c0_98, %c0_99] : memref<7x7x3x128xf32, #tpu.memory_space<vmem>>, vector<1x1x1x128xf32>
    %163 = vector.shape_cast %162 : vector<1x1x1x128xf32> to vector<1x128xf32>
    %164 = vector.extract_strided_slice %161 {offsets = [0, 0, 0], sizes = [4, 4, 1], strides = [1, 1, 1]} : vector<4x4x3xf32> to vector<4x4x1xf32>
    %165 = vector.shape_cast %163 : vector<1x128xf32> to vector<1x1x128xf32>
    %166 = vector.broadcast %164 : vector<4x4x1xf32> to vector<4x4x128xf32>
    %167 = vector.broadcast %165 : vector<1x1x128xf32> to vector<4x4x128xf32>
    %168 = arith.mulf %166, %167 : vector<4x4x128xf32>
    %169 = arith.addf %159, %168 : vector<4x4x128xf32>
    %c0_100 = arith.constant 0 : index
    %c6_101 = arith.constant 6 : index
    %c1_102 = arith.constant 1 : index
    %c0_103 = arith.constant 0 : index
    %170 = vector.load %arg2[%c0_100, %c6_101, %c1_102, %c0_103] : memref<7x7x3x128xf32, #tpu.memory_space<vmem>>, vector<1x1x1x128xf32>
    %171 = vector.shape_cast %170 : vector<1x1x1x128xf32> to vector<1x128xf32>
    %172 = vector.extract_strided_slice %161 {offsets = [0, 0, 1], sizes = [4, 4, 1], strides = [1, 1, 1]} : vector<4x4x3xf32> to vector<4x4x1xf32>
    %173 = vector.shape_cast %171 : vector<1x128xf32> to vector<1x1x128xf32>
    %174 = vector.broadcast %172 : vector<4x4x1xf32> to vector<4x4x128xf32>
    %175 = vector.broadcast %173 : vector<1x1x128xf32> to vector<4x4x128xf32>
    %176 = arith.mulf %174, %175 : vector<4x4x128xf32>
    %177 = arith.addf %169, %176 : vector<4x4x128xf32>
    %c0_104 = arith.constant 0 : index
    %c6_105 = arith.constant 6 : index
    %c2_106 = arith.constant 2 : index
    %c0_107 = arith.constant 0 : index
    %178 = vector.load %arg2[%c0_104, %c6_105, %c2_106, %c0_107] : memref<7x7x3x128xf32, #tpu.memory_space<vmem>>, vector<1x1x1x128xf32>
    %179 = vector.shape_cast %178 : vector<1x1x1x128xf32> to vector<1x128xf32>
    %180 = vector.extract_strided_slice %161 {offsets = [0, 0, 2], sizes = [4, 4, 1], strides = [1, 1, 1]} : vector<4x4x3xf32> to vector<4x4x1xf32>
    %181 = vector.shape_cast %179 : vector<1x128xf32> to vector<1x1x128xf32>
    %182 = vector.broadcast %180 : vector<4x4x1xf32> to vector<4x4x128xf32>
    %183 = vector.broadcast %181 : vector<1x1x128xf32> to vector<4x4x128xf32>
    %184 = arith.mulf %182, %183 : vector<4x4x128xf32>
    %185 = arith.addf %177, %184 : vector<4x4x128xf32>
    %c4_108 = arith.constant 4 : index
    %c0_109 = arith.constant 0 : index
    %c0_110 = arith.constant 0 : index
    %c0_111 = arith.constant 0 : index
    %186 = vector.load %arg1[%c4_108, %c0_109, %c0_110, %c0_111] : memref<16x5x5x3xf32, #tpu.memory_space<vmem>>, vector<1x4x4x3xf32>
    %187 = vector.shape_cast %186 : vector<1x4x4x3xf32> to vector<4x4x3xf32>
    %c1_112 = arith.constant 1 : index
    %c0_113 = arith.constant 0 : index
    %c0_114 = arith.constant 0 : index
    %c0_115 = arith.constant 0 : index
    %188 = vector.load %arg2[%c1_112, %c0_113, %c0_114, %c0_115] : memref<7x7x3x128xf32, #tpu.memory_space<vmem>>, vector<1x1x1x128xf32>
    %189 = vector.shape_cast %188 : vector<1x1x1x128xf32> to vector<1x128xf32>
    %190 = vector.extract_strided_slice %187 {offsets = [0, 0, 0], sizes = [4, 4, 1], strides = [1, 1, 1]} : vector<4x4x3xf32> to vector<4x4x1xf32>
    %191 = vector.shape_cast %189 : vector<1x128xf32> to vector<1x1x128xf32>
    %192 = vector.broadcast %190 : vector<4x4x1xf32> to vector<4x4x128xf32>
    %193 = vector.broadcast %191 : vector<1x1x128xf32> to vector<4x4x128xf32>
    %194 = arith.mulf %192, %193 : vector<4x4x128xf32>
    %195 = arith.addf %185, %194 : vector<4x4x128xf32>
    %c1_116 = arith.constant 1 : index
    %c0_117 = arith.constant 0 : index
    %c1_118 = arith.constant 1 : index
    %c0_119 = arith.constant 0 : index
    %196 = vector.load %arg2[%c1_116, %c0_117, %c1_118, %c0_119] : memref<7x7x3x128xf32, #tpu.memory_space<vmem>>, vector<1x1x1x128xf32>
    %197 = vector.shape_cast %196 : vector<1x1x1x128xf32> to vector<1x128xf32>
    %198 = vector.extract_strided_slice %187 {offsets = [0, 0, 1], sizes = [4, 4, 1], strides = [1, 1, 1]} : vector<4x4x3xf32> to vector<4x4x1xf32>
    %199 = vector.shape_cast %197 : vector<1x128xf32> to vector<1x1x128xf32>
    %200 = vector.broadcast %198 : vector<4x4x1xf32> to vector<4x4x128xf32>
    %201 = vector.broadcast %199 : vector<1x1x128xf32> to vector<4x4x128xf32>
    %202 = arith.mulf %200, %201 : vector<4x4x128xf32>
    %203 = arith.addf %195, %202 : vector<4x4x128xf32>
    %c1_120 = arith.constant 1 : index
    %c0_121 = arith.constant 0 : index
    %c2_122 = arith.constant 2 : index
    %c0_123 = arith.constant 0 : index
    %204 = vector.load %arg2[%c1_120, %c0_121, %c2_122, %c0_123] : memref<7x7x3x128xf32, #tpu.memory_space<vmem>>, vector<1x1x1x128xf32>
    %205 = vector.shape_cast %204 : vector<1x1x1x128xf32> to vector<1x128xf32>
    %206 = vector.extract_strided_slice %187 {offsets = [0, 0, 2], sizes = [4, 4, 1], strides = [1, 1, 1]} : vector<4x4x3xf32> to vector<4x4x1xf32>
    %207 = vector.shape_cast %205 : vector<1x128xf32> to vector<1x1x128xf32>
    %208 = vector.broadcast %206 : vector<4x4x1xf32> to vector<4x4x128xf32>
    %209 = vector.broadcast %207 : vector<1x1x128xf32> to vector<4x4x128xf32>
    %210 = arith.mulf %208, %209 : vector<4x4x128xf32>
    %211 = arith.addf %203, %210 : vector<4x4x128xf32>
    %c5_124 = arith.constant 5 : index
    %c0_125 = arith.constant 0 : index
    %c0_126 = arith.constant 0 : index
    %c0_127 = arith.constant 0 : index
    %212 = vector.load %arg1[%c5_124, %c0_125, %c0_126, %c0_127] : memref<16x5x5x3xf32, #tpu.memory_space<vmem>>, vector<1x4x4x3xf32>
    %213 = vector.shape_cast %212 : vector<1x4x4x3xf32> to vector<4x4x3xf32>
    %c1_128 = arith.constant 1 : index
    %c1_129 = arith.constant 1 : index
    %c0_130 = arith.constant 0 : index
    %c0_131 = arith.constant 0 : index
    %214 = vector.load %arg2[%c1_128, %c1_129, %c0_130, %c0_131] : memref<7x7x3x128xf32, #tpu.memory_space<vmem>>, vector<1x1x1x128xf32>
    %215 = vector.shape_cast %214 : vector<1x1x1x128xf32> to vector<1x128xf32>
    %216 = vector.extract_strided_slice %213 {offsets = [0, 0, 0], sizes = [4, 4, 1], strides = [1, 1, 1]} : vector<4x4x3xf32> to vector<4x4x1xf32>
    %217 = vector.shape_cast %215 : vector<1x128xf32> to vector<1x1x128xf32>
    %218 = vector.broadcast %216 : vector<4x4x1xf32> to vector<4x4x128xf32>
    %219 = vector.broadcast %217 : vector<1x1x128xf32> to vector<4x4x128xf32>
    %220 = arith.mulf %218, %219 : vector<4x4x128xf32>
    %221 = arith.addf %211, %220 : vector<4x4x128xf32>
    %c1_132 = arith.constant 1 : index
    %c1_133 = arith.constant 1 : index
    %c1_134 = arith.constant 1 : index
    %c0_135 = arith.constant 0 : index
    %222 = vector.load %arg2[%c1_132, %c1_133, %c1_134, %c0_135] : memref<7x7x3x128xf32, #tpu.memory_space<vmem>>, vector<1x1x1x128xf32>
    %223 = vector.shape_cast %222 : vector<1x1x1x128xf32> to vector<1x128xf32>
    %224 = vector.extract_strided_slice %213 {offsets = [0, 0, 1], sizes = [4, 4, 1], strides = [1, 1, 1]} : vector<4x4x3xf32> to vector<4x4x1xf32>
    %225 = vector.shape_cast %223 : vector<1x128xf32> to vector<1x1x128xf32>
    %226 = vector.broadcast %224 : vector<4x4x1xf32> to vector<4x4x128xf32>
    %227 = vector.broadcast %225 : vector<1x1x128xf32> to vector<4x4x128xf32>
    %228 = arith.mulf %226, %227 : vector<4x4x128xf32>
    %229 = arith.addf %221, %228 : vector<4x4x128xf32>
    %c1_136 = arith.constant 1 : index
    %c1_137 = arith.constant 1 : index
    %c2_138 = arith.constant 2 : index
    %c0_139 = arith.constant 0 : index
    %230 = vector.load %arg2[%c1_136, %c1_137, %c2_138, %c0_139] : memref<7x7x3x128xf32, #tpu.memory_space<vmem>>, vector<1x1x1x128xf32>
    %231 = vector.shape_cast %230 : vector<1x1x1x128xf32> to vector<1x128xf32>
    %232 = vector.extract_strided_slice %213 {offsets = [0, 0, 2], sizes = [4, 4, 1], strides = [1, 1, 1]} : vector<4x4x3xf32> to vector<4x4x1xf32>
    %233 = vector.shape_cast %231 : vector<1x128xf32> to vector<1x1x128xf32>
    %234 = vector.broadcast %232 : vector<4x4x1xf32> to vector<4x4x128xf32>
    %235 = vector.broadcast %233 : vector<1x1x128xf32> to vector<4x4x128xf32>
    %236 = arith.mulf %234, %235 : vector<4x4x128xf32>
    %237 = arith.addf %229, %236 : vector<4x4x128xf32>
    %c6_140 = arith.constant 6 : index
    %c0_141 = arith.constant 0 : index
    %c0_142 = arith.constant 0 : index
    %c0_143 = arith.constant 0 : index
    %238 = vector.load %arg1[%c6_140, %c0_141, %c0_142, %c0_143] : memref<16x5x5x3xf32, #tpu.memory_space<vmem>>, vector<1x4x4x3xf32>
    %239 = vector.shape_cast %238 : vector<1x4x4x3xf32> to vector<4x4x3xf32>
    %c1_144 = arith.constant 1 : index
    %c2_145 = arith.constant 2 : index
    %c0_146 = arith.constant 0 : index
    %c0_147 = arith.constant 0 : index
    %240 = vector.load %arg2[%c1_144, %c2_145, %c0_146, %c0_147] : memref<7x7x3x128xf32, #tpu.memory_space<vmem>>, vector<1x1x1x128xf32>
    %241 = vector.shape_cast %240 : vector<1x1x1x128xf32> to vector<1x128xf32>
    %242 = vector.extract_strided_slice %239 {offsets = [0, 0, 0], sizes = [4, 4, 1], strides = [1, 1, 1]} : vector<4x4x3xf32> to vector<4x4x1xf32>
    %243 = vector.shape_cast %241 : vector<1x128xf32> to vector<1x1x128xf32>
    %244 = vector.broadcast %242 : vector<4x4x1xf32> to vector<4x4x128xf32>
    %245 = vector.broadcast %243 : vector<1x1x128xf32> to vector<4x4x128xf32>
    %246 = arith.mulf %244, %245 : vector<4x4x128xf32>
    %247 = arith.addf %237, %246 : vector<4x4x128xf32>
    %c1_148 = arith.constant 1 : index
    %c2_149 = arith.constant 2 : index
    %c1_150 = arith.constant 1 : index
    %c0_151 = arith.constant 0 : index
    %248 = vector.load %arg2[%c1_148, %c2_149, %c1_150, %c0_151] : memref<7x7x3x128xf32, #tpu.memory_space<vmem>>, vector<1x1x1x128xf32>
    %249 = vector.shape_cast %248 : vector<1x1x1x128xf32> to vector<1x128xf32>
    %250 = vector.extract_strided_slice %239 {offsets = [0, 0, 1], sizes = [4, 4, 1], strides = [1, 1, 1]} : vector<4x4x3xf32> to vector<4x4x1xf32>
    %251 = vector.shape_cast %249 : vector<1x128xf32> to vector<1x1x128xf32>
    %252 = vector.broadcast %250 : vector<4x4x1xf32> to vector<4x4x128xf32>
    %253 = vector.broadcast %251 : vector<1x1x128xf32> to vector<4x4x128xf32>
    %254 = arith.mulf %252, %253 : vector<4x4x128xf32>
    %255 = arith.addf %247, %254 : vector<4x4x128xf32>
    %c1_152 = arith.constant 1 : index
    %c2_153 = arith.constant 2 : index
    %c2_154 = arith.constant 2 : index
    %c0_155 = arith.constant 0 : index
    %256 = vector.load %arg2[%c1_152, %c2_153, %c2_154, %c0_155] : memref<7x7x3x128xf32, #tpu.memory_space<vmem>>, vector<1x1x1x128xf32>
    %257 = vector.shape_cast %256 : vector<1x1x1x128xf32> to vector<1x128xf32>
    %258 = vector.extract_strided_slice %239 {offsets = [0, 0, 2], sizes = [4, 4, 1], strides = [1, 1, 1]} : vector<4x4x3xf32> to vector<4x4x1xf32>
    %259 = vector.shape_cast %257 : vector<1x128xf32> to vector<1x1x128xf32>
    %260 = vector.broadcast %258 : vector<4x4x1xf32> to vector<4x4x128xf32>
    %261 = vector.broadcast %259 : vector<1x1x128xf32> to vector<4x4x128xf32>
    %262 = arith.mulf %260, %261 : vector<4x4x128xf32>
    %263 = arith.addf %255, %262 : vector<4x4x128xf32>
    %c7 = arith.constant 7 : index
    %c0_156 = arith.constant 0 : index
    %c0_157 = arith.constant 0 : index
    %c0_158 = arith.constant 0 : index
    %264 = vector.load %arg1[%c7, %c0_156, %c0_157, %c0_158] : memref<16x5x5x3xf32, #tpu.memory_space<vmem>>, vector<1x4x4x3xf32>
    %265 = vector.shape_cast %264 : vector<1x4x4x3xf32> to vector<4x4x3xf32>
    %c1_159 = arith.constant 1 : index
    %c3_160 = arith.constant 3 : index
    %c0_161 = arith.constant 0 : index
    %c0_162 = arith.constant 0 : index
    %266 = vector.load %arg2[%c1_159, %c3_160, %c0_161, %c0_162] : memref<7x7x3x128xf32, #tpu.memory_space<vmem>>, vector<1x1x1x128xf32>
    %267 = vector.shape_cast %266 : vector<1x1x1x128xf32> to vector<1x128xf32>
    %268 = vector.extract_strided_slice %265 {offsets = [0, 0, 0], sizes = [4, 4, 1], strides = [1, 1, 1]} : vector<4x4x3xf32> to vector<4x4x1xf32>
    %269 = vector.shape_cast %267 : vector<1x128xf32> to vector<1x1x128xf32>
    %270 = vector.broadcast %268 : vector<4x4x1xf32> to vector<4x4x128xf32>
    %271 = vector.broadcast %269 : vector<1x1x128xf32> to vector<4x4x128xf32>
    %272 = arith.mulf %270, %271 : vector<4x4x128xf32>
    %273 = arith.addf %263, %272 : vector<4x4x128xf32>
    %c1_163 = arith.constant 1 : index
    %c3_164 = arith.constant 3 : index
    %c1_165 = arith.constant 1 : index
    %c0_166 = arith.constant 0 : index
    %274 = vector.load %arg2[%c1_163, %c3_164, %c1_165, %c0_166] : memref<7x7x3x128xf32, #tpu.memory_space<vmem>>, vector<1x1x1x128xf32>
    %275 = vector.shape_cast %274 : vector<1x1x1x128xf32> to vector<1x128xf32>
    %276 = vector.extract_strided_slice %265 {offsets = [0, 0, 1], sizes = [4, 4, 1], strides = [1, 1, 1]} : vector<4x4x3xf32> to vector<4x4x1xf32>
    %277 = vector.shape_cast %275 : vector<1x128xf32> to vector<1x1x128xf32>
    %278 = vector.broadcast %276 : vector<4x4x1xf32> to vector<4x4x128xf32>
    %279 = vector.broadcast %277 : vector<1x1x128xf32> to vector<4x4x128xf32>
    %280 = arith.mulf %278, %279 : vector<4x4x128xf32>
    %281 = arith.addf %273, %280 : vector<4x4x128xf32>
    %c1_167 = arith.constant 1 : index
    %c3_168 = arith.constant 3 : index
    %c2_169 = arith.constant 2 : index
    %c0_170 = arith.constant 0 : index
    %282 = vector.load %arg2[%c1_167, %c3_168, %c2_169, %c0_170] : memref<7x7x3x128xf32, #tpu.memory_space<vmem>>, vector<1x1x1x128xf32>
    %283 = vector.shape_cast %282 : vector<1x1x1x128xf32> to vector<1x128xf32>
    %284 = vector.extract_strided_slice %265 {offsets = [0, 0, 2], sizes = [4, 4, 1], strides = [1, 1, 1]} : vector<4x4x3xf32> to vector<4x4x1xf32>
    %285 = vector.shape_cast %283 : vector<1x128xf32> to vector<1x1x128xf32>
    %286 = vector.broadcast %284 : vector<4x4x1xf32> to vector<4x4x128xf32>
    %287 = vector.broadcast %285 : vector<1x1x128xf32> to vector<4x4x128xf32>
    %288 = arith.mulf %286, %287 : vector<4x4x128xf32>
    %289 = arith.addf %281, %288 : vector<4x4x128xf32>
    %c4_171 = arith.constant 4 : index
    %c0_172 = arith.constant 0 : index
    %c1_173 = arith.constant 1 : index
    %c0_174 = arith.constant 0 : index
    %290 = vector.load %arg1[%c4_171, %c0_172, %c1_173, %c0_174] : memref<16x5x5x3xf32, #tpu.memory_space<vmem>>, vector<1x4x4x3xf32>
    %291 = vector.shape_cast %290 : vector<1x4x4x3xf32> to vector<4x4x3xf32>
    %c1_175 = arith.constant 1 : index
    %c4_176 = arith.constant 4 : index
    %c0_177 = arith.constant 0 : index
    %c0_178 = arith.constant 0 : index
    %292 = vector.load %arg2[%c1_175, %c4_176, %c0_177, %c0_178] : memref<7x7x3x128xf32, #tpu.memory_space<vmem>>, vector<1x1x1x128xf32>
    %293 = vector.shape_cast %292 : vector<1x1x1x128xf32> to vector<1x128xf32>
    %294 = vector.extract_strided_slice %291 {offsets = [0, 0, 0], sizes = [4, 4, 1], strides = [1, 1, 1]} : vector<4x4x3xf32> to vector<4x4x1xf32>
    %295 = vector.shape_cast %293 : vector<1x128xf32> to vector<1x1x128xf32>
    %296 = vector.broadcast %294 : vector<4x4x1xf32> to vector<4x4x128xf32>
    %297 = vector.broadcast %295 : vector<1x1x128xf32> to vector<4x4x128xf32>
    %298 = arith.mulf %296, %297 : vector<4x4x128xf32>
    %299 = arith.addf %289, %298 : vector<4x4x128xf32>
    %c1_179 = arith.constant 1 : index
    %c4_180 = arith.constant 4 : index
    %c1_181 = arith.constant 1 : index
    %c0_182 = arith.constant 0 : index
    %300 = vector.load %arg2[%c1_179, %c4_180, %c1_181, %c0_182] : memref<7x7x3x128xf32, #tpu.memory_space<vmem>>, vector<1x1x1x128xf32>
    %301 = vector.shape_cast %300 : vector<1x1x1x128xf32> to vector<1x128xf32>
    %302 = vector.extract_strided_slice %291 {offsets = [0, 0, 1], sizes = [4, 4, 1], strides = [1, 1, 1]} : vector<4x4x3xf32> to vector<4x4x1xf32>
    %303 = vector.shape_cast %301 : vector<1x128xf32> to vector<1x1x128xf32>
    %304 = vector.broadcast %302 : vector<4x4x1xf32> to vector<4x4x128xf32>
    %305 = vector.broadcast %303 : vector<1x1x128xf32> to vector<4x4x128xf32>
    %306 = arith.mulf %304, %305 : vector<4x4x128xf32>
    %307 = arith.addf %299, %306 : vector<4x4x128xf32>
    %c1_183 = arith.constant 1 : index
    %c4_184 = arith.constant 4 : index
    %c2_185 = arith.constant 2 : index
    %c0_186 = arith.constant 0 : index
    %308 = vector.load %arg2[%c1_183, %c4_184, %c2_185, %c0_186] : memref<7x7x3x128xf32, #tpu.memory_space<vmem>>, vector<1x1x1x128xf32>
    %309 = vector.shape_cast %308 : vector<1x1x1x128xf32> to vector<1x128xf32>
    %310 = vector.extract_strided_slice %291 {offsets = [0, 0, 2], sizes = [4, 4, 1], strides = [1, 1, 1]} : vector<4x4x3xf32> to vector<4x4x1xf32>
    %311 = vector.shape_cast %309 : vector<1x128xf32> to vector<1x1x128xf32>
    %312 = vector.broadcast %310 : vector<4x4x1xf32> to vector<4x4x128xf32>
    %313 = vector.broadcast %311 : vector<1x1x128xf32> to vector<4x4x128xf32>
    %314 = arith.mulf %312, %313 : vector<4x4x128xf32>
    %315 = arith.addf %307, %314 : vector<4x4x128xf32>
    %c5_187 = arith.constant 5 : index
    %c0_188 = arith.constant 0 : index
    %c1_189 = arith.constant 1 : index
    %c0_190 = arith.constant 0 : index
    %316 = vector.load %arg1[%c5_187, %c0_188, %c1_189, %c0_190] : memref<16x5x5x3xf32, #tpu.memory_space<vmem>>, vector<1x4x4x3xf32>
    %317 = vector.shape_cast %316 : vector<1x4x4x3xf32> to vector<4x4x3xf32>
    %c1_191 = arith.constant 1 : index
    %c5_192 = arith.constant 5 : index
    %c0_193 = arith.constant 0 : index
    %c0_194 = arith.constant 0 : index
    %318 = vector.load %arg2[%c1_191, %c5_192, %c0_193, %c0_194] : memref<7x7x3x128xf32, #tpu.memory_space<vmem>>, vector<1x1x1x128xf32>
    %319 = vector.shape_cast %318 : vector<1x1x1x128xf32> to vector<1x128xf32>
    %320 = vector.extract_strided_slice %317 {offsets = [0, 0, 0], sizes = [4, 4, 1], strides = [1, 1, 1]} : vector<4x4x3xf32> to vector<4x4x1xf32>
    %321 = vector.shape_cast %319 : vector<1x128xf32> to vector<1x1x128xf32>
    %322 = vector.broadcast %320 : vector<4x4x1xf32> to vector<4x4x128xf32>
    %323 = vector.broadcast %321 : vector<1x1x128xf32> to vector<4x4x128xf32>
    %324 = arith.mulf %322, %323 : vector<4x4x128xf32>
    %325 = arith.addf %315, %324 : vector<4x4x128xf32>
    %c1_195 = arith.constant 1 : index
    %c5_196 = arith.constant 5 : index
    %c1_197 = arith.constant 1 : index
    %c0_198 = arith.constant 0 : index
    %326 = vector.load %arg2[%c1_195, %c5_196, %c1_197, %c0_198] : memref<7x7x3x128xf32, #tpu.memory_space<vmem>>, vector<1x1x1x128xf32>
    %327 = vector.shape_cast %326 : vector<1x1x1x128xf32> to vector<1x128xf32>
    %328 = vector.extract_strided_slice %317 {offsets = [0, 0, 1], sizes = [4, 4, 1], strides = [1, 1, 1]} : vector<4x4x3xf32> to vector<4x4x1xf32>
    %329 = vector.shape_cast %327 : vector<1x128xf32> to vector<1x1x128xf32>
    %330 = vector.broadcast %328 : vector<4x4x1xf32> to vector<4x4x128xf32>
    %331 = vector.broadcast %329 : vector<1x1x128xf32> to vector<4x4x128xf32>
    %332 = arith.mulf %330, %331 : vector<4x4x128xf32>
    %333 = arith.addf %325, %332 : vector<4x4x128xf32>
    %c1_199 = arith.constant 1 : index
    %c5_200 = arith.constant 5 : index
    %c2_201 = arith.constant 2 : index
    %c0_202 = arith.constant 0 : index
    %334 = vector.load %arg2[%c1_199, %c5_200, %c2_201, %c0_202] : memref<7x7x3x128xf32, #tpu.memory_space<vmem>>, vector<1x1x1x128xf32>
    %335 = vector.shape_cast %334 : vector<1x1x1x128xf32> to vector<1x128xf32>
    %336 = vector.extract_strided_slice %317 {offsets = [0, 0, 2], sizes = [4, 4, 1], strides = [1, 1, 1]} : vector<4x4x3xf32> to vector<4x4x1xf32>
    %337 = vector.shape_cast %335 : vector<1x128xf32> to vector<1x1x128xf32>
    %338 = vector.broadcast %336 : vector<4x4x1xf32> to vector<4x4x128xf32>
    %339 = vector.broadcast %337 : vector<1x1x128xf32> to vector<4x4x128xf32>
    %340 = arith.mulf %338, %339 : vector<4x4x128xf32>
    %341 = arith.addf %333, %340 : vector<4x4x128xf32>
    %c6_203 = arith.constant 6 : index
    %c0_204 = arith.constant 0 : index
    %c1_205 = arith.constant 1 : index
    %c0_206 = arith.constant 0 : index
    %342 = vector.load %arg1[%c6_203, %c0_204, %c1_205, %c0_206] : memref<16x5x5x3xf32, #tpu.memory_space<vmem>>, vector<1x4x4x3xf32>
    %343 = vector.shape_cast %342 : vector<1x4x4x3xf32> to vector<4x4x3xf32>
    %c1_207 = arith.constant 1 : index
    %c6_208 = arith.constant 6 : index
    %c0_209 = arith.constant 0 : index
    %c0_210 = arith.constant 0 : index
    %344 = vector.load %arg2[%c1_207, %c6_208, %c0_209, %c0_210] : memref<7x7x3x128xf32, #tpu.memory_space<vmem>>, vector<1x1x1x128xf32>
    %345 = vector.shape_cast %344 : vector<1x1x1x128xf32> to vector<1x128xf32>
    %346 = vector.extract_strided_slice %343 {offsets = [0, 0, 0], sizes = [4, 4, 1], strides = [1, 1, 1]} : vector<4x4x3xf32> to vector<4x4x1xf32>
    %347 = vector.shape_cast %345 : vector<1x128xf32> to vector<1x1x128xf32>
    %348 = vector.broadcast %346 : vector<4x4x1xf32> to vector<4x4x128xf32>
    %349 = vector.broadcast %347 : vector<1x1x128xf32> to vector<4x4x128xf32>
    %350 = arith.mulf %348, %349 : vector<4x4x128xf32>
    %351 = arith.addf %341, %350 : vector<4x4x128xf32>
    %c1_211 = arith.constant 1 : index
    %c6_212 = arith.constant 6 : index
    %c1_213 = arith.constant 1 : index
    %c0_214 = arith.constant 0 : index
    %352 = vector.load %arg2[%c1_211, %c6_212, %c1_213, %c0_214] : memref<7x7x3x128xf32, #tpu.memory_space<vmem>>, vector<1x1x1x128xf32>
    %353 = vector.shape_cast %352 : vector<1x1x1x128xf32> to vector<1x128xf32>
    %354 = vector.extract_strided_slice %343 {offsets = [0, 0, 1], sizes = [4, 4, 1], strides = [1, 1, 1]} : vector<4x4x3xf32> to vector<4x4x1xf32>
    %355 = vector.shape_cast %353 : vector<1x128xf32> to vector<1x1x128xf32>
    %356 = vector.broadcast %354 : vector<4x4x1xf32> to vector<4x4x128xf32>
    %357 = vector.broadcast %355 : vector<1x1x128xf32> to vector<4x4x128xf32>
    %358 = arith.mulf %356, %357 : vector<4x4x128xf32>
    %359 = arith.addf %351, %358 : vector<4x4x128xf32>
    %c1_215 = arith.constant 1 : index
    %c6_216 = arith.constant 6 : index
    %c2_217 = arith.constant 2 : index
    %c0_218 = arith.constant 0 : index
    %360 = vector.load %arg2[%c1_215, %c6_216, %c2_217, %c0_218] : memref<7x7x3x128xf32, #tpu.memory_space<vmem>>, vector<1x1x1x128xf32>
    %361 = vector.shape_cast %360 : vector<1x1x1x128xf32> to vector<1x128xf32>
    %362 = vector.extract_strided_slice %343 {offsets = [0, 0, 2], sizes = [4, 4, 1], strides = [1, 1, 1]} : vector<4x4x3xf32> to vector<4x4x1xf32>
    %363 = vector.shape_cast %361 : vector<1x128xf32> to vector<1x1x128xf32>
    %364 = vector.broadcast %362 : vector<4x4x1xf32> to vector<4x4x128xf32>
    %365 = vector.broadcast %363 : vector<1x1x128xf32> to vector<4x4x128xf32>
    %366 = arith.mulf %364, %365 : vector<4x4x128xf32>
    %367 = arith.addf %359, %366 : vector<4x4x128xf32>
    %c8 = arith.constant 8 : index
    %c0_219 = arith.constant 0 : index
    %c0_220 = arith.constant 0 : index
    %c0_221 = arith.constant 0 : index
    %368 = vector.load %arg1[%c8, %c0_219, %c0_220, %c0_221] : memref<16x5x5x3xf32, #tpu.memory_space<vmem>>, vector<1x4x4x3xf32>
    %369 = vector.shape_cast %368 : vector<1x4x4x3xf32> to vector<4x4x3xf32>
    %c2_222 = arith.constant 2 : index
    %c0_223 = arith.constant 0 : index
    %c0_224 = arith.constant 0 : index
    %c0_225 = arith.constant 0 : index
    %370 = vector.load %arg2[%c2_222, %c0_223, %c0_224, %c0_225] : memref<7x7x3x128xf32, #tpu.memory_space<vmem>>, vector<1x1x1x128xf32>
    %371 = vector.shape_cast %370 : vector<1x1x1x128xf32> to vector<1x128xf32>
    %372 = vector.extract_strided_slice %369 {offsets = [0, 0, 0], sizes = [4, 4, 1], strides = [1, 1, 1]} : vector<4x4x3xf32> to vector<4x4x1xf32>
    %373 = vector.shape_cast %371 : vector<1x128xf32> to vector<1x1x128xf32>
    %374 = vector.broadcast %372 : vector<4x4x1xf32> to vector<4x4x128xf32>
    %375 = vector.broadcast %373 : vector<1x1x128xf32> to vector<4x4x128xf32>
    %376 = arith.mulf %374, %375 : vector<4x4x128xf32>
    %377 = arith.addf %367, %376 : vector<4x4x128xf32>
    %c2_226 = arith.constant 2 : index
    %c0_227 = arith.constant 0 : index
    %c1_228 = arith.constant 1 : index
    %c0_229 = arith.constant 0 : index
    %378 = vector.load %arg2[%c2_226, %c0_227, %c1_228, %c0_229] : memref<7x7x3x128xf32, #tpu.memory_space<vmem>>, vector<1x1x1x128xf32>
    %379 = vector.shape_cast %378 : vector<1x1x1x128xf32> to vector<1x128xf32>
    %380 = vector.extract_strided_slice %369 {offsets = [0, 0, 1], sizes = [4, 4, 1], strides = [1, 1, 1]} : vector<4x4x3xf32> to vector<4x4x1xf32>
    %381 = vector.shape_cast %379 : vector<1x128xf32> to vector<1x1x128xf32>
    %382 = vector.broadcast %380 : vector<4x4x1xf32> to vector<4x4x128xf32>
    %383 = vector.broadcast %381 : vector<1x1x128xf32> to vector<4x4x128xf32>
    %384 = arith.mulf %382, %383 : vector<4x4x128xf32>
    %385 = arith.addf %377, %384 : vector<4x4x128xf32>
    %c2_230 = arith.constant 2 : index
    %c0_231 = arith.constant 0 : index
    %c2_232 = arith.constant 2 : index
    %c0_233 = arith.constant 0 : index
    %386 = vector.load %arg2[%c2_230, %c0_231, %c2_232, %c0_233] : memref<7x7x3x128xf32, #tpu.memory_space<vmem>>, vector<1x1x1x128xf32>
    %387 = vector.shape_cast %386 : vector<1x1x1x128xf32> to vector<1x128xf32>
    %388 = vector.extract_strided_slice %369 {offsets = [0, 0, 2], sizes = [4, 4, 1], strides = [1, 1, 1]} : vector<4x4x3xf32> to vector<4x4x1xf32>
    %389 = vector.shape_cast %387 : vector<1x128xf32> to vector<1x1x128xf32>
    %390 = vector.broadcast %388 : vector<4x4x1xf32> to vector<4x4x128xf32>
    %391 = vector.broadcast %389 : vector<1x1x128xf32> to vector<4x4x128xf32>
    %392 = arith.mulf %390, %391 : vector<4x4x128xf32>
    %393 = arith.addf %385, %392 : vector<4x4x128xf32>
    %c9 = arith.constant 9 : index
    %c0_234 = arith.constant 0 : index
    %c0_235 = arith.constant 0 : index
    %c0_236 = arith.constant 0 : index
    %394 = vector.load %arg1[%c9, %c0_234, %c0_235, %c0_236] : memref<16x5x5x3xf32, #tpu.memory_space<vmem>>, vector<1x4x4x3xf32>
    %395 = vector.shape_cast %394 : vector<1x4x4x3xf32> to vector<4x4x3xf32>
    %c2_237 = arith.constant 2 : index
    %c1_238 = arith.constant 1 : index
    %c0_239 = arith.constant 0 : index
    %c0_240 = arith.constant 0 : index
    %396 = vector.load %arg2[%c2_237, %c1_238, %c0_239, %c0_240] : memref<7x7x3x128xf32, #tpu.memory_space<vmem>>, vector<1x1x1x128xf32>
    %397 = vector.shape_cast %396 : vector<1x1x1x128xf32> to vector<1x128xf32>
    %398 = vector.extract_strided_slice %395 {offsets = [0, 0, 0], sizes = [4, 4, 1], strides = [1, 1, 1]} : vector<4x4x3xf32> to vector<4x4x1xf32>
    %399 = vector.shape_cast %397 : vector<1x128xf32> to vector<1x1x128xf32>
    %400 = vector.broadcast %398 : vector<4x4x1xf32> to vector<4x4x128xf32>
    %401 = vector.broadcast %399 : vector<1x1x128xf32> to vector<4x4x128xf32>
    %402 = arith.mulf %400, %401 : vector<4x4x128xf32>
    %403 = arith.addf %393, %402 : vector<4x4x128xf32>
    %c2_241 = arith.constant 2 : index
    %c1_242 = arith.constant 1 : index
    %c1_243 = arith.constant 1 : index
    %c0_244 = arith.constant 0 : index
    %404 = vector.load %arg2[%c2_241, %c1_242, %c1_243, %c0_244] : memref<7x7x3x128xf32, #tpu.memory_space<vmem>>, vector<1x1x1x128xf32>
    %405 = vector.shape_cast %404 : vector<1x1x1x128xf32> to vector<1x128xf32>
    %406 = vector.extract_strided_slice %395 {offsets = [0, 0, 1], sizes = [4, 4, 1], strides = [1, 1, 1]} : vector<4x4x3xf32> to vector<4x4x1xf32>
    %407 = vector.shape_cast %405 : vector<1x128xf32> to vector<1x1x128xf32>
    %408 = vector.broadcast %406 : vector<4x4x1xf32> to vector<4x4x128xf32>
    %409 = vector.broadcast %407 : vector<1x1x128xf32> to vector<4x4x128xf32>
    %410 = arith.mulf %408, %409 : vector<4x4x128xf32>
    %411 = arith.addf %403, %410 : vector<4x4x128xf32>
    %c2_245 = arith.constant 2 : index
    %c1_246 = arith.constant 1 : index
    %c2_247 = arith.constant 2 : index
    %c0_248 = arith.constant 0 : index
    %412 = vector.load %arg2[%c2_245, %c1_246, %c2_247, %c0_248] : memref<7x7x3x128xf32, #tpu.memory_space<vmem>>, vector<1x1x1x128xf32>
    %413 = vector.shape_cast %412 : vector<1x1x1x128xf32> to vector<1x128xf32>
    %414 = vector.extract_strided_slice %395 {offsets = [0, 0, 2], sizes = [4, 4, 1], strides = [1, 1, 1]} : vector<4x4x3xf32> to vector<4x4x1xf32>
    %415 = vector.shape_cast %413 : vector<1x128xf32> to vector<1x1x128xf32>
    %416 = vector.broadcast %414 : vector<4x4x1xf32> to vector<4x4x128xf32>
    %417 = vector.broadcast %415 : vector<1x1x128xf32> to vector<4x4x128xf32>
    %418 = arith.mulf %416, %417 : vector<4x4x128xf32>
    %419 = arith.addf %411, %418 : vector<4x4x128xf32>
    %c10 = arith.constant 10 : index
    %c0_249 = arith.constant 0 : index
    %c0_250 = arith.constant 0 : index
    %c0_251 = arith.constant 0 : index
    %420 = vector.load %arg1[%c10, %c0_249, %c0_250, %c0_251] : memref<16x5x5x3xf32, #tpu.memory_space<vmem>>, vector<1x4x4x3xf32>
    %421 = vector.shape_cast %420 : vector<1x4x4x3xf32> to vector<4x4x3xf32>
    %c2_252 = arith.constant 2 : index
    %c2_253 = arith.constant 2 : index
    %c0_254 = arith.constant 0 : index
    %c0_255 = arith.constant 0 : index
    %422 = vector.load %arg2[%c2_252, %c2_253, %c0_254, %c0_255] : memref<7x7x3x128xf32, #tpu.memory_space<vmem>>, vector<1x1x1x128xf32>
    %423 = vector.shape_cast %422 : vector<1x1x1x128xf32> to vector<1x128xf32>
    %424 = vector.extract_strided_slice %421 {offsets = [0, 0, 0], sizes = [4, 4, 1], strides = [1, 1, 1]} : vector<4x4x3xf32> to vector<4x4x1xf32>
    %425 = vector.shape_cast %423 : vector<1x128xf32> to vector<1x1x128xf32>
    %426 = vector.broadcast %424 : vector<4x4x1xf32> to vector<4x4x128xf32>
    %427 = vector.broadcast %425 : vector<1x1x128xf32> to vector<4x4x128xf32>
    %428 = arith.mulf %426, %427 : vector<4x4x128xf32>
    %429 = arith.addf %419, %428 : vector<4x4x128xf32>
    %c2_256 = arith.constant 2 : index
    %c2_257 = arith.constant 2 : index
    %c1_258 = arith.constant 1 : index
    %c0_259 = arith.constant 0 : index
    %430 = vector.load %arg2[%c2_256, %c2_257, %c1_258, %c0_259] : memref<7x7x3x128xf32, #tpu.memory_space<vmem>>, vector<1x1x1x128xf32>
    %431 = vector.shape_cast %430 : vector<1x1x1x128xf32> to vector<1x128xf32>
    %432 = vector.extract_strided_slice %421 {offsets = [0, 0, 1], sizes = [4, 4, 1], strides = [1, 1, 1]} : vector<4x4x3xf32> to vector<4x4x1xf32>
    %433 = vector.shape_cast %431 : vector<1x128xf32> to vector<1x1x128xf32>
    %434 = vector.broadcast %432 : vector<4x4x1xf32> to vector<4x4x128xf32>
    %435 = vector.broadcast %433 : vector<1x1x128xf32> to vector<4x4x128xf32>
    %436 = arith.mulf %434, %435 : vector<4x4x128xf32>
    %437 = arith.addf %429, %436 : vector<4x4x128xf32>
    %c2_260 = arith.constant 2 : index
    %c2_261 = arith.constant 2 : index
    %c2_262 = arith.constant 2 : index
    %c0_263 = arith.constant 0 : index
    %438 = vector.load %arg2[%c2_260, %c2_261, %c2_262, %c0_263] : memref<7x7x3x128xf32, #tpu.memory_space<vmem>>, vector<1x1x1x128xf32>
    %439 = vector.shape_cast %438 : vector<1x1x1x128xf32> to vector<1x128xf32>
    %440 = vector.extract_strided_slice %421 {offsets = [0, 0, 2], sizes = [4, 4, 1], strides = [1, 1, 1]} : vector<4x4x3xf32> to vector<4x4x1xf32>
    %441 = vector.shape_cast %439 : vector<1x128xf32> to vector<1x1x128xf32>
    %442 = vector.broadcast %440 : vector<4x4x1xf32> to vector<4x4x128xf32>
    %443 = vector.broadcast %441 : vector<1x1x128xf32> to vector<4x4x128xf32>
    %444 = arith.mulf %442, %443 : vector<4x4x128xf32>
    %445 = arith.addf %437, %444 : vector<4x4x128xf32>
    %c11 = arith.constant 11 : index
    %c0_264 = arith.constant 0 : index
    %c0_265 = arith.constant 0 : index
    %c0_266 = arith.constant 0 : index
    %446 = vector.load %arg1[%c11, %c0_264, %c0_265, %c0_266] : memref<16x5x5x3xf32, #tpu.memory_space<vmem>>, vector<1x4x4x3xf32>
    %447 = vector.shape_cast %446 : vector<1x4x4x3xf32> to vector<4x4x3xf32>
    %c2_267 = arith.constant 2 : index
    %c3_268 = arith.constant 3 : index
    %c0_269 = arith.constant 0 : index
    %c0_270 = arith.constant 0 : index
    %448 = vector.load %arg2[%c2_267, %c3_268, %c0_269, %c0_270] : memref<7x7x3x128xf32, #tpu.memory_space<vmem>>, vector<1x1x1x128xf32>
    %449 = vector.shape_cast %448 : vector<1x1x1x128xf32> to vector<1x128xf32>
    %450 = vector.extract_strided_slice %447 {offsets = [0, 0, 0], sizes = [4, 4, 1], strides = [1, 1, 1]} : vector<4x4x3xf32> to vector<4x4x1xf32>
    %451 = vector.shape_cast %449 : vector<1x128xf32> to vector<1x1x128xf32>
    %452 = vector.broadcast %450 : vector<4x4x1xf32> to vector<4x4x128xf32>
    %453 = vector.broadcast %451 : vector<1x1x128xf32> to vector<4x4x128xf32>
    %454 = arith.mulf %452, %453 : vector<4x4x128xf32>
    %455 = arith.addf %445, %454 : vector<4x4x128xf32>
    %c2_271 = arith.constant 2 : index
    %c3_272 = arith.constant 3 : index
    %c1_273 = arith.constant 1 : index
    %c0_274 = arith.constant 0 : index
    %456 = vector.load %arg2[%c2_271, %c3_272, %c1_273, %c0_274] : memref<7x7x3x128xf32, #tpu.memory_space<vmem>>, vector<1x1x1x128xf32>
    %457 = vector.shape_cast %456 : vector<1x1x1x128xf32> to vector<1x128xf32>
    %458 = vector.extract_strided_slice %447 {offsets = [0, 0, 1], sizes = [4, 4, 1], strides = [1, 1, 1]} : vector<4x4x3xf32> to vector<4x4x1xf32>
    %459 = vector.shape_cast %457 : vector<1x128xf32> to vector<1x1x128xf32>
    %460 = vector.broadcast %458 : vector<4x4x1xf32> to vector<4x4x128xf32>
    %461 = vector.broadcast %459 : vector<1x1x128xf32> to vector<4x4x128xf32>
    %462 = arith.mulf %460, %461 : vector<4x4x128xf32>
    %463 = arith.addf %455, %462 : vector<4x4x128xf32>
    %c2_275 = arith.constant 2 : index
    %c3_276 = arith.constant 3 : index
    %c2_277 = arith.constant 2 : index
    %c0_278 = arith.constant 0 : index
    %464 = vector.load %arg2[%c2_275, %c3_276, %c2_277, %c0_278] : memref<7x7x3x128xf32, #tpu.memory_space<vmem>>, vector<1x1x1x128xf32>
    %465 = vector.shape_cast %464 : vector<1x1x1x128xf32> to vector<1x128xf32>
    %466 = vector.extract_strided_slice %447 {offsets = [0, 0, 2], sizes = [4, 4, 1], strides = [1, 1, 1]} : vector<4x4x3xf32> to vector<4x4x1xf32>
    %467 = vector.shape_cast %465 : vector<1x128xf32> to vector<1x1x128xf32>
    %468 = vector.broadcast %466 : vector<4x4x1xf32> to vector<4x4x128xf32>
    %469 = vector.broadcast %467 : vector<1x1x128xf32> to vector<4x4x128xf32>
    %470 = arith.mulf %468, %469 : vector<4x4x128xf32>
    %471 = arith.addf %463, %470 : vector<4x4x128xf32>
    %c8_279 = arith.constant 8 : index
    %c0_280 = arith.constant 0 : index
    %c1_281 = arith.constant 1 : index
    %c0_282 = arith.constant 0 : index
    %472 = vector.load %arg1[%c8_279, %c0_280, %c1_281, %c0_282] : memref<16x5x5x3xf32, #tpu.memory_space<vmem>>, vector<1x4x4x3xf32>
    %473 = vector.shape_cast %472 : vector<1x4x4x3xf32> to vector<4x4x3xf32>
    %c2_283 = arith.constant 2 : index
    %c4_284 = arith.constant 4 : index
    %c0_285 = arith.constant 0 : index
    %c0_286 = arith.constant 0 : index
    %474 = vector.load %arg2[%c2_283, %c4_284, %c0_285, %c0_286] : memref<7x7x3x128xf32, #tpu.memory_space<vmem>>, vector<1x1x1x128xf32>
    %475 = vector.shape_cast %474 : vector<1x1x1x128xf32> to vector<1x128xf32>
    %476 = vector.extract_strided_slice %473 {offsets = [0, 0, 0], sizes = [4, 4, 1], strides = [1, 1, 1]} : vector<4x4x3xf32> to vector<4x4x1xf32>
    %477 = vector.shape_cast %475 : vector<1x128xf32> to vector<1x1x128xf32>
    %478 = vector.broadcast %476 : vector<4x4x1xf32> to vector<4x4x128xf32>
    %479 = vector.broadcast %477 : vector<1x1x128xf32> to vector<4x4x128xf32>
    %480 = arith.mulf %478, %479 : vector<4x4x128xf32>
    %481 = arith.addf %471, %480 : vector<4x4x128xf32>
    %c2_287 = arith.constant 2 : index
    %c4_288 = arith.constant 4 : index
    %c1_289 = arith.constant 1 : index
    %c0_290 = arith.constant 0 : index
    %482 = vector.load %arg2[%c2_287, %c4_288, %c1_289, %c0_290] : memref<7x7x3x128xf32, #tpu.memory_space<vmem>>, vector<1x1x1x128xf32>
    %483 = vector.shape_cast %482 : vector<1x1x1x128xf32> to vector<1x128xf32>
    %484 = vector.extract_strided_slice %473 {offsets = [0, 0, 1], sizes = [4, 4, 1], strides = [1, 1, 1]} : vector<4x4x3xf32> to vector<4x4x1xf32>
    %485 = vector.shape_cast %483 : vector<1x128xf32> to vector<1x1x128xf32>
    %486 = vector.broadcast %484 : vector<4x4x1xf32> to vector<4x4x128xf32>
    %487 = vector.broadcast %485 : vector<1x1x128xf32> to vector<4x4x128xf32>
    %488 = arith.mulf %486, %487 : vector<4x4x128xf32>
    %489 = arith.addf %481, %488 : vector<4x4x128xf32>
    %c2_291 = arith.constant 2 : index
    %c4_292 = arith.constant 4 : index
    %c2_293 = arith.constant 2 : index
    %c0_294 = arith.constant 0 : index
    %490 = vector.load %arg2[%c2_291, %c4_292, %c2_293, %c0_294] : memref<7x7x3x128xf32, #tpu.memory_space<vmem>>, vector<1x1x1x128xf32>
    %491 = vector.shape_cast %490 : vector<1x1x1x128xf32> to vector<1x128xf32>
    %492 = vector.extract_strided_slice %473 {offsets = [0, 0, 2], sizes = [4, 4, 1], strides = [1, 1, 1]} : vector<4x4x3xf32> to vector<4x4x1xf32>
    %493 = vector.shape_cast %491 : vector<1x128xf32> to vector<1x1x128xf32>
    %494 = vector.broadcast %492 : vector<4x4x1xf32> to vector<4x4x128xf32>
    %495 = vector.broadcast %493 : vector<1x1x128xf32> to vector<4x4x128xf32>
    %496 = arith.mulf %494, %495 : vector<4x4x128xf32>
    %497 = arith.addf %489, %496 : vector<4x4x128xf32>
    %c9_295 = arith.constant 9 : index
    %c0_296 = arith.constant 0 : index
    %c1_297 = arith.constant 1 : index
    %c0_298 = arith.constant 0 : index
    %498 = vector.load %arg1[%c9_295, %c0_296, %c1_297, %c0_298] : memref<16x5x5x3xf32, #tpu.memory_space<vmem>>, vector<1x4x4x3xf32>
    %499 = vector.shape_cast %498 : vector<1x4x4x3xf32> to vector<4x4x3xf32>
    %c2_299 = arith.constant 2 : index
    %c5_300 = arith.constant 5 : index
    %c0_301 = arith.constant 0 : index
    %c0_302 = arith.constant 0 : index
    %500 = vector.load %arg2[%c2_299, %c5_300, %c0_301, %c0_302] : memref<7x7x3x128xf32, #tpu.memory_space<vmem>>, vector<1x1x1x128xf32>
    %501 = vector.shape_cast %500 : vector<1x1x1x128xf32> to vector<1x128xf32>
    %502 = vector.extract_strided_slice %499 {offsets = [0, 0, 0], sizes = [4, 4, 1], strides = [1, 1, 1]} : vector<4x4x3xf32> to vector<4x4x1xf32>
    %503 = vector.shape_cast %501 : vector<1x128xf32> to vector<1x1x128xf32>
    %504 = vector.broadcast %502 : vector<4x4x1xf32> to vector<4x4x128xf32>
    %505 = vector.broadcast %503 : vector<1x1x128xf32> to vector<4x4x128xf32>
    %506 = arith.mulf %504, %505 : vector<4x4x128xf32>
    %507 = arith.addf %497, %506 : vector<4x4x128xf32>
    %c2_303 = arith.constant 2 : index
    %c5_304 = arith.constant 5 : index
    %c1_305 = arith.constant 1 : index
    %c0_306 = arith.constant 0 : index
    %508 = vector.load %arg2[%c2_303, %c5_304, %c1_305, %c0_306] : memref<7x7x3x128xf32, #tpu.memory_space<vmem>>, vector<1x1x1x128xf32>
    %509 = vector.shape_cast %508 : vector<1x1x1x128xf32> to vector<1x128xf32>
    %510 = vector.extract_strided_slice %499 {offsets = [0, 0, 1], sizes = [4, 4, 1], strides = [1, 1, 1]} : vector<4x4x3xf32> to vector<4x4x1xf32>
    %511 = vector.shape_cast %509 : vector<1x128xf32> to vector<1x1x128xf32>
    %512 = vector.broadcast %510 : vector<4x4x1xf32> to vector<4x4x128xf32>
    %513 = vector.broadcast %511 : vector<1x1x128xf32> to vector<4x4x128xf32>
    %514 = arith.mulf %512, %513 : vector<4x4x128xf32>
    %515 = arith.addf %507, %514 : vector<4x4x128xf32>
    %c2_307 = arith.constant 2 : index
    %c5_308 = arith.constant 5 : index
    %c2_309 = arith.constant 2 : index
    %c0_310 = arith.constant 0 : index
    %516 = vector.load %arg2[%c2_307, %c5_308, %c2_309, %c0_310] : memref<7x7x3x128xf32, #tpu.memory_space<vmem>>, vector<1x1x1x128xf32>
    %517 = vector.shape_cast %516 : vector<1x1x1x128xf32> to vector<1x128xf32>
    %518 = vector.extract_strided_slice %499 {offsets = [0, 0, 2], sizes = [4, 4, 1], strides = [1, 1, 1]} : vector<4x4x3xf32> to vector<4x4x1xf32>
    %519 = vector.shape_cast %517 : vector<1x128xf32> to vector<1x1x128xf32>
    %520 = vector.broadcast %518 : vector<4x4x1xf32> to vector<4x4x128xf32>
    %521 = vector.broadcast %519 : vector<1x1x128xf32> to vector<4x4x128xf32>
    %522 = arith.mulf %520, %521 : vector<4x4x128xf32>
    %523 = arith.addf %515, %522 : vector<4x4x128xf32>
    %c10_311 = arith.constant 10 : index
    %c0_312 = arith.constant 0 : index
    %c1_313 = arith.constant 1 : index
    %c0_314 = arith.constant 0 : index
    %524 = vector.load %arg1[%c10_311, %c0_312, %c1_313, %c0_314] : memref<16x5x5x3xf32, #tpu.memory_space<vmem>>, vector<1x4x4x3xf32>
    %525 = vector.shape_cast %524 : vector<1x4x4x3xf32> to vector<4x4x3xf32>
    %c2_315 = arith.constant 2 : index
    %c6_316 = arith.constant 6 : index
    %c0_317 = arith.constant 0 : index
    %c0_318 = arith.constant 0 : index
    %526 = vector.load %arg2[%c2_315, %c6_316, %c0_317, %c0_318] : memref<7x7x3x128xf32, #tpu.memory_space<vmem>>, vector<1x1x1x128xf32>
    %527 = vector.shape_cast %526 : vector<1x1x1x128xf32> to vector<1x128xf32>
    %528 = vector.extract_strided_slice %525 {offsets = [0, 0, 0], sizes = [4, 4, 1], strides = [1, 1, 1]} : vector<4x4x3xf32> to vector<4x4x1xf32>
    %529 = vector.shape_cast %527 : vector<1x128xf32> to vector<1x1x128xf32>
    %530 = vector.broadcast %528 : vector<4x4x1xf32> to vector<4x4x128xf32>
    %531 = vector.broadcast %529 : vector<1x1x128xf32> to vector<4x4x128xf32>
    %532 = arith.mulf %530, %531 : vector<4x4x128xf32>
    %533 = arith.addf %523, %532 : vector<4x4x128xf32>
    %c2_319 = arith.constant 2 : index
    %c6_320 = arith.constant 6 : index
    %c1_321 = arith.constant 1 : index
    %c0_322 = arith.constant 0 : index
    %534 = vector.load %arg2[%c2_319, %c6_320, %c1_321, %c0_322] : memref<7x7x3x128xf32, #tpu.memory_space<vmem>>, vector<1x1x1x128xf32>
    %535 = vector.shape_cast %534 : vector<1x1x1x128xf32> to vector<1x128xf32>
    %536 = vector.extract_strided_slice %525 {offsets = [0, 0, 1], sizes = [4, 4, 1], strides = [1, 1, 1]} : vector<4x4x3xf32> to vector<4x4x1xf32>
    %537 = vector.shape_cast %535 : vector<1x128xf32> to vector<1x1x128xf32>
    %538 = vector.broadcast %536 : vector<4x4x1xf32> to vector<4x4x128xf32>
    %539 = vector.broadcast %537 : vector<1x1x128xf32> to vector<4x4x128xf32>
    %540 = arith.mulf %538, %539 : vector<4x4x128xf32>
    %541 = arith.addf %533, %540 : vector<4x4x128xf32>
    %c2_323 = arith.constant 2 : index
    %c6_324 = arith.constant 6 : index
    %c2_325 = arith.constant 2 : index
    %c0_326 = arith.constant 0 : index
    %542 = vector.load %arg2[%c2_323, %c6_324, %c2_325, %c0_326] : memref<7x7x3x128xf32, #tpu.memory_space<vmem>>, vector<1x1x1x128xf32>
    %543 = vector.shape_cast %542 : vector<1x1x1x128xf32> to vector<1x128xf32>
    %544 = vector.extract_strided_slice %525 {offsets = [0, 0, 2], sizes = [4, 4, 1], strides = [1, 1, 1]} : vector<4x4x3xf32> to vector<4x4x1xf32>
    %545 = vector.shape_cast %543 : vector<1x128xf32> to vector<1x1x128xf32>
    %546 = vector.broadcast %544 : vector<4x4x1xf32> to vector<4x4x128xf32>
    %547 = vector.broadcast %545 : vector<1x1x128xf32> to vector<4x4x128xf32>
    %548 = arith.mulf %546, %547 : vector<4x4x128xf32>
    %549 = arith.addf %541, %548 : vector<4x4x128xf32>
    %c12 = arith.constant 12 : index
    %c0_327 = arith.constant 0 : index
    %c0_328 = arith.constant 0 : index
    %c0_329 = arith.constant 0 : index
    %550 = vector.load %arg1[%c12, %c0_327, %c0_328, %c0_329] : memref<16x5x5x3xf32, #tpu.memory_space<vmem>>, vector<1x4x4x3xf32>
    %551 = vector.shape_cast %550 : vector<1x4x4x3xf32> to vector<4x4x3xf32>
    %c3_330 = arith.constant 3 : index
    %c0_331 = arith.constant 0 : index
    %c0_332 = arith.constant 0 : index
    %c0_333 = arith.constant 0 : index
    %552 = vector.load %arg2[%c3_330, %c0_331, %c0_332, %c0_333] : memref<7x7x3x128xf32, #tpu.memory_space<vmem>>, vector<1x1x1x128xf32>
    %553 = vector.shape_cast %552 : vector<1x1x1x128xf32> to vector<1x128xf32>
    %554 = vector.extract_strided_slice %551 {offsets = [0, 0, 0], sizes = [4, 4, 1], strides = [1, 1, 1]} : vector<4x4x3xf32> to vector<4x4x1xf32>
    %555 = vector.shape_cast %553 : vector<1x128xf32> to vector<1x1x128xf32>
    %556 = vector.broadcast %554 : vector<4x4x1xf32> to vector<4x4x128xf32>
    %557 = vector.broadcast %555 : vector<1x1x128xf32> to vector<4x4x128xf32>
    %558 = arith.mulf %556, %557 : vector<4x4x128xf32>
    %559 = arith.addf %549, %558 : vector<4x4x128xf32>
    %c3_334 = arith.constant 3 : index
    %c0_335 = arith.constant 0 : index
    %c1_336 = arith.constant 1 : index
    %c0_337 = arith.constant 0 : index
    %560 = vector.load %arg2[%c3_334, %c0_335, %c1_336, %c0_337] : memref<7x7x3x128xf32, #tpu.memory_space<vmem>>, vector<1x1x1x128xf32>
    %561 = vector.shape_cast %560 : vector<1x1x1x128xf32> to vector<1x128xf32>
    %562 = vector.extract_strided_slice %551 {offsets = [0, 0, 1], sizes = [4, 4, 1], strides = [1, 1, 1]} : vector<4x4x3xf32> to vector<4x4x1xf32>
    %563 = vector.shape_cast %561 : vector<1x128xf32> to vector<1x1x128xf32>
    %564 = vector.broadcast %562 : vector<4x4x1xf32> to vector<4x4x128xf32>
    %565 = vector.broadcast %563 : vector<1x1x128xf32> to vector<4x4x128xf32>
    %566 = arith.mulf %564, %565 : vector<4x4x128xf32>
    %567 = arith.addf %559, %566 : vector<4x4x128xf32>
    %c3_338 = arith.constant 3 : index
    %c0_339 = arith.constant 0 : index
    %c2_340 = arith.constant 2 : index
    %c0_341 = arith.constant 0 : index
    %568 = vector.load %arg2[%c3_338, %c0_339, %c2_340, %c0_341] : memref<7x7x3x128xf32, #tpu.memory_space<vmem>>, vector<1x1x1x128xf32>
    %569 = vector.shape_cast %568 : vector<1x1x1x128xf32> to vector<1x128xf32>
    %570 = vector.extract_strided_slice %551 {offsets = [0, 0, 2], sizes = [4, 4, 1], strides = [1, 1, 1]} : vector<4x4x3xf32> to vector<4x4x1xf32>
    %571 = vector.shape_cast %569 : vector<1x128xf32> to vector<1x1x128xf32>
    %572 = vector.broadcast %570 : vector<4x4x1xf32> to vector<4x4x128xf32>
    %573 = vector.broadcast %571 : vector<1x1x128xf32> to vector<4x4x128xf32>
    %574 = arith.mulf %572, %573 : vector<4x4x128xf32>
    %575 = arith.addf %567, %574 : vector<4x4x128xf32>
    %c13 = arith.constant 13 : index
    %c0_342 = arith.constant 0 : index
    %c0_343 = arith.constant 0 : index
    %c0_344 = arith.constant 0 : index
    %576 = vector.load %arg1[%c13, %c0_342, %c0_343, %c0_344] : memref<16x5x5x3xf32, #tpu.memory_space<vmem>>, vector<1x4x4x3xf32>
    %577 = vector.shape_cast %576 : vector<1x4x4x3xf32> to vector<4x4x3xf32>
    %c3_345 = arith.constant 3 : index
    %c1_346 = arith.constant 1 : index
    %c0_347 = arith.constant 0 : index
    %c0_348 = arith.constant 0 : index
    %578 = vector.load %arg2[%c3_345, %c1_346, %c0_347, %c0_348] : memref<7x7x3x128xf32, #tpu.memory_space<vmem>>, vector<1x1x1x128xf32>
    %579 = vector.shape_cast %578 : vector<1x1x1x128xf32> to vector<1x128xf32>
    %580 = vector.extract_strided_slice %577 {offsets = [0, 0, 0], sizes = [4, 4, 1], strides = [1, 1, 1]} : vector<4x4x3xf32> to vector<4x4x1xf32>
    %581 = vector.shape_cast %579 : vector<1x128xf32> to vector<1x1x128xf32>
    %582 = vector.broadcast %580 : vector<4x4x1xf32> to vector<4x4x128xf32>
    %583 = vector.broadcast %581 : vector<1x1x128xf32> to vector<4x4x128xf32>
    %584 = arith.mulf %582, %583 : vector<4x4x128xf32>
    %585 = arith.addf %575, %584 : vector<4x4x128xf32>
    %c3_349 = arith.constant 3 : index
    %c1_350 = arith.constant 1 : index
    %c1_351 = arith.constant 1 : index
    %c0_352 = arith.constant 0 : index
    %586 = vector.load %arg2[%c3_349, %c1_350, %c1_351, %c0_352] : memref<7x7x3x128xf32, #tpu.memory_space<vmem>>, vector<1x1x1x128xf32>
    %587 = vector.shape_cast %586 : vector<1x1x1x128xf32> to vector<1x128xf32>
    %588 = vector.extract_strided_slice %577 {offsets = [0, 0, 1], sizes = [4, 4, 1], strides = [1, 1, 1]} : vector<4x4x3xf32> to vector<4x4x1xf32>
    %589 = vector.shape_cast %587 : vector<1x128xf32> to vector<1x1x128xf32>
    %590 = vector.broadcast %588 : vector<4x4x1xf32> to vector<4x4x128xf32>
    %591 = vector.broadcast %589 : vector<1x1x128xf32> to vector<4x4x128xf32>
    %592 = arith.mulf %590, %591 : vector<4x4x128xf32>
    %593 = arith.addf %585, %592 : vector<4x4x128xf32>
    %c3_353 = arith.constant 3 : index
    %c1_354 = arith.constant 1 : index
    %c2_355 = arith.constant 2 : index
    %c0_356 = arith.constant 0 : index
    %594 = vector.load %arg2[%c3_353, %c1_354, %c2_355, %c0_356] : memref<7x7x3x128xf32, #tpu.memory_space<vmem>>, vector<1x1x1x128xf32>
    %595 = vector.shape_cast %594 : vector<1x1x1x128xf32> to vector<1x128xf32>
    %596 = vector.extract_strided_slice %577 {offsets = [0, 0, 2], sizes = [4, 4, 1], strides = [1, 1, 1]} : vector<4x4x3xf32> to vector<4x4x1xf32>
    %597 = vector.shape_cast %595 : vector<1x128xf32> to vector<1x1x128xf32>
    %598 = vector.broadcast %596 : vector<4x4x1xf32> to vector<4x4x128xf32>
    %599 = vector.broadcast %597 : vector<1x1x128xf32> to vector<4x4x128xf32>
    %600 = arith.mulf %598, %599 : vector<4x4x128xf32>
    %601 = arith.addf %593, %600 : vector<4x4x128xf32>
    %c14 = arith.constant 14 : index
    %c0_357 = arith.constant 0 : index
    %c0_358 = arith.constant 0 : index
    %c0_359 = arith.constant 0 : index
    %602 = vector.load %arg1[%c14, %c0_357, %c0_358, %c0_359] : memref<16x5x5x3xf32, #tpu.memory_space<vmem>>, vector<1x4x4x3xf32>
    %603 = vector.shape_cast %602 : vector<1x4x4x3xf32> to vector<4x4x3xf32>
    %c3_360 = arith.constant 3 : index
    %c2_361 = arith.constant 2 : index
    %c0_362 = arith.constant 0 : index
    %c0_363 = arith.constant 0 : index
    %604 = vector.load %arg2[%c3_360, %c2_361, %c0_362, %c0_363] : memref<7x7x3x128xf32, #tpu.memory_space<vmem>>, vector<1x1x1x128xf32>
    %605 = vector.shape_cast %604 : vector<1x1x1x128xf32> to vector<1x128xf32>
    %606 = vector.extract_strided_slice %603 {offsets = [0, 0, 0], sizes = [4, 4, 1], strides = [1, 1, 1]} : vector<4x4x3xf32> to vector<4x4x1xf32>
    %607 = vector.shape_cast %605 : vector<1x128xf32> to vector<1x1x128xf32>
    %608 = vector.broadcast %606 : vector<4x4x1xf32> to vector<4x4x128xf32>
    %609 = vector.broadcast %607 : vector<1x1x128xf32> to vector<4x4x128xf32>
    %610 = arith.mulf %608, %609 : vector<4x4x128xf32>
    %611 = arith.addf %601, %610 : vector<4x4x128xf32>
    %c3_364 = arith.constant 3 : index
    %c2_365 = arith.constant 2 : index
    %c1_366 = arith.constant 1 : index
    %c0_367 = arith.constant 0 : index
    %612 = vector.load %arg2[%c3_364, %c2_365, %c1_366, %c0_367] : memref<7x7x3x128xf32, #tpu.memory_space<vmem>>, vector<1x1x1x128xf32>
    %613 = vector.shape_cast %612 : vector<1x1x1x128xf32> to vector<1x128xf32>
    %614 = vector.extract_strided_slice %603 {offsets = [0, 0, 1], sizes = [4, 4, 1], strides = [1, 1, 1]} : vector<4x4x3xf32> to vector<4x4x1xf32>
    %615 = vector.shape_cast %613 : vector<1x128xf32> to vector<1x1x128xf32>
    %616 = vector.broadcast %614 : vector<4x4x1xf32> to vector<4x4x128xf32>
    %617 = vector.broadcast %615 : vector<1x1x128xf32> to vector<4x4x128xf32>
    %618 = arith.mulf %616, %617 : vector<4x4x128xf32>
    %619 = arith.addf %611, %618 : vector<4x4x128xf32>
    %c3_368 = arith.constant 3 : index
    %c2_369 = arith.constant 2 : index
    %c2_370 = arith.constant 2 : index
    %c0_371 = arith.constant 0 : index
    %620 = vector.load %arg2[%c3_368, %c2_369, %c2_370, %c0_371] : memref<7x7x3x128xf32, #tpu.memory_space<vmem>>, vector<1x1x1x128xf32>
    %621 = vector.shape_cast %620 : vector<1x1x1x128xf32> to vector<1x128xf32>
    %622 = vector.extract_strided_slice %603 {offsets = [0, 0, 2], sizes = [4, 4, 1], strides = [1, 1, 1]} : vector<4x4x3xf32> to vector<4x4x1xf32>
    %623 = vector.shape_cast %621 : vector<1x128xf32> to vector<1x1x128xf32>
    %624 = vector.broadcast %622 : vector<4x4x1xf32> to vector<4x4x128xf32>
    %625 = vector.broadcast %623 : vector<1x1x128xf32> to vector<4x4x128xf32>
    %626 = arith.mulf %624, %625 : vector<4x4x128xf32>
    %627 = arith.addf %619, %626 : vector<4x4x128xf32>
    %c15 = arith.constant 15 : index
    %c0_372 = arith.constant 0 : index
    %c0_373 = arith.constant 0 : index
    %c0_374 = arith.constant 0 : index
    %628 = vector.load %arg1[%c15, %c0_372, %c0_373, %c0_374] : memref<16x5x5x3xf32, #tpu.memory_space<vmem>>, vector<1x4x4x3xf32>
    %629 = vector.shape_cast %628 : vector<1x4x4x3xf32> to vector<4x4x3xf32>
    %c3_375 = arith.constant 3 : index
    %c3_376 = arith.constant 3 : index
    %c0_377 = arith.constant 0 : index
    %c0_378 = arith.constant 0 : index
    %630 = vector.load %arg2[%c3_375, %c3_376, %c0_377, %c0_378] : memref<7x7x3x128xf32, #tpu.memory_space<vmem>>, vector<1x1x1x128xf32>
    %631 = vector.shape_cast %630 : vector<1x1x1x128xf32> to vector<1x128xf32>
    %632 = vector.extract_strided_slice %629 {offsets = [0, 0, 0], sizes = [4, 4, 1], strides = [1, 1, 1]} : vector<4x4x3xf32> to vector<4x4x1xf32>
    %633 = vector.shape_cast %631 : vector<1x128xf32> to vector<1x1x128xf32>
    %634 = vector.broadcast %632 : vector<4x4x1xf32> to vector<4x4x128xf32>
    %635 = vector.broadcast %633 : vector<1x1x128xf32> to vector<4x4x128xf32>
    %636 = arith.mulf %634, %635 : vector<4x4x128xf32>
    %637 = arith.addf %627, %636 : vector<4x4x128xf32>
    %c3_379 = arith.constant 3 : index
    %c3_380 = arith.constant 3 : index
    %c1_381 = arith.constant 1 : index
    %c0_382 = arith.constant 0 : index
    %638 = vector.load %arg2[%c3_379, %c3_380, %c1_381, %c0_382] : memref<7x7x3x128xf32, #tpu.memory_space<vmem>>, vector<1x1x1x128xf32>
    %639 = vector.shape_cast %638 : vector<1x1x1x128xf32> to vector<1x128xf32>
    %640 = vector.extract_strided_slice %629 {offsets = [0, 0, 1], sizes = [4, 4, 1], strides = [1, 1, 1]} : vector<4x4x3xf32> to vector<4x4x1xf32>
    %641 = vector.shape_cast %639 : vector<1x128xf32> to vector<1x1x128xf32>
    %642 = vector.broadcast %640 : vector<4x4x1xf32> to vector<4x4x128xf32>
    %643 = vector.broadcast %641 : vector<1x1x128xf32> to vector<4x4x128xf32>
    %644 = arith.mulf %642, %643 : vector<4x4x128xf32>
    %645 = arith.addf %637, %644 : vector<4x4x128xf32>
    %c3_383 = arith.constant 3 : index
    %c3_384 = arith.constant 3 : index
    %c2_385 = arith.constant 2 : index
    %c0_386 = arith.constant 0 : index
    %646 = vector.load %arg2[%c3_383, %c3_384, %c2_385, %c0_386] : memref<7x7x3x128xf32, #tpu.memory_space<vmem>>, vector<1x1x1x128xf32>
    %647 = vector.shape_cast %646 : vector<1x1x1x128xf32> to vector<1x128xf32>
    %648 = vector.extract_strided_slice %629 {offsets = [0, 0, 2], sizes = [4, 4, 1], strides = [1, 1, 1]} : vector<4x4x3xf32> to vector<4x4x1xf32>
    %649 = vector.shape_cast %647 : vector<1x128xf32> to vector<1x1x128xf32>
    %650 = vector.broadcast %648 : vector<4x4x1xf32> to vector<4x4x128xf32>
    %651 = vector.broadcast %649 : vector<1x1x128xf32> to vector<4x4x128xf32>
    %652 = arith.mulf %650, %651 : vector<4x4x128xf32>
    %653 = arith.addf %645, %652 : vector<4x4x128xf32>
    %c12_387 = arith.constant 12 : index
    %c0_388 = arith.constant 0 : index
    %c1_389 = arith.constant 1 : index
    %c0_390 = arith.constant 0 : index
    %654 = vector.load %arg1[%c12_387, %c0_388, %c1_389, %c0_390] : memref<16x5x5x3xf32, #tpu.memory_space<vmem>>, vector<1x4x4x3xf32>
    %655 = vector.shape_cast %654 : vector<1x4x4x3xf32> to vector<4x4x3xf32>
    %c3_391 = arith.constant 3 : index
    %c4_392 = arith.constant 4 : index
    %c0_393 = arith.constant 0 : index
    %c0_394 = arith.constant 0 : index
    %656 = vector.load %arg2[%c3_391, %c4_392, %c0_393, %c0_394] : memref<7x7x3x128xf32, #tpu.memory_space<vmem>>, vector<1x1x1x128xf32>
    %657 = vector.shape_cast %656 : vector<1x1x1x128xf32> to vector<1x128xf32>
    %658 = vector.extract_strided_slice %655 {offsets = [0, 0, 0], sizes = [4, 4, 1], strides = [1, 1, 1]} : vector<4x4x3xf32> to vector<4x4x1xf32>
    %659 = vector.shape_cast %657 : vector<1x128xf32> to vector<1x1x128xf32>
    %660 = vector.broadcast %658 : vector<4x4x1xf32> to vector<4x4x128xf32>
    %661 = vector.broadcast %659 : vector<1x1x128xf32> to vector<4x4x128xf32>
    %662 = arith.mulf %660, %661 : vector<4x4x128xf32>
    %663 = arith.addf %653, %662 : vector<4x4x128xf32>
    %c3_395 = arith.constant 3 : index
    %c4_396 = arith.constant 4 : index
    %c1_397 = arith.constant 1 : index
    %c0_398 = arith.constant 0 : index
    %664 = vector.load %arg2[%c3_395, %c4_396, %c1_397, %c0_398] : memref<7x7x3x128xf32, #tpu.memory_space<vmem>>, vector<1x1x1x128xf32>
    %665 = vector.shape_cast %664 : vector<1x1x1x128xf32> to vector<1x128xf32>
    %666 = vector.extract_strided_slice %655 {offsets = [0, 0, 1], sizes = [4, 4, 1], strides = [1, 1, 1]} : vector<4x4x3xf32> to vector<4x4x1xf32>
    %667 = vector.shape_cast %665 : vector<1x128xf32> to vector<1x1x128xf32>
    %668 = vector.broadcast %666 : vector<4x4x1xf32> to vector<4x4x128xf32>
    %669 = vector.broadcast %667 : vector<1x1x128xf32> to vector<4x4x128xf32>
    %670 = arith.mulf %668, %669 : vector<4x4x128xf32>
    %671 = arith.addf %663, %670 : vector<4x4x128xf32>
    %c3_399 = arith.constant 3 : index
    %c4_400 = arith.constant 4 : index
    %c2_401 = arith.constant 2 : index
    %c0_402 = arith.constant 0 : index
    %672 = vector.load %arg2[%c3_399, %c4_400, %c2_401, %c0_402] : memref<7x7x3x128xf32, #tpu.memory_space<vmem>>, vector<1x1x1x128xf32>
    %673 = vector.shape_cast %672 : vector<1x1x1x128xf32> to vector<1x128xf32>
    %674 = vector.extract_strided_slice %655 {offsets = [0, 0, 2], sizes = [4, 4, 1], strides = [1, 1, 1]} : vector<4x4x3xf32> to vector<4x4x1xf32>
    %675 = vector.shape_cast %673 : vector<1x128xf32> to vector<1x1x128xf32>
    %676 = vector.broadcast %674 : vector<4x4x1xf32> to vector<4x4x128xf32>
    %677 = vector.broadcast %675 : vector<1x1x128xf32> to vector<4x4x128xf32>
    %678 = arith.mulf %676, %677 : vector<4x4x128xf32>
    %679 = arith.addf %671, %678 : vector<4x4x128xf32>
    %c13_403 = arith.constant 13 : index
    %c0_404 = arith.constant 0 : index
    %c1_405 = arith.constant 1 : index
    %c0_406 = arith.constant 0 : index
    %680 = vector.load %arg1[%c13_403, %c0_404, %c1_405, %c0_406] : memref<16x5x5x3xf32, #tpu.memory_space<vmem>>, vector<1x4x4x3xf32>
    %681 = vector.shape_cast %680 : vector<1x4x4x3xf32> to vector<4x4x3xf32>
    %c3_407 = arith.constant 3 : index
    %c5_408 = arith.constant 5 : index
    %c0_409 = arith.constant 0 : index
    %c0_410 = arith.constant 0 : index
    %682 = vector.load %arg2[%c3_407, %c5_408, %c0_409, %c0_410] : memref<7x7x3x128xf32, #tpu.memory_space<vmem>>, vector<1x1x1x128xf32>
    %683 = vector.shape_cast %682 : vector<1x1x1x128xf32> to vector<1x128xf32>
    %684 = vector.extract_strided_slice %681 {offsets = [0, 0, 0], sizes = [4, 4, 1], strides = [1, 1, 1]} : vector<4x4x3xf32> to vector<4x4x1xf32>
    %685 = vector.shape_cast %683 : vector<1x128xf32> to vector<1x1x128xf32>
    %686 = vector.broadcast %684 : vector<4x4x1xf32> to vector<4x4x128xf32>
    %687 = vector.broadcast %685 : vector<1x1x128xf32> to vector<4x4x128xf32>
    %688 = arith.mulf %686, %687 : vector<4x4x128xf32>
    %689 = arith.addf %679, %688 : vector<4x4x128xf32>
    %c3_411 = arith.constant 3 : index
    %c5_412 = arith.constant 5 : index
    %c1_413 = arith.constant 1 : index
    %c0_414 = arith.constant 0 : index
    %690 = vector.load %arg2[%c3_411, %c5_412, %c1_413, %c0_414] : memref<7x7x3x128xf32, #tpu.memory_space<vmem>>, vector<1x1x1x128xf32>
    %691 = vector.shape_cast %690 : vector<1x1x1x128xf32> to vector<1x128xf32>
    %692 = vector.extract_strided_slice %681 {offsets = [0, 0, 1], sizes = [4, 4, 1], strides = [1, 1, 1]} : vector<4x4x3xf32> to vector<4x4x1xf32>
    %693 = vector.shape_cast %691 : vector<1x128xf32> to vector<1x1x128xf32>
    %694 = vector.broadcast %692 : vector<4x4x1xf32> to vector<4x4x128xf32>
    %695 = vector.broadcast %693 : vector<1x1x128xf32> to vector<4x4x128xf32>
    %696 = arith.mulf %694, %695 : vector<4x4x128xf32>
    %697 = arith.addf %689, %696 : vector<4x4x128xf32>
    %c3_415 = arith.constant 3 : index
    %c5_416 = arith.constant 5 : index
    %c2_417 = arith.constant 2 : index
    %c0_418 = arith.constant 0 : index
    %698 = vector.load %arg2[%c3_415, %c5_416, %c2_417, %c0_418] : memref<7x7x3x128xf32, #tpu.memory_space<vmem>>, vector<1x1x1x128xf32>
    %699 = vector.shape_cast %698 : vector<1x1x1x128xf32> to vector<1x128xf32>
    %700 = vector.extract_strided_slice %681 {offsets = [0, 0, 2], sizes = [4, 4, 1], strides = [1, 1, 1]} : vector<4x4x3xf32> to vector<4x4x1xf32>
    %701 = vector.shape_cast %699 : vector<1x128xf32> to vector<1x1x128xf32>
    %702 = vector.broadcast %700 : vector<4x4x1xf32> to vector<4x4x128xf32>
    %703 = vector.broadcast %701 : vector<1x1x128xf32> to vector<4x4x128xf32>
    %704 = arith.mulf %702, %703 : vector<4x4x128xf32>
    %705 = arith.addf %697, %704 : vector<4x4x128xf32>
    %c14_419 = arith.constant 14 : index
    %c0_420 = arith.constant 0 : index
    %c1_421 = arith.constant 1 : index
    %c0_422 = arith.constant 0 : index
    %706 = vector.load %arg1[%c14_419, %c0_420, %c1_421, %c0_422] : memref<16x5x5x3xf32, #tpu.memory_space<vmem>>, vector<1x4x4x3xf32>
    %707 = vector.shape_cast %706 : vector<1x4x4x3xf32> to vector<4x4x3xf32>
    %c3_423 = arith.constant 3 : index
    %c6_424 = arith.constant 6 : index
    %c0_425 = arith.constant 0 : index
    %c0_426 = arith.constant 0 : index
    %708 = vector.load %arg2[%c3_423, %c6_424, %c0_425, %c0_426] : memref<7x7x3x128xf32, #tpu.memory_space<vmem>>, vector<1x1x1x128xf32>
    %709 = vector.shape_cast %708 : vector<1x1x1x128xf32> to vector<1x128xf32>
    %710 = vector.extract_strided_slice %707 {offsets = [0, 0, 0], sizes = [4, 4, 1], strides = [1, 1, 1]} : vector<4x4x3xf32> to vector<4x4x1xf32>
    %711 = vector.shape_cast %709 : vector<1x128xf32> to vector<1x1x128xf32>
    %712 = vector.broadcast %710 : vector<4x4x1xf32> to vector<4x4x128xf32>
    %713 = vector.broadcast %711 : vector<1x1x128xf32> to vector<4x4x128xf32>
    %714 = arith.mulf %712, %713 : vector<4x4x128xf32>
    %715 = arith.addf %705, %714 : vector<4x4x128xf32>
    %c3_427 = arith.constant 3 : index
    %c6_428 = arith.constant 6 : index
    %c1_429 = arith.constant 1 : index
    %c0_430 = arith.constant 0 : index
    %716 = vector.load %arg2[%c3_427, %c6_428, %c1_429, %c0_430] : memref<7x7x3x128xf32, #tpu.memory_space<vmem>>, vector<1x1x1x128xf32>
    %717 = vector.shape_cast %716 : vector<1x1x1x128xf32> to vector<1x128xf32>
    %718 = vector.extract_strided_slice %707 {offsets = [0, 0, 1], sizes = [4, 4, 1], strides = [1, 1, 1]} : vector<4x4x3xf32> to vector<4x4x1xf32>
    %719 = vector.shape_cast %717 : vector<1x128xf32> to vector<1x1x128xf32>
    %720 = vector.broadcast %718 : vector<4x4x1xf32> to vector<4x4x128xf32>
    %721 = vector.broadcast %719 : vector<1x1x128xf32> to vector<4x4x128xf32>
    %722 = arith.mulf %720, %721 : vector<4x4x128xf32>
    %723 = arith.addf %715, %722 : vector<4x4x128xf32>
    %c3_431 = arith.constant 3 : index
    %c6_432 = arith.constant 6 : index
    %c2_433 = arith.constant 2 : index
    %c0_434 = arith.constant 0 : index
    %724 = vector.load %arg2[%c3_431, %c6_432, %c2_433, %c0_434] : memref<7x7x3x128xf32, #tpu.memory_space<vmem>>, vector<1x1x1x128xf32>
    %725 = vector.shape_cast %724 : vector<1x1x1x128xf32> to vector<1x128xf32>
    %726 = vector.extract_strided_slice %707 {offsets = [0, 0, 2], sizes = [4, 4, 1], strides = [1, 1, 1]} : vector<4x4x3xf32> to vector<4x4x1xf32>
    %727 = vector.shape_cast %725 : vector<1x128xf32> to vector<1x1x128xf32>
    %728 = vector.broadcast %726 : vector<4x4x1xf32> to vector<4x4x128xf32>
    %729 = vector.broadcast %727 : vector<1x1x128xf32> to vector<4x4x128xf32>
    %730 = arith.mulf %728, %729 : vector<4x4x128xf32>
    %731 = arith.addf %723, %730 : vector<4x4x128xf32>
    %c0_435 = arith.constant 0 : index
    %c1_436 = arith.constant 1 : index
    %c0_437 = arith.constant 0 : index
    %c0_438 = arith.constant 0 : index
    %732 = vector.load %arg1[%c0_435, %c1_436, %c0_437, %c0_438] : memref<16x5x5x3xf32, #tpu.memory_space<vmem>>, vector<1x4x4x3xf32>
    %733 = vector.shape_cast %732 : vector<1x4x4x3xf32> to vector<4x4x3xf32>
    %c4_439 = arith.constant 4 : index
    %c0_440 = arith.constant 0 : index
    %c0_441 = arith.constant 0 : index
    %c0_442 = arith.constant 0 : index
    %734 = vector.load %arg2[%c4_439, %c0_440, %c0_441, %c0_442] : memref<7x7x3x128xf32, #tpu.memory_space<vmem>>, vector<1x1x1x128xf32>
    %735 = vector.shape_cast %734 : vector<1x1x1x128xf32> to vector<1x128xf32>
    %736 = vector.extract_strided_slice %733 {offsets = [0, 0, 0], sizes = [4, 4, 1], strides = [1, 1, 1]} : vector<4x4x3xf32> to vector<4x4x1xf32>
    %737 = vector.shape_cast %735 : vector<1x128xf32> to vector<1x1x128xf32>
    %738 = vector.broadcast %736 : vector<4x4x1xf32> to vector<4x4x128xf32>
    %739 = vector.broadcast %737 : vector<1x1x128xf32> to vector<4x4x128xf32>
    %740 = arith.mulf %738, %739 : vector<4x4x128xf32>
    %741 = arith.addf %731, %740 : vector<4x4x128xf32>
    %c4_443 = arith.constant 4 : index
    %c0_444 = arith.constant 0 : index
    %c1_445 = arith.constant 1 : index
    %c0_446 = arith.constant 0 : index
    %742 = vector.load %arg2[%c4_443, %c0_444, %c1_445, %c0_446] : memref<7x7x3x128xf32, #tpu.memory_space<vmem>>, vector<1x1x1x128xf32>
    %743 = vector.shape_cast %742 : vector<1x1x1x128xf32> to vector<1x128xf32>
    %744 = vector.extract_strided_slice %733 {offsets = [0, 0, 1], sizes = [4, 4, 1], strides = [1, 1, 1]} : vector<4x4x3xf32> to vector<4x4x1xf32>
    %745 = vector.shape_cast %743 : vector<1x128xf32> to vector<1x1x128xf32>
    %746 = vector.broadcast %744 : vector<4x4x1xf32> to vector<4x4x128xf32>
    %747 = vector.broadcast %745 : vector<1x1x128xf32> to vector<4x4x128xf32>
    %748 = arith.mulf %746, %747 : vector<4x4x128xf32>
    %749 = arith.addf %741, %748 : vector<4x4x128xf32>
    %c4_447 = arith.constant 4 : index
    %c0_448 = arith.constant 0 : index
    %c2_449 = arith.constant 2 : index
    %c0_450 = arith.constant 0 : index
    %750 = vector.load %arg2[%c4_447, %c0_448, %c2_449, %c0_450] : memref<7x7x3x128xf32, #tpu.memory_space<vmem>>, vector<1x1x1x128xf32>
    %751 = vector.shape_cast %750 : vector<1x1x1x128xf32> to vector<1x128xf32>
    %752 = vector.extract_strided_slice %733 {offsets = [0, 0, 2], sizes = [4, 4, 1], strides = [1, 1, 1]} : vector<4x4x3xf32> to vector<4x4x1xf32>
    %753 = vector.shape_cast %751 : vector<1x128xf32> to vector<1x1x128xf32>
    %754 = vector.broadcast %752 : vector<4x4x1xf32> to vector<4x4x128xf32>
    %755 = vector.broadcast %753 : vector<1x1x128xf32> to vector<4x4x128xf32>
    %756 = arith.mulf %754, %755 : vector<4x4x128xf32>
    %757 = arith.addf %749, %756 : vector<4x4x128xf32>
    %c1_451 = arith.constant 1 : index
    %c1_452 = arith.constant 1 : index
    %c0_453 = arith.constant 0 : index
    %c0_454 = arith.constant 0 : index
    %758 = vector.load %arg1[%c1_451, %c1_452, %c0_453, %c0_454] : memref<16x5x5x3xf32, #tpu.memory_space<vmem>>, vector<1x4x4x3xf32>
    %759 = vector.shape_cast %758 : vector<1x4x4x3xf32> to vector<4x4x3xf32>
    %c4_455 = arith.constant 4 : index
    %c1_456 = arith.constant 1 : index
    %c0_457 = arith.constant 0 : index
    %c0_458 = arith.constant 0 : index
    %760 = vector.load %arg2[%c4_455, %c1_456, %c0_457, %c0_458] : memref<7x7x3x128xf32, #tpu.memory_space<vmem>>, vector<1x1x1x128xf32>
    %761 = vector.shape_cast %760 : vector<1x1x1x128xf32> to vector<1x128xf32>
    %762 = vector.extract_strided_slice %759 {offsets = [0, 0, 0], sizes = [4, 4, 1], strides = [1, 1, 1]} : vector<4x4x3xf32> to vector<4x4x1xf32>
    %763 = vector.shape_cast %761 : vector<1x128xf32> to vector<1x1x128xf32>
    %764 = vector.broadcast %762 : vector<4x4x1xf32> to vector<4x4x128xf32>
    %765 = vector.broadcast %763 : vector<1x1x128xf32> to vector<4x4x128xf32>
    %766 = arith.mulf %764, %765 : vector<4x4x128xf32>
    %767 = arith.addf %757, %766 : vector<4x4x128xf32>
    %c4_459 = arith.constant 4 : index
    %c1_460 = arith.constant 1 : index
    %c1_461 = arith.constant 1 : index
    %c0_462 = arith.constant 0 : index
    %768 = vector.load %arg2[%c4_459, %c1_460, %c1_461, %c0_462] : memref<7x7x3x128xf32, #tpu.memory_space<vmem>>, vector<1x1x1x128xf32>
    %769 = vector.shape_cast %768 : vector<1x1x1x128xf32> to vector<1x128xf32>
    %770 = vector.extract_strided_slice %759 {offsets = [0, 0, 1], sizes = [4, 4, 1], strides = [1, 1, 1]} : vector<4x4x3xf32> to vector<4x4x1xf32>
    %771 = vector.shape_cast %769 : vector<1x128xf32> to vector<1x1x128xf32>
    %772 = vector.broadcast %770 : vector<4x4x1xf32> to vector<4x4x128xf32>
    %773 = vector.broadcast %771 : vector<1x1x128xf32> to vector<4x4x128xf32>
    %774 = arith.mulf %772, %773 : vector<4x4x128xf32>
    %775 = arith.addf %767, %774 : vector<4x4x128xf32>
    %c4_463 = arith.constant 4 : index
    %c1_464 = arith.constant 1 : index
    %c2_465 = arith.constant 2 : index
    %c0_466 = arith.constant 0 : index
    %776 = vector.load %arg2[%c4_463, %c1_464, %c2_465, %c0_466] : memref<7x7x3x128xf32, #tpu.memory_space<vmem>>, vector<1x1x1x128xf32>
    %777 = vector.shape_cast %776 : vector<1x1x1x128xf32> to vector<1x128xf32>
    %778 = vector.extract_strided_slice %759 {offsets = [0, 0, 2], sizes = [4, 4, 1], strides = [1, 1, 1]} : vector<4x4x3xf32> to vector<4x4x1xf32>
    %779 = vector.shape_cast %777 : vector<1x128xf32> to vector<1x1x128xf32>
    %780 = vector.broadcast %778 : vector<4x4x1xf32> to vector<4x4x128xf32>
    %781 = vector.broadcast %779 : vector<1x1x128xf32> to vector<4x4x128xf32>
    %782 = arith.mulf %780, %781 : vector<4x4x128xf32>
    %783 = arith.addf %775, %782 : vector<4x4x128xf32>
    %c2_467 = arith.constant 2 : index
    %c1_468 = arith.constant 1 : index
    %c0_469 = arith.constant 0 : index
    %c0_470 = arith.constant 0 : index
    %784 = vector.load %arg1[%c2_467, %c1_468, %c0_469, %c0_470] : memref<16x5x5x3xf32, #tpu.memory_space<vmem>>, vector<1x4x4x3xf32>
    %785 = vector.shape_cast %784 : vector<1x4x4x3xf32> to vector<4x4x3xf32>
    %c4_471 = arith.constant 4 : index
    %c2_472 = arith.constant 2 : index
    %c0_473 = arith.constant 0 : index
    %c0_474 = arith.constant 0 : index
    %786 = vector.load %arg2[%c4_471, %c2_472, %c0_473, %c0_474] : memref<7x7x3x128xf32, #tpu.memory_space<vmem>>, vector<1x1x1x128xf32>
    %787 = vector.shape_cast %786 : vector<1x1x1x128xf32> to vector<1x128xf32>
    %788 = vector.extract_strided_slice %785 {offsets = [0, 0, 0], sizes = [4, 4, 1], strides = [1, 1, 1]} : vector<4x4x3xf32> to vector<4x4x1xf32>
    %789 = vector.shape_cast %787 : vector<1x128xf32> to vector<1x1x128xf32>
    %790 = vector.broadcast %788 : vector<4x4x1xf32> to vector<4x4x128xf32>
    %791 = vector.broadcast %789 : vector<1x1x128xf32> to vector<4x4x128xf32>
    %792 = arith.mulf %790, %791 : vector<4x4x128xf32>
    %793 = arith.addf %783, %792 : vector<4x4x128xf32>
    %c4_475 = arith.constant 4 : index
    %c2_476 = arith.constant 2 : index
    %c1_477 = arith.constant 1 : index
    %c0_478 = arith.constant 0 : index
    %794 = vector.load %arg2[%c4_475, %c2_476, %c1_477, %c0_478] : memref<7x7x3x128xf32, #tpu.memory_space<vmem>>, vector<1x1x1x128xf32>
    %795 = vector.shape_cast %794 : vector<1x1x1x128xf32> to vector<1x128xf32>
    %796 = vector.extract_strided_slice %785 {offsets = [0, 0, 1], sizes = [4, 4, 1], strides = [1, 1, 1]} : vector<4x4x3xf32> to vector<4x4x1xf32>
    %797 = vector.shape_cast %795 : vector<1x128xf32> to vector<1x1x128xf32>
    %798 = vector.broadcast %796 : vector<4x4x1xf32> to vector<4x4x128xf32>
    %799 = vector.broadcast %797 : vector<1x1x128xf32> to vector<4x4x128xf32>
    %800 = arith.mulf %798, %799 : vector<4x4x128xf32>
    %801 = arith.addf %793, %800 : vector<4x4x128xf32>
    %c4_479 = arith.constant 4 : index
    %c2_480 = arith.constant 2 : index
    %c2_481 = arith.constant 2 : index
    %c0_482 = arith.constant 0 : index
    %802 = vector.load %arg2[%c4_479, %c2_480, %c2_481, %c0_482] : memref<7x7x3x128xf32, #tpu.memory_space<vmem>>, vector<1x1x1x128xf32>
    %803 = vector.shape_cast %802 : vector<1x1x1x128xf32> to vector<1x128xf32>
    %804 = vector.extract_strided_slice %785 {offsets = [0, 0, 2], sizes = [4, 4, 1], strides = [1, 1, 1]} : vector<4x4x3xf32> to vector<4x4x1xf32>
    %805 = vector.shape_cast %803 : vector<1x128xf32> to vector<1x1x128xf32>
    %806 = vector.broadcast %804 : vector<4x4x1xf32> to vector<4x4x128xf32>
    %807 = vector.broadcast %805 : vector<1x1x128xf32> to vector<4x4x128xf32>
    %808 = arith.mulf %806, %807 : vector<4x4x128xf32>
    %809 = arith.addf %801, %808 : vector<4x4x128xf32>
    %c3_483 = arith.constant 3 : index
    %c1_484 = arith.constant 1 : index
    %c0_485 = arith.constant 0 : index
    %c0_486 = arith.constant 0 : index
    %810 = vector.load %arg1[%c3_483, %c1_484, %c0_485, %c0_486] : memref<16x5x5x3xf32, #tpu.memory_space<vmem>>, vector<1x4x4x3xf32>
    %811 = vector.shape_cast %810 : vector<1x4x4x3xf32> to vector<4x4x3xf32>
    %c4_487 = arith.constant 4 : index
    %c3_488 = arith.constant 3 : index
    %c0_489 = arith.constant 0 : index
    %c0_490 = arith.constant 0 : index
    %812 = vector.load %arg2[%c4_487, %c3_488, %c0_489, %c0_490] : memref<7x7x3x128xf32, #tpu.memory_space<vmem>>, vector<1x1x1x128xf32>
    %813 = vector.shape_cast %812 : vector<1x1x1x128xf32> to vector<1x128xf32>
    %814 = vector.extract_strided_slice %811 {offsets = [0, 0, 0], sizes = [4, 4, 1], strides = [1, 1, 1]} : vector<4x4x3xf32> to vector<4x4x1xf32>
    %815 = vector.shape_cast %813 : vector<1x128xf32> to vector<1x1x128xf32>
    %816 = vector.broadcast %814 : vector<4x4x1xf32> to vector<4x4x128xf32>
    %817 = vector.broadcast %815 : vector<1x1x128xf32> to vector<4x4x128xf32>
    %818 = arith.mulf %816, %817 : vector<4x4x128xf32>
    %819 = arith.addf %809, %818 : vector<4x4x128xf32>
    %c4_491 = arith.constant 4 : index
    %c3_492 = arith.constant 3 : index
    %c1_493 = arith.constant 1 : index
    %c0_494 = arith.constant 0 : index
    %820 = vector.load %arg2[%c4_491, %c3_492, %c1_493, %c0_494] : memref<7x7x3x128xf32, #tpu.memory_space<vmem>>, vector<1x1x1x128xf32>
    %821 = vector.shape_cast %820 : vector<1x1x1x128xf32> to vector<1x128xf32>
    %822 = vector.extract_strided_slice %811 {offsets = [0, 0, 1], sizes = [4, 4, 1], strides = [1, 1, 1]} : vector<4x4x3xf32> to vector<4x4x1xf32>
    %823 = vector.shape_cast %821 : vector<1x128xf32> to vector<1x1x128xf32>
    %824 = vector.broadcast %822 : vector<4x4x1xf32> to vector<4x4x128xf32>
    %825 = vector.broadcast %823 : vector<1x1x128xf32> to vector<4x4x128xf32>
    %826 = arith.mulf %824, %825 : vector<4x4x128xf32>
    %827 = arith.addf %819, %826 : vector<4x4x128xf32>
    %c4_495 = arith.constant 4 : index
    %c3_496 = arith.constant 3 : index
    %c2_497 = arith.constant 2 : index
    %c0_498 = arith.constant 0 : index
    %828 = vector.load %arg2[%c4_495, %c3_496, %c2_497, %c0_498] : memref<7x7x3x128xf32, #tpu.memory_space<vmem>>, vector<1x1x1x128xf32>
    %829 = vector.shape_cast %828 : vector<1x1x1x128xf32> to vector<1x128xf32>
    %830 = vector.extract_strided_slice %811 {offsets = [0, 0, 2], sizes = [4, 4, 1], strides = [1, 1, 1]} : vector<4x4x3xf32> to vector<4x4x1xf32>
    %831 = vector.shape_cast %829 : vector<1x128xf32> to vector<1x1x128xf32>
    %832 = vector.broadcast %830 : vector<4x4x1xf32> to vector<4x4x128xf32>
    %833 = vector.broadcast %831 : vector<1x1x128xf32> to vector<4x4x128xf32>
    %834 = arith.mulf %832, %833 : vector<4x4x128xf32>
    %835 = arith.addf %827, %834 : vector<4x4x128xf32>
    %c0_499 = arith.constant 0 : index
    %c1_500 = arith.constant 1 : index
    %c1_501 = arith.constant 1 : index
    %c0_502 = arith.constant 0 : index
    %836 = vector.load %arg1[%c0_499, %c1_500, %c1_501, %c0_502] : memref<16x5x5x3xf32, #tpu.memory_space<vmem>>, vector<1x4x4x3xf32>
    %837 = vector.shape_cast %836 : vector<1x4x4x3xf32> to vector<4x4x3xf32>
    %c4_503 = arith.constant 4 : index
    %c4_504 = arith.constant 4 : index
    %c0_505 = arith.constant 0 : index
    %c0_506 = arith.constant 0 : index
    %838 = vector.load %arg2[%c4_503, %c4_504, %c0_505, %c0_506] : memref<7x7x3x128xf32, #tpu.memory_space<vmem>>, vector<1x1x1x128xf32>
    %839 = vector.shape_cast %838 : vector<1x1x1x128xf32> to vector<1x128xf32>
    %840 = vector.extract_strided_slice %837 {offsets = [0, 0, 0], sizes = [4, 4, 1], strides = [1, 1, 1]} : vector<4x4x3xf32> to vector<4x4x1xf32>
    %841 = vector.shape_cast %839 : vector<1x128xf32> to vector<1x1x128xf32>
    %842 = vector.broadcast %840 : vector<4x4x1xf32> to vector<4x4x128xf32>
    %843 = vector.broadcast %841 : vector<1x1x128xf32> to vector<4x4x128xf32>
    %844 = arith.mulf %842, %843 : vector<4x4x128xf32>
    %845 = arith.addf %835, %844 : vector<4x4x128xf32>
    %c4_507 = arith.constant 4 : index
    %c4_508 = arith.constant 4 : index
    %c1_509 = arith.constant 1 : index
    %c0_510 = arith.constant 0 : index
    %846 = vector.load %arg2[%c4_507, %c4_508, %c1_509, %c0_510] : memref<7x7x3x128xf32, #tpu.memory_space<vmem>>, vector<1x1x1x128xf32>
    %847 = vector.shape_cast %846 : vector<1x1x1x128xf32> to vector<1x128xf32>
    %848 = vector.extract_strided_slice %837 {offsets = [0, 0, 1], sizes = [4, 4, 1], strides = [1, 1, 1]} : vector<4x4x3xf32> to vector<4x4x1xf32>
    %849 = vector.shape_cast %847 : vector<1x128xf32> to vector<1x1x128xf32>
    %850 = vector.broadcast %848 : vector<4x4x1xf32> to vector<4x4x128xf32>
    %851 = vector.broadcast %849 : vector<1x1x128xf32> to vector<4x4x128xf32>
    %852 = arith.mulf %850, %851 : vector<4x4x128xf32>
    %853 = arith.addf %845, %852 : vector<4x4x128xf32>
    %c4_511 = arith.constant 4 : index
    %c4_512 = arith.constant 4 : index
    %c2_513 = arith.constant 2 : index
    %c0_514 = arith.constant 0 : index
    %854 = vector.load %arg2[%c4_511, %c4_512, %c2_513, %c0_514] : memref<7x7x3x128xf32, #tpu.memory_space<vmem>>, vector<1x1x1x128xf32>
    %855 = vector.shape_cast %854 : vector<1x1x1x128xf32> to vector<1x128xf32>
    %856 = vector.extract_strided_slice %837 {offsets = [0, 0, 2], sizes = [4, 4, 1], strides = [1, 1, 1]} : vector<4x4x3xf32> to vector<4x4x1xf32>
    %857 = vector.shape_cast %855 : vector<1x128xf32> to vector<1x1x128xf32>
    %858 = vector.broadcast %856 : vector<4x4x1xf32> to vector<4x4x128xf32>
    %859 = vector.broadcast %857 : vector<1x1x128xf32> to vector<4x4x128xf32>
    %860 = arith.mulf %858, %859 : vector<4x4x128xf32>
    %861 = arith.addf %853, %860 : vector<4x4x128xf32>
    %c1_515 = arith.constant 1 : index
    %c1_516 = arith.constant 1 : index
    %c1_517 = arith.constant 1 : index
    %c0_518 = arith.constant 0 : index
    %862 = vector.load %arg1[%c1_515, %c1_516, %c1_517, %c0_518] : memref<16x5x5x3xf32, #tpu.memory_space<vmem>>, vector<1x4x4x3xf32>
    %863 = vector.shape_cast %862 : vector<1x4x4x3xf32> to vector<4x4x3xf32>
    %c4_519 = arith.constant 4 : index
    %c5_520 = arith.constant 5 : index
    %c0_521 = arith.constant 0 : index
    %c0_522 = arith.constant 0 : index
    %864 = vector.load %arg2[%c4_519, %c5_520, %c0_521, %c0_522] : memref<7x7x3x128xf32, #tpu.memory_space<vmem>>, vector<1x1x1x128xf32>
    %865 = vector.shape_cast %864 : vector<1x1x1x128xf32> to vector<1x128xf32>
    %866 = vector.extract_strided_slice %863 {offsets = [0, 0, 0], sizes = [4, 4, 1], strides = [1, 1, 1]} : vector<4x4x3xf32> to vector<4x4x1xf32>
    %867 = vector.shape_cast %865 : vector<1x128xf32> to vector<1x1x128xf32>
    %868 = vector.broadcast %866 : vector<4x4x1xf32> to vector<4x4x128xf32>
    %869 = vector.broadcast %867 : vector<1x1x128xf32> to vector<4x4x128xf32>
    %870 = arith.mulf %868, %869 : vector<4x4x128xf32>
    %871 = arith.addf %861, %870 : vector<4x4x128xf32>
    %c4_523 = arith.constant 4 : index
    %c5_524 = arith.constant 5 : index
    %c1_525 = arith.constant 1 : index
    %c0_526 = arith.constant 0 : index
    %872 = vector.load %arg2[%c4_523, %c5_524, %c1_525, %c0_526] : memref<7x7x3x128xf32, #tpu.memory_space<vmem>>, vector<1x1x1x128xf32>
    %873 = vector.shape_cast %872 : vector<1x1x1x128xf32> to vector<1x128xf32>
    %874 = vector.extract_strided_slice %863 {offsets = [0, 0, 1], sizes = [4, 4, 1], strides = [1, 1, 1]} : vector<4x4x3xf32> to vector<4x4x1xf32>
    %875 = vector.shape_cast %873 : vector<1x128xf32> to vector<1x1x128xf32>
    %876 = vector.broadcast %874 : vector<4x4x1xf32> to vector<4x4x128xf32>
    %877 = vector.broadcast %875 : vector<1x1x128xf32> to vector<4x4x128xf32>
    %878 = arith.mulf %876, %877 : vector<4x4x128xf32>
    %879 = arith.addf %871, %878 : vector<4x4x128xf32>
    %c4_527 = arith.constant 4 : index
    %c5_528 = arith.constant 5 : index
    %c2_529 = arith.constant 2 : index
    %c0_530 = arith.constant 0 : index
    %880 = vector.load %arg2[%c4_527, %c5_528, %c2_529, %c0_530] : memref<7x7x3x128xf32, #tpu.memory_space<vmem>>, vector<1x1x1x128xf32>
    %881 = vector.shape_cast %880 : vector<1x1x1x128xf32> to vector<1x128xf32>
    %882 = vector.extract_strided_slice %863 {offsets = [0, 0, 2], sizes = [4, 4, 1], strides = [1, 1, 1]} : vector<4x4x3xf32> to vector<4x4x1xf32>
    %883 = vector.shape_cast %881 : vector<1x128xf32> to vector<1x1x128xf32>
    %884 = vector.broadcast %882 : vector<4x4x1xf32> to vector<4x4x128xf32>
    %885 = vector.broadcast %883 : vector<1x1x128xf32> to vector<4x4x128xf32>
    %886 = arith.mulf %884, %885 : vector<4x4x128xf32>
    %887 = arith.addf %879, %886 : vector<4x4x128xf32>
    %c2_531 = arith.constant 2 : index
    %c1_532 = arith.constant 1 : index
    %c1_533 = arith.constant 1 : index
    %c0_534 = arith.constant 0 : index
    %888 = vector.load %arg1[%c2_531, %c1_532, %c1_533, %c0_534] : memref<16x5x5x3xf32, #tpu.memory_space<vmem>>, vector<1x4x4x3xf32>
    %889 = vector.shape_cast %888 : vector<1x4x4x3xf32> to vector<4x4x3xf32>
    %c4_535 = arith.constant 4 : index
    %c6_536 = arith.constant 6 : index
    %c0_537 = arith.constant 0 : index
    %c0_538 = arith.constant 0 : index
    %890 = vector.load %arg2[%c4_535, %c6_536, %c0_537, %c0_538] : memref<7x7x3x128xf32, #tpu.memory_space<vmem>>, vector<1x1x1x128xf32>
    %891 = vector.shape_cast %890 : vector<1x1x1x128xf32> to vector<1x128xf32>
    %892 = vector.extract_strided_slice %889 {offsets = [0, 0, 0], sizes = [4, 4, 1], strides = [1, 1, 1]} : vector<4x4x3xf32> to vector<4x4x1xf32>
    %893 = vector.shape_cast %891 : vector<1x128xf32> to vector<1x1x128xf32>
    %894 = vector.broadcast %892 : vector<4x4x1xf32> to vector<4x4x128xf32>
    %895 = vector.broadcast %893 : vector<1x1x128xf32> to vector<4x4x128xf32>
    %896 = arith.mulf %894, %895 : vector<4x4x128xf32>
    %897 = arith.addf %887, %896 : vector<4x4x128xf32>
    %c4_539 = arith.constant 4 : index
    %c6_540 = arith.constant 6 : index
    %c1_541 = arith.constant 1 : index
    %c0_542 = arith.constant 0 : index
    %898 = vector.load %arg2[%c4_539, %c6_540, %c1_541, %c0_542] : memref<7x7x3x128xf32, #tpu.memory_space<vmem>>, vector<1x1x1x128xf32>
    %899 = vector.shape_cast %898 : vector<1x1x1x128xf32> to vector<1x128xf32>
    %900 = vector.extract_strided_slice %889 {offsets = [0, 0, 1], sizes = [4, 4, 1], strides = [1, 1, 1]} : vector<4x4x3xf32> to vector<4x4x1xf32>
    %901 = vector.shape_cast %899 : vector<1x128xf32> to vector<1x1x128xf32>
    %902 = vector.broadcast %900 : vector<4x4x1xf32> to vector<4x4x128xf32>
    %903 = vector.broadcast %901 : vector<1x1x128xf32> to vector<4x4x128xf32>
    %904 = arith.mulf %902, %903 : vector<4x4x128xf32>
    %905 = arith.addf %897, %904 : vector<4x4x128xf32>
    %c4_543 = arith.constant 4 : index
    %c6_544 = arith.constant 6 : index
    %c2_545 = arith.constant 2 : index
    %c0_546 = arith.constant 0 : index
    %906 = vector.load %arg2[%c4_543, %c6_544, %c2_545, %c0_546] : memref<7x7x3x128xf32, #tpu.memory_space<vmem>>, vector<1x1x1x128xf32>
    %907 = vector.shape_cast %906 : vector<1x1x1x128xf32> to vector<1x128xf32>
    %908 = vector.extract_strided_slice %889 {offsets = [0, 0, 2], sizes = [4, 4, 1], strides = [1, 1, 1]} : vector<4x4x3xf32> to vector<4x4x1xf32>
    %909 = vector.shape_cast %907 : vector<1x128xf32> to vector<1x1x128xf32>
    %910 = vector.broadcast %908 : vector<4x4x1xf32> to vector<4x4x128xf32>
    %911 = vector.broadcast %909 : vector<1x1x128xf32> to vector<4x4x128xf32>
    %912 = arith.mulf %910, %911 : vector<4x4x128xf32>
    %913 = arith.addf %905, %912 : vector<4x4x128xf32>
    %c4_547 = arith.constant 4 : index
    %c1_548 = arith.constant 1 : index
    %c0_549 = arith.constant 0 : index
    %c0_550 = arith.constant 0 : index
    %914 = vector.load %arg1[%c4_547, %c1_548, %c0_549, %c0_550] : memref<16x5x5x3xf32, #tpu.memory_space<vmem>>, vector<1x4x4x3xf32>
    %915 = vector.shape_cast %914 : vector<1x4x4x3xf32> to vector<4x4x3xf32>
    %c5_551 = arith.constant 5 : index
    %c0_552 = arith.constant 0 : index
    %c0_553 = arith.constant 0 : index
    %c0_554 = arith.constant 0 : index
    %916 = vector.load %arg2[%c5_551, %c0_552, %c0_553, %c0_554] : memref<7x7x3x128xf32, #tpu.memory_space<vmem>>, vector<1x1x1x128xf32>
    %917 = vector.shape_cast %916 : vector<1x1x1x128xf32> to vector<1x128xf32>
    %918 = vector.extract_strided_slice %915 {offsets = [0, 0, 0], sizes = [4, 4, 1], strides = [1, 1, 1]} : vector<4x4x3xf32> to vector<4x4x1xf32>
    %919 = vector.shape_cast %917 : vector<1x128xf32> to vector<1x1x128xf32>
    %920 = vector.broadcast %918 : vector<4x4x1xf32> to vector<4x4x128xf32>
    %921 = vector.broadcast %919 : vector<1x1x128xf32> to vector<4x4x128xf32>
    %922 = arith.mulf %920, %921 : vector<4x4x128xf32>
    %923 = arith.addf %913, %922 : vector<4x4x128xf32>
    %c5_555 = arith.constant 5 : index
    %c0_556 = arith.constant 0 : index
    %c1_557 = arith.constant 1 : index
    %c0_558 = arith.constant 0 : index
    %924 = vector.load %arg2[%c5_555, %c0_556, %c1_557, %c0_558] : memref<7x7x3x128xf32, #tpu.memory_space<vmem>>, vector<1x1x1x128xf32>
    %925 = vector.shape_cast %924 : vector<1x1x1x128xf32> to vector<1x128xf32>
    %926 = vector.extract_strided_slice %915 {offsets = [0, 0, 1], sizes = [4, 4, 1], strides = [1, 1, 1]} : vector<4x4x3xf32> to vector<4x4x1xf32>
    %927 = vector.shape_cast %925 : vector<1x128xf32> to vector<1x1x128xf32>
    %928 = vector.broadcast %926 : vector<4x4x1xf32> to vector<4x4x128xf32>
    %929 = vector.broadcast %927 : vector<1x1x128xf32> to vector<4x4x128xf32>
    %930 = arith.mulf %928, %929 : vector<4x4x128xf32>
    %931 = arith.addf %923, %930 : vector<4x4x128xf32>
    %c5_559 = arith.constant 5 : index
    %c0_560 = arith.constant 0 : index
    %c2_561 = arith.constant 2 : index
    %c0_562 = arith.constant 0 : index
    %932 = vector.load %arg2[%c5_559, %c0_560, %c2_561, %c0_562] : memref<7x7x3x128xf32, #tpu.memory_space<vmem>>, vector<1x1x1x128xf32>
    %933 = vector.shape_cast %932 : vector<1x1x1x128xf32> to vector<1x128xf32>
    %934 = vector.extract_strided_slice %915 {offsets = [0, 0, 2], sizes = [4, 4, 1], strides = [1, 1, 1]} : vector<4x4x3xf32> to vector<4x4x1xf32>
    %935 = vector.shape_cast %933 : vector<1x128xf32> to vector<1x1x128xf32>
    %936 = vector.broadcast %934 : vector<4x4x1xf32> to vector<4x4x128xf32>
    %937 = vector.broadcast %935 : vector<1x1x128xf32> to vector<4x4x128xf32>
    %938 = arith.mulf %936, %937 : vector<4x4x128xf32>
    %939 = arith.addf %931, %938 : vector<4x4x128xf32>
    %c5_563 = arith.constant 5 : index
    %c1_564 = arith.constant 1 : index
    %c0_565 = arith.constant 0 : index
    %c0_566 = arith.constant 0 : index
    %940 = vector.load %arg1[%c5_563, %c1_564, %c0_565, %c0_566] : memref<16x5x5x3xf32, #tpu.memory_space<vmem>>, vector<1x4x4x3xf32>
    %941 = vector.shape_cast %940 : vector<1x4x4x3xf32> to vector<4x4x3xf32>
    %c5_567 = arith.constant 5 : index
    %c1_568 = arith.constant 1 : index
    %c0_569 = arith.constant 0 : index
    %c0_570 = arith.constant 0 : index
    %942 = vector.load %arg2[%c5_567, %c1_568, %c0_569, %c0_570] : memref<7x7x3x128xf32, #tpu.memory_space<vmem>>, vector<1x1x1x128xf32>
    %943 = vector.shape_cast %942 : vector<1x1x1x128xf32> to vector<1x128xf32>
    %944 = vector.extract_strided_slice %941 {offsets = [0, 0, 0], sizes = [4, 4, 1], strides = [1, 1, 1]} : vector<4x4x3xf32> to vector<4x4x1xf32>
    %945 = vector.shape_cast %943 : vector<1x128xf32> to vector<1x1x128xf32>
    %946 = vector.broadcast %944 : vector<4x4x1xf32> to vector<4x4x128xf32>
    %947 = vector.broadcast %945 : vector<1x1x128xf32> to vector<4x4x128xf32>
    %948 = arith.mulf %946, %947 : vector<4x4x128xf32>
    %949 = arith.addf %939, %948 : vector<4x4x128xf32>
    %c5_571 = arith.constant 5 : index
    %c1_572 = arith.constant 1 : index
    %c1_573 = arith.constant 1 : index
    %c0_574 = arith.constant 0 : index
    %950 = vector.load %arg2[%c5_571, %c1_572, %c1_573, %c0_574] : memref<7x7x3x128xf32, #tpu.memory_space<vmem>>, vector<1x1x1x128xf32>
    %951 = vector.shape_cast %950 : vector<1x1x1x128xf32> to vector<1x128xf32>
    %952 = vector.extract_strided_slice %941 {offsets = [0, 0, 1], sizes = [4, 4, 1], strides = [1, 1, 1]} : vector<4x4x3xf32> to vector<4x4x1xf32>
    %953 = vector.shape_cast %951 : vector<1x128xf32> to vector<1x1x128xf32>
    %954 = vector.broadcast %952 : vector<4x4x1xf32> to vector<4x4x128xf32>
    %955 = vector.broadcast %953 : vector<1x1x128xf32> to vector<4x4x128xf32>
    %956 = arith.mulf %954, %955 : vector<4x4x128xf32>
    %957 = arith.addf %949, %956 : vector<4x4x128xf32>
    %c5_575 = arith.constant 5 : index
    %c1_576 = arith.constant 1 : index
    %c2_577 = arith.constant 2 : index
    %c0_578 = arith.constant 0 : index
    %958 = vector.load %arg2[%c5_575, %c1_576, %c2_577, %c0_578] : memref<7x7x3x128xf32, #tpu.memory_space<vmem>>, vector<1x1x1x128xf32>
    %959 = vector.shape_cast %958 : vector<1x1x1x128xf32> to vector<1x128xf32>
    %960 = vector.extract_strided_slice %941 {offsets = [0, 0, 2], sizes = [4, 4, 1], strides = [1, 1, 1]} : vector<4x4x3xf32> to vector<4x4x1xf32>
    %961 = vector.shape_cast %959 : vector<1x128xf32> to vector<1x1x128xf32>
    %962 = vector.broadcast %960 : vector<4x4x1xf32> to vector<4x4x128xf32>
    %963 = vector.broadcast %961 : vector<1x1x128xf32> to vector<4x4x128xf32>
    %964 = arith.mulf %962, %963 : vector<4x4x128xf32>
    %965 = arith.addf %957, %964 : vector<4x4x128xf32>
    %c6_579 = arith.constant 6 : index
    %c1_580 = arith.constant 1 : index
    %c0_581 = arith.constant 0 : index
    %c0_582 = arith.constant 0 : index
    %966 = vector.load %arg1[%c6_579, %c1_580, %c0_581, %c0_582] : memref<16x5x5x3xf32, #tpu.memory_space<vmem>>, vector<1x4x4x3xf32>
    %967 = vector.shape_cast %966 : vector<1x4x4x3xf32> to vector<4x4x3xf32>
    %c5_583 = arith.constant 5 : index
    %c2_584 = arith.constant 2 : index
    %c0_585 = arith.constant 0 : index
    %c0_586 = arith.constant 0 : index
    %968 = vector.load %arg2[%c5_583, %c2_584, %c0_585, %c0_586] : memref<7x7x3x128xf32, #tpu.memory_space<vmem>>, vector<1x1x1x128xf32>
    %969 = vector.shape_cast %968 : vector<1x1x1x128xf32> to vector<1x128xf32>
    %970 = vector.extract_strided_slice %967 {offsets = [0, 0, 0], sizes = [4, 4, 1], strides = [1, 1, 1]} : vector<4x4x3xf32> to vector<4x4x1xf32>
    %971 = vector.shape_cast %969 : vector<1x128xf32> to vector<1x1x128xf32>
    %972 = vector.broadcast %970 : vector<4x4x1xf32> to vector<4x4x128xf32>
    %973 = vector.broadcast %971 : vector<1x1x128xf32> to vector<4x4x128xf32>
    %974 = arith.mulf %972, %973 : vector<4x4x128xf32>
    %975 = arith.addf %965, %974 : vector<4x4x128xf32>
    %c5_587 = arith.constant 5 : index
    %c2_588 = arith.constant 2 : index
    %c1_589 = arith.constant 1 : index
    %c0_590 = arith.constant 0 : index
    %976 = vector.load %arg2[%c5_587, %c2_588, %c1_589, %c0_590] : memref<7x7x3x128xf32, #tpu.memory_space<vmem>>, vector<1x1x1x128xf32>
    %977 = vector.shape_cast %976 : vector<1x1x1x128xf32> to vector<1x128xf32>
    %978 = vector.extract_strided_slice %967 {offsets = [0, 0, 1], sizes = [4, 4, 1], strides = [1, 1, 1]} : vector<4x4x3xf32> to vector<4x4x1xf32>
    %979 = vector.shape_cast %977 : vector<1x128xf32> to vector<1x1x128xf32>
    %980 = vector.broadcast %978 : vector<4x4x1xf32> to vector<4x4x128xf32>
    %981 = vector.broadcast %979 : vector<1x1x128xf32> to vector<4x4x128xf32>
    %982 = arith.mulf %980, %981 : vector<4x4x128xf32>
    %983 = arith.addf %975, %982 : vector<4x4x128xf32>
    %c5_591 = arith.constant 5 : index
    %c2_592 = arith.constant 2 : index
    %c2_593 = arith.constant 2 : index
    %c0_594 = arith.constant 0 : index
    %984 = vector.load %arg2[%c5_591, %c2_592, %c2_593, %c0_594] : memref<7x7x3x128xf32, #tpu.memory_space<vmem>>, vector<1x1x1x128xf32>
    %985 = vector.shape_cast %984 : vector<1x1x1x128xf32> to vector<1x128xf32>
    %986 = vector.extract_strided_slice %967 {offsets = [0, 0, 2], sizes = [4, 4, 1], strides = [1, 1, 1]} : vector<4x4x3xf32> to vector<4x4x1xf32>
    %987 = vector.shape_cast %985 : vector<1x128xf32> to vector<1x1x128xf32>
    %988 = vector.broadcast %986 : vector<4x4x1xf32> to vector<4x4x128xf32>
    %989 = vector.broadcast %987 : vector<1x1x128xf32> to vector<4x4x128xf32>
    %990 = arith.mulf %988, %989 : vector<4x4x128xf32>
    %991 = arith.addf %983, %990 : vector<4x4x128xf32>
    %c7_595 = arith.constant 7 : index
    %c1_596 = arith.constant 1 : index
    %c0_597 = arith.constant 0 : index
    %c0_598 = arith.constant 0 : index
    %992 = vector.load %arg1[%c7_595, %c1_596, %c0_597, %c0_598] : memref<16x5x5x3xf32, #tpu.memory_space<vmem>>, vector<1x4x4x3xf32>
    %993 = vector.shape_cast %992 : vector<1x4x4x3xf32> to vector<4x4x3xf32>
    %c5_599 = arith.constant 5 : index
    %c3_600 = arith.constant 3 : index
    %c0_601 = arith.constant 0 : index
    %c0_602 = arith.constant 0 : index
    %994 = vector.load %arg2[%c5_599, %c3_600, %c0_601, %c0_602] : memref<7x7x3x128xf32, #tpu.memory_space<vmem>>, vector<1x1x1x128xf32>
    %995 = vector.shape_cast %994 : vector<1x1x1x128xf32> to vector<1x128xf32>
    %996 = vector.extract_strided_slice %993 {offsets = [0, 0, 0], sizes = [4, 4, 1], strides = [1, 1, 1]} : vector<4x4x3xf32> to vector<4x4x1xf32>
    %997 = vector.shape_cast %995 : vector<1x128xf32> to vector<1x1x128xf32>
    %998 = vector.broadcast %996 : vector<4x4x1xf32> to vector<4x4x128xf32>
    %999 = vector.broadcast %997 : vector<1x1x128xf32> to vector<4x4x128xf32>
    %1000 = arith.mulf %998, %999 : vector<4x4x128xf32>
    %1001 = arith.addf %991, %1000 : vector<4x4x128xf32>
    %c5_603 = arith.constant 5 : index
    %c3_604 = arith.constant 3 : index
    %c1_605 = arith.constant 1 : index
    %c0_606 = arith.constant 0 : index
    %1002 = vector.load %arg2[%c5_603, %c3_604, %c1_605, %c0_606] : memref<7x7x3x128xf32, #tpu.memory_space<vmem>>, vector<1x1x1x128xf32>
    %1003 = vector.shape_cast %1002 : vector<1x1x1x128xf32> to vector<1x128xf32>
    %1004 = vector.extract_strided_slice %993 {offsets = [0, 0, 1], sizes = [4, 4, 1], strides = [1, 1, 1]} : vector<4x4x3xf32> to vector<4x4x1xf32>
    %1005 = vector.shape_cast %1003 : vector<1x128xf32> to vector<1x1x128xf32>
    %1006 = vector.broadcast %1004 : vector<4x4x1xf32> to vector<4x4x128xf32>
    %1007 = vector.broadcast %1005 : vector<1x1x128xf32> to vector<4x4x128xf32>
    %1008 = arith.mulf %1006, %1007 : vector<4x4x128xf32>
    %1009 = arith.addf %1001, %1008 : vector<4x4x128xf32>
    %c5_607 = arith.constant 5 : index
    %c3_608 = arith.constant 3 : index
    %c2_609 = arith.constant 2 : index
    %c0_610 = arith.constant 0 : index
    %1010 = vector.load %arg2[%c5_607, %c3_608, %c2_609, %c0_610] : memref<7x7x3x128xf32, #tpu.memory_space<vmem>>, vector<1x1x1x128xf32>
    %1011 = vector.shape_cast %1010 : vector<1x1x1x128xf32> to vector<1x128xf32>
    %1012 = vector.extract_strided_slice %993 {offsets = [0, 0, 2], sizes = [4, 4, 1], strides = [1, 1, 1]} : vector<4x4x3xf32> to vector<4x4x1xf32>
    %1013 = vector.shape_cast %1011 : vector<1x128xf32> to vector<1x1x128xf32>
    %1014 = vector.broadcast %1012 : vector<4x4x1xf32> to vector<4x4x128xf32>
    %1015 = vector.broadcast %1013 : vector<1x1x128xf32> to vector<4x4x128xf32>
    %1016 = arith.mulf %1014, %1015 : vector<4x4x128xf32>
    %1017 = arith.addf %1009, %1016 : vector<4x4x128xf32>
    %c4_611 = arith.constant 4 : index
    %c1_612 = arith.constant 1 : index
    %c1_613 = arith.constant 1 : index
    %c0_614 = arith.constant 0 : index
    %1018 = vector.load %arg1[%c4_611, %c1_612, %c1_613, %c0_614] : memref<16x5x5x3xf32, #tpu.memory_space<vmem>>, vector<1x4x4x3xf32>
    %1019 = vector.shape_cast %1018 : vector<1x4x4x3xf32> to vector<4x4x3xf32>
    %c5_615 = arith.constant 5 : index
    %c4_616 = arith.constant 4 : index
    %c0_617 = arith.constant 0 : index
    %c0_618 = arith.constant 0 : index
    %1020 = vector.load %arg2[%c5_615, %c4_616, %c0_617, %c0_618] : memref<7x7x3x128xf32, #tpu.memory_space<vmem>>, vector<1x1x1x128xf32>
    %1021 = vector.shape_cast %1020 : vector<1x1x1x128xf32> to vector<1x128xf32>
    %1022 = vector.extract_strided_slice %1019 {offsets = [0, 0, 0], sizes = [4, 4, 1], strides = [1, 1, 1]} : vector<4x4x3xf32> to vector<4x4x1xf32>
    %1023 = vector.shape_cast %1021 : vector<1x128xf32> to vector<1x1x128xf32>
    %1024 = vector.broadcast %1022 : vector<4x4x1xf32> to vector<4x4x128xf32>
    %1025 = vector.broadcast %1023 : vector<1x1x128xf32> to vector<4x4x128xf32>
    %1026 = arith.mulf %1024, %1025 : vector<4x4x128xf32>
    %1027 = arith.addf %1017, %1026 : vector<4x4x128xf32>
    %c5_619 = arith.constant 5 : index
    %c4_620 = arith.constant 4 : index
    %c1_621 = arith.constant 1 : index
    %c0_622 = arith.constant 0 : index
    %1028 = vector.load %arg2[%c5_619, %c4_620, %c1_621, %c0_622] : memref<7x7x3x128xf32, #tpu.memory_space<vmem>>, vector<1x1x1x128xf32>
    %1029 = vector.shape_cast %1028 : vector<1x1x1x128xf32> to vector<1x128xf32>
    %1030 = vector.extract_strided_slice %1019 {offsets = [0, 0, 1], sizes = [4, 4, 1], strides = [1, 1, 1]} : vector<4x4x3xf32> to vector<4x4x1xf32>
    %1031 = vector.shape_cast %1029 : vector<1x128xf32> to vector<1x1x128xf32>
    %1032 = vector.broadcast %1030 : vector<4x4x1xf32> to vector<4x4x128xf32>
    %1033 = vector.broadcast %1031 : vector<1x1x128xf32> to vector<4x4x128xf32>
    %1034 = arith.mulf %1032, %1033 : vector<4x4x128xf32>
    %1035 = arith.addf %1027, %1034 : vector<4x4x128xf32>
    %c5_623 = arith.constant 5 : index
    %c4_624 = arith.constant 4 : index
    %c2_625 = arith.constant 2 : index
    %c0_626 = arith.constant 0 : index
    %1036 = vector.load %arg2[%c5_623, %c4_624, %c2_625, %c0_626] : memref<7x7x3x128xf32, #tpu.memory_space<vmem>>, vector<1x1x1x128xf32>
    %1037 = vector.shape_cast %1036 : vector<1x1x1x128xf32> to vector<1x128xf32>
    %1038 = vector.extract_strided_slice %1019 {offsets = [0, 0, 2], sizes = [4, 4, 1], strides = [1, 1, 1]} : vector<4x4x3xf32> to vector<4x4x1xf32>
    %1039 = vector.shape_cast %1037 : vector<1x128xf32> to vector<1x1x128xf32>
    %1040 = vector.broadcast %1038 : vector<4x4x1xf32> to vector<4x4x128xf32>
    %1041 = vector.broadcast %1039 : vector<1x1x128xf32> to vector<4x4x128xf32>
    %1042 = arith.mulf %1040, %1041 : vector<4x4x128xf32>
    %1043 = arith.addf %1035, %1042 : vector<4x4x128xf32>
    %c5_627 = arith.constant 5 : index
    %c1_628 = arith.constant 1 : index
    %c1_629 = arith.constant 1 : index
    %c0_630 = arith.constant 0 : index
    %1044 = vector.load %arg1[%c5_627, %c1_628, %c1_629, %c0_630] : memref<16x5x5x3xf32, #tpu.memory_space<vmem>>, vector<1x4x4x3xf32>
    %1045 = vector.shape_cast %1044 : vector<1x4x4x3xf32> to vector<4x4x3xf32>
    %c5_631 = arith.constant 5 : index
    %c5_632 = arith.constant 5 : index
    %c0_633 = arith.constant 0 : index
    %c0_634 = arith.constant 0 : index
    %1046 = vector.load %arg2[%c5_631, %c5_632, %c0_633, %c0_634] : memref<7x7x3x128xf32, #tpu.memory_space<vmem>>, vector<1x1x1x128xf32>
    %1047 = vector.shape_cast %1046 : vector<1x1x1x128xf32> to vector<1x128xf32>
    %1048 = vector.extract_strided_slice %1045 {offsets = [0, 0, 0], sizes = [4, 4, 1], strides = [1, 1, 1]} : vector<4x4x3xf32> to vector<4x4x1xf32>
    %1049 = vector.shape_cast %1047 : vector<1x128xf32> to vector<1x1x128xf32>
    %1050 = vector.broadcast %1048 : vector<4x4x1xf32> to vector<4x4x128xf32>
    %1051 = vector.broadcast %1049 : vector<1x1x128xf32> to vector<4x4x128xf32>
    %1052 = arith.mulf %1050, %1051 : vector<4x4x128xf32>
    %1053 = arith.addf %1043, %1052 : vector<4x4x128xf32>
    %c5_635 = arith.constant 5 : index
    %c5_636 = arith.constant 5 : index
    %c1_637 = arith.constant 1 : index
    %c0_638 = arith.constant 0 : index
    %1054 = vector.load %arg2[%c5_635, %c5_636, %c1_637, %c0_638] : memref<7x7x3x128xf32, #tpu.memory_space<vmem>>, vector<1x1x1x128xf32>
    %1055 = vector.shape_cast %1054 : vector<1x1x1x128xf32> to vector<1x128xf32>
    %1056 = vector.extract_strided_slice %1045 {offsets = [0, 0, 1], sizes = [4, 4, 1], strides = [1, 1, 1]} : vector<4x4x3xf32> to vector<4x4x1xf32>
    %1057 = vector.shape_cast %1055 : vector<1x128xf32> to vector<1x1x128xf32>
    %1058 = vector.broadcast %1056 : vector<4x4x1xf32> to vector<4x4x128xf32>
    %1059 = vector.broadcast %1057 : vector<1x1x128xf32> to vector<4x4x128xf32>
    %1060 = arith.mulf %1058, %1059 : vector<4x4x128xf32>
    %1061 = arith.addf %1053, %1060 : vector<4x4x128xf32>
    %c5_639 = arith.constant 5 : index
    %c5_640 = arith.constant 5 : index
    %c2_641 = arith.constant 2 : index
    %c0_642 = arith.constant 0 : index
    %1062 = vector.load %arg2[%c5_639, %c5_640, %c2_641, %c0_642] : memref<7x7x3x128xf32, #tpu.memory_space<vmem>>, vector<1x1x1x128xf32>
    %1063 = vector.shape_cast %1062 : vector<1x1x1x128xf32> to vector<1x128xf32>
    %1064 = vector.extract_strided_slice %1045 {offsets = [0, 0, 2], sizes = [4, 4, 1], strides = [1, 1, 1]} : vector<4x4x3xf32> to vector<4x4x1xf32>
    %1065 = vector.shape_cast %1063 : vector<1x128xf32> to vector<1x1x128xf32>
    %1066 = vector.broadcast %1064 : vector<4x4x1xf32> to vector<4x4x128xf32>
    %1067 = vector.broadcast %1065 : vector<1x1x128xf32> to vector<4x4x128xf32>
    %1068 = arith.mulf %1066, %1067 : vector<4x4x128xf32>
    %1069 = arith.addf %1061, %1068 : vector<4x4x128xf32>
    %c6_643 = arith.constant 6 : index
    %c1_644 = arith.constant 1 : index
    %c1_645 = arith.constant 1 : index
    %c0_646 = arith.constant 0 : index
    %1070 = vector.load %arg1[%c6_643, %c1_644, %c1_645, %c0_646] : memref<16x5x5x3xf32, #tpu.memory_space<vmem>>, vector<1x4x4x3xf32>
    %1071 = vector.shape_cast %1070 : vector<1x4x4x3xf32> to vector<4x4x3xf32>
    %c5_647 = arith.constant 5 : index
    %c6_648 = arith.constant 6 : index
    %c0_649 = arith.constant 0 : index
    %c0_650 = arith.constant 0 : index
    %1072 = vector.load %arg2[%c5_647, %c6_648, %c0_649, %c0_650] : memref<7x7x3x128xf32, #tpu.memory_space<vmem>>, vector<1x1x1x128xf32>
    %1073 = vector.shape_cast %1072 : vector<1x1x1x128xf32> to vector<1x128xf32>
    %1074 = vector.extract_strided_slice %1071 {offsets = [0, 0, 0], sizes = [4, 4, 1], strides = [1, 1, 1]} : vector<4x4x3xf32> to vector<4x4x1xf32>
    %1075 = vector.shape_cast %1073 : vector<1x128xf32> to vector<1x1x128xf32>
    %1076 = vector.broadcast %1074 : vector<4x4x1xf32> to vector<4x4x128xf32>
    %1077 = vector.broadcast %1075 : vector<1x1x128xf32> to vector<4x4x128xf32>
    %1078 = arith.mulf %1076, %1077 : vector<4x4x128xf32>
    %1079 = arith.addf %1069, %1078 : vector<4x4x128xf32>
    %c5_651 = arith.constant 5 : index
    %c6_652 = arith.constant 6 : index
    %c1_653 = arith.constant 1 : index
    %c0_654 = arith.constant 0 : index
    %1080 = vector.load %arg2[%c5_651, %c6_652, %c1_653, %c0_654] : memref<7x7x3x128xf32, #tpu.memory_space<vmem>>, vector<1x1x1x128xf32>
    %1081 = vector.shape_cast %1080 : vector<1x1x1x128xf32> to vector<1x128xf32>
    %1082 = vector.extract_strided_slice %1071 {offsets = [0, 0, 1], sizes = [4, 4, 1], strides = [1, 1, 1]} : vector<4x4x3xf32> to vector<4x4x1xf32>
    %1083 = vector.shape_cast %1081 : vector<1x128xf32> to vector<1x1x128xf32>
    %1084 = vector.broadcast %1082 : vector<4x4x1xf32> to vector<4x4x128xf32>
    %1085 = vector.broadcast %1083 : vector<1x1x128xf32> to vector<4x4x128xf32>
    %1086 = arith.mulf %1084, %1085 : vector<4x4x128xf32>
    %1087 = arith.addf %1079, %1086 : vector<4x4x128xf32>
    %c5_655 = arith.constant 5 : index
    %c6_656 = arith.constant 6 : index
    %c2_657 = arith.constant 2 : index
    %c0_658 = arith.constant 0 : index
    %1088 = vector.load %arg2[%c5_655, %c6_656, %c2_657, %c0_658] : memref<7x7x3x128xf32, #tpu.memory_space<vmem>>, vector<1x1x1x128xf32>
    %1089 = vector.shape_cast %1088 : vector<1x1x1x128xf32> to vector<1x128xf32>
    %1090 = vector.extract_strided_slice %1071 {offsets = [0, 0, 2], sizes = [4, 4, 1], strides = [1, 1, 1]} : vector<4x4x3xf32> to vector<4x4x1xf32>
    %1091 = vector.shape_cast %1089 : vector<1x128xf32> to vector<1x1x128xf32>
    %1092 = vector.broadcast %1090 : vector<4x4x1xf32> to vector<4x4x128xf32>
    %1093 = vector.broadcast %1091 : vector<1x1x128xf32> to vector<4x4x128xf32>
    %1094 = arith.mulf %1092, %1093 : vector<4x4x128xf32>
    %1095 = arith.addf %1087, %1094 : vector<4x4x128xf32>
    %c8_659 = arith.constant 8 : index
    %c1_660 = arith.constant 1 : index
    %c0_661 = arith.constant 0 : index
    %c0_662 = arith.constant 0 : index
    %1096 = vector.load %arg1[%c8_659, %c1_660, %c0_661, %c0_662] : memref<16x5x5x3xf32, #tpu.memory_space<vmem>>, vector<1x4x4x3xf32>
    %1097 = vector.shape_cast %1096 : vector<1x4x4x3xf32> to vector<4x4x3xf32>
    %c6_663 = arith.constant 6 : index
    %c0_664 = arith.constant 0 : index
    %c0_665 = arith.constant 0 : index
    %c0_666 = arith.constant 0 : index
    %1098 = vector.load %arg2[%c6_663, %c0_664, %c0_665, %c0_666] : memref<7x7x3x128xf32, #tpu.memory_space<vmem>>, vector<1x1x1x128xf32>
    %1099 = vector.shape_cast %1098 : vector<1x1x1x128xf32> to vector<1x128xf32>
    %1100 = vector.extract_strided_slice %1097 {offsets = [0, 0, 0], sizes = [4, 4, 1], strides = [1, 1, 1]} : vector<4x4x3xf32> to vector<4x4x1xf32>
    %1101 = vector.shape_cast %1099 : vector<1x128xf32> to vector<1x1x128xf32>
    %1102 = vector.broadcast %1100 : vector<4x4x1xf32> to vector<4x4x128xf32>
    %1103 = vector.broadcast %1101 : vector<1x1x128xf32> to vector<4x4x128xf32>
    %1104 = arith.mulf %1102, %1103 : vector<4x4x128xf32>
    %1105 = arith.addf %1095, %1104 : vector<4x4x128xf32>
    %c6_667 = arith.constant 6 : index
    %c0_668 = arith.constant 0 : index
    %c1_669 = arith.constant 1 : index
    %c0_670 = arith.constant 0 : index
    %1106 = vector.load %arg2[%c6_667, %c0_668, %c1_669, %c0_670] : memref<7x7x3x128xf32, #tpu.memory_space<vmem>>, vector<1x1x1x128xf32>
    %1107 = vector.shape_cast %1106 : vector<1x1x1x128xf32> to vector<1x128xf32>
    %1108 = vector.extract_strided_slice %1097 {offsets = [0, 0, 1], sizes = [4, 4, 1], strides = [1, 1, 1]} : vector<4x4x3xf32> to vector<4x4x1xf32>
    %1109 = vector.shape_cast %1107 : vector<1x128xf32> to vector<1x1x128xf32>
    %1110 = vector.broadcast %1108 : vector<4x4x1xf32> to vector<4x4x128xf32>
    %1111 = vector.broadcast %1109 : vector<1x1x128xf32> to vector<4x4x128xf32>
    %1112 = arith.mulf %1110, %1111 : vector<4x4x128xf32>
    %1113 = arith.addf %1105, %1112 : vector<4x4x128xf32>
    %c6_671 = arith.constant 6 : index
    %c0_672 = arith.constant 0 : index
    %c2_673 = arith.constant 2 : index
    %c0_674 = arith.constant 0 : index
    %1114 = vector.load %arg2[%c6_671, %c0_672, %c2_673, %c0_674] : memref<7x7x3x128xf32, #tpu.memory_space<vmem>>, vector<1x1x1x128xf32>
    %1115 = vector.shape_cast %1114 : vector<1x1x1x128xf32> to vector<1x128xf32>
    %1116 = vector.extract_strided_slice %1097 {offsets = [0, 0, 2], sizes = [4, 4, 1], strides = [1, 1, 1]} : vector<4x4x3xf32> to vector<4x4x1xf32>
    %1117 = vector.shape_cast %1115 : vector<1x128xf32> to vector<1x1x128xf32>
    %1118 = vector.broadcast %1116 : vector<4x4x1xf32> to vector<4x4x128xf32>
    %1119 = vector.broadcast %1117 : vector<1x1x128xf32> to vector<4x4x128xf32>
    %1120 = arith.mulf %1118, %1119 : vector<4x4x128xf32>
    %1121 = arith.addf %1113, %1120 : vector<4x4x128xf32>
    %c9_675 = arith.constant 9 : index
    %c1_676 = arith.constant 1 : index
    %c0_677 = arith.constant 0 : index
    %c0_678 = arith.constant 0 : index
    %1122 = vector.load %arg1[%c9_675, %c1_676, %c0_677, %c0_678] : memref<16x5x5x3xf32, #tpu.memory_space<vmem>>, vector<1x4x4x3xf32>
    %1123 = vector.shape_cast %1122 : vector<1x4x4x3xf32> to vector<4x4x3xf32>
    %c6_679 = arith.constant 6 : index
    %c1_680 = arith.constant 1 : index
    %c0_681 = arith.constant 0 : index
    %c0_682 = arith.constant 0 : index
    %1124 = vector.load %arg2[%c6_679, %c1_680, %c0_681, %c0_682] : memref<7x7x3x128xf32, #tpu.memory_space<vmem>>, vector<1x1x1x128xf32>
    %1125 = vector.shape_cast %1124 : vector<1x1x1x128xf32> to vector<1x128xf32>
    %1126 = vector.extract_strided_slice %1123 {offsets = [0, 0, 0], sizes = [4, 4, 1], strides = [1, 1, 1]} : vector<4x4x3xf32> to vector<4x4x1xf32>
    %1127 = vector.shape_cast %1125 : vector<1x128xf32> to vector<1x1x128xf32>
    %1128 = vector.broadcast %1126 : vector<4x4x1xf32> to vector<4x4x128xf32>
    %1129 = vector.broadcast %1127 : vector<1x1x128xf32> to vector<4x4x128xf32>
    %1130 = arith.mulf %1128, %1129 : vector<4x4x128xf32>
    %1131 = arith.addf %1121, %1130 : vector<4x4x128xf32>
    %c6_683 = arith.constant 6 : index
    %c1_684 = arith.constant 1 : index
    %c1_685 = arith.constant 1 : index
    %c0_686 = arith.constant 0 : index
    %1132 = vector.load %arg2[%c6_683, %c1_684, %c1_685, %c0_686] : memref<7x7x3x128xf32, #tpu.memory_space<vmem>>, vector<1x1x1x128xf32>
    %1133 = vector.shape_cast %1132 : vector<1x1x1x128xf32> to vector<1x128xf32>
    %1134 = vector.extract_strided_slice %1123 {offsets = [0, 0, 1], sizes = [4, 4, 1], strides = [1, 1, 1]} : vector<4x4x3xf32> to vector<4x4x1xf32>
    %1135 = vector.shape_cast %1133 : vector<1x128xf32> to vector<1x1x128xf32>
    %1136 = vector.broadcast %1134 : vector<4x4x1xf32> to vector<4x4x128xf32>
    %1137 = vector.broadcast %1135 : vector<1x1x128xf32> to vector<4x4x128xf32>
    %1138 = arith.mulf %1136, %1137 : vector<4x4x128xf32>
    %1139 = arith.addf %1131, %1138 : vector<4x4x128xf32>
    %c6_687 = arith.constant 6 : index
    %c1_688 = arith.constant 1 : index
    %c2_689 = arith.constant 2 : index
    %c0_690 = arith.constant 0 : index
    %1140 = vector.load %arg2[%c6_687, %c1_688, %c2_689, %c0_690] : memref<7x7x3x128xf32, #tpu.memory_space<vmem>>, vector<1x1x1x128xf32>
    %1141 = vector.shape_cast %1140 : vector<1x1x1x128xf32> to vector<1x128xf32>
    %1142 = vector.extract_strided_slice %1123 {offsets = [0, 0, 2], sizes = [4, 4, 1], strides = [1, 1, 1]} : vector<4x4x3xf32> to vector<4x4x1xf32>
    %1143 = vector.shape_cast %1141 : vector<1x128xf32> to vector<1x1x128xf32>
    %1144 = vector.broadcast %1142 : vector<4x4x1xf32> to vector<4x4x128xf32>
    %1145 = vector.broadcast %1143 : vector<1x1x128xf32> to vector<4x4x128xf32>
    %1146 = arith.mulf %1144, %1145 : vector<4x4x128xf32>
    %1147 = arith.addf %1139, %1146 : vector<4x4x128xf32>
    %c10_691 = arith.constant 10 : index
    %c1_692 = arith.constant 1 : index
    %c0_693 = arith.constant 0 : index
    %c0_694 = arith.constant 0 : index
    %1148 = vector.load %arg1[%c10_691, %c1_692, %c0_693, %c0_694] : memref<16x5x5x3xf32, #tpu.memory_space<vmem>>, vector<1x4x4x3xf32>
    %1149 = vector.shape_cast %1148 : vector<1x4x4x3xf32> to vector<4x4x3xf32>
    %c6_695 = arith.constant 6 : index
    %c2_696 = arith.constant 2 : index
    %c0_697 = arith.constant 0 : index
    %c0_698 = arith.constant 0 : index
    %1150 = vector.load %arg2[%c6_695, %c2_696, %c0_697, %c0_698] : memref<7x7x3x128xf32, #tpu.memory_space<vmem>>, vector<1x1x1x128xf32>
    %1151 = vector.shape_cast %1150 : vector<1x1x1x128xf32> to vector<1x128xf32>
    %1152 = vector.extract_strided_slice %1149 {offsets = [0, 0, 0], sizes = [4, 4, 1], strides = [1, 1, 1]} : vector<4x4x3xf32> to vector<4x4x1xf32>
    %1153 = vector.shape_cast %1151 : vector<1x128xf32> to vector<1x1x128xf32>
    %1154 = vector.broadcast %1152 : vector<4x4x1xf32> to vector<4x4x128xf32>
    %1155 = vector.broadcast %1153 : vector<1x1x128xf32> to vector<4x4x128xf32>
    %1156 = arith.mulf %1154, %1155 : vector<4x4x128xf32>
    %1157 = arith.addf %1147, %1156 : vector<4x4x128xf32>
    %c6_699 = arith.constant 6 : index
    %c2_700 = arith.constant 2 : index
    %c1_701 = arith.constant 1 : index
    %c0_702 = arith.constant 0 : index
    %1158 = vector.load %arg2[%c6_699, %c2_700, %c1_701, %c0_702] : memref<7x7x3x128xf32, #tpu.memory_space<vmem>>, vector<1x1x1x128xf32>
    %1159 = vector.shape_cast %1158 : vector<1x1x1x128xf32> to vector<1x128xf32>
    %1160 = vector.extract_strided_slice %1149 {offsets = [0, 0, 1], sizes = [4, 4, 1], strides = [1, 1, 1]} : vector<4x4x3xf32> to vector<4x4x1xf32>
    %1161 = vector.shape_cast %1159 : vector<1x128xf32> to vector<1x1x128xf32>
    %1162 = vector.broadcast %1160 : vector<4x4x1xf32> to vector<4x4x128xf32>
    %1163 = vector.broadcast %1161 : vector<1x1x128xf32> to vector<4x4x128xf32>
    %1164 = arith.mulf %1162, %1163 : vector<4x4x128xf32>
    %1165 = arith.addf %1157, %1164 : vector<4x4x128xf32>
    %c6_703 = arith.constant 6 : index
    %c2_704 = arith.constant 2 : index
    %c2_705 = arith.constant 2 : index
    %c0_706 = arith.constant 0 : index
    %1166 = vector.load %arg2[%c6_703, %c2_704, %c2_705, %c0_706] : memref<7x7x3x128xf32, #tpu.memory_space<vmem>>, vector<1x1x1x128xf32>
    %1167 = vector.shape_cast %1166 : vector<1x1x1x128xf32> to vector<1x128xf32>
    %1168 = vector.extract_strided_slice %1149 {offsets = [0, 0, 2], sizes = [4, 4, 1], strides = [1, 1, 1]} : vector<4x4x3xf32> to vector<4x4x1xf32>
    %1169 = vector.shape_cast %1167 : vector<1x128xf32> to vector<1x1x128xf32>
    %1170 = vector.broadcast %1168 : vector<4x4x1xf32> to vector<4x4x128xf32>
    %1171 = vector.broadcast %1169 : vector<1x1x128xf32> to vector<4x4x128xf32>
    %1172 = arith.mulf %1170, %1171 : vector<4x4x128xf32>
    %1173 = arith.addf %1165, %1172 : vector<4x4x128xf32>
    %c11_707 = arith.constant 11 : index
    %c1_708 = arith.constant 1 : index
    %c0_709 = arith.constant 0 : index
    %c0_710 = arith.constant 0 : index
    %1174 = vector.load %arg1[%c11_707, %c1_708, %c0_709, %c0_710] : memref<16x5x5x3xf32, #tpu.memory_space<vmem>>, vector<1x4x4x3xf32>
    %1175 = vector.shape_cast %1174 : vector<1x4x4x3xf32> to vector<4x4x3xf32>
    %c6_711 = arith.constant 6 : index
    %c3_712 = arith.constant 3 : index
    %c0_713 = arith.constant 0 : index
    %c0_714 = arith.constant 0 : index
    %1176 = vector.load %arg2[%c6_711, %c3_712, %c0_713, %c0_714] : memref<7x7x3x128xf32, #tpu.memory_space<vmem>>, vector<1x1x1x128xf32>
    %1177 = vector.shape_cast %1176 : vector<1x1x1x128xf32> to vector<1x128xf32>
    %1178 = vector.extract_strided_slice %1175 {offsets = [0, 0, 0], sizes = [4, 4, 1], strides = [1, 1, 1]} : vector<4x4x3xf32> to vector<4x4x1xf32>
    %1179 = vector.shape_cast %1177 : vector<1x128xf32> to vector<1x1x128xf32>
    %1180 = vector.broadcast %1178 : vector<4x4x1xf32> to vector<4x4x128xf32>
    %1181 = vector.broadcast %1179 : vector<1x1x128xf32> to vector<4x4x128xf32>
    %1182 = arith.mulf %1180, %1181 : vector<4x4x128xf32>
    %1183 = arith.addf %1173, %1182 : vector<4x4x128xf32>
    %c6_715 = arith.constant 6 : index
    %c3_716 = arith.constant 3 : index
    %c1_717 = arith.constant 1 : index
    %c0_718 = arith.constant 0 : index
    %1184 = vector.load %arg2[%c6_715, %c3_716, %c1_717, %c0_718] : memref<7x7x3x128xf32, #tpu.memory_space<vmem>>, vector<1x1x1x128xf32>
    %1185 = vector.shape_cast %1184 : vector<1x1x1x128xf32> to vector<1x128xf32>
    %1186 = vector.extract_strided_slice %1175 {offsets = [0, 0, 1], sizes = [4, 4, 1], strides = [1, 1, 1]} : vector<4x4x3xf32> to vector<4x4x1xf32>
    %1187 = vector.shape_cast %1185 : vector<1x128xf32> to vector<1x1x128xf32>
    %1188 = vector.broadcast %1186 : vector<4x4x1xf32> to vector<4x4x128xf32>
    %1189 = vector.broadcast %1187 : vector<1x1x128xf32> to vector<4x4x128xf32>
    %1190 = arith.mulf %1188, %1189 : vector<4x4x128xf32>
    %1191 = arith.addf %1183, %1190 : vector<4x4x128xf32>
    %c6_719 = arith.constant 6 : index
    %c3_720 = arith.constant 3 : index
    %c2_721 = arith.constant 2 : index
    %c0_722 = arith.constant 0 : index
    %1192 = vector.load %arg2[%c6_719, %c3_720, %c2_721, %c0_722] : memref<7x7x3x128xf32, #tpu.memory_space<vmem>>, vector<1x1x1x128xf32>
    %1193 = vector.shape_cast %1192 : vector<1x1x1x128xf32> to vector<1x128xf32>
    %1194 = vector.extract_strided_slice %1175 {offsets = [0, 0, 2], sizes = [4, 4, 1], strides = [1, 1, 1]} : vector<4x4x3xf32> to vector<4x4x1xf32>
    %1195 = vector.shape_cast %1193 : vector<1x128xf32> to vector<1x1x128xf32>
    %1196 = vector.broadcast %1194 : vector<4x4x1xf32> to vector<4x4x128xf32>
    %1197 = vector.broadcast %1195 : vector<1x1x128xf32> to vector<4x4x128xf32>
    %1198 = arith.mulf %1196, %1197 : vector<4x4x128xf32>
    %1199 = arith.addf %1191, %1198 : vector<4x4x128xf32>
    %c8_723 = arith.constant 8 : index
    %c1_724 = arith.constant 1 : index
    %c1_725 = arith.constant 1 : index
    %c0_726 = arith.constant 0 : index
    %1200 = vector.load %arg1[%c8_723, %c1_724, %c1_725, %c0_726] : memref<16x5x5x3xf32, #tpu.memory_space<vmem>>, vector<1x4x4x3xf32>
    %1201 = vector.shape_cast %1200 : vector<1x4x4x3xf32> to vector<4x4x3xf32>
    %c6_727 = arith.constant 6 : index
    %c4_728 = arith.constant 4 : index
    %c0_729 = arith.constant 0 : index
    %c0_730 = arith.constant 0 : index
    %1202 = vector.load %arg2[%c6_727, %c4_728, %c0_729, %c0_730] : memref<7x7x3x128xf32, #tpu.memory_space<vmem>>, vector<1x1x1x128xf32>
    %1203 = vector.shape_cast %1202 : vector<1x1x1x128xf32> to vector<1x128xf32>
    %1204 = vector.extract_strided_slice %1201 {offsets = [0, 0, 0], sizes = [4, 4, 1], strides = [1, 1, 1]} : vector<4x4x3xf32> to vector<4x4x1xf32>
    %1205 = vector.shape_cast %1203 : vector<1x128xf32> to vector<1x1x128xf32>
    %1206 = vector.broadcast %1204 : vector<4x4x1xf32> to vector<4x4x128xf32>
    %1207 = vector.broadcast %1205 : vector<1x1x128xf32> to vector<4x4x128xf32>
    %1208 = arith.mulf %1206, %1207 : vector<4x4x128xf32>
    %1209 = arith.addf %1199, %1208 : vector<4x4x128xf32>
    %c6_731 = arith.constant 6 : index
    %c4_732 = arith.constant 4 : index
    %c1_733 = arith.constant 1 : index
    %c0_734 = arith.constant 0 : index
    %1210 = vector.load %arg2[%c6_731, %c4_732, %c1_733, %c0_734] : memref<7x7x3x128xf32, #tpu.memory_space<vmem>>, vector<1x1x1x128xf32>
    %1211 = vector.shape_cast %1210 : vector<1x1x1x128xf32> to vector<1x128xf32>
    %1212 = vector.extract_strided_slice %1201 {offsets = [0, 0, 1], sizes = [4, 4, 1], strides = [1, 1, 1]} : vector<4x4x3xf32> to vector<4x4x1xf32>
    %1213 = vector.shape_cast %1211 : vector<1x128xf32> to vector<1x1x128xf32>
    %1214 = vector.broadcast %1212 : vector<4x4x1xf32> to vector<4x4x128xf32>
    %1215 = vector.broadcast %1213 : vector<1x1x128xf32> to vector<4x4x128xf32>
    %1216 = arith.mulf %1214, %1215 : vector<4x4x128xf32>
    %1217 = arith.addf %1209, %1216 : vector<4x4x128xf32>
    %c6_735 = arith.constant 6 : index
    %c4_736 = arith.constant 4 : index
    %c2_737 = arith.constant 2 : index
    %c0_738 = arith.constant 0 : index
    %1218 = vector.load %arg2[%c6_735, %c4_736, %c2_737, %c0_738] : memref<7x7x3x128xf32, #tpu.memory_space<vmem>>, vector<1x1x1x128xf32>
    %1219 = vector.shape_cast %1218 : vector<1x1x1x128xf32> to vector<1x128xf32>
    %1220 = vector.extract_strided_slice %1201 {offsets = [0, 0, 2], sizes = [4, 4, 1], strides = [1, 1, 1]} : vector<4x4x3xf32> to vector<4x4x1xf32>
    %1221 = vector.shape_cast %1219 : vector<1x128xf32> to vector<1x1x128xf32>
    %1222 = vector.broadcast %1220 : vector<4x4x1xf32> to vector<4x4x128xf32>
    %1223 = vector.broadcast %1221 : vector<1x1x128xf32> to vector<4x4x128xf32>
    %1224 = arith.mulf %1222, %1223 : vector<4x4x128xf32>
    %1225 = arith.addf %1217, %1224 : vector<4x4x128xf32>
    %c9_739 = arith.constant 9 : index
    %c1_740 = arith.constant 1 : index
    %c1_741 = arith.constant 1 : index
    %c0_742 = arith.constant 0 : index
    %1226 = vector.load %arg1[%c9_739, %c1_740, %c1_741, %c0_742] : memref<16x5x5x3xf32, #tpu.memory_space<vmem>>, vector<1x4x4x3xf32>
    %1227 = vector.shape_cast %1226 : vector<1x4x4x3xf32> to vector<4x4x3xf32>
    %c6_743 = arith.constant 6 : index
    %c5_744 = arith.constant 5 : index
    %c0_745 = arith.constant 0 : index
    %c0_746 = arith.constant 0 : index
    %1228 = vector.load %arg2[%c6_743, %c5_744, %c0_745, %c0_746] : memref<7x7x3x128xf32, #tpu.memory_space<vmem>>, vector<1x1x1x128xf32>
    %1229 = vector.shape_cast %1228 : vector<1x1x1x128xf32> to vector<1x128xf32>
    %1230 = vector.extract_strided_slice %1227 {offsets = [0, 0, 0], sizes = [4, 4, 1], strides = [1, 1, 1]} : vector<4x4x3xf32> to vector<4x4x1xf32>
    %1231 = vector.shape_cast %1229 : vector<1x128xf32> to vector<1x1x128xf32>
    %1232 = vector.broadcast %1230 : vector<4x4x1xf32> to vector<4x4x128xf32>
    %1233 = vector.broadcast %1231 : vector<1x1x128xf32> to vector<4x4x128xf32>
    %1234 = arith.mulf %1232, %1233 : vector<4x4x128xf32>
    %1235 = arith.addf %1225, %1234 : vector<4x4x128xf32>
    %c6_747 = arith.constant 6 : index
    %c5_748 = arith.constant 5 : index
    %c1_749 = arith.constant 1 : index
    %c0_750 = arith.constant 0 : index
    %1236 = vector.load %arg2[%c6_747, %c5_748, %c1_749, %c0_750] : memref<7x7x3x128xf32, #tpu.memory_space<vmem>>, vector<1x1x1x128xf32>
    %1237 = vector.shape_cast %1236 : vector<1x1x1x128xf32> to vector<1x128xf32>
    %1238 = vector.extract_strided_slice %1227 {offsets = [0, 0, 1], sizes = [4, 4, 1], strides = [1, 1, 1]} : vector<4x4x3xf32> to vector<4x4x1xf32>
    %1239 = vector.shape_cast %1237 : vector<1x128xf32> to vector<1x1x128xf32>
    %1240 = vector.broadcast %1238 : vector<4x4x1xf32> to vector<4x4x128xf32>
    %1241 = vector.broadcast %1239 : vector<1x1x128xf32> to vector<4x4x128xf32>
    %1242 = arith.mulf %1240, %1241 : vector<4x4x128xf32>
    %1243 = arith.addf %1235, %1242 : vector<4x4x128xf32>
    %c6_751 = arith.constant 6 : index
    %c5_752 = arith.constant 5 : index
    %c2_753 = arith.constant 2 : index
    %c0_754 = arith.constant 0 : index
    %1244 = vector.load %arg2[%c6_751, %c5_752, %c2_753, %c0_754] : memref<7x7x3x128xf32, #tpu.memory_space<vmem>>, vector<1x1x1x128xf32>
    %1245 = vector.shape_cast %1244 : vector<1x1x1x128xf32> to vector<1x128xf32>
    %1246 = vector.extract_strided_slice %1227 {offsets = [0, 0, 2], sizes = [4, 4, 1], strides = [1, 1, 1]} : vector<4x4x3xf32> to vector<4x4x1xf32>
    %1247 = vector.shape_cast %1245 : vector<1x128xf32> to vector<1x1x128xf32>
    %1248 = vector.broadcast %1246 : vector<4x4x1xf32> to vector<4x4x128xf32>
    %1249 = vector.broadcast %1247 : vector<1x1x128xf32> to vector<4x4x128xf32>
    %1250 = arith.mulf %1248, %1249 : vector<4x4x128xf32>
    %1251 = arith.addf %1243, %1250 : vector<4x4x128xf32>
    %c10_755 = arith.constant 10 : index
    %c1_756 = arith.constant 1 : index
    %c1_757 = arith.constant 1 : index
    %c0_758 = arith.constant 0 : index
    %1252 = vector.load %arg1[%c10_755, %c1_756, %c1_757, %c0_758] : memref<16x5x5x3xf32, #tpu.memory_space<vmem>>, vector<1x4x4x3xf32>
    %1253 = vector.shape_cast %1252 : vector<1x4x4x3xf32> to vector<4x4x3xf32>
    %c6_759 = arith.constant 6 : index
    %c6_760 = arith.constant 6 : index
    %c0_761 = arith.constant 0 : index
    %c0_762 = arith.constant 0 : index
    %1254 = vector.load %arg2[%c6_759, %c6_760, %c0_761, %c0_762] : memref<7x7x3x128xf32, #tpu.memory_space<vmem>>, vector<1x1x1x128xf32>
    %1255 = vector.shape_cast %1254 : vector<1x1x1x128xf32> to vector<1x128xf32>
    %1256 = vector.extract_strided_slice %1253 {offsets = [0, 0, 0], sizes = [4, 4, 1], strides = [1, 1, 1]} : vector<4x4x3xf32> to vector<4x4x1xf32>
    %1257 = vector.shape_cast %1255 : vector<1x128xf32> to vector<1x1x128xf32>
    %1258 = vector.broadcast %1256 : vector<4x4x1xf32> to vector<4x4x128xf32>
    %1259 = vector.broadcast %1257 : vector<1x1x128xf32> to vector<4x4x128xf32>
    %1260 = arith.mulf %1258, %1259 : vector<4x4x128xf32>
    %1261 = arith.addf %1251, %1260 : vector<4x4x128xf32>
    %c6_763 = arith.constant 6 : index
    %c6_764 = arith.constant 6 : index
    %c1_765 = arith.constant 1 : index
    %c0_766 = arith.constant 0 : index
    %1262 = vector.load %arg2[%c6_763, %c6_764, %c1_765, %c0_766] : memref<7x7x3x128xf32, #tpu.memory_space<vmem>>, vector<1x1x1x128xf32>
    %1263 = vector.shape_cast %1262 : vector<1x1x1x128xf32> to vector<1x128xf32>
    %1264 = vector.extract_strided_slice %1253 {offsets = [0, 0, 1], sizes = [4, 4, 1], strides = [1, 1, 1]} : vector<4x4x3xf32> to vector<4x4x1xf32>
    %1265 = vector.shape_cast %1263 : vector<1x128xf32> to vector<1x1x128xf32>
    %1266 = vector.broadcast %1264 : vector<4x4x1xf32> to vector<4x4x128xf32>
    %1267 = vector.broadcast %1265 : vector<1x1x128xf32> to vector<4x4x128xf32>
    %1268 = arith.mulf %1266, %1267 : vector<4x4x128xf32>
    %1269 = arith.addf %1261, %1268 : vector<4x4x128xf32>
    %c6_767 = arith.constant 6 : index
    %c6_768 = arith.constant 6 : index
    %c2_769 = arith.constant 2 : index
    %c0_770 = arith.constant 0 : index
    %1270 = vector.load %arg2[%c6_767, %c6_768, %c2_769, %c0_770] : memref<7x7x3x128xf32, #tpu.memory_space<vmem>>, vector<1x1x1x128xf32>
    %1271 = vector.shape_cast %1270 : vector<1x1x1x128xf32> to vector<1x128xf32>
    %1272 = vector.extract_strided_slice %1253 {offsets = [0, 0, 2], sizes = [4, 4, 1], strides = [1, 1, 1]} : vector<4x4x3xf32> to vector<4x4x1xf32>
    %1273 = vector.shape_cast %1271 : vector<1x128xf32> to vector<1x1x128xf32>
    %1274 = vector.broadcast %1272 : vector<4x4x1xf32> to vector<4x4x128xf32>
    %1275 = vector.broadcast %1273 : vector<1x1x128xf32> to vector<4x4x128xf32>
    %1276 = arith.mulf %1274, %1275 : vector<4x4x128xf32>
    %1277 = arith.addf %1269, %1276 : vector<4x4x128xf32>
    %c0_771 = arith.constant 0 : index
    %c0_772 = arith.constant 0 : index
    %c0_773 = arith.constant 0 : index
    %c0_774 = arith.constant 0 : index
    %1278 = vector.load %arg4[%c0_771, %c0_772, %c0_773, %c0_774] : memref<1x4x4x128xf32, #tpu.memory_space<vmem>>, vector<1x4x4x128xf32>
    %1279 = vector.shape_cast %1278 : vector<1x4x4x128xf32> to vector<4x4x128xf32>
    %1280 = vector.shape_cast %1277 : vector<4x4x128xf32> to vector<1x4x4x128xf32>
    tpu.vector_store %arg4[%c0_771, %c0_772, %c0_773, %c0_774], %1280 {strides = array<i32>} : memref<1x4x4x128xf32, #tpu.memory_space<vmem>>, vector<1x4x4x128xf32>,
    return
  }
  func.func @transform_0(%arg0: i32) -> (i32, i32, i32, i32) {
    %c0_i32 = arith.constant 0 : i32
    %c0_i32_0 = arith.constant 0 : i32
    %c0_i32_1 = arith.constant 0 : i32
    %c0_i32_2 = arith.constant 0 : i32
    return %arg0, %c0_i32, %c0_i32_0, %c0_i32_1 : i32, i32, i32, i32
  }
  func.func @transform_1(%arg0: i32) -> (i32, i32, i32, i32) {
    %c0_i32 = arith.constant 0 : i32
    %c0_i32_0 = arith.constant 0 : i32
    %c0_i32_1 = arith.constant 0 : i32
    %c0_i32_2 = arith.constant 0 : i32
    %c0_i32_3 = arith.constant 0 : i32
    return %c0_i32, %c0_i32_0, %c0_i32_1, %c0_i32_2 : i32, i32, i32, i32
  }
  func.func @transform_2(%arg0: i32) -> (i32, i32, i32) {
    %c0_i32 = arith.constant 0 : i32
    %c0_i32_0 = arith.constant 0 : i32
    %c0_i32_1 = arith.constant 0 : i32
    %c0_i32_2 = arith.constant 0 : i32
    return %c0_i32, %c0_i32_0, %c0_i32_1 : i32, i32, i32
  }
  func.func @transform_3(%arg0: i32) -> (i32, i32, i32, i32) {
    %c0_i32 = arith.constant 0 : i32
    %c0_i32_0 = arith.constant 0 : i32
    %c0_i32_1 = arith.constant 0 : i32
    %c0_i32_2 = arith.constant 0 : i32
    return %arg0, %c0_i32, %c0_i32_0, %c0_i32_1 : i32, i32, i32, i32
  }
}

</mosaic_0001>

<bundles_post_ra>
// kernel: tpu_custom_call.1
= control target key start
LH: loop header
LB: loop body
LE: loop exit
PB: predicated region body
PF: predicated region fallthrough
CT: control target
= control target key end

     0   :  { %8 = vsyncpa [#allocation3], 0  ;;  %s9628_s0 = inlined_call_operand.vmem [shape: f32[32,5,5,3], index: 0, kind: input, shape index: {}]   ;;  %s9629_s1 = inlined_call_operand.vmem [shape: f32[7,7,3,128], index: 1, kind: input, shape index: {}]   ;;  %s9630_s2 = inlined_call_operand.vmem [shape: f32[1,1,128], index: 2, kind: input, shape index: {}]   ;;  %s9631_s3 = inlined_call_operand.hbm [shape: f32[2,4,4,128], index: 3, kind: output, shape index: {}]  }
   0x1   :  { %10 = vsyncpa [#allocation3 + $0x1], 0  ;;  %s5843_s12 = smov 0   ;;  %s5845_s13 = smov 0  }
   0x2   :  { %s5847_s14 = smov 0   ;;  %s5849_s15 = smov 0  }
   0x3 LB: > { %s5864_s16 = sadd.s32 4294967295, %s5815_s15   ;;  %s4991_s17 = sadd.s32 4294967294, %s5815_s15   ;;  %s5815_s15 = sphi %s5849_s15, %s10583_s15   ;;  %s5811_s14 = sphi %s5847_s14, %s10582_s14   ;;  %s5807_s13 = sphi %s5845_s13, %s10581_s13   ;;  %s5803_s12 = sphi %s5843_s12, %s10580_s12  }
   0x4   : > { %s5868_s18 = sadd.s32 1, %s5815_s15   ;;  %s91_s19 = sadd.s32 1, %s5811_s14 }
   0x5   : > { %s88_s20 = ssub.s32 %s5815_s15, %s5868_s18  ;;  %p101_p0 = scmp.ne.s32.totalorder %s5811_s14, %s5807_s13 }
   0x6   : > { %p89_p1 = scmp.eq.s32.totalorder %s88_s20, 0  ;;  %p102_p2 = scmp.eq.s32.totalorder %s5864_s16, 1 }
   0x7   : > { %p107_p3 = scmp.ne.s32.totalorder %s5807_s13, %s5803_s12  ;;  %p108_p4 = scmp.eq.s32.totalorder %s4991_s17, 1 }
   0x8   : > { %s5879_s21 = scalar_select %p89_p1, %s5811_s14, %s91_s19  }
   0x9   : > { %p5881_p5 = por %p102_p2, %p101_p0  ;;  %p5885_p6 = por %p108_p4, %p107_p3 }
   0xa   : > { %p4994_p7 = scmp.ge.s32.totalorder %s5815_s15, 1  ;;  %p142_p8 = scmp.lt.s32.totalorder %s5815_s15, 3 }
   0xc   : > { %p143_p9 = pnand %p4994_p7, %p142_p8 }
   0xe   : > { %146 = sbr.rel (%p143_p9) target bundleno = 1786 (0x6fa), region = 32 }
  0x15   : > { %s4996_s24 = sshll.u32 %s5864_s16, 4  ;;  %v9632_v0 = vmov 2   ;;  %v9636_v1 = vmov 0   ;;  %v9634_v7 = vmov 1   ;;  %s164_s5 = sand.u32 1, %s5807_s13  }
  0x16   : > { %5532 = vset.pattern.permute.xlu0 %v9632_v0  ;;  %5529 = vset.pattern.permute.xlu1 %v9636_v1  ;;  %p168_p10 = scmp.lt.s32.totalorder %s4996_s24, 31  ;;  %s4995_s8 = sshll.u32 %s164_s5, 4 }
  0x17   : > { %s9568_s9 = scalar_lea.vmem [#allocation2], %s4995_s8  ;;  %s5483_s11 = sshll.u32 %s5864_s16, 8 }
  0x18   : > { %s10585_s24 = smov (!%p168_p10, %s4996_s24), 31  ;;  %s4929_s10 = sshll.u32 %s9568_s9, 4  ;;  %s9577_s10 = int_to_ptr.vmem [resolvable:$true] %s4929_s10 }
  0x19   : > { %s5484_s25 = smul.u32 40, %s10585_s24  ;;  %s9582_s20 = scalar_lea.hbm %s9631_s3, %s5483_s11 }
  0x1a   : > { %s9587_s24 = scalar_lea.sflag [#allocation3], %s164_s5  ;;  %s5820_s16 = smov [#allocation2]  }
  0x1b   : > { %s5897_s28 = scalar_lea.vmem %s9628_s0, %s5484_s25  ;;  %s5753_s25 = scalar_lea.vmem %s9577_s10, 256 }
  0x1c   : > { %v183_v2 = vld [vmem:[%s5897_s28 + $0x10] sm:$0xf]  ;;  %v5901_v3 = vld [vmem:[%s5897_s28 + $0x8] sm:$0xf]  ;;  %v184_v4 = vld [vmem:[%s5897_s28 + $0x18] sm:$0xf]  ;;  %p5754_p11 = scmp.ne.s32.totalorder %s9577_s10, %s5753_s25 }
  0x1d   : > { %198 = vperm.xlu1 %5529, %v183_v2   ;;  %253 = vperm.xlu0 %5532, %v5901_v3   ;;  %v5906_v5 = vld [vmem:[%s5897_s28 + $0x28] sm:$0xf]  ;;  %v5910_v6 = vld [vmem:[%s5897_s28 + $0x40] sm:$0xf]  ;;  %v5916_v8 = vld [vmem:[%s5897_s28 + $0x58] sm:$0xf] }
  0x1e   : > { %v5920_v9 = vld [vmem:[%s5897_s28 + $0x78] sm:$0xf]  ;;  %v5923_v10 = vld [vmem:[%s5897_s28] sm:$0xf]  ;;  %v5928_v11 = vld [vmem:[%s5897_s28 + $0x90] sm:$0xf]  ;;  %p5755_p12 = pnand %p5754_p11, %p5881_p5 }
  0x1f   : > { %v5933_v12 = vld [vmem:[%s5897_s28 + $0x9] sm:$0xf]  ;;  %v5003_v14 = vld [vmem:[%s5897_s28 + $0x30] sm:$0xf]  ;;  %v5942_v15 = vld [vmem:[%s5897_s28 + $0x41] sm:$0xf] }
  0x20   : > { %v5937_v13 = vld [vmem:[%s5897_s28 + $0x29] sm:$0xf]  ;;  %v5004_v16 = vld [vmem:[%s5897_s28 + $0x38] sm:$0xf]  ;;  %v5952_v18 = vld [vmem:[%s5897_s28 + $0xa0] sm:$0xf]  ;;  %p5756_p13 = pneg %p5755_p12 }
  0x21   : > { %203 = vperm.xlu1 %5529, %v184_v4   ;;  %346 = vperm.xlu0 %5532, %v5906_v5   ;;  %v5948_v17 = vld [vmem:[%s5897_s28 + $0x59] sm:$0xf]  ;;  %v5962_v20 = vld [vmem:[%s5897_s28 + $0xd0] sm:$0xf]  ;;  %v5972_v22 = vld [vmem:[%s5897_s28 + $0x108] sm:$0xf] }
  0x22   : > { %v5958_v19 = vld [vmem:[%s5897_s28 + $0xb8] sm:$0xf]  ;;  %v5967_v21 = vld [vmem:[%s5897_s28 + $0xf0] sm:$0xf]  ;;  %v5976_v23 = vld [vmem:[%s5897_s28 + $0x120] sm:$0xf] }
  0x23   : > { %v5012_v24 = vld [vmem:[%s5897_s28 + $0x50] sm:$0xf]  ;;  %v5982_v25 = vld [vmem:[%s5897_s28 + $0xa1] sm:$0xf]  ;;  %v5987_v27 = vld [vmem:[%s5897_s28 + $0xb9] sm:$0xf] }
  0x24   : > { %v5014_v26 = vld [vmem:[%s5897_s28 + $0x60] sm:$0xf]  ;;  %v5015_v28 = vld [vmem:[%s5897_s28 + $0x68] sm:$0xf]  ;;  %v5992_v29 = vld [vmem:[%s5897_s28 + $0xd1] sm:$0xf] }
  0x25   : > { %5530 = vset.pattern.permute.xlu1 %v9634_v7  ;;  %358 = vperm.xlu0 %5532, %v5910_v6   ;;  %v5996_v30 = vld [vmem:[%s5897_s28 + $0xf1] sm:$0xf]  ;;  %v6002_v31 = vld [vmem:[%s5897_s28 + $0x109] sm:$0xf]  ;;  %v6015_v34 = vld [vmem:[%s5897_s28 + $0x180] sm:$0xf] }
  0x26   : > { %224 = vperm.xlu1 %5530, %v5901_v3   ;;  %v6006_v32 = vld [vmem:[%s5897_s28 + $0x148] sm:$0xf]  ;;  %v6019_v35 = vld [vmem:[%s5897_s28 + $0x198] sm:$0xf]  ;;  %v5023_v36 = vld [vmem:[%s5897_s28 + $0x80] sm:$0xf] }
  0x27   : > { %v6011_v33 = vld [vmem:[%s5897_s28 + $0x168] sm:$0xf]  ;;  %v6025_v37 = vld [vmem:[%s5897_s28 + $0x1b8] sm:$0xf]  ;;  %v6030_v39 = vld [vmem:[%s5897_s28 + $0x1d0] sm:$0xf] }
  0x28   : > { %v5024_v38 = vld [vmem:[%s5897_s28 + $0x88] sm:$0xf]  ;;  %v6044_v42 = vld [vmem:[%s5897_s28 + $0x181] sm:$0xf]  ;;  %v6049_v43 = vld [vmem:[%s5897_s28 + $0x199] sm:$0xf] }
  0x29   : > { %447 = vperm.xlu0 %5532, %v5916_v8   ;;  %v6035_v40 = vld [vmem:[%s5897_s28 + $0x149] sm:$0xf]  ;;  %v6054_v44 = vld [vmem:[%s5897_s28 + $0x1e0] sm:$0xf]  ;;  %v6058_v45 = vld [vmem:[%s5897_s28 + $0x1f8] sm:$0xf] }
  0x2a   : > { %228 = vperm.xlu1 %5530, %v183_v2   ;;  %v6040_v41 = vld [vmem:[%s5897_s28 + $0x169] sm:$0xf]  ;;  %v567_v46 = vld [vmem:[%s5897_s28 + $0x1] sm:$0xf]  ;;  %v6068_v49 = vld [vmem:[%s5897_s28 + $0x210] sm:$0xf] }
  0x2b   : > { %v569_v50 = vld [vmem:[%s5897_s28 + $0x11] sm:$0xf]  ;;  %v570_v54 = vld [vmem:[%s5897_s28 + $0x19] sm:$0xf]  ;;  %v6086_v57 = vld [vmem:[%s5897_s28 + $0x248] sm:$0xf] }
  0x2c   : > { %v6077_v53 = vld [vmem:[%s5897_s28 + $0x230] sm:$0xf]  ;;  %v6096_v60 = vld [vmem:[%s5897_s28 + $0x260] sm:$0xf]  ;;  %s5757_s26 = sshll.u32 %s5820_s16, 4  ;;  %s5758_s26 = int_to_ptr.vmem [resolvable:$false] %s5757_s26 }
  0x2d   : > { %540 = vperm.xlu0 %5532, %v5920_v9   ;;  %v6104_v63 = vld [vmem:[%s5897_s28 + $0x1e1] sm:$0xf]  ;;  %s5759_s27 = scalar_lea.vmem %s5758_s26, 512  ;;  %p5760_p0 = scmp.lt.s32.totalorder %s9577_s10, %s5758_s26 }
  0x2e   : > { %5531 = vset.pattern.permute.xlu1 %v9632_v0  ;;  %p5761_p1 = scmp.lt.s32.totalorder %s5759_s27, %s5753_s25 }
  0x2f   : > { %249 = vperm.xlu1 %5531, %v5923_v10  }
  0x30   : > { %p5762_p2 = por %p5761_p1, %p5760_p0 }
  0x31   : > { %552 = vperm.xlu0 %5532, %v5928_v11  }
  0x32   : > { %p5763_p3 = pnand %p5762_p2, %p5756_p13 }
  0x33   : > { %257 = vperm.xlu1 %5531, %v183_v2  }
  0x35   : > { %640 = vperm.xlu0 %5532, %v5933_v12  }
  0x37   : > { %261 = vperm.xlu1 %5531, %v184_v4  }
  0x39   : > { %732 = vperm.xlu0 %5532, %v5937_v13  }
  0x3b   : > { %5533 = vset.pattern.permute.xlu1 %v9636_v1 }
  0x3c   : > { %290 = vperm.xlu1 %5533, %v5003_v14  }
  0x3d   : > { %744 = vperm.xlu0 %5532, %v5942_v15  }
  0x40   : > { %295 = vperm.xlu1 %5533, %v5004_v16  }
  0x41   : > { %832 = vperm.xlu0 %5532, %v5948_v17  }
  0x44   : > { %5534 = vset.pattern.permute.xlu1 %v9634_v7 }
  0x45   : > { %925 = vperm.xlu0 %5532, %v5952_v18   ;;  %317 = vperm.xlu1 %5534, %v5906_v5  }
  0x49   : > { %937 = vperm.xlu0 %5532, %v5958_v19   ;;  %325 = vperm.xlu1 %5534, %v5004_v16  }
  0x4d   : > { %1026 = vperm.xlu0 %5532, %v5962_v20   ;;  %329 = vperm.xlu1 %5534, %v5910_v6  }
  0x51   : > { %1119 = vperm.xlu0 %5532, %v5967_v21   ;;  %5535 = vset.pattern.permute.xlu1 %v9632_v0 }
  0x52   : > { %350 = vperm.xlu1 %5535, %v5003_v14   ;;  %v6113_v14 = vld [vmem:[%s5897_s28 + $0x1f9] sm:$0xf] }
  0x55   : > { %1131 = vperm.xlu0 %5532, %v5972_v22  }
  0x56   : > { %354 = vperm.xlu1 %5535, %v5004_v16  }
  0x59   : > { %1220 = vperm.xlu0 %5532, %v5976_v23  }
  0x5a   : > { %5536 = vset.pattern.permute.xlu1 %v9636_v1 }
  0x5b   : > { %382 = vperm.xlu1 %5536, %v5012_v24  }
  0x5d   : > { %1312 = vperm.xlu0 %5532, %v5982_v25  }
  0x5f   : > { %392 = vperm.xlu1 %5536, %v5014_v26  }
  0x61   : > { %1324 = vperm.xlu0 %5532, %v5987_v27  }
  0x63   : > { %397 = vperm.xlu1 %5536, %v5015_v28  }
  0x65   : > { %1412 = vperm.xlu0 %5532, %v5992_v29  }
  0x67   : > { %5537 = vset.pattern.permute.xlu1 %v9634_v7 }
  0x68   : > { %418 = vperm.xlu1 %5537, %v5916_v8  }
  0x69   : > { %1504 = vperm.xlu0 %5532, %v5996_v30  }
  0x6c   : > { %422 = vperm.xlu1 %5537, %v5014_v26  }
  0x6d   : > { %1516 = vperm.xlu0 %5532, %v6002_v31  }
  0x70   : > { %5538 = vset.pattern.permute.xlu1 %v9632_v0 }
  0x71   : > { %1605 = vperm.xlu0 %5532, %v6006_v32   ;;  %443 = vperm.xlu1 %5538, %v5012_v24  }
  0x75   : > { %1698 = vperm.xlu0 %5532, %v6011_v33   ;;  %451 = vperm.xlu1 %5538, %v5014_v26   ;;  %v6121_v26 = vld [vmem:[%s5897_s28 + $0x211] sm:$0xf] }
  0x79   : > { %1710 = vperm.xlu0 %5532, %v6015_v34   ;;  %455 = vperm.xlu1 %5538, %v5015_v28  }
  0x7d   : > { %1799 = vperm.xlu0 %5532, %v6019_v35   ;;  %5539 = vset.pattern.permute.xlu1 %v9636_v1 }
  0x7e   : > { %484 = vperm.xlu1 %5539, %v5023_v36  }
  0x81   : > { %1892 = vperm.xlu0 %5532, %v6025_v37  }
  0x82   : > { %489 = vperm.xlu1 %5539, %v5024_v38  }
  0x85   : > { %1904 = vperm.xlu0 %5532, %v6030_v39  }
  0x86   : > { %5540 = vset.pattern.permute.xlu1 %v9634_v7 }
  0x87   : > { %511 = vperm.xlu1 %5540, %v5920_v9  }
  0x89   : > { %1992 = vperm.xlu0 %5532, %v6035_v40  }
  0x8b   : > { %519 = vperm.xlu1 %5540, %v5024_v38  }
  0x8d   : > { %2084 = vperm.xlu0 %5532, %v6040_v41  }
  0x8f   : > { %523 = vperm.xlu1 %5540, %v5928_v11  }
  0x91   : > { %2096 = vperm.xlu0 %5532, %v6044_v42  }
  0x93   : > { %5541 = vset.pattern.permute.xlu1 %v9632_v0 }
  0x94   : > { %544 = vperm.xlu1 %5541, %v5023_v36   ;;  %v6127_v36 = vld [vmem:[%s5897_s28 + $0x231] sm:$0xf] }
  0x95   : > { %2184 = vperm.xlu0 %5532, %v6049_v43  }
  0x98   : > { %548 = vperm.xlu1 %5541, %v5024_v38  }
  0x99   : > { %2277 = vperm.xlu0 %5532, %v6054_v44  }
  0x9c   : > { %v6061_v47 = vpop.permute.xlu1 %198  ;;  %5542 = vset.pattern.permute.xlu1 %v9636_v1  ;;  %v6064_v48 = vpop.permute.xlu0 %253 }
  0x9d   : > { %9685 = vst [vmem:[#allocation5_spill] sm:$0xff] %v6061_v47  ;;  %9686 = vst [vmem:[#allocation6_spill] sm:$0xff] %v6064_v48  ;;  %2289 = vperm.xlu0 %5532, %v6058_v45   ;;  %575 = vperm.xlu1 %5542, %v567_v46   ;;  %v6203_v48 = vld [vmem:[%s5897_s28 + $0x51] sm:$0xf] }
  0x9e   : > { %9719 = vst [vmem:[#allocation37_spill] sm:$0xff] %v6203_v48 }
  0xa0   : > { %v6071_v51 = vpop.permute.xlu1 %203  ;;  %v6073_v52 = vpop.permute.xlu0 %346 }
  0xa1   : > { %9687 = vst [vmem:[#allocation7_spill] sm:$0xff] %v6071_v51  ;;  %9688 = vst [vmem:[#allocation8_spill] sm:$0xff] %v6073_v52  ;;  %2378 = vperm.xlu0 %5532, %v6068_v49   ;;  %585 = vperm.xlu1 %5542, %v569_v50  }
  0xa4   : > { %v6080_v55 = vpop.permute.xlu0 %358 }
  0xa5   : > { %9689 = vst [vmem:[#allocation9_spill] sm:$0xff] %v6080_v55  ;;  %2471 = vperm.xlu0 %5532, %v6077_v53   ;;  %v6083_v56 = vpop.permute.xlu1 %224  ;;  %590 = vperm.xlu1 %5542, %v570_v54  }
  0xa6   : > { %9690 = vst [vmem:[#allocation10_spill] sm:$0xff] %v6083_v56  ;;  %v6225_v56 = vld [vmem:[%s5897_s28 + $0x69] sm:$0xf] }
  0xa7   : > { %9726 = vst [vmem:[#allocation43_spill] sm:$0xff] %v6225_v56 }
  0xa8   : > { %v6088_v58 = vpop.permute.xlu0 %447 }
  0xa9   : > { %9691 = vst [vmem:[#allocation11_spill] sm:$0xff] %v6088_v58  ;;  %2483 = vperm.xlu0 %5532, %v6086_v57   ;;  %v6091_v59 = vpop.permute.xlu1 %228  ;;  %5543 = vset.pattern.permute.xlu1 %v9634_v7  ;;  %v6136_v7 = vld [vmem:[%s5897_s28 + $0x249] sm:$0xf]  ;;  %v6181_v58 = vld [vmem:[%s5897_s28 + $0x80] sm:$0xf] }
  0xaa   : > { %9692 = vst [vmem:[#allocation12_spill] sm:$0xff] %v6091_v59  ;;  %611 = vperm.xlu1 %5543, %v5933_v12   ;;  %v6146_v59 = vld [vmem:[%s5897_s28 + $0x10] sm:$0xf] }
  0xac   : > { %v6098_v61 = vpop.permute.xlu0 %540 }
  0xad   : > { %9693 = vst [vmem:[#allocation13_spill] sm:$0xff] %v6098_v61  ;;  %2572 = vperm.xlu0 %5532, %v6096_v60   ;;  %v6172_v61 = vld [vmem:[%s5897_s28 + $0x60] sm:$0xf] }
  0xae   : > { %615 = vperm.xlu1 %5543, %v569_v50   ;;  %v6101_v62 = vpop.permute.xlu1 %249 }
  0xaf   : > { %9694 = vst [vmem:[#allocation14_spill] sm:$0xff] %v6101_v62 }
  0xb0   : > { %v6106_v2 = vpop.permute.xlu0 %552 }
  0xb1   : > { %9695 = vst [vmem:[#allocation15_spill] sm:$0xff] %v6106_v2  ;;  %2664 = vperm.xlu0 %5532, %v6104_v63  }
  0xb2   : > { %5544 = vset.pattern.permute.xlu1 %v9632_v0  ;;  %v6110_v4 = vpop.permute.xlu1 %257  ;;  %v5039_v0 = vld [vmem:[%s5897_s28 + $0x31] sm:$0xf] }
  0xb3   : > { %9696 = vst [vmem:[#allocation16_spill] sm:$0xff] %v6110_v4  ;;  %636 = vperm.xlu1 %5544, %v567_v46  }
  0xb4   : > { %v6115_v16 = vpop.permute.xlu0 %640 }
  0xb5   : > { %9697 = vst [vmem:[#allocation17_spill] sm:$0xff] %v6115_v16  ;;  %2676 = vperm.xlu0 %5532, %v6113_v14   ;;  %v6164_v16 = vld [vmem:[%s5897_s28 + $0x48] sm:$0xf] }
  0xb6   : > { %v6118_v24 = vpop.permute.xlu1 %261 }
  0xb7   : > { %9698 = vst [vmem:[#allocation18_spill] sm:$0xff] %v6118_v24  ;;  %644 = vperm.xlu1 %5544, %v569_v50  }
  0xb8   : > { %v6123_v28 = vpop.permute.xlu0 %732 }
  0xb9   : > { %9699 = vst [vmem:[#allocation19_spill] sm:$0xff] %v6123_v28  ;;  %2764 = vperm.xlu0 %5532, %v6121_v26  }
  0xbb   : > { %648 = vperm.xlu1 %5544, %v570_v54   ;;  %v6129_v38 = vpop.permute.xlu1 %290  ;;  %v5040_v54 = vld [vmem:[%s5897_s28 + $0x39] sm:$0xf] }
  0xbc   : > { %9700 = vst [vmem:[#allocation20_spill] sm:$0xff] %v6129_v38  ;;  %v6131_v46 = vpop.permute.xlu0 %744 }
  0xbd   : > { %9701 = vst [vmem:[#allocation21_spill] sm:$0xff] %v6131_v46  ;;  %2856 = vperm.xlu0 %5532, %v6127_v36  }
  0xbf   : > { %5545 = vset.pattern.permute.xlu1 %v9636_v1  ;;  %v6139_v50 = vpop.permute.xlu1 %295  ;;  %v6154_v1 = vld [vmem:[%s5897_s28 + $0x30] sm:$0xf] }
  0xc0   : > { %9702 = vst [vmem:[#allocation22_spill] sm:$0xff] %v6139_v50  ;;  %676 = vperm.xlu1 %5545, %v5039_v0   ;;  %v6141_v4 = vpop.permute.xlu0 %832  ;;  %v9706_v50 = vmov 1  }
  0xc1   : > { %9703 = vst [vmem:[#allocation23_spill] sm:$0xff] %v6141_v4  ;;  %2868 = vperm.xlu0 %5532, %v6136_v7  }
  0xc4   : > { %681 = vperm.xlu1 %5545, %v5040_v54   ;;  %v6148_v47 = vpop.permute.xlu1 %317  ;;  %v6150_v46 = vpop.permute.xlu0 %925 }
  0xc5   : > { %9704 = vst [vmem:[#allocation24_spill] sm:$0xff] %v6148_v47  ;;  %9705 = vst [vmem:[#allocation25_spill] sm:$0xff] %v6150_v46  ;;  %2957 = vperm.xlu0 %5532, %v6146_v59   ;;  %v6220_v47 = vld [vmem:[%s5897_s28 + $0x49] sm:$0xf] }
  0xc6   : > { %9724 = vst [vmem:[#allocation41_spill] sm:$0xff] %v6220_v47 }
  0xc8   : > { %5546 = vset.pattern.permute.xlu1 %v9706_v50  ;;  %v6157_v28 = vpop.permute.xlu1 %325  ;;  %v6159_v4 = vpop.permute.xlu0 %937 }
  0xc9   : > { %9707 = vst [vmem:[#allocation26_spill] sm:$0xff] %v6157_v28  ;;  %9708 = vst [vmem:[#allocation27_spill] sm:$0xff] %v6159_v4  ;;  %3050 = vperm.xlu0 %5532, %v6154_v1   ;;  %703 = vperm.xlu1 %5546, %v5937_v13  }
  0xcc   : > { %v6166_v2 = vpop.permute.xlu1 %329  ;;  %v6168_v46 = vpop.permute.xlu0 %1026 }
  0xcd   : > { %9709 = vst [vmem:[#allocation28_spill] sm:$0xff] %v6166_v2  ;;  %9710 = vst [vmem:[#allocation29_spill] sm:$0xff] %v6168_v46  ;;  %3062 = vperm.xlu0 %5532, %v6164_v16   ;;  %711 = vperm.xlu1 %5546, %v5040_v54   ;;  %v9714_v46 = vmov 2  }
  0xd0   : > { %v6174_v28 = vpop.permute.xlu0 %1119 }
  0xd1   : > { %9711 = vst [vmem:[#allocation30_spill] sm:$0xff] %v6174_v28  ;;  %3151 = vperm.xlu0 %5532, %v6172_v61   ;;  %715 = vperm.xlu1 %5546, %v5942_v15   ;;  %v6178_v4 = vpop.permute.xlu1 %350  ;;  %v6190_v28 = vld [vmem:[%s5897_s28 + $0x98] sm:$0xf] }
  0xd2   : > { %9712 = vst [vmem:[#allocation31_spill] sm:$0xff] %v6178_v4 }
  0xd4   : > { %v6183_v55 = vpop.permute.xlu0 %1131 }
  0xd5   : > { %9713 = vst [vmem:[#allocation32_spill] sm:$0xff] %v6183_v55  ;;  %3244 = vperm.xlu0 %5532, %v6181_v58   ;;  %5547 = vset.pattern.permute.xlu1 %v9714_v46  ;;  %v6187_v2 = vpop.permute.xlu1 %354  ;;  %v6198_v55 = vld [vmem:[%s5897_s28 + $0x11] sm:$0xf] }
  0xd6   : > { %9715 = vst [vmem:[#allocation33_spill] sm:$0xff] %v6187_v2  ;;  %736 = vperm.xlu1 %5547, %v5039_v0   ;;  %v9720_v0 = vmov 0  }
  0xd8   : > { %v6192_v38 = vpop.permute.xlu0 %1220 }
  0xd9   : > { %9716 = vst [vmem:[#allocation34_spill] sm:$0xff] %v6192_v38  ;;  %3256 = vperm.xlu0 %5532, %v6190_v28   ;;  %v6210_v38 = vld [vmem:[%s5897_s28 + $0x31] sm:$0xf] }
  0xda   : > { %740 = vperm.xlu1 %5547, %v5040_v54   ;;  %v6195_v4 = vpop.permute.xlu1 %382 }
  0xdb   : > { %9717 = vst [vmem:[#allocation35_spill] sm:$0xff] %v6195_v4  ;;  %v5050_v4 = vld [vmem:[%s5897_s28 + $0x61] sm:$0xf] }
  0xdc   : > { %v6200_v52 = vpop.permute.xlu0 %1312 }
  0xdd   : > { %9718 = vst [vmem:[#allocation36_spill] sm:$0xff] %v6200_v52  ;;  %3344 = vperm.xlu0 %5532, %v6198_v55  }
  0xde   : > { %5548 = vset.pattern.permute.xlu1 %v9720_v0  ;;  %v6207_v2 = vpop.permute.xlu1 %392 }
  0xdf   : > { %9721 = vst [vmem:[#allocation38_spill] sm:$0xff] %v6207_v2  ;;  %767 = vperm.xlu1 %5548, %v6203_v48   ;;  %v6229_v2 = vld [vmem:[%s5897_s28 + $0x61] sm:$0xf] }
  0xe0   : > { %v6213_v54 = vpop.permute.xlu0 %1324  ;;  %9727 = vst [vmem:[#allocation44_spill] sm:$0xff] %v6229_v2 }
  0xe1   : > { %9722 = vst [vmem:[#allocation39_spill] sm:$0xff] %v6213_v54  ;;  %3436 = vperm.xlu0 %5532, %v6210_v38  }
  0xe2   : > { %v6217_v52 = vpop.permute.xlu1 %397 }
  0xe3   : > { %9723 = vst [vmem:[#allocation40_spill] sm:$0xff] %v6217_v52  ;;  %777 = vperm.xlu1 %5548, %v5050_v4   ;;  %v6238_v52 = vld [vmem:[%s5897_s28 + $0xa8] sm:$0xf] }
  0xe4   : > { %v6222_v24 = vpop.permute.xlu0 %1412  ;;  %9730 = vst [vmem:[#allocation47_spill] sm:$0xff] %v6238_v52 }
  0xe5   : > { %9725 = vst [vmem:[#allocation42_spill] sm:$0xff] %v6222_v24  ;;  %3448 = vperm.xlu0 %5532, %v6220_v47   ;;  %v6248_v47 = vld [vmem:[%s5897_s28 + $0xc0] sm:$0xf] }
  0xe6   : > { %9733 = vst [vmem:[#allocation50_spill] sm:$0xff] %v6248_v47 }
  0xe7   : > { %782 = vperm.xlu1 %5548, %v6225_v56   ;;  %v6232_v54 = vpop.permute.xlu1 %418 }
  0xe8   : > { %9728 = vst [vmem:[#allocation45_spill] sm:$0xff] %v6232_v54  ;;  %v6234_v62 = vpop.permute.xlu0 %1504 }
  0xe9   : > { %9729 = vst [vmem:[#allocation46_spill] sm:$0xff] %v6234_v62  ;;  %3536 = vperm.xlu0 %5532, %v6229_v2   ;;  %v6256_v2 = vld [vmem:[%s5897_s28 + $0xd8] sm:$0xf] }
  0xea   : > { %9736 = vst [vmem:[#allocation53_spill] sm:$0xff] %v6256_v2 }
  0xeb   : > { %5549 = vset.pattern.permute.xlu1 %v9706_v50  ;;  %v6241_v24 = vpop.permute.xlu1 %422 }
  0xec   : > { %9731 = vst [vmem:[#allocation48_spill] sm:$0xff] %v6241_v24  ;;  %803 = vperm.xlu1 %5549, %v5948_v17   ;;  %v6244_v51 = vpop.permute.xlu0 %1516 }
  0xed   : > { %9732 = vst [vmem:[#allocation49_spill] sm:$0xff] %v6244_v51  ;;  %3629 = vperm.xlu0 %5532, %v6238_v52   ;;  %v6266_v52 = vld [vmem:[%s5897_s28 + $0xf8] sm:$0xf] }
  0xee   : > { %9739 = vst [vmem:[#allocation56_spill] sm:$0xff] %v6266_v52 }
  0xf0   : > { %807 = vperm.xlu1 %5549, %v5050_v4   ;;  %v6250_v62 = vpop.permute.xlu1 %443  ;;  %v6252_v54 = vpop.permute.xlu0 %1605 }
  0xf1   : > { %9734 = vst [vmem:[#allocation51_spill] sm:$0xff] %v6250_v62  ;;  %9735 = vst [vmem:[#allocation52_spill] sm:$0xff] %v6252_v54  ;;  %3641 = vperm.xlu0 %5532, %v6248_v47   ;;  %v6274_v47 = vld [vmem:[%s5897_s28 + $0x110] sm:$0xf] }
  0xf2   : > { %9742 = vst [vmem:[#allocation59_spill] sm:$0xff] %v6274_v47 }
  0xf4   : > { %5550 = vset.pattern.permute.xlu1 %v9714_v46  ;;  %v6259_v24 = vpop.permute.xlu1 %451  ;;  %v6261_v51 = vpop.permute.xlu0 %1698 }
  0xf5   : > { %9737 = vst [vmem:[#allocation54_spill] sm:$0xff] %v6259_v24  ;;  %9738 = vst [vmem:[#allocation55_spill] sm:$0xff] %v6261_v51  ;;  %3730 = vperm.xlu0 %5532, %v6256_v2   ;;  %828 = vperm.xlu1 %5550, %v6203_v48   ;;  %v6283_v48 = vld [vmem:[%s5897_s28 + $0x128] sm:$0xf]  ;;  %v6408_v2 = vld [vmem:[%s5897_s28 + $0x171] sm:$0xf] }
  0xf6   : > { %9745 = vst [vmem:[#allocation62_spill] sm:$0xff] %v6283_v48  ;;  %9784 = vst [vmem:[#allocation101_spill] sm:$0xff] %v6408_v2 }
  0xf8   : > { %v6268_v62 = vpop.permute.xlu1 %455  ;;  %v6270_v54 = vpop.permute.xlu0 %1710 }
  0xf9   : > { %9740 = vst [vmem:[#allocation57_spill] sm:$0xff] %v6268_v62  ;;  %9741 = vst [vmem:[#allocation58_spill] sm:$0xff] %v6270_v54  ;;  %3823 = vperm.xlu0 %5532, %v6266_v52   ;;  %836 = vperm.xlu1 %5550, %v5050_v4   ;;  %v6286_v62 = vld [vmem:[%s5897_s28 + $0xa8] sm:$0xf]  ;;  %v6314_v52 = vld [vmem:[%s5897_s28 + $0xd9] sm:$0xf] }
  0xfa   : > { %9746 = vst [vmem:[#allocation63_spill] sm:$0xff] %v6286_v62  ;;  %9755 = vst [vmem:[#allocation72_spill] sm:$0xff] %v6314_v52 }
  0xfc   : > { %v6276_v24 = vpop.permute.xlu0 %1799 }
  0xfd   : > { %9743 = vst [vmem:[#allocation60_spill] sm:$0xff] %v6276_v24  ;;  %3835 = vperm.xlu0 %5532, %v6274_v47   ;;  %840 = vperm.xlu1 %5550, %v6225_v56   ;;  %v6280_v51 = vpop.permute.xlu1 %484  ;;  %v6296_v24 = vld [vmem:[%s5897_s28 + $0xa9] sm:$0xf]  ;;  %v5060_v56 = vld [vmem:[%s5897_s28 + $0xb0] sm:$0xf] }
  0xfe   : > { %9744 = vst [vmem:[#allocation61_spill] sm:$0xff] %v6280_v51  ;;  %9749 = vst [vmem:[#allocation66_spill] sm:$0xff] %v6296_v24  ;;  %v6305_v47 = vld [vmem:[%s5897_s28 + $0xc1] sm:$0xf] }
  0xff   : > { %9752 = vst [vmem:[#allocation69_spill] sm:$0xff] %v6305_v47 }
 0x100   : > { %v6288_v54 = vpop.permute.xlu0 %1892 }
 0x101   : > { %9747 = vst [vmem:[#allocation64_spill] sm:$0xff] %v6288_v54  ;;  %3924 = vperm.xlu0 %5532, %v6283_v48   ;;  %5551 = vset.pattern.permute.xlu1 %v9720_v0  ;;  %v6292_v4 = vpop.permute.xlu1 %489 }
 0x102   : > { %9748 = vst [vmem:[#allocation65_spill] sm:$0xff] %v6292_v4  ;;  %869 = vperm.xlu1 %5551, %v6286_v62  }
 0x104   : > { %v6299_v51 = vpop.permute.xlu0 %1904 }
 0x105   : > { %9750 = vst [vmem:[#allocation67_spill] sm:$0xff] %v6299_v51  ;;  %4016 = vperm.xlu0 %5532, %v6296_v24   ;;  %v6323_v24 = vld [vmem:[%s5897_s28 + $0xf9] sm:$0xf] }
 0x106   : > { %874 = vperm.xlu1 %5551, %v5060_v56   ;;  %v6302_v54 = vpop.permute.xlu1 %511  ;;  %9758 = vst [vmem:[#allocation75_spill] sm:$0xff] %v6323_v24 }
 0x107   : > { %9751 = vst [vmem:[#allocation68_spill] sm:$0xff] %v6302_v54 }
 0x108   : > { %v6307_v48 = vpop.permute.xlu0 %1992 }
 0x109   : > { %9753 = vst [vmem:[#allocation70_spill] sm:$0xff] %v6307_v48  ;;  %4028 = vperm.xlu0 %5532, %v6305_v47   ;;  %v6329_v47 = vld [vmem:[%s5897_s28 + $0x111] sm:$0xf] }
 0x10a   : > { %5552 = vset.pattern.permute.xlu1 %v9706_v50  ;;  %v6311_v4 = vpop.permute.xlu1 %519  ;;  %9760 = vst [vmem:[#allocation77_spill] sm:$0xff] %v6329_v47 }
 0x10b   : > { %9754 = vst [vmem:[#allocation71_spill] sm:$0xff] %v6311_v4  ;;  %896 = vperm.xlu1 %5552, %v5952_v18  }
 0x10c   : > { %v6317_v51 = vpop.permute.xlu0 %2084 }
 0x10d   : > { %9756 = vst [vmem:[#allocation73_spill] sm:$0xff] %v6317_v51  ;;  %4116 = vperm.xlu0 %5532, %v6314_v52  }
 0x10e   : > { %v6320_v54 = vpop.permute.xlu1 %523 }
 0x10f   : > { %9757 = vst [vmem:[#allocation74_spill] sm:$0xff] %v6320_v54  ;;  %904 = vperm.xlu1 %5552, %v5060_v56   ;;  %v6338_v54 = vld [vmem:[%s5897_s28 + $0x150] sm:$0xf] }
 0x110   : > { %v6325_v48 = vpop.permute.xlu0 %2096  ;;  %9763 = vst [vmem:[#allocation80_spill] sm:$0xff] %v6338_v54 }
 0x111   : > { %9759 = vst [vmem:[#allocation76_spill] sm:$0xff] %v6325_v48  ;;  %4208 = vperm.xlu0 %5532, %v6323_v24   ;;  %v6348_v24 = vld [vmem:[%s5897_s28 + $0x170] sm:$0xf] }
 0x112   : > { %9766 = vst [vmem:[#allocation83_spill] sm:$0xff] %v6348_v24 }
 0x113   : > { %908 = vperm.xlu1 %5552, %v5958_v19   ;;  %v6332_v4 = vpop.permute.xlu1 %544 }
 0x114   : > { %9761 = vst [vmem:[#allocation78_spill] sm:$0xff] %v6332_v4  ;;  %v6334_v51 = vpop.permute.xlu0 %2184 }
 0x115   : > { %9762 = vst [vmem:[#allocation79_spill] sm:$0xff] %v6334_v51  ;;  %4220 = vperm.xlu0 %5532, %v6329_v47   ;;  %v6359_v47 = vld [vmem:[%s5897_s28 + $0xc8] sm:$0xf] }
 0x116   : > { %9770 = vst [vmem:[#allocation87_spill] sm:$0xff] %v6359_v47 }
 0x117   : > { %5553 = vset.pattern.permute.xlu1 %v9714_v46  ;;  %v6341_v52 = vpop.permute.xlu1 %548 }
 0x118   : > { %9764 = vst [vmem:[#allocation81_spill] sm:$0xff] %v6341_v52  ;;  %929 = vperm.xlu1 %5553, %v6286_v62   ;;  %v6344_v48 = vpop.permute.xlu0 %2277  ;;  %v6356_v52 = vld [vmem:[%s5897_s28 + $0x188] sm:$0xf] }
 0x119   : > { %9765 = vst [vmem:[#allocation82_spill] sm:$0xff] %v6344_v48  ;;  %4309 = vperm.xlu0 %5532, %v6338_v54   ;;  %9769 = vst [vmem:[#allocation86_spill] sm:$0xff] %v6356_v52  ;;  %v6378_v54 = vld [vmem:[%s5897_s28 + $0x1c0] sm:$0xf] }
 0x11a   : > { %9776 = vst [vmem:[#allocation93_spill] sm:$0xff] %v6378_v54 }
 0x11c   : > { %933 = vperm.xlu1 %5553, %v5060_v56   ;;  %v6350_v51 = vpop.permute.xlu1 %575  ;;  %v6352_v4 = vpop.permute.xlu0 %2289  ;;  %v6369_v56 = vld [vmem:[%s5897_s28 + $0x1a0] sm:$0xf] }
 0x11d   : > { %9767 = vst [vmem:[#allocation84_spill] sm:$0xff] %v6350_v51  ;;  %9768 = vst [vmem:[#allocation85_spill] sm:$0xff] %v6352_v4  ;;  %4402 = vperm.xlu0 %5532, %v6348_v24   ;;  %v5070_v4 = vld [vmem:[%s5897_s28 + $0xd8] sm:$0xf] }
 0x11e   : > { %9773 = vst [vmem:[#allocation90_spill] sm:$0xff] %v6369_v56 }
 0x120   : > { %5554 = vset.pattern.permute.xlu1 %v9720_v0  ;;  %v6362_v48 = vpop.permute.xlu1 %585  ;;  %v6364_v62 = vpop.permute.xlu0 %2378 }
 0x121   : > { %9771 = vst [vmem:[#allocation88_spill] sm:$0xff] %v6362_v48  ;;  %9772 = vst [vmem:[#allocation89_spill] sm:$0xff] %v6364_v62  ;;  %4414 = vperm.xlu0 %5532, %v6356_v52   ;;  %961 = vperm.xlu1 %5554, %v6359_v47   ;;  %v6381_v48 = vld [vmem:[%s5897_s28 + $0xe0] sm:$0xf] }
 0x124   : > { %v6372_v51 = vpop.permute.xlu1 %590  ;;  %v6374_v24 = vpop.permute.xlu0 %2471 }
 0x125   : > { %9774 = vst [vmem:[#allocation91_spill] sm:$0xff] %v6372_v51  ;;  %9775 = vst [vmem:[#allocation92_spill] sm:$0xff] %v6374_v24  ;;  %4503 = vperm.xlu0 %5532, %v6369_v56   ;;  %971 = vperm.xlu1 %5554, %v5070_v4   ;;  %v6390_v51 = vld [vmem:[%s5897_s28 + $0x1d8] sm:$0xf] }
 0x126   : > { %9779 = vst [vmem:[#allocation96_spill] sm:$0xff] %v6390_v51 }
 0x128   : > { %v6383_v62 = vpop.permute.xlu0 %2483 }
 0x129   : > { %9777 = vst [vmem:[#allocation94_spill] sm:$0xff] %v6383_v62  ;;  %4596 = vperm.xlu0 %5532, %v6378_v54   ;;  %976 = vperm.xlu1 %5554, %v6381_v48   ;;  %v6387_v52 = vpop.permute.xlu1 %611  ;;  %v6400_v62 = vld [vmem:[%s5897_s28 + $0x151] sm:$0xf] }
 0x12a   : > { %9778 = vst [vmem:[#allocation95_spill] sm:$0xff] %v6387_v52 }
 0x12c   : > { %v6392_v24 = vpop.permute.xlu0 %2572 }
 0x12d   : > { %9780 = vst [vmem:[#allocation97_spill] sm:$0xff] %v6392_v24  ;;  %4608 = vperm.xlu0 %5532, %v6390_v51   ;;  %5555 = vset.pattern.permute.xlu1 %v9706_v50  ;;  %v6396_v56 = vpop.permute.xlu1 %615  ;;  %v6417_v51 = vld [vmem:[%s5897_s28 + $0x189] sm:$0xf] }
 0x12e   : > { %9781 = vst [vmem:[#allocation98_spill] sm:$0xff] %v6396_v56  ;;  %997 = vperm.xlu1 %5555, %v5962_v20  }
 0x130   : > { %v6402_v54 = vpop.permute.xlu0 %2664 }
 0x131   : > { %9782 = vst [vmem:[#allocation99_spill] sm:$0xff] %v6402_v54  ;;  %4696 = vperm.xlu0 %5532, %v6400_v62  }
 0x132   : > { %1001 = vperm.xlu1 %5555, %v5070_v4   ;;  %v6405_v52 = vpop.permute.xlu1 %636 }
 0x133   : > { %9783 = vst [vmem:[#allocation100_spill] sm:$0xff] %v6405_v52 }
 0x134   : > { %v6410_v24 = vpop.permute.xlu0 %2676 }
 0x135   : > { %9785 = vst [vmem:[#allocation102_spill] sm:$0xff] %v6410_v24  ;;  %4788 = vperm.xlu0 %5532, %v6408_v2  }
 0x136   : > { %5556 = vset.pattern.permute.xlu1 %v9714_v46  ;;  %v6414_v56 = vpop.permute.xlu1 %644 }
 0x137   : > { %9786 = vst [vmem:[#allocation103_spill] sm:$0xff] %v6414_v56  ;;  %1022 = vperm.xlu1 %5556, %v6359_v47   ;;  %v6435_v47 = vld [vmem:[%s5897_s28 + $0xf8] sm:$0xf] }
 0x138   : > { %v6420_v54 = vpop.permute.xlu0 %2764 }
 0x139   : > { %9787 = vst [vmem:[#allocation104_spill] sm:$0xff] %v6420_v54  ;;  %4800 = vperm.xlu0 %5532, %v6417_v51  }
 0x13a   : > { %v6423_v52 = vpop.permute.xlu1 %648 }
 0x13b   : > { %1030 = vperm.xlu1 %5556, %v5070_v4  }
 0x13c   : > { %v6425_v24 = vpop.permute.xlu0 %2856 }
 0x13d   : > { %9788 = vst [vmem:[#allocation105_spill] sm:$0xff] %v6425_v24  ;;  %5674 = vset.pattern.permute.xlu0 %v9720_v0  ;;  %v5080_v24 = vld [vmem:[%s5897_s28 + $0x100] sm:$0xf] }
 0x13e   : > { %188 = vperm.xlu0 %5674, %v5923_v10  }
 0x13f   : > { %1034 = vperm.xlu1 %5556, %v6381_v48   ;;  %v6430_v56 = vpop.permute.xlu1 %676 }
 0x140   : > { %9789 = vst [vmem:[#allocation106_spill] sm:$0xff] %v6430_v56  ;;  %v6432_v2 = vpop.permute.xlu0 %2868 }
 0x141   : > { %9790 = vst [vmem:[#allocation107_spill] sm:$0xff] %v6432_v2 }
 0x142   : > { %193 = vperm.xlu0 %5674, %v5901_v3  }
 0x143   : > { %5557 = vset.pattern.permute.xlu1 %v9720_v0  ;;  %v6439_v54 = vpop.permute.xlu1 %681 }
 0x144   : > { %9791 = vst [vmem:[#allocation108_spill] sm:$0xff] %v6439_v54  ;;  %1063 = vperm.xlu1 %5557, %v6435_v47   ;;  %v6442_v4 = vpop.permute.xlu0 %2957 }
 0x145   : > { %9792 = vst [vmem:[#allocation109_spill] sm:$0xff] %v6442_v4 }
 0x146   : > { %285 = vperm.xlu0 %5674, %v5906_v5  }
 0x148   : > { %1068 = vperm.xlu1 %5557, %v5080_v24   ;;  %v6446_v10 = vpop.permute.xlu1 %703  ;;  %v6448_v56 = vpop.permute.xlu0 %3050 }
 0x149   : > { %9793 = vst [vmem:[#allocation110_spill] sm:$0xff] %v6448_v56 }
 0x14a   : > { %300 = vperm.xlu0 %5674, %v5910_v6  }
 0x14c   : > { %5558 = vset.pattern.permute.xlu1 %v9706_v50  ;;  %v6452_v3 = vpop.permute.xlu1 %711  ;;  %v6454_v2 = vpop.permute.xlu0 %3062 }
 0x14d   : > { %9794 = vst [vmem:[#allocation111_spill] sm:$0xff] %v6452_v3  ;;  %9795 = vst [vmem:[#allocation112_spill] sm:$0xff] %v6454_v2  ;;  %1090 = vperm.xlu1 %5558, %v5967_v21  }
 0x14e   : > { %387 = vperm.xlu0 %5674, %v5916_v8  }
 0x150   : > { %v6458_v4 = vpop.permute.xlu1 %715  ;;  %v6460_v5 = vpop.permute.xlu0 %3151 }
 0x151   : > { %9796 = vst [vmem:[#allocation113_spill] sm:$0xff] %v6460_v5  ;;  %1098 = vperm.xlu1 %5558, %v5080_v24  }
 0x152   : > { %479 = vperm.xlu0 %5674, %v5920_v9  }
 0x154   : > { %v6463_v56 = vpop.permute.xlu0 %3244 }
 0x155   : > { %9797 = vst [vmem:[#allocation114_spill] sm:$0xff] %v6463_v56  ;;  %1102 = vperm.xlu1 %5558, %v5972_v22   ;;  %v6466_v6 = vpop.permute.xlu1 %736 }
 0x156   : > { %494 = vperm.xlu0 %5674, %v5928_v11  }
 0x158   : > { %v6469_v2 = vpop.permute.xlu0 %3256 }
 0x159   : > { %9798 = vst [vmem:[#allocation115_spill] sm:$0xff] %v6469_v2  ;;  %5559 = vset.pattern.permute.xlu1 %v9714_v46  ;;  %v6472_v8 = vpop.permute.xlu1 %740  ;;  %v6484_v2 = vld [vmem:[%s5897_s28 + $0x118] sm:$0xf] }
 0x15a   : > { %9799 = vst [vmem:[#allocation116_spill] sm:$0xff] %v6472_v8  ;;  %580 = vperm.xlu0 %5674, %v5933_v12   ;;  %1123 = vperm.xlu1 %5559, %v6435_v47  }
 0x15c   : > { %v6476_v9 = vpop.permute.xlu0 %3344 }
 0x15d   : > { %9800 = vst [vmem:[#allocation117_spill] sm:$0xff] %v6476_v9  ;;  %v5090_v9 = vld [vmem:[%s5897_s28 + $0x128] sm:$0xf] }
 0x15e   : > { %671 = vperm.xlu0 %5674, %v5937_v13   ;;  %1127 = vperm.xlu1 %5559, %v5080_v24   ;;  %v6479_v5 = vpop.permute.xlu1 %767 }
 0x160   : > { %v6481_v11 = vpop.permute.xlu0 %3436 }
 0x161   : > { %9801 = vst [vmem:[#allocation118_spill] sm:$0xff] %v6481_v11  ;;  %v6500_v11 = vld [vmem:[%s5897_s28 + $0x130] sm:$0xf] }
 0x162   : > { %686 = vperm.xlu0 %5674, %v5942_v15   ;;  %5560 = vset.pattern.permute.xlu1 %v9720_v0  ;;  %v6488_v56 = vpop.permute.xlu1 %777 }
 0x163   : > { %9802 = vst [vmem:[#allocation119_spill] sm:$0xff] %v6488_v56  ;;  %1155 = vperm.xlu1 %5560, %v6484_v2  }
 0x164   : > { %v6491_v12 = vpop.permute.xlu0 %3448 }
 0x165   : > { %9803 = vst [vmem:[#allocation120_spill] sm:$0xff] %v6491_v12 }
 0x166   : > { %772 = vperm.xlu0 %5674, %v5948_v17   ;;  %v6495_v13 = vpop.permute.xlu1 %782 }
 0x167   : > { %1165 = vperm.xlu1 %5560, %v5090_v9  }
 0x168   : > { %v6497_v24 = vpop.permute.xlu0 %3536 }
 0x169   : > { %9804 = vst [vmem:[#allocation121_spill] sm:$0xff] %v6497_v24 }
 0x16a   : > { %864 = vperm.xlu0 %5674, %v5952_v18  }
 0x16b   : > { %1170 = vperm.xlu1 %5560, %v6500_v11   ;;  %v6504_v15 = vpop.permute.xlu1 %803 }
 0x16c   : > { %v6506_v56 = vpop.permute.xlu0 %3629 }
 0x16d   : > { %9805 = vst [vmem:[#allocation122_spill] sm:$0xff] %v6506_v56 }
 0x16e   : > { %879 = vperm.xlu0 %5674, %v5958_v19  }
 0x16f   : > { %5561 = vset.pattern.permute.xlu1 %v9706_v50  ;;  %v6510_v17 = vpop.permute.xlu1 %807 }
 0x170   : > { %9806 = vst [vmem:[#allocation123_spill] sm:$0xff] %v6510_v17  ;;  %1191 = vperm.xlu1 %5561, %v5976_v23   ;;  %v6513_v12 = vpop.permute.xlu0 %3641 }
 0x171   : > { %9807 = vst [vmem:[#allocation124_spill] sm:$0xff] %v6513_v12 }
 0x172   : > { %966 = vperm.xlu0 %5674, %v5962_v20  }
 0x174   : > { %1195 = vperm.xlu1 %5561, %v5090_v9   ;;  %v6516_v18 = vpop.permute.xlu1 %828  ;;  %v6518_v24 = vpop.permute.xlu0 %3730 }
 0x175   : > { %9808 = vst [vmem:[#allocation125_spill] sm:$0xff] %v6518_v24 }
 0x176   : > { %1058 = vperm.xlu0 %5674, %v5967_v21  }
 0x178   : > { %5562 = vset.pattern.permute.xlu1 %v9714_v46  ;;  %v6522_v19 = vpop.permute.xlu1 %836  ;;  %v6524_v56 = vpop.permute.xlu0 %3823 }
 0x179   : > { %9809 = vst [vmem:[#allocation126_spill] sm:$0xff] %v6522_v19  ;;  %9810 = vst [vmem:[#allocation127_spill] sm:$0xff] %v6524_v56  ;;  %1216 = vperm.xlu1 %5562, %v6484_v2   ;;  %v6540_v56 = vld [vmem:[%s5897_s28 + $0xa9] sm:$0xf] }
 0x17a   : > { %1073 = vperm.xlu0 %5674, %v5972_v22  }
 0x17c   : > { %v6528_v20 = vpop.permute.xlu1 %840  ;;  %v6530_v12 = vpop.permute.xlu0 %3835 }
 0x17d   : > { %9811 = vst [vmem:[#allocation128_spill] sm:$0xff] %v6530_v12  ;;  %1224 = vperm.xlu1 %5562, %v5090_v9  }
 0x17e   : > { %1160 = vperm.xlu0 %5674, %v5976_v23   ;;  %v5100_v23 = vld [vmem:[%s5897_s28 + $0xb1] sm:$0xf] }
 0x180   : > { %v6533_v24 = vpop.permute.xlu0 %3924 }
 0x181   : > { %9812 = vst [vmem:[#allocation129_spill] sm:$0xff] %v6533_v24  ;;  %1228 = vperm.xlu1 %5562, %v6500_v11   ;;  %v6536_v21 = vpop.permute.xlu1 %869 }
 0x182   : > { %1251 = vperm.xlu0 %5674, %v5982_v25  }
 0x184   : > { %v6542_v19 = vpop.permute.xlu0 %4016 }
 0x185   : > { %9813 = vst [vmem:[#allocation130_spill] sm:$0xff] %v6542_v19  ;;  %5563 = vset.pattern.permute.xlu1 %v9720_v0  ;;  %v6545_v22 = vpop.permute.xlu1 %874 }
 0x186   : > { %9814 = vst [vmem:[#allocation131_spill] sm:$0xff] %v6545_v22  ;;  %1266 = vperm.xlu0 %5674, %v5987_v27   ;;  %1256 = vperm.xlu1 %5563, %v6540_v56  }
 0x188   : > { %v6550_v9 = vpop.permute.xlu0 %4028 }
 0x189   : > { %9815 = vst [vmem:[#allocation132_spill] sm:$0xff] %v6550_v9 }
 0x18a   : > { %1352 = vperm.xlu0 %5674, %v5992_v29   ;;  %1261 = vperm.xlu1 %5563, %v5100_v23   ;;  %v6553_v24 = vpop.permute.xlu1 %896 }
 0x18c   : > { %v6555_v12 = vpop.permute.xlu0 %4116 }
 0x18d   : > { %9816 = vst [vmem:[#allocation133_spill] sm:$0xff] %v6555_v12 }
 0x18e   : > { %1443 = vperm.xlu0 %5674, %v5996_v30   ;;  %5564 = vset.pattern.permute.xlu1 %v9706_v50  ;;  %v6559_v19 = vpop.permute.xlu1 %904 }
 0x18f   : > { %9817 = vst [vmem:[#allocation134_spill] sm:$0xff] %v6559_v19  ;;  %1283 = vperm.xlu1 %5564, %v5982_v25  }
 0x190   : > { %v6562_v22 = vpop.permute.xlu0 %4208 }
 0x191   : > { %9818 = vst [vmem:[#allocation135_spill] sm:$0xff] %v6562_v22 }
 0x192   : > { %1458 = vperm.xlu0 %5674, %v6002_v31   ;;  %v6565_v9 = vpop.permute.xlu1 %908 }
 0x193   : > { %1291 = vperm.xlu1 %5564, %v5100_v23  }
 0x194   : > { %v6567_v17 = vpop.permute.xlu0 %4220 }
 0x195   : > { %9819 = vst [vmem:[#allocation136_spill] sm:$0xff] %v6567_v17 }
 0x196   : > { %1545 = vperm.xlu0 %5674, %v6006_v32  }
 0x197   : > { %1295 = vperm.xlu1 %5564, %v5987_v27   ;;  %v6571_v12 = vpop.permute.xlu1 %929 }
 0x198   : > { %9820 = vst [vmem:[#allocation137_spill] sm:$0xff] %v6571_v12  ;;  %v6573_v8 = vpop.permute.xlu0 %4309  ;;  %v10093_v12 = vld [vmem:[#allocation6_spill] sm:$0xff] }
 0x199   : > { %9821 = vst [vmem:[#allocation138_spill] sm:$0xff] %v6573_v8  ;;  %v6589_v8 = vld [vmem:[%s5897_s28 + $0xc9] sm:$0xf] }
 0x19a   : > { %1637 = vperm.xlu0 %5674, %v6011_v33  }
 0x19b   : > { %5565 = vset.pattern.permute.xlu1 %v9714_v46  ;;  %v6577_v25 = vpop.permute.xlu1 %933 }
 0x19c   : > { %9822 = vst [vmem:[#allocation139_spill] sm:$0xff] %v6577_v25  ;;  %1316 = vperm.xlu1 %5565, %v6540_v56   ;;  %v6580_v22 = vpop.permute.xlu0 %4402 }
 0x19d   : > { %9823 = vst [vmem:[#allocation140_spill] sm:$0xff] %v6580_v22  ;;  %v5110_v22 = vld [vmem:[%s5897_s28 + $0xd9] sm:$0xf] }
 0x19e   : > { %1652 = vperm.xlu0 %5674, %v6015_v34  }
 0x1a0   : > { %1320 = vperm.xlu1 %5565, %v5100_v23   ;;  %v6583_v27 = vpop.permute.xlu1 %961  ;;  %v6585_v17 = vpop.permute.xlu0 %4414 }
 0x1a1   : > { %9824 = vst [vmem:[#allocation141_spill] sm:$0xff] %v6585_v17 }
 0x1a2   : > { %1739 = vperm.xlu0 %5674, %v6019_v35   ;;  %v6605_v35 = vld [vmem:[%s5897_s28 + $0xe1] sm:$0xf] }
 0x1a4   : > { %5566 = vset.pattern.permute.xlu1 %v9720_v0  ;;  %v6592_v19 = vpop.permute.xlu1 %971  ;;  %v6594_v25 = vpop.permute.xlu0 %4503 }
 0x1a5   : > { %9825 = vst [vmem:[#allocation142_spill] sm:$0xff] %v6592_v19  ;;  %9826 = vst [vmem:[#allocation143_spill] sm:$0xff] %v6594_v25  ;;  %1347 = vperm.xlu1 %5566, %v6589_v8  }
 0x1a6   : > { %1831 = vperm.xlu0 %5674, %v6025_v37  }
 0x1a8   : > { %v6599_v23 = vpop.permute.xlu1 %976  ;;  %v6601_v3 = vpop.permute.xlu0 %4596 }
 0x1a9   : > { %9827 = vst [vmem:[#allocation144_spill] sm:$0xff] %v6599_v23  ;;  %9828 = vst [vmem:[#allocation145_spill] sm:$0xff] %v6601_v3  ;;  %1357 = vperm.xlu1 %5566, %v5110_v22  }
 0x1aa   : > { %1846 = vperm.xlu0 %5674, %v6030_v39  }
 0x1ac   : > { %v6607_v17 = vpop.permute.xlu0 %4608 }
 0x1ad   : > { %9829 = vst [vmem:[#allocation146_spill] sm:$0xff] %v6607_v17  ;;  %1362 = vperm.xlu1 %5566, %v6605_v35   ;;  %v6610_v19 = vpop.permute.xlu1 %997 }
 0x1ae   : > { %9830 = vst [vmem:[#allocation147_spill] sm:$0xff] %v6610_v19  ;;  %1932 = vperm.xlu0 %5674, %v6035_v40  }
 0x1b0   : > { %v6613_v25 = vpop.permute.xlu0 %4696 }
 0x1b1   : > { %9831 = vst [vmem:[#allocation148_spill] sm:$0xff] %v6613_v25  ;;  %5567 = vset.pattern.permute.xlu1 %v9706_v50  ;;  %v6616_v37 = vpop.permute.xlu1 %1001  ;;  %v5120_v25 = vld [vmem:[%s5897_s28 + $0x101] sm:$0xf] }
 0x1b2   : > { %9832 = vst [vmem:[#allocation149_spill] sm:$0xff] %v6616_v37  ;;  %2023 = vperm.xlu0 %5674, %v6040_v41   ;;  %1383 = vperm.xlu1 %5567, %v5992_v29  }
 0x1b4   : > { %v6620_v39 = vpop.permute.xlu0 %4788 }
 0x1b5   : > { %9833 = vst [vmem:[#allocation150_spill] sm:$0xff] %v6620_v39  ;;  %v6646_v39 = vld [vmem:[%s5897_s28 + $0xf9] sm:$0xf] }
 0x1b6   : > { %2038 = vperm.xlu0 %5674, %v6044_v42   ;;  %1387 = vperm.xlu1 %5567, %v5110_v22   ;;  %v6623_v17 = vpop.permute.xlu1 %1022 }
 0x1b7   : > { %9834 = vst [vmem:[#allocation151_spill] sm:$0xff] %v6623_v17 }
 0x1b8   : > { %v6625_v3 = vpop.permute.xlu0 %4800 }
 0x1b9   : > { %9835 = vst [vmem:[#allocation152_spill] sm:$0xff] %v6625_v3 }
 0x1ba   : > { %2124 = vperm.xlu0 %5674, %v6049_v43   ;;  %5568 = vset.pattern.permute.xlu1 %v9714_v46  ;;  %v6629_v40 = vpop.permute.xlu1 %1030 }
 0x1bb   : > { %9836 = vst [vmem:[#allocation153_spill] sm:$0xff] %v6629_v40  ;;  %1408 = vperm.xlu1 %5568, %v6589_v8  }
 0x1bd   : > { %v6632_v29 = vpop.permute.xlu0 %188 }
 0x1be   : > { %2216 = vperm.xlu0 %5674, %v6054_v44   ;;  %v6635_v41 = vpop.permute.xlu1 %1034 }
 0x1bf   : > { %9837 = vst [vmem:[#allocation154_spill] sm:$0xff] %v6635_v41  ;;  %1416 = vperm.xlu1 %5568, %v5110_v22   ;;  %v10084_v41 = vld [vmem:[#allocation7_spill] sm:$0xff] }
 0x1c1   : > { %v6637_v42 = vpop.permute.xlu0 %193 }
 0x1c2   : > { %2231 = vperm.xlu0 %5674, %v6058_v45  }
 0x1c3   : > { %1420 = vperm.xlu1 %5568, %v6605_v35   ;;  %v6641_v43 = vpop.permute.xlu1 %1063 }
 0x1c4   : > { %9838 = vst [vmem:[#allocation155_spill] sm:$0xff] %v6641_v43  ;;  %v5693_v43 = vld [vmem:[%s5897_s28 + $0x169] sm:$0xf] }
 0x1c5   : > { %v6643_v3 = vpop.permute.xlu0 %285 }
 0x1c6   : > { %2318 = vperm.xlu0 %5674, %v6068_v49  }
 0x1c7   : > { %5569 = vset.pattern.permute.xlu1 %v9720_v0  ;;  %v6650_v44 = vpop.permute.xlu1 %1068 }
 0x1c8   : > { %9839 = vst [vmem:[#allocation156_spill] sm:$0xff] %v6650_v44  ;;  %1448 = vperm.xlu1 %5569, %v6646_v39  }
 0x1c9   : > { %v6653_v22 = vpop.permute.xlu0 %300 }
 0x1ca   : > { %2410 = vperm.xlu0 %5674, %v6077_v53  }
 0x1cc   : > { %1453 = vperm.xlu1 %5569, %v5120_v25   ;;  %v6657_v45 = vpop.permute.xlu1 %1090 }
 0x1cd   : > { %9840 = vst [vmem:[#allocation157_spill] sm:$0xff] %v6657_v45  ;;  %v6659_v40 = vpop.permute.xlu0 %387 }
 0x1ce   : > { %2425 = vperm.xlu0 %5674, %v6086_v57  }
 0x1d0   : > { %5570 = vset.pattern.permute.xlu1 %v9706_v50  ;;  %v6663_v49 = vpop.permute.xlu1 %1098 }
 0x1d1   : > { %9841 = vst [vmem:[#allocation158_spill] sm:$0xff] %v6663_v49  ;;  %1475 = vperm.xlu1 %5570, %v5996_v30   ;;  %v6666_v44 = vpop.permute.xlu0 %479 }
 0x1d2   : > { %2512 = vperm.xlu0 %5674, %v6096_v60  }
 0x1d4   : > { %v6669_v37 = vpop.permute.xlu1 %1102 }
 0x1d5   : > { %9842 = vst [vmem:[#allocation159_spill] sm:$0xff] %v6669_v37  ;;  %1483 = vperm.xlu1 %5570, %v5120_v25   ;;  %v6671_v53 = vpop.permute.xlu0 %494 }
 0x1d6   : > { %2603 = vperm.xlu0 %5674, %v6104_v63  }
 0x1d9   : > { %1487 = vperm.xlu1 %5570, %v6002_v31   ;;  %v6675_v57 = vpop.permute.xlu1 %1123  ;;  %v6677_v54 = vpop.permute.xlu0 %580 }
 0x1da   : > { %9843 = vst [vmem:[#allocation160_spill] sm:$0xff] %v6675_v57  ;;  %2618 = vperm.xlu0 %5674, %v6113_v14   ;;  %v6693_v14 = vld [vmem:[%s5897_s28 + $0x140] sm:$0xf] }
 0x1dd   : > { %5571 = vset.pattern.permute.xlu1 %v9714_v46  ;;  %v6681_v30 = vpop.permute.xlu1 %1127  ;;  %v6683_v60 = vpop.permute.xlu0 %671 }
 0x1de   : > { %9844 = vst [vmem:[#allocation161_spill] sm:$0xff] %v6681_v30  ;;  %2704 = vperm.xlu0 %5674, %v6121_v26   ;;  %1508 = vperm.xlu1 %5571, %v6646_v39   ;;  %v5130_v26 = vld [vmem:[%s5897_s28 + $0x150] sm:$0xf] }
 0x1e1   : > { %v6687_v63 = vpop.permute.xlu0 %686 }
 0x1e2   : > { %2795 = vperm.xlu0 %5674, %v6127_v36   ;;  %1512 = vperm.xlu1 %5571, %v5120_v25   ;;  %v6690_v31 = vpop.permute.xlu1 %1155  ;;  %v6709_v25 = vld [vmem:[%s5897_s28 + $0x158] sm:$0xf] }
 0x1e3   : > { %9845 = vst [vmem:[#allocation162_spill] sm:$0xff] %v6690_v31 }
 0x1e5   : > { %v6695_v49 = vpop.permute.xlu0 %772 }
 0x1e6   : > { %2810 = vperm.xlu0 %5674, %v6136_v7   ;;  %5572 = vset.pattern.permute.xlu1 %v9720_v0  ;;  %v6699_v30 = vpop.permute.xlu1 %1165 }
 0x1e7   : > { %9846 = vst [vmem:[#allocation163_spill] sm:$0xff] %v6699_v30  ;;  %1540 = vperm.xlu1 %5572, %v6693_v14  }
 0x1e9   : > { %v6703_v57 = vpop.permute.xlu0 %864 }
 0x1ea   : > { %2897 = vperm.xlu0 %5674, %v6146_v59   ;;  %v6706_v36 = vpop.permute.xlu1 %1170 }
 0x1eb   : > { %9847 = vst [vmem:[#allocation164_spill] sm:$0xff] %v6706_v36  ;;  %1550 = vperm.xlu1 %5572, %v5130_v26  }
 0x1ed   : > { %v6711_v31 = vpop.permute.xlu0 %879 }
 0x1ee   : > { %2989 = vperm.xlu0 %5674, %v6154_v1  }
 0x1ef   : > { %1555 = vperm.xlu1 %5572, %v6709_v25   ;;  %v6715_v7 = vpop.permute.xlu1 %1191 }
 0x1f0   : > { %9848 = vst [vmem:[#allocation165_spill] sm:$0xff] %v6715_v7 }
 0x1f1   : > { %v6717_v30 = vpop.permute.xlu0 %966 }
 0x1f2   : > { %9849 = vst [vmem:[#allocation166_spill] sm:$0xff] %v6717_v30  ;;  %3004 = vperm.xlu0 %5674, %v6164_v16  }
 0x1f3   : > { %5573 = vset.pattern.permute.xlu1 %v9706_v50  ;;  %v6721_v59 = vpop.permute.xlu1 %1195 }
 0x1f4   : > { %9850 = vst [vmem:[#allocation167_spill] sm:$0xff] %v6721_v59  ;;  %1576 = vperm.xlu1 %5573, %v6006_v32  }
 0x1f5   : > { %v6724_v36 = vpop.permute.xlu0 %1058 }
 0x1f6   : > { %9851 = vst [vmem:[#allocation168_spill] sm:$0xff] %v6724_v36  ;;  %3091 = vperm.xlu0 %5674, %v6172_v61   ;;  %v10085_v36 = vld [vmem:[#allocation14_spill] sm:$0xff] }
 0x1f8   : > { %1580 = vperm.xlu1 %5573, %v5130_v26   ;;  %v6727_v1 = vpop.permute.xlu1 %1216 }
 0x1f9   : > { %9852 = vst [vmem:[#allocation169_spill] sm:$0xff] %v6727_v1  ;;  %v6729_v37 = vpop.permute.xlu0 %1073  ;;  %v9867_v1 = vld [vmem:[#allocation47_spill] sm:$0xff] }
 0x1fa   : > { %9853 = vst [vmem:[#allocation170_spill] sm:$0xff] %v6729_v37  ;;  %3183 = vperm.xlu0 %5674, %v6181_v58  }
 0x1fc   : > { %5574 = vset.pattern.permute.xlu1 %v9714_v46  ;;  %v6733_v16 = vpop.permute.xlu1 %1224 }
 0x1fd   : > { %9854 = vst [vmem:[#allocation171_spill] sm:$0xff] %v6733_v16  ;;  %1601 = vperm.xlu1 %5574, %v6693_v14   ;;  %v6736_v59 = vpop.permute.xlu0 %1160  ;;  %v6751_v16 = vld [vmem:[%s5897_s28 + $0x170] sm:$0xf] }
 0x1fe   : > { %9855 = vst [vmem:[#allocation172_spill] sm:$0xff] %v6736_v59  ;;  %3198 = vperm.xlu0 %5674, %v6190_v28  }
 0x200   : > { %v6739_v32 = vpop.permute.xlu1 %1228 }
 0x201   : > { %9856 = vst [vmem:[#allocation173_spill] sm:$0xff] %v6739_v32  ;;  %1609 = vperm.xlu1 %5574, %v5130_v26   ;;  %v6741_v61 = vpop.permute.xlu0 %1251  ;;  %v9862_v26 = vld [vmem:[#allocation41_spill] sm:$0xff] }
 0x202   : > { %9857 = vst [vmem:[#allocation174_spill] sm:$0xff] %v6741_v61  ;;  %3284 = vperm.xlu0 %5674, %v6198_v55   ;;  %v5140_v55 = vld [vmem:[%s5897_s28 + $0x178] sm:$0xf] }
 0x205   : > { %1613 = vperm.xlu1 %5574, %v6709_v25   ;;  %v6745_v58 = vpop.permute.xlu1 %1256  ;;  %v6747_v7 = vpop.permute.xlu0 %1266 }
 0x206   : > { %9858 = vst [vmem:[#allocation175_spill] sm:$0xff] %v6745_v58  ;;  %9859 = vst [vmem:[#allocation176_spill] sm:$0xff] %v6747_v7  ;;  %3375 = vperm.xlu0 %5674, %v6210_v38   ;;  %v9864_v58 = vld [vmem:[#allocation44_spill] sm:$0xff] }
 0x209   : > { %5575 = vset.pattern.permute.xlu1 %v9720_v0  ;;  %v6754_v28 = vpop.permute.xlu1 %1261  ;;  %v6756_v32 = vpop.permute.xlu0 %1352 }
 0x20a   : > { %9860 = vst [vmem:[#allocation177_spill] sm:$0xff] %v6754_v28  ;;  %9861 = vst [vmem:[#allocation178_spill] sm:$0xff] %v6756_v32  ;;  %3390 = vperm.xlu0 %5674, %v9862_v26   ;;  %1642 = vperm.xlu1 %5575, %v6751_v16   ;;  %v9870_v32 = vld [vmem:[#allocation50_spill] sm:$0xff] }
 0x20d   : > { %v6761_v61 = vpop.permute.xlu0 %1443 }
 0x20e   : > { %9863 = vst [vmem:[#allocation41_spill] sm:$0xff] %v6761_v61  ;;  %3476 = vperm.xlu0 %5674, %v9864_v58   ;;  %1647 = vperm.xlu1 %5575, %v5140_v55   ;;  %v6764_v7 = vpop.permute.xlu1 %1283 }
 0x20f   : > { %9865 = vst [vmem:[#allocation44_spill] sm:$0xff] %v6764_v7  ;;  %v9873_v7 = vld [vmem:[#allocation53_spill] sm:$0xff] }
 0x211   : > { %v6766_v38 = vpop.permute.xlu0 %1458 }
 0x212   : > { %9866 = vst [vmem:[#allocation179_spill] sm:$0xff] %v6766_v38  ;;  %3568 = vperm.xlu0 %5674, %v9867_v1   ;;  %5576 = vset.pattern.permute.xlu1 %v9706_v50  ;;  %v6770_v28 = vpop.permute.xlu1 %1291 }
 0x213   : > { %9868 = vst [vmem:[#allocation47_spill] sm:$0xff] %v6770_v28  ;;  %1669 = vperm.xlu1 %5576, %v6011_v33   ;;  %v9876_v28 = vld [vmem:[#allocation56_spill] sm:$0xff] }
 0x215   : > { %v6773_v26 = vpop.permute.xlu0 %1545 }
 0x216   : > { %9869 = vst [vmem:[#allocation180_spill] sm:$0xff] %v6773_v26  ;;  %3583 = vperm.xlu0 %5674, %v9870_v32   ;;  %v6776_v61 = vpop.permute.xlu1 %1295 }
 0x217   : > { %9871 = vst [vmem:[#allocation50_spill] sm:$0xff] %v6776_v61  ;;  %1677 = vperm.xlu1 %5576, %v5140_v55  }
 0x219   : > { %v6778_v58 = vpop.permute.xlu0 %1637 }
 0x21a   : > { %9872 = vst [vmem:[#allocation181_spill] sm:$0xff] %v6778_v58  ;;  %3670 = vperm.xlu0 %5674, %v9873_v7   ;;  %v9879_v58 = vld [vmem:[#allocation59_spill] sm:$0xff] }
 0x21b   : > { %1681 = vperm.xlu1 %5576, %v6015_v34   ;;  %v6782_v1 = vpop.permute.xlu1 %1316 }
 0x21c   : > { %9874 = vst [vmem:[#allocation53_spill] sm:$0xff] %v6782_v1  ;;  %v6816_v1 = vld [vmem:[%s5897_s28 + $0x1a8] sm:$0xf] }
 0x21d   : > { %v6784_v38 = vpop.permute.xlu0 %1652 }
 0x21e   : > { %9875 = vst [vmem:[#allocation182_spill] sm:$0xff] %v6784_v38  ;;  %3762 = vperm.xlu0 %5674, %v9876_v28   ;;  %v9882_v38 = vld [vmem:[#allocation62_spill] sm:$0xff]  ;;  %v6800_v28 = vld [vmem:[%s5897_s28 + $0x190] sm:$0xf] }
 0x21f   : > { %5577 = vset.pattern.permute.xlu1 %v9714_v46  ;;  %v6788_v33 = vpop.permute.xlu1 %1320 }
 0x220   : > { %9877 = vst [vmem:[#allocation56_spill] sm:$0xff] %v6788_v33  ;;  %1702 = vperm.xlu1 %5577, %v6751_v16  }
 0x221   : > { %v6791_v32 = vpop.permute.xlu0 %1739 }
 0x222   : > { %9878 = vst [vmem:[#allocation183_spill] sm:$0xff] %v6791_v32  ;;  %3777 = vperm.xlu0 %5674, %v9879_v58   ;;  %v9885_v32 = vld [vmem:[#allocation66_spill] sm:$0xff] }
 0x224   : > { %1706 = vperm.xlu1 %5577, %v5140_v55   ;;  %v6794_v34 = vpop.permute.xlu1 %1347  ;;  %v5150_v55 = vld [vmem:[%s5897_s28 + $0x1a0] sm:$0xf] }
 0x225   : > { %9880 = vst [vmem:[#allocation59_spill] sm:$0xff] %v6794_v34  ;;  %v6796_v7 = vpop.permute.xlu0 %1831 }
 0x226   : > { %9881 = vst [vmem:[#allocation184_spill] sm:$0xff] %v6796_v7  ;;  %3864 = vperm.xlu0 %5674, %v9882_v38   ;;  %v9888_v38 = vld [vmem:[#allocation69_spill] sm:$0xff] }
 0x228   : > { %5578 = vset.pattern.permute.xlu1 %v9720_v0  ;;  %v6803_v26 = vpop.permute.xlu1 %1357 }
 0x229   : > { %9883 = vst [vmem:[#allocation62_spill] sm:$0xff] %v6803_v26  ;;  %1734 = vperm.xlu1 %5578, %v6800_v28   ;;  %v6806_v33 = vpop.permute.xlu0 %1846 }
 0x22a   : > { %9884 = vst [vmem:[#allocation185_spill] sm:$0xff] %v6806_v33  ;;  %3955 = vperm.xlu0 %5674, %v9885_v32   ;;  %v9891_v33 = vld [vmem:[#allocation72_spill] sm:$0xff] }
 0x22c   : > { %v6810_v58 = vpop.permute.xlu1 %1362 }
 0x22d   : > { %9886 = vst [vmem:[#allocation66_spill] sm:$0xff] %v6810_v58  ;;  %1744 = vperm.xlu1 %5578, %v5150_v55   ;;  %v6812_v7 = vpop.permute.xlu0 %1932  ;;  %v9893_v58 = vld [vmem:[#allocation75_spill] sm:$0xff] }
 0x22e   : > { %9887 = vst [vmem:[#allocation186_spill] sm:$0xff] %v6812_v7  ;;  %3970 = vperm.xlu0 %5674, %v9888_v38   ;;  %v5680_v7 = vld [vmem:[%s5897_s28 + $0x198] sm:$0xf]  ;;  %v9895_v38 = vld [vmem:[#allocation77_spill] sm:$0xff] }
 0x231   : > { %1749 = vperm.xlu1 %5578, %v6816_v1   ;;  %v6819_v26 = vpop.permute.xlu1 %1383  ;;  %v6821_v34 = vpop.permute.xlu0 %2023 }
 0x232   : > { %9889 = vst [vmem:[#allocation69_spill] sm:$0xff] %v6819_v26  ;;  %9890 = vst [vmem:[#allocation187_spill] sm:$0xff] %v6821_v34  ;;  %4056 = vperm.xlu0 %5674, %v9891_v33   ;;  %v9898_v34 = vld [vmem:[#allocation80_spill] sm:$0xff] }
 0x235   : > { %5579 = vset.pattern.permute.xlu1 %v9706_v50  ;;  %v6825_v32 = vpop.permute.xlu1 %1387  ;;  %v6828_v61 = vpop.permute.xlu0 %2038 }
 0x236   : > { %9892 = vst [vmem:[#allocation72_spill] sm:$0xff] %v6825_v32  ;;  %4147 = vperm.xlu0 %5674, %v9893_v58   ;;  %9894 = vst [vmem:[#allocation75_spill] sm:$0xff] %v6828_v61  ;;  %1770 = vperm.xlu1 %5579, %v5680_v7   ;;  %v9901_v7 = vld [vmem:[#allocation83_spill] sm:$0xff]  ;;  %v9903_v32 = vld [vmem:[#allocation86_spill] sm:$0xff] }
 0x237   : > { %v6853_v61 = vld [vmem:[%s5897_s28 + $0x1c0] sm:$0xf] }
 0x239   : > { %v6834_v26 = vpop.permute.xlu0 %2124 }
 0x23a   : > { %4162 = vperm.xlu0 %5674, %v9895_v38   ;;  %1774 = vperm.xlu1 %5579, %v5150_v55   ;;  %v6832_v59 = vpop.permute.xlu1 %1408  ;;  %9897 = vst [vmem:[#allocation188_spill] sm:$0xff] %v6834_v26 }
 0x23b   : > { %9896 = vst [vmem:[#allocation77_spill] sm:$0xff] %v6832_v59 }
 0x23d   : > { %v6841_v58 = vpop.permute.xlu0 %2216 }
 0x23e   : > { %4249 = vperm.xlu0 %5674, %v9898_v34   ;;  %5580 = vset.pattern.permute.xlu1 %v9714_v46  ;;  %v6838_v33 = vpop.permute.xlu1 %1416  ;;  %9900 = vst [vmem:[#allocation189_spill] sm:$0xff] %v6841_v58 }
 0x23f   : > { %9899 = vst [vmem:[#allocation80_spill] sm:$0xff] %v6838_v33  ;;  %1795 = vperm.xlu1 %5580, %v6800_v28   ;;  %v9906_v33 = vld [vmem:[#allocation90_spill] sm:$0xff] }
 0x241   : > { %v6850_v34 = vpop.permute.xlu0 %2231 }
 0x242   : > { %4341 = vperm.xlu0 %5674, %v9901_v7   ;;  %v6844_v38 = vpop.permute.xlu1 %1420  ;;  %9905 = vst [vmem:[#allocation190_spill] sm:$0xff] %v6850_v34  ;;  %v9909_v7 = vld [vmem:[#allocation93_spill] sm:$0xff]  ;;  %v9911_v34 = vld [vmem:[#allocation96_spill] sm:$0xff] }
 0x243   : > { %9902 = vst [vmem:[#allocation83_spill] sm:$0xff] %v6844_v38  ;;  %1803 = vperm.xlu1 %5580, %v5150_v55   ;;  %v5160_v55 = vld [vmem:[%s5897_s28 + $0x1c8] sm:$0xf] }
 0x246   : > { %4356 = vperm.xlu0 %5674, %v9903_v32   ;;  %v6861_v32 = vpop.permute.xlu0 %2318 }
 0x247   : > { %1807 = vperm.xlu1 %5580, %v6816_v1   ;;  %v6848_v26 = vpop.permute.xlu1 %1448  ;;  %9908 = vst [vmem:[#allocation191_spill] sm:$0xff] %v6861_v32  ;;  %v9916_v32 = vld [vmem:[#allocation101_spill] sm:$0xff] }
 0x248   : > { %9904 = vst [vmem:[#allocation86_spill] sm:$0xff] %v6848_v26 }
 0x24a   : > { %4443 = vperm.xlu0 %5674, %v9906_v33   ;;  %v6867_v38 = vpop.permute.xlu0 %2410 }
 0x24b   : > { %5581 = vset.pattern.permute.xlu1 %v9720_v0  ;;  %v6857_v58 = vpop.permute.xlu1 %1453  ;;  %9912 = vst [vmem:[#allocation96_spill] sm:$0xff] %v6867_v38  ;;  %v5469_v38 = vld [vmem:[%s5897_s28 + $0x1a1] sm:$0xf] }
 0x24c   : > { %9907 = vst [vmem:[#allocation90_spill] sm:$0xff] %v6857_v58  ;;  %1836 = vperm.xlu1 %5581, %v6853_v61   ;;  %v5681_v58 = vld [vmem:[%s5897_s28 + $0x1b8] sm:$0xf] }
 0x24e   : > { %4535 = vperm.xlu0 %5674, %v9909_v7   ;;  %v6876_v7 = vpop.permute.xlu0 %2425 }
 0x24f   : > { %9915 = vst [vmem:[#allocation194_spill] sm:$0xff] %v6876_v7 }
 0x250   : > { %1841 = vperm.xlu1 %5581, %v5160_v55   ;;  %v6864_v26 = vpop.permute.xlu1 %1475 }
 0x251   : > { %9910 = vst [vmem:[#allocation93_spill] sm:$0xff] %v6864_v26  ;;  %v5682_v26 = vld [vmem:[%s5897_s28 + $0x1d0] sm:$0xf] }
 0x252   : > { %4550 = vperm.xlu0 %5674, %v9911_v34  }
 0x254   : > { %5582 = vset.pattern.permute.xlu1 %v9706_v50  ;;  %v6870_v33 = vpop.permute.xlu1 %1483 }
 0x255   : > { %9913 = vst [vmem:[#allocation192_spill] sm:$0xff] %v6870_v33  ;;  %1863 = vperm.xlu1 %5582, %v5681_v58   ;;  %v6884_v58 = vpop.permute.xlu0 %2512  ;;  %v5685_v33 = vld [vmem:[%s5897_s28 + $0x30] sm:$0xf] }
 0x256   : > { %4636 = vperm.xlu0 %5674, %v6400_v62   ;;  %9918 = vst [vmem:[#allocation195_spill] sm:$0xff] %v6884_v58  ;;  %v6897_v58 = vld [vmem:[%s5897_s28 + $0x141] sm:$0xf] }
 0x258   : > { %v6874_v59 = vpop.permute.xlu1 %1487 }
 0x259   : > { %9914 = vst [vmem:[#allocation193_spill] sm:$0xff] %v6874_v59  ;;  %1871 = vperm.xlu1 %5582, %v5160_v55  }
 0x25a   : > { %4727 = vperm.xlu0 %5674, %v9916_v32   ;;  %v6890_v32 = vpop.permute.xlu0 %2603 }
 0x25b   : > { %9920 = vst [vmem:[#allocation197_spill] sm:$0xff] %v6890_v32 }
 0x25d   : > { %1875 = vperm.xlu1 %5582, %v5682_v26   ;;  %v6880_v34 = vpop.permute.xlu1 %1508  ;;  %v5683_v26 = vld [vmem:[%s5897_s28] sm:$0xf] }
 0x25e   : > { %9917 = vst [vmem:[#allocation101_spill] sm:$0xff] %v6880_v34  ;;  %4742 = vperm.xlu0 %5674, %v6417_v51   ;;  %v6904_v32 = vpop.permute.xlu0 %2618 }
 0x25f   : > { %9923 = vst [vmem:[#allocation200_spill] sm:$0xff] %v6904_v32  ;;  %v5687_v32 = vld [vmem:[%s5897_s28 + $0x68] sm:$0xf] }
 0x261   : > { %5583 = vset.pattern.permute.xlu1 %v9714_v46  ;;  %v6887_v62 = vpop.permute.xlu1 %1512 }
 0x262   : > { %9919 = vst [vmem:[#allocation196_spill] sm:$0xff] %v6887_v62  ;;  %4828 = vperm.xlu0 %5674, %v5469_v38   ;;  %1896 = vperm.xlu1 %5583, %v6853_v61   ;;  %v5684_v38 = vld [vmem:[%s5897_s28 + $0x18] sm:$0xf]  ;;  %v6913_v34 = vpop.permute.xlu0 %2704 }
 0x263   : > { %9925 = vst [vmem:[#allocation202_spill] sm:$0xff] %v6913_v34  ;;  %v5689_v34 = vld [vmem:[%s5897_s28 + $0x80] sm:$0xf] }
 0x266   : > { %5676 = vset.pattern.permute.xlu0 %v9706_v50  ;;  %1900 = vperm.xlu1 %5583, %v5160_v55   ;;  %v6893_v51 = vpop.permute.xlu1 %1540  ;;  %v5170_v55 = vld [vmem:[%s5897_s28 + $0x151] sm:$0xf] }
 0x267   : > { %9921 = vst [vmem:[#allocation198_spill] sm:$0xff] %v6893_v51  ;;  %220 = vperm.xlu0 %5676, %v5683_v26   ;;  %v6911_v26 = vld [vmem:[%s5897_s28 + $0x159] sm:$0xf]  ;;  %v5688_v51 = vld [vmem:[%s5897_s28 + $0x149] sm:$0xf] }
 0x26a   : > { %5584 = vset.pattern.permute.xlu1 %v9720_v0  ;;  %v6900_v7 = vpop.permute.xlu1 %1550 }
 0x26b   : > { %9922 = vst [vmem:[#allocation199_spill] sm:$0xff] %v6900_v7  ;;  %232 = vperm.xlu0 %5676, %v5684_v38   ;;  %1927 = vperm.xlu1 %5584, %v6897_v58   ;;  %v5686_v7 = vld [vmem:[%s5897_s28 + $0x50] sm:$0xf] }
 0x26e   : > { %v6907_v62 = vpop.permute.xlu1 %1555 }
 0x26f   : > { %9924 = vst [vmem:[#allocation201_spill] sm:$0xff] %v6907_v62  ;;  %321 = vperm.xlu0 %5676, %v5685_v33   ;;  %1937 = vperm.xlu1 %5584, %v5170_v55   ;;  %v6923_v33 = vpop.permute.xlu0 %2795 }
 0x270   : > { %9928 = vst [vmem:[#allocation205_spill] sm:$0xff] %v6923_v33  ;;  %v5691_v33 = vld [vmem:[%s5897_s28 + $0x19] sm:$0xf] }
 0x273   : > { %414 = vperm.xlu0 %5676, %v5686_v7   ;;  %1942 = vperm.xlu1 %5584, %v6911_v26   ;;  %v6917_v38 = vpop.permute.xlu1 %1576  ;;  %v6929_v59 = vpop.permute.xlu0 %2810 }
 0x274   : > { %9926 = vst [vmem:[#allocation203_spill] sm:$0xff] %v6917_v38  ;;  %9930 = vst [vmem:[#allocation207_spill] sm:$0xff] %v6929_v59  ;;  %v5690_v38 = vld [vmem:[%s5897_s28 + $0x1] sm:$0xf] }
 0x277   : > { %426 = vperm.xlu0 %5676, %v5687_v32   ;;  %5585 = vset.pattern.permute.xlu1 %v9706_v50  ;;  %v6921_v62 = vpop.permute.xlu1 %1580 }
 0x278   : > { %9927 = vst [vmem:[#allocation204_spill] sm:$0xff] %v6921_v62  ;;  %1963 = vperm.xlu1 %5585, %v5688_v51   ;;  %v6937_v51 = vpop.permute.xlu0 %2897  ;;  %v5692_v62 = vld [vmem:[%s5897_s28 + $0x31] sm:$0xf] }
 0x279   : > { %9932 = vst [vmem:[#allocation209_spill] sm:$0xff] %v6937_v51 }
 0x27b   : > { %515 = vperm.xlu0 %5676, %v5689_v34  }
 0x27c   : > { %1967 = vperm.xlu1 %5585, %v5170_v55   ;;  %v6927_v7 = vpop.permute.xlu1 %1601 }
 0x27d   : > { %9929 = vst [vmem:[#allocation206_spill] sm:$0xff] %v6927_v7  ;;  %v9936_v7 = vld [vmem:[#allocation37_spill] sm:$0xff] }
 0x27f   : > { %607 = vperm.xlu0 %5676, %v5690_v38   ;;  %v6945_v38 = vpop.permute.xlu0 %2989 }
 0x280   : > { %5586 = vset.pattern.permute.xlu1 %v9714_v46  ;;  %v6933_v32 = vpop.permute.xlu1 %1609  ;;  %9935 = vst [vmem:[#allocation212_spill] sm:$0xff] %v6945_v38  ;;  %v9941_v38 = vld [vmem:[#allocation63_spill] sm:$0xff] }
 0x281   : > { %9931 = vst [vmem:[#allocation208_spill] sm:$0xff] %v6933_v32  ;;  %1988 = vperm.xlu1 %5586, %v6897_v58   ;;  %v6949_v32 = vld [vmem:[%s5897_s28 + $0x171] sm:$0xf] }
 0x283   : > { %619 = vperm.xlu0 %5676, %v5691_v33   ;;  %v6957_v51 = vpop.permute.xlu0 %3004 }
 0x284   : > { %v6939_v34 = vpop.permute.xlu1 %1613 }
 0x285   : > { %9933 = vst [vmem:[#allocation210_spill] sm:$0xff] %v6939_v34  ;;  %1996 = vperm.xlu1 %5586, %v5170_v55   ;;  %v9938_v55 = vld [vmem:[#allocation43_spill] sm:$0xff] }
 0x286   : > { %9939 = vst [vmem:[#allocation43_spill] sm:$0xff] %v6957_v51 }
 0x287   : > { %707 = vperm.xlu0 %5676, %v5692_v62   ;;  %v5180_v62 = vld [vmem:[%s5897_s28 + $0x179] sm:$0xf] }
 0x289   : > { %2000 = vperm.xlu1 %5586, %v6911_v26   ;;  %v6943_v59 = vpop.permute.xlu1 %1642 }
 0x28a   : > { %9934 = vst [vmem:[#allocation211_spill] sm:$0xff] %v6943_v59 }
 0x28b   : > { %799 = vperm.xlu0 %5676, %v9936_v7   ;;  %v6962_v7 = vpop.permute.xlu0 %3091 }
 0x28c   : > { %9942 = vst [vmem:[#allocation63_spill] sm:$0xff] %v6962_v7 }
 0x28d   : > { %5587 = vset.pattern.permute.xlu1 %v9720_v0  ;;  %v6952_v33 = vpop.permute.xlu1 %1647 }
 0x28e   : > { %9937 = vst [vmem:[#allocation37_spill] sm:$0xff] %v6952_v33  ;;  %2028 = vperm.xlu1 %5587, %v6949_v32   ;;  %v9944_v33 = vld [vmem:[#allocation87_spill] sm:$0xff] }
 0x28f   : > { %811 = vperm.xlu0 %5676, %v9938_v55   ;;  %v6972_v51 = vpop.permute.xlu0 %3183 }
 0x290   : > { %9946 = vst [vmem:[#allocation215_spill] sm:$0xff] %v6972_v51 }
 0x292   : > { %2033 = vperm.xlu1 %5587, %v5180_v62   ;;  %v6959_v59 = vpop.permute.xlu1 %1669 }
 0x293   : > { %9940 = vst [vmem:[#allocation213_spill] sm:$0xff] %v6959_v59  ;;  %900 = vperm.xlu0 %5676, %v9941_v38   ;;  %v5694_v38 = vld [vmem:[%s5897_s28 + $0x181] sm:$0xf]  ;;  %v5715_v59 = vld [vmem:[%s5897_s28 + $0x49] sm:$0xf] }
 0x296   : > { %5588 = vset.pattern.permute.xlu1 %v9706_v50  ;;  %v6965_v34 = vpop.permute.xlu1 %1677 }
 0x297   : > { %9943 = vst [vmem:[#allocation214_spill] sm:$0xff] %v6965_v34  ;;  %993 = vperm.xlu0 %5676, %v9944_v33   ;;  %2055 = vperm.xlu1 %5588, %v5693_v43   ;;  %v6978_v34 = vpop.permute.xlu0 %3198  ;;  %v5188_v33 = vld [vmem:[%s5897_s28 + $0x191] sm:$0xf] }
 0x298   : > { %9948 = vst [vmem:[#allocation217_spill] sm:$0xff] %v6978_v34  ;;  %v5190_v34 = vld [vmem:[%s5897_s28 + $0x1a1] sm:$0xf] }
 0x29a   : > { %v6969_v55 = vpop.permute.xlu1 %1681 }
 0x29b   : > { %9945 = vst [vmem:[#allocation87_spill] sm:$0xff] %v6969_v55  ;;  %1005 = vperm.xlu0 %5676, %v6381_v48   ;;  %2063 = vperm.xlu1 %5588, %v5180_v62   ;;  %v6986_v48 = vpop.permute.xlu0 %3284 }
 0x29c   : > { %9950 = vst [vmem:[#allocation219_spill] sm:$0xff] %v6986_v48 }
 0x29f   : > { %1094 = vperm.xlu0 %5676, %v6435_v47   ;;  %2067 = vperm.xlu1 %5588, %v5694_v38   ;;  %v6976_v7 = vpop.permute.xlu1 %1702  ;;  %v6995_v38 = vpop.permute.xlu0 %3375 }
 0x2a0   : > { %9947 = vst [vmem:[#allocation216_spill] sm:$0xff] %v6976_v7  ;;  %9953 = vst [vmem:[#allocation222_spill] sm:$0xff] %v6995_v38 }
 0x2a3   : > { %1187 = vperm.xlu0 %5676, %v6484_v2   ;;  %5589 = vset.pattern.permute.xlu1 %v9714_v46  ;;  %v6982_v43 = vpop.permute.xlu1 %1706  ;;  %v7003_v48 = vpop.permute.xlu0 %3390 }
 0x2a4   : > { %9949 = vst [vmem:[#allocation218_spill] sm:$0xff] %v6982_v43  ;;  %2088 = vperm.xlu1 %5589, %v6949_v32   ;;  %9955 = vst [vmem:[#allocation224_spill] sm:$0xff] %v7003_v48 }
 0x2a7   : > { %1199 = vperm.xlu0 %5676, %v6500_v11   ;;  %v7011_v38 = vpop.permute.xlu0 %3476 }
 0x2a8   : > { %2092 = vperm.xlu1 %5589, %v5180_v62   ;;  %v6988_v47 = vpop.permute.xlu1 %1734  ;;  %v5191_v62 = vld [vmem:[%s5897_s28 + $0x1a9] sm:$0xf]  ;;  %9958 = vst [vmem:[#allocation227_spill] sm:$0xff] %v7011_v38 }
 0x2a9   : > { %9951 = vst [vmem:[#allocation220_spill] sm:$0xff] %v6988_v47  ;;  %v7479_v47 = vld [vmem:[%s9630_s2] ss:$0 sm:$0xff] }
 0x2aa   : > { %10080 = vst [vmem:[#allocation349_spill] sm:$0xff] %v7479_v47 }
 0x2ab   : > { %1287 = vperm.xlu0 %5676, %v6540_v56   ;;  %v7018_v48 = vpop.permute.xlu0 %3568 }
 0x2ac   : > { %5590 = vset.pattern.permute.xlu1 %v9720_v0  ;;  %v6993_v2 = vpop.permute.xlu1 %1744  ;;  %9960 = vst [vmem:[#allocation229_spill] sm:$0xff] %v7018_v48  ;;  %v5199_v48 = vld [vmem:[%s5897_s28 + $0x1e8] sm:$0xf] }
 0x2ad   : > { %9952 = vst [vmem:[#allocation221_spill] sm:$0xff] %v6993_v2  ;;  %2119 = vperm.xlu1 %5590, %v5188_v33   ;;  %v5698_v2 = vld [vmem:[%s5897_s28 + $0x210] sm:$0xf] }
 0x2af   : > { %1379 = vperm.xlu0 %5676, %v6589_v8   ;;  %v5695_v8 = vld [vmem:[%s5897_s28 + $0x199] sm:$0xf]  ;;  %v7024_v38 = vpop.permute.xlu0 %3583 }
 0x2b0   : > { %v6999_v11 = vpop.permute.xlu1 %1749  ;;  %9962 = vst [vmem:[#allocation231_spill] sm:$0xff] %v7024_v38  ;;  %v5200_v38 = vld [vmem:[%s5897_s28 + $0x1f0] sm:$0xf] }
 0x2b1   : > { %9954 = vst [vmem:[#allocation223_spill] sm:$0xff] %v6999_v11  ;;  %2129 = vperm.xlu1 %5590, %v5190_v34   ;;  %v5320_v11 = vld [vmem:[%s5897_s28 + $0x41] sm:$0xf] }
 0x2b3   : > { %1391 = vperm.xlu0 %5676, %v6605_v35  }
 0x2b5   : > { %2134 = vperm.xlu1 %5590, %v5191_v62   ;;  %v7005_v56 = vpop.permute.xlu1 %1770 }
 0x2b6   : > { %9956 = vst [vmem:[#allocation225_spill] sm:$0xff] %v7005_v56 }
 0x2b7   : > { %1479 = vperm.xlu0 %5676, %v6646_v39  }
 0x2b9   : > { %5591 = vset.pattern.permute.xlu1 %v9706_v50  ;;  %v7009_v51 = vpop.permute.xlu1 %1774 }
 0x2ba   : > { %9957 = vst [vmem:[#allocation226_spill] sm:$0xff] %v7009_v51  ;;  %2155 = vperm.xlu1 %5591, %v5695_v8  }
 0x2bb   : > { %1572 = vperm.xlu0 %5676, %v6693_v14  }
 0x2be   : > { %2159 = vperm.xlu1 %5591, %v5190_v34   ;;  %v7015_v35 = vpop.permute.xlu1 %1795 }
 0x2bf   : > { %9959 = vst [vmem:[#allocation228_spill] sm:$0xff] %v7015_v35  ;;  %1584 = vperm.xlu0 %5676, %v6709_v25   ;;  %v7032_v25 = vpop.permute.xlu0 %3670 }
 0x2c0   : > { %9965 = vst [vmem:[#allocation234_spill] sm:$0xff] %v7032_v25  ;;  %v5696_v25 = vld [vmem:[%s5897_s28 + $0x1e0] sm:$0xf] }
 0x2c2   : > { %5592 = vset.pattern.permute.xlu1 %v9714_v46  ;;  %v7021_v39 = vpop.permute.xlu1 %1803 }
 0x2c3   : > { %9961 = vst [vmem:[#allocation230_spill] sm:$0xff] %v7021_v39  ;;  %1673 = vperm.xlu0 %5676, %v6751_v16   ;;  %2180 = vperm.xlu1 %5592, %v5188_v33   ;;  %v7092_v39 = vld [vmem:[%s5897_s28 + $0x270] sm:$0xf] }
 0x2c6   : > { %v7026_v8 = vpop.permute.xlu1 %1807 }
 0x2c7   : > { %9963 = vst [vmem:[#allocation232_spill] sm:$0xff] %v7026_v8  ;;  %1766 = vperm.xlu0 %5676, %v6800_v28   ;;  %2188 = vperm.xlu1 %5592, %v5190_v34   ;;  %v7040_v28 = vpop.permute.xlu0 %3762 }
 0x2c8   : > { %9967 = vst [vmem:[#allocation236_spill] sm:$0xff] %v7040_v28  ;;  %v5697_v28 = vld [vmem:[%s5897_s28 + $0x1f8] sm:$0xf] }
 0x2cb   : > { %1778 = vperm.xlu0 %5676, %v6816_v1   ;;  %2192 = vperm.xlu1 %5592, %v5191_v62   ;;  %v7030_v14 = vpop.permute.xlu1 %1836  ;;  %v7046_v34 = vpop.permute.xlu0 %3777 }
 0x2cc   : > { %9964 = vst [vmem:[#allocation233_spill] sm:$0xff] %v7030_v14  ;;  %9969 = vst [vmem:[#allocation238_spill] sm:$0xff] %v7046_v34 }
 0x2cf   : > { %1867 = vperm.xlu0 %5676, %v6853_v61   ;;  %5593 = vset.pattern.permute.xlu1 %v9720_v0  ;;  %v7037_v16 = vpop.permute.xlu1 %1841 }
 0x2d0   : > { %9966 = vst [vmem:[#allocation235_spill] sm:$0xff] %v7037_v16  ;;  %2221 = vperm.xlu1 %5593, %v5199_v48  }
 0x2d3   : > { %1959 = vperm.xlu0 %5676, %v6897_v58   ;;  %v7055_v58 = vpop.permute.xlu0 %3864 }
 0x2d4   : > { %2226 = vperm.xlu1 %5593, %v5200_v38   ;;  %v7043_v1 = vpop.permute.xlu1 %1863  ;;  %9972 = vst [vmem:[#allocation241_spill] sm:$0xff] %v7055_v58  ;;  %v5211_v58 = vld [vmem:[%s5897_s28 + $0x220] sm:$0xf] }
 0x2d5   : > { %9968 = vst [vmem:[#allocation237_spill] sm:$0xff] %v7043_v1 }
 0x2d7   : > { %1971 = vperm.xlu0 %5676, %v6911_v26   ;;  %v7060_v34 = vpop.permute.xlu0 %3955 }
 0x2d8   : > { %5594 = vset.pattern.permute.xlu1 %v9706_v50  ;;  %v7049_v61 = vpop.permute.xlu1 %1871  ;;  %9974 = vst [vmem:[#allocation243_spill] sm:$0xff] %v7060_v34 }
 0x2d9   : > { %9970 = vst [vmem:[#allocation239_spill] sm:$0xff] %v7049_v61  ;;  %2248 = vperm.xlu1 %5594, %v5696_v25  }
 0x2db   : > { %2059 = vperm.xlu0 %5676, %v6949_v32   ;;  %v7065_v32 = vpop.permute.xlu0 %3970 }
 0x2dc   : > { %v7053_v16 = vpop.permute.xlu1 %1875  ;;  %9976 = vst [vmem:[#allocation245_spill] sm:$0xff] %v7065_v32 }
 0x2dd   : > { %9971 = vst [vmem:[#allocation240_spill] sm:$0xff] %v7053_v16  ;;  %2256 = vperm.xlu1 %5594, %v5200_v38  }
 0x2df   : > { %2151 = vperm.xlu0 %5676, %v5188_v33   ;;  %v7074_v34 = vpop.permute.xlu0 %4056 }
 0x2e0   : > { %9979 = vst [vmem:[#allocation248_spill] sm:$0xff] %v7074_v34 }
 0x2e1   : > { %2260 = vperm.xlu1 %5594, %v5697_v28   ;;  %v7058_v26 = vpop.permute.xlu1 %1896  ;;  %v5208_v28 = vld [vmem:[%s5897_s28 + $0x208] sm:$0xf] }
 0x2e2   : > { %9973 = vst [vmem:[#allocation242_spill] sm:$0xff] %v7058_v26 }
 0x2e3   : > { %2163 = vperm.xlu0 %5676, %v5191_v62   ;;  %v7080_v32 = vpop.permute.xlu0 %4147 }
 0x2e4   : > { %9981 = vst [vmem:[#allocation250_spill] sm:$0xff] %v7080_v32  ;;  %v7099_v32 = vld [vmem:[%s5897_s28 + $0x1e9] sm:$0xf] }
 0x2e5   : > { %5595 = vset.pattern.permute.xlu1 %v9714_v46  ;;  %v7063_v25 = vpop.permute.xlu1 %1900 }
 0x2e6   : > { %9975 = vst [vmem:[#allocation244_spill] sm:$0xff] %v7063_v25  ;;  %2281 = vperm.xlu1 %5595, %v5199_v48   ;;  %v5210_v25 = vld [vmem:[%s5897_s28 + $0x218] sm:$0xf] }
 0x2e7   : > { %2252 = vperm.xlu0 %5676, %v5199_v48   ;;  %v7094_v51 = vpop.permute.xlu0 %4162 }
 0x2e8   : > { %9984 = vst [vmem:[#allocation253_spill] sm:$0xff] %v7094_v51 }
 0x2ea   : > { %2285 = vperm.xlu1 %5595, %v5200_v38   ;;  %v7067_v33 = vpop.permute.xlu1 %1927  ;;  %v5219_v38 = vld [vmem:[%s5897_s28 + $0x238] sm:$0xf] }
 0x2eb   : > { %9977 = vst [vmem:[#allocation246_spill] sm:$0xff] %v7067_v33  ;;  %2345 = vperm.xlu0 %5676, %v5208_v28  }
 0x2ee   : > { %5596 = vset.pattern.permute.xlu1 %v9720_v0  ;;  %v7071_v62 = vpop.permute.xlu1 %1937 }
 0x2ef   : > { %9978 = vst [vmem:[#allocation247_spill] sm:$0xff] %v7071_v62  ;;  %2313 = vperm.xlu1 %5596, %v5208_v28   ;;  %2357 = vperm.xlu0 %5676, %v5211_v58   ;;  %v7085_v62 = vld [vmem:[%s5897_s28 + $0x258] sm:$0xf] }
 0x2f2   : > { %v7077_v48 = vpop.permute.xlu1 %1942 }
 0x2f3   : > { %9980 = vst [vmem:[#allocation249_spill] sm:$0xff] %v7077_v48  ;;  %2323 = vperm.xlu1 %5596, %v5210_v25   ;;  %2446 = vperm.xlu0 %5676, %v5219_v38  }
 0x2f7   : > { %2328 = vperm.xlu1 %5596, %v5211_v58   ;;  %v7082_v61 = vpop.permute.xlu1 %1963  ;;  %2539 = vperm.xlu0 %5676, %v7085_v62  }
 0x2f8   : > { %9982 = vst [vmem:[#allocation251_spill] sm:$0xff] %v7082_v61  ;;  %v7104_v61 = vpop.permute.xlu0 %4249 }
 0x2f9   : > { %9986 = vst [vmem:[#allocation255_spill] sm:$0xff] %v7104_v61 }
 0x2fb   : > { %5597 = vset.pattern.permute.xlu1 %v9706_v50  ;;  %v7089_v34 = vpop.permute.xlu1 %1967  ;;  %2551 = vperm.xlu0 %5676, %v7092_v39  }
 0x2fc   : > { %9983 = vst [vmem:[#allocation252_spill] sm:$0xff] %v7089_v34  ;;  %2349 = vperm.xlu1 %5597, %v5698_v2   ;;  %v7107_v34 = vld [vmem:[%s5897_s28 + $0x209] sm:$0xf]  ;;  %v7114_v2 = vld [vmem:[%s5897_s28 + $0x221] sm:$0xf]  ;;  %v7116_v51 = vpop.permute.xlu0 %4341 }
 0x2fd   : > { %9988 = vst [vmem:[#allocation257_spill] sm:$0xff] %v7116_v51  ;;  %v7130_v51 = vld [vmem:[%s5897_s28 + $0x239] sm:$0xf] }
 0x2ff   : > { %2639 = vperm.xlu0 %5676, %v7099_v32  }
 0x300   : > { %2353 = vperm.xlu1 %5597, %v5210_v25   ;;  %v7101_v43 = vpop.permute.xlu1 %1988 }
 0x301   : > { %9985 = vst [vmem:[#allocation254_spill] sm:$0xff] %v7101_v43 }
 0x303   : > { %2731 = vperm.xlu0 %5676, %v7107_v34  }
 0x304   : > { %5598 = vset.pattern.permute.xlu1 %v9714_v46  ;;  %v7110_v48 = vpop.permute.xlu1 %1996 }
 0x305   : > { %9987 = vst [vmem:[#allocation256_spill] sm:$0xff] %v7110_v48  ;;  %2374 = vperm.xlu1 %5598, %v5208_v28   ;;  %v5220_v28 = vld [vmem:[%s5897_s28 + $0x240] sm:$0xf] }
 0x307   : > { %2743 = vperm.xlu0 %5676, %v7114_v2  }
 0x308   : > { %v7118_v43 = vpop.permute.xlu1 %2000 }
 0x309   : > { %9989 = vst [vmem:[#allocation258_spill] sm:$0xff] %v7118_v43  ;;  %2382 = vperm.xlu1 %5598, %v5210_v25   ;;  %v7132_v43 = vpop.permute.xlu0 %4356  ;;  %v5699_v25 = vld [vmem:[%s5897_s28 + $0x230] sm:$0xf] }
 0x30a   : > { %9993 = vst [vmem:[#allocation262_spill] sm:$0xff] %v7132_v43 }
 0x30b   : > { %2831 = vperm.xlu0 %5676, %v7130_v51  }
 0x30d   : > { %2386 = vperm.xlu1 %5598, %v5211_v58   ;;  %v7121_v61 = vpop.permute.xlu1 %2028 }
 0x30e   : > { %9990 = vst [vmem:[#allocation259_spill] sm:$0xff] %v7121_v61 }
 0x311   : > { %5599 = vset.pattern.permute.xlu1 %v9720_v0  ;;  %v7124_v48 = vpop.permute.xlu1 %2033 }
 0x312   : > { %9991 = vst [vmem:[#allocation260_spill] sm:$0xff] %v7124_v48  ;;  %2415 = vperm.xlu1 %5599, %v5219_v38   ;;  %v5700_v48 = vld [vmem:[%s5897_s28 + $0x248] sm:$0xf] }
 0x316   : > { %2420 = vperm.xlu1 %5599, %v5220_v28   ;;  %v7127_v26 = vpop.permute.xlu1 %2055 }
 0x317   : > { %9992 = vst [vmem:[#allocation261_spill] sm:$0xff] %v7127_v26 }
 0x31a   : > { %5600 = vset.pattern.permute.xlu1 %v9706_v50  ;;  %v7136_v58 = vpop.permute.xlu1 %2063 }
 0x31b   : > { %9994 = vst [vmem:[#allocation263_spill] sm:$0xff] %v7136_v58  ;;  %2442 = vperm.xlu1 %5600, %v5699_v25   ;;  %v5230_v58 = vld [vmem:[%s5897_s28 + $0x268] sm:$0xf] }
 0x31e   : > { %v7139_v61 = vpop.permute.xlu1 %2067 }
 0x31f   : > { %9995 = vst [vmem:[#allocation264_spill] sm:$0xff] %v7139_v61  ;;  %2450 = vperm.xlu1 %5600, %v5220_v28   ;;  %v7159_v61 = vpop.permute.xlu0 %4443 }
 0x320   : > { %10001 = vst [vmem:[#allocation270_spill] sm:$0xff] %v7159_v61 }
 0x323   : > { %2454 = vperm.xlu1 %5600, %v5700_v48   ;;  %v7142_v26 = vpop.permute.xlu1 %2088 }
 0x324   : > { %9996 = vst [vmem:[#allocation265_spill] sm:$0xff] %v7142_v26  ;;  %v7157_v26 = vld [vmem:[%s5897_s28 + $0x8] sm:$0xf] }
 0x325   : > { %2924 = vperm.xlu0 %5676, %v7157_v26  }
 0x327   : > { %5601 = vset.pattern.permute.xlu1 %v9714_v46  ;;  %v7145_v43 = vpop.permute.xlu1 %2092 }
 0x328   : > { %9997 = vst [vmem:[#allocation266_spill] sm:$0xff] %v7145_v43  ;;  %2475 = vperm.xlu1 %5601, %v5219_v38   ;;  %v7171_v43 = vpop.permute.xlu0 %4535 }
 0x329   : > { %10004 = vst [vmem:[#allocation273_spill] sm:$0xff] %v7171_v43 }
 0x32c   : > { %2479 = vperm.xlu1 %5601, %v5220_v28   ;;  %v7147_v33 = vpop.permute.xlu1 %2119 }
 0x32d   : > { %9998 = vst [vmem:[#allocation267_spill] sm:$0xff] %v7147_v33  ;;  %v7196_v33 = vpop.permute.xlu0 %4550 }
 0x32e   : > { %10011 = vst [vmem:[#allocation280_spill] sm:$0xff] %v7196_v33 }
 0x330   : > { %5602 = vset.pattern.permute.xlu1 %v9720_v0  ;;  %v7150_v25 = vpop.permute.xlu1 %2129 }
 0x331   : > { %9999 = vst [vmem:[#allocation268_spill] sm:$0xff] %v7150_v25  ;;  %2507 = vperm.xlu1 %5602, %v7085_v62   ;;  %v7169_v25 = vld [vmem:[%s5897_s28 + $0x20] sm:$0xf] }
 0x332   : > { %2936 = vperm.xlu0 %5676, %v7169_v25  }
 0x334   : > { %v7154_v48 = vpop.permute.xlu1 %2134 }
 0x335   : > { %10000 = vst [vmem:[#allocation269_spill] sm:$0xff] %v7154_v48  ;;  %2517 = vperm.xlu1 %5602, %v5230_v58   ;;  %v5701_v48 = vld [vmem:[%s5897_s28 + $0x260] sm:$0xf] }
 0x339   : > { %2522 = vperm.xlu1 %5602, %v7092_v39   ;;  %v7163_v38 = vpop.permute.xlu1 %2155 }
 0x33a   : > { %10002 = vst [vmem:[#allocation271_spill] sm:$0xff] %v7163_v38 }
 0x33d   : > { %5603 = vset.pattern.permute.xlu1 %v9706_v50  ;;  %v7166_v28 = vpop.permute.xlu1 %2159 }
 0x33e   : > { %10003 = vst [vmem:[#allocation272_spill] sm:$0xff] %v7166_v28  ;;  %2543 = vperm.xlu1 %5603, %v5701_v48  }
 0x342   : > { %2547 = vperm.xlu1 %5603, %v5230_v58   ;;  %v7175_v61 = vpop.permute.xlu1 %2180 }
 0x343   : > { %10005 = vst [vmem:[#allocation274_spill] sm:$0xff] %v7175_v61  ;;  %v5240_v61 = vld [vmem:[%s5897_s28 + $0x1f1] sm:$0xf] }
 0x346   : > { %5604 = vset.pattern.permute.xlu1 %v9714_v46  ;;  %v7178_v38 = vpop.permute.xlu1 %2188 }
 0x347   : > { %10006 = vst [vmem:[#allocation275_spill] sm:$0xff] %v7178_v38  ;;  %2568 = vperm.xlu1 %5604, %v7085_v62   ;;  %v7194_v62 = vld [vmem:[%s5897_s28 + $0x38] sm:$0xf] }
 0x348   : > { %3025 = vperm.xlu0 %5676, %v7194_v62  }
 0x34a   : > { %v7181_v28 = vpop.permute.xlu1 %2192 }
 0x34b   : > { %10007 = vst [vmem:[#allocation276_spill] sm:$0xff] %v7181_v28  ;;  %2576 = vperm.xlu1 %5604, %v5230_v58   ;;  %v5702_v58 = vld [vmem:[%s5897_s28 + $0x1e1] sm:$0xf] }
 0x34f   : > { %2580 = vperm.xlu1 %5604, %v7092_v39   ;;  %v7184_v43 = vpop.permute.xlu1 %2221 }
 0x350   : > { %10008 = vst [vmem:[#allocation277_spill] sm:$0xff] %v7184_v43  ;;  %v5703_v43 = vld [vmem:[%s5897_s28 + $0x1f9] sm:$0xf] }
 0x353   : > { %5605 = vset.pattern.permute.xlu1 %v9720_v0  ;;  %v7187_v48 = vpop.permute.xlu1 %2226 }
 0x354   : > { %10009 = vst [vmem:[#allocation278_spill] sm:$0xff] %v7187_v48  ;;  %2608 = vperm.xlu1 %5605, %v7099_v32  }
 0x358   : > { %2613 = vperm.xlu1 %5605, %v5240_v61   ;;  %v7191_v38 = vpop.permute.xlu1 %2248 }
 0x359   : > { %10010 = vst [vmem:[#allocation279_spill] sm:$0xff] %v7191_v38 }
 0x35c   : > { %5606 = vset.pattern.permute.xlu1 %v9706_v50  ;;  %v7200_v39 = vpop.permute.xlu1 %2256 }
 0x35d   : > { %10012 = vst [vmem:[#allocation281_spill] sm:$0xff] %v7200_v39  ;;  %2635 = vperm.xlu1 %5606, %v5702_v58  }
 0x360   : > { %v7203_v48 = vpop.permute.xlu1 %2260 }
 0x361   : > { %10013 = vst [vmem:[#allocation282_spill] sm:$0xff] %v7203_v48  ;;  %2643 = vperm.xlu1 %5606, %v5240_v61  }
 0x365   : > { %2647 = vperm.xlu1 %5606, %v5703_v43   ;;  %v7206_v38 = vpop.permute.xlu1 %2281  ;;  %v5250_v43 = vld [vmem:[%s5897_s28 + $0x219] sm:$0xf] }
 0x366   : > { %10014 = vst [vmem:[#allocation283_spill] sm:$0xff] %v7206_v38  ;;  %v7222_v38 = vld [vmem:[%s5897_s28 + $0x58] sm:$0xf] }
 0x369   : > { %5607 = vset.pattern.permute.xlu1 %v9714_v46  ;;  %v7209_v33 = vpop.permute.xlu1 %2285 }
 0x36a   : > { %10015 = vst [vmem:[#allocation284_spill] sm:$0xff] %v7209_v33  ;;  %2668 = vperm.xlu1 %5607, %v7099_v32   ;;  %v7224_v33 = vpop.permute.xlu0 %4636  ;;  %3118 = vperm.xlu0 %5676, %v7222_v38  }
 0x36b   : > { %10019 = vst [vmem:[#allocation288_spill] sm:$0xff] %v7224_v33 }
 0x36e   : > { %2672 = vperm.xlu1 %5607, %v5240_v61   ;;  %v7212_v39 = vpop.permute.xlu1 %2313 }
 0x36f   : > { %10016 = vst [vmem:[#allocation285_spill] sm:$0xff] %v7212_v39  ;;  %v7236_v39 = vpop.permute.xlu0 %4727 }
 0x370   : > { %10022 = vst [vmem:[#allocation291_spill] sm:$0xff] %v7236_v39 }
 0x372   : > { %5608 = vset.pattern.permute.xlu1 %v9720_v0  ;;  %v7215_v58 = vpop.permute.xlu1 %2323 }
 0x373   : > { %10017 = vst [vmem:[#allocation286_spill] sm:$0xff] %v7215_v58  ;;  %2699 = vperm.xlu1 %5608, %v7107_v34   ;;  %v7234_v58 = vld [vmem:[%s5897_s28 + $0x70] sm:$0xf]  ;;  %v7261_v28 = vpop.permute.xlu0 %4742 }
 0x374   : > { %3130 = vperm.xlu0 %5676, %v7234_v58   ;;  %10029 = vst [vmem:[#allocation298_spill] sm:$0xff] %v7261_v28 }
 0x376   : > { %v7219_v48 = vpop.permute.xlu1 %2328 }
 0x377   : > { %10018 = vst [vmem:[#allocation287_spill] sm:$0xff] %v7219_v48  ;;  %2709 = vperm.xlu1 %5608, %v5250_v43   ;;  %v5704_v48 = vld [vmem:[%s5897_s28 + $0x211] sm:$0xf] }
 0x37b   : > { %2714 = vperm.xlu1 %5608, %v7114_v2   ;;  %v7228_v61 = vpop.permute.xlu1 %2349 }
 0x37c   : > { %10020 = vst [vmem:[#allocation289_spill] sm:$0xff] %v7228_v61 }
 0x37f   : > { %5609 = vset.pattern.permute.xlu1 %v9706_v50  ;;  %v7231_v32 = vpop.permute.xlu1 %2353 }
 0x380   : > { %10021 = vst [vmem:[#allocation290_spill] sm:$0xff] %v7231_v32  ;;  %2735 = vperm.xlu1 %5609, %v5704_v48  }
 0x384   : > { %2739 = vperm.xlu1 %5609, %v5250_v43   ;;  %v7240_v33 = vpop.permute.xlu1 %2374 }
 0x385   : > { %10023 = vst [vmem:[#allocation292_spill] sm:$0xff] %v7240_v33  ;;  %v5260_v33 = vld [vmem:[%s5897_s28 + $0x241] sm:$0xf] }
 0x388   : > { %5610 = vset.pattern.permute.xlu1 %v9714_v46  ;;  %v7243_v61 = vpop.permute.xlu1 %2382 }
 0x389   : > { %10024 = vst [vmem:[#allocation293_spill] sm:$0xff] %v7243_v61  ;;  %2760 = vperm.xlu1 %5610, %v7107_v34   ;;  %v7259_v34 = vld [vmem:[%s5897_s28 + $0x88] sm:$0xf] }
 0x38a   : > { %3219 = vperm.xlu0 %5676, %v7259_v34  }
 0x38c   : > { %v7246_v32 = vpop.permute.xlu1 %2386 }
 0x38d   : > { %10025 = vst [vmem:[#allocation294_spill] sm:$0xff] %v7246_v32  ;;  %2768 = vperm.xlu1 %5610, %v5250_v43   ;;  %v5705_v43 = vld [vmem:[%s5897_s28 + $0x231] sm:$0xf] }
 0x391   : > { %2772 = vperm.xlu1 %5610, %v7114_v2   ;;  %v7249_v39 = vpop.permute.xlu1 %2415 }
 0x392   : > { %10026 = vst [vmem:[#allocation295_spill] sm:$0xff] %v7249_v39  ;;  %v5706_v39 = vld [vmem:[%s5897_s28 + $0x249] sm:$0xf] }
 0x395   : > { %5611 = vset.pattern.permute.xlu1 %v9720_v0  ;;  %v7252_v48 = vpop.permute.xlu1 %2420 }
 0x396   : > { %10027 = vst [vmem:[#allocation296_spill] sm:$0xff] %v7252_v48  ;;  %2800 = vperm.xlu1 %5611, %v7130_v51  }
 0x39a   : > { %2805 = vperm.xlu1 %5611, %v5260_v33   ;;  %v7256_v61 = vpop.permute.xlu1 %2442 }
 0x39b   : > { %10028 = vst [vmem:[#allocation297_spill] sm:$0xff] %v7256_v61 }
 0x39e   : > { %5612 = vset.pattern.permute.xlu1 %v9706_v50  ;;  %v7265_v2 = vpop.permute.xlu1 %2450 }
 0x39f   : > { %10030 = vst [vmem:[#allocation299_spill] sm:$0xff] %v7265_v2  ;;  %2827 = vperm.xlu1 %5612, %v5705_v43  }
 0x3a2   : > { %v7268_v48 = vpop.permute.xlu1 %2454 }
 0x3a3   : > { %10031 = vst [vmem:[#allocation300_spill] sm:$0xff] %v7268_v48  ;;  %2835 = vperm.xlu1 %5612, %v5260_v33  }
 0x3a7   : > { %2839 = vperm.xlu1 %5612, %v5706_v39   ;;  %v7271_v32 = vpop.permute.xlu1 %2475  ;;  %v5270_v39 = vld [vmem:[%s5897_s28 + $0x18] sm:$0xf] }
 0x3a8   : > { %10032 = vst [vmem:[#allocation301_spill] sm:$0xff] %v7271_v32  ;;  %v7287_v32 = vld [vmem:[%s5897_s28 + $0x9] sm:$0xf] }
 0x3ab   : > { %5613 = vset.pattern.permute.xlu1 %v9714_v46  ;;  %v7274_v28 = vpop.permute.xlu1 %2479 }
 0x3ac   : > { %10033 = vst [vmem:[#allocation302_spill] sm:$0xff] %v7274_v28  ;;  %2860 = vperm.xlu1 %5613, %v7130_v51   ;;  %v7289_v28 = vpop.permute.xlu0 %4828  ;;  %3311 = vperm.xlu0 %5676, %v7287_v32  }
 0x3ad   : > { %10037 = vst [vmem:[#allocation306_spill] sm:$0xff] %v7289_v28 }
 0x3b0   : > { %2864 = vperm.xlu1 %5613, %v5260_v33   ;;  %v7277_v2 = vpop.permute.xlu1 %2507 }
 0x3b1   : > { %10034 = vst [vmem:[#allocation303_spill] sm:$0xff] %v7277_v2  ;;  %v7301_v2 = vpop.permute.xlu0 %220 }
 0x3b4   : > { %5614 = vset.pattern.permute.xlu1 %v9720_v0  ;;  %v7280_v43 = vpop.permute.xlu1 %2517 }
 0x3b5   : > { %10035 = vst [vmem:[#allocation304_spill] sm:$0xff] %v7280_v43  ;;  %2892 = vperm.xlu1 %5614, %v7157_v26   ;;  %v7299_v43 = vld [vmem:[%s5897_s28 + $0x21] sm:$0xf]  ;;  %v7326_v16 = vpop.permute.xlu0 %232 }
 0x3b6   : > { %3323 = vperm.xlu0 %5676, %v7299_v43  }
 0x3b8   : > { %v7284_v48 = vpop.permute.xlu1 %2522 }
 0x3b9   : > { %10036 = vst [vmem:[#allocation305_spill] sm:$0xff] %v7284_v48  ;;  %2902 = vperm.xlu1 %5614, %v5270_v39   ;;  %v5707_v48 = vld [vmem:[%s5897_s28 + $0x10] sm:$0xf] }
 0x3bd   : > { %2907 = vperm.xlu1 %5614, %v7169_v25   ;;  %v7293_v51 = vpop.permute.xlu1 %2543 }
 0x3be   : > { %10038 = vst [vmem:[#allocation307_spill] sm:$0xff] %v7293_v51 }
 0x3c1   : > { %5615 = vset.pattern.permute.xlu1 %v9706_v50  ;;  %v7296_v33 = vpop.permute.xlu1 %2547 }
 0x3c2   : > { %10039 = vst [vmem:[#allocation308_spill] sm:$0xff] %v7296_v33  ;;  %2928 = vperm.xlu1 %5615, %v5707_v48  }
 0x3c6   : > { %2932 = vperm.xlu1 %5615, %v5270_v39   ;;  %v7305_v28 = vpop.permute.xlu1 %2568 }
 0x3c7   : > { %10040 = vst [vmem:[#allocation309_spill] sm:$0xff] %v7305_v28  ;;  %v5280_v28 = vld [vmem:[%s5897_s28 + $0x40] sm:$0xf] }
 0x3ca   : > { %5616 = vset.pattern.permute.xlu1 %v9714_v46  ;;  %v7308_v51 = vpop.permute.xlu1 %2576 }
 0x3cb   : > { %10041 = vst [vmem:[#allocation310_spill] sm:$0xff] %v7308_v51  ;;  %2953 = vperm.xlu1 %5616, %v7157_v26   ;;  %v7324_v26 = vld [vmem:[%s5897_s28 + $0x39] sm:$0xf] }
 0x3cc   : > { %3411 = vperm.xlu0 %5676, %v7324_v26  }
 0x3ce   : > { %v7311_v33 = vpop.permute.xlu1 %2580 }
 0x3cf   : > { %10042 = vst [vmem:[#allocation311_spill] sm:$0xff] %v7311_v33  ;;  %2961 = vperm.xlu1 %5616, %v5270_v39   ;;  %v5708_v39 = vld [vmem:[%s5897_s28 + $0x30] sm:$0xf] }
 0x3d3   : > { %2965 = vperm.xlu1 %5616, %v7169_v25   ;;  %v7314_v61 = vpop.permute.xlu1 %2608 }
 0x3d4   : > { %10043 = vst [vmem:[#allocation312_spill] sm:$0xff] %v7314_v61  ;;  %v5709_v61 = vld [vmem:[%s5897_s28 + $0x48] sm:$0xf] }
 0x3d7   : > { %5617 = vset.pattern.permute.xlu1 %v9720_v0  ;;  %v7317_v48 = vpop.permute.xlu1 %2613 }
 0x3d8   : > { %10044 = vst [vmem:[#allocation313_spill] sm:$0xff] %v7317_v48  ;;  %2994 = vperm.xlu1 %5617, %v7194_v62  }
 0x3dc   : > { %2999 = vperm.xlu1 %5617, %v5280_v28   ;;  %v7321_v51 = vpop.permute.xlu1 %2635 }
 0x3dd   : > { %10045 = vst [vmem:[#allocation314_spill] sm:$0xff] %v7321_v51 }
 0x3e0   : > { %5618 = vset.pattern.permute.xlu1 %v9706_v50  ;;  %v7330_v25 = vpop.permute.xlu1 %2643 }
 0x3e1   : > { %10046 = vst [vmem:[#allocation315_spill] sm:$0xff] %v7330_v25  ;;  %3021 = vperm.xlu1 %5618, %v5708_v39  }
 0x3e4   : > { %v7333_v48 = vpop.permute.xlu1 %2647 }
 0x3e5   : > { %10047 = vst [vmem:[#allocation316_spill] sm:$0xff] %v7333_v48  ;;  %3029 = vperm.xlu1 %5618, %v5280_v28  }
 0x3e9   : > { %3033 = vperm.xlu1 %5618, %v5709_v61   ;;  %v7336_v33 = vpop.permute.xlu1 %2668  ;;  %v5290_v61 = vld [vmem:[%s5897_s28 + $0x68] sm:$0xf] }
 0x3ea   : > { %10048 = vst [vmem:[#allocation317_spill] sm:$0xff] %v7336_v33  ;;  %v7352_v33 = vld [vmem:[%s5897_s28 + $0x59] sm:$0xf] }
 0x3ed   : > { %5619 = vset.pattern.permute.xlu1 %v9714_v46  ;;  %v7339_v51 = vpop.permute.xlu1 %2672 }
 0x3ee   : > { %10049 = vst [vmem:[#allocation318_spill] sm:$0xff] %v7339_v51  ;;  %3054 = vperm.xlu1 %5619, %v7194_v62   ;;  %v7354_v51 = vpop.permute.xlu0 %321  ;;  %3503 = vperm.xlu0 %5676, %v7352_v33  }
 0x3f2   : > { %3058 = vperm.xlu1 %5619, %v5280_v28   ;;  %v7342_v25 = vpop.permute.xlu1 %2699 }
 0x3f3   : > { %10050 = vst [vmem:[#allocation319_spill] sm:$0xff] %v7342_v25  ;;  %v7366_v25 = vpop.permute.xlu0 %414 }
 0x3f6   : > { %5620 = vset.pattern.permute.xlu1 %v9720_v0  ;;  %v7345_v39 = vpop.permute.xlu1 %2709 }
 0x3f7   : > { %10051 = vst [vmem:[#allocation320_spill] sm:$0xff] %v7345_v39  ;;  %3086 = vperm.xlu1 %5620, %v7222_v38   ;;  %v7364_v39 = vld [vmem:[%s5897_s28 + $0x71] sm:$0xf]  ;;  %v7391_v8 = vpop.permute.xlu0 %426 }
 0x3f8   : > { %3515 = vperm.xlu0 %5676, %v7364_v39  }
 0x3fa   : > { %v7349_v48 = vpop.permute.xlu1 %2714 }
 0x3fb   : > { %10052 = vst [vmem:[#allocation321_spill] sm:$0xff] %v7349_v48  ;;  %3096 = vperm.xlu1 %5620, %v5290_v61   ;;  %v5710_v48 = vld [vmem:[%s5897_s28 + $0x60] sm:$0xf] }
 0x3ff   : > { %3101 = vperm.xlu1 %5620, %v7234_v58   ;;  %v7358_v28 = vpop.permute.xlu1 %2735 }
 0x400   : > { %10053 = vst [vmem:[#allocation322_spill] sm:$0xff] %v7358_v28 }
 0x403   : > { %5621 = vset.pattern.permute.xlu1 %v9706_v50  ;;  %v7361_v62 = vpop.permute.xlu1 %2739 }
 0x404   : > { %10054 = vst [vmem:[#allocation323_spill] sm:$0xff] %v7361_v62  ;;  %3122 = vperm.xlu1 %5621, %v5710_v48  }
 0x408   : > { %3126 = vperm.xlu1 %5621, %v5290_v61   ;;  %v7370_v14 = vpop.permute.xlu1 %2760 }
 0x409   : > { %10055 = vst [vmem:[#allocation324_spill] sm:$0xff] %v7370_v14  ;;  %v5300_v14 = vld [vmem:[%s5897_s28 + $0x90] sm:$0xf] }
 0x40c   : > { %5622 = vset.pattern.permute.xlu1 %v9714_v46  ;;  %v7373_v28 = vpop.permute.xlu1 %2768 }
 0x40d   : > { %10056 = vst [vmem:[#allocation325_spill] sm:$0xff] %v7373_v28  ;;  %3147 = vperm.xlu1 %5622, %v7222_v38   ;;  %v7389_v38 = vld [vmem:[%s5897_s28 + $0xb0] sm:$0xf] }
 0x40e   : > { %3604 = vperm.xlu0 %5676, %v7389_v38  }
 0x410   : > { %v7376_v62 = vpop.permute.xlu1 %2772 }
 0x411   : > { %10057 = vst [vmem:[#allocation326_spill] sm:$0xff] %v7376_v62  ;;  %3155 = vperm.xlu1 %5622, %v5290_v61   ;;  %v5711_v61 = vld [vmem:[%s5897_s28 + $0x80] sm:$0xf] }
 0x415   : > { %3159 = vperm.xlu1 %5622, %v7234_v58   ;;  %v7379_v1 = vpop.permute.xlu1 %2800 }
 0x416   : > { %10058 = vst [vmem:[#allocation327_spill] sm:$0xff] %v7379_v1  ;;  %v5712_v1 = vld [vmem:[%s5897_s28 + $0x98] sm:$0xf] }
 0x419   : > { %5623 = vset.pattern.permute.xlu1 %v9720_v0  ;;  %v7382_v48 = vpop.permute.xlu1 %2805 }
 0x41a   : > { %10059 = vst [vmem:[#allocation328_spill] sm:$0xff] %v7382_v48  ;;  %3188 = vperm.xlu1 %5623, %v7259_v34  }
 0x41e   : > { %3193 = vperm.xlu1 %5623, %v5300_v14   ;;  %v7386_v28 = vpop.permute.xlu1 %2827 }
 0x41f   : > { %10060 = vst [vmem:[#allocation329_spill] sm:$0xff] %v7386_v28 }
 0x422   : > { %5624 = vset.pattern.permute.xlu1 %v9706_v50  ;;  %v7395_v58 = vpop.permute.xlu1 %2835 }
 0x423   : > { %10061 = vst [vmem:[#allocation330_spill] sm:$0xff] %v7395_v58  ;;  %3215 = vperm.xlu1 %5624, %v5711_v61  }
 0x426   : > { %v7398_v48 = vpop.permute.xlu1 %2839 }
 0x427   : > { %10062 = vst [vmem:[#allocation331_spill] sm:$0xff] %v7398_v48  ;;  %3223 = vperm.xlu1 %5624, %v5300_v14  }
 0x42b   : > { %3227 = vperm.xlu1 %5624, %v5712_v1   ;;  %v7401_v62 = vpop.permute.xlu1 %2860  ;;  %v5310_v1 = vld [vmem:[%s5897_s28 + $0x19] sm:$0xf] }
 0x42c   : > { %10063 = vst [vmem:[#allocation332_spill] sm:$0xff] %v7401_v62  ;;  %v7417_v62 = vld [vmem:[%s5897_s28 + $0xd0] sm:$0xf] }
 0x42f   : > { %5625 = vset.pattern.permute.xlu1 %v9714_v46  ;;  %v7404_v28 = vpop.permute.xlu1 %2864 }
 0x430   : > { %10064 = vst [vmem:[#allocation333_spill] sm:$0xff] %v7404_v28  ;;  %3248 = vperm.xlu1 %5625, %v7259_v34   ;;  %v7419_v28 = vpop.permute.xlu0 %515  ;;  %3697 = vperm.xlu0 %5676, %v7417_v62  }
 0x434   : > { %3252 = vperm.xlu1 %5625, %v5300_v14   ;;  %v7407_v58 = vpop.permute.xlu1 %2892 }
 0x435   : > { %10065 = vst [vmem:[#allocation334_spill] sm:$0xff] %v7407_v58  ;;  %v7431_v58 = vpop.permute.xlu0 %607 }
 0x438   : > { %5626 = vset.pattern.permute.xlu1 %v9720_v0  ;;  %v7410_v61 = vpop.permute.xlu1 %2902 }
 0x439   : > { %10066 = vst [vmem:[#allocation335_spill] sm:$0xff] %v7410_v61  ;;  %3279 = vperm.xlu1 %5626, %v7287_v32   ;;  %v7429_v61 = vld [vmem:[%s5897_s28 + $0xe8] sm:$0xf] }
 0x43a   : > { %3709 = vperm.xlu0 %5676, %v7429_v61  }
 0x43c   : > { %v7414_v48 = vpop.permute.xlu1 %2907 }
 0x43d   : > { %10067 = vst [vmem:[#allocation336_spill] sm:$0xff] %v7414_v48  ;;  %3289 = vperm.xlu1 %5626, %v5310_v1   ;;  %v5713_v48 = vld [vmem:[%s5897_s28 + $0x11] sm:$0xf] }
 0x441   : > { %3294 = vperm.xlu1 %5626, %v7299_v43   ;;  %v7423_v14 = vpop.permute.xlu1 %2928 }
 0x442   : > { %10068 = vst [vmem:[#allocation337_spill] sm:$0xff] %v7423_v14 }
 0x445   : > { %5627 = vset.pattern.permute.xlu1 %v9706_v50  ;;  %v7426_v34 = vpop.permute.xlu1 %2932 }
 0x446   : > { %10069 = vst [vmem:[#allocation338_spill] sm:$0xff] %v7426_v34  ;;  %3315 = vperm.xlu1 %5627, %v5713_v48   ;;  %v7446_v48 = vpop.permute.xlu0 %619 }
 0x44a   : > { %3319 = vperm.xlu1 %5627, %v5310_v1   ;;  %v7435_v56 = vpop.permute.xlu1 %2953 }
 0x44b   : > { %10070 = vst [vmem:[#allocation339_spill] sm:$0xff] %v7435_v56 }
 0x44e   : > { %5628 = vset.pattern.permute.xlu1 %v9714_v46  ;;  %v7438_v14 = vpop.permute.xlu1 %2961 }
 0x44f   : > { %10071 = vst [vmem:[#allocation340_spill] sm:$0xff] %v7438_v14  ;;  %3340 = vperm.xlu1 %5628, %v7287_v32   ;;  %v7453_v14 = vpop.permute.xlu0 %707 }
 0x452   : > { %v7441_v34 = vpop.permute.xlu1 %2965 }
 0x453   : > { %10072 = vst [vmem:[#allocation341_spill] sm:$0xff] %v7441_v34  ;;  %3348 = vperm.xlu1 %5628, %v5310_v1   ;;  %v7458_v1 = vld [vmem:[%s5897_s28 + $0x100] sm:$0xf] }
 0x454   : > { %10076 = vst [vmem:[#allocation345_spill] sm:$0xff] %v7458_v1  ;;  %3798 = vperm.xlu0 %5676, %v7458_v1   ;;  %v7470_v34 = vld [vmem:[%s9629_s1] ss:$0 sm:$0xff]  ;;  %v7497_v1 = vld [vmem:[%s9629_s1 + $0x2] ss:$0 sm:$0xff] }
 0x455   : > { %10078 = vst [vmem:[#allocation347_spill] sm:$0xff] %v7470_v34  ;;  %10083 = vst [vmem:[#allocation352_spill] sm:$0xff] %v7497_v1  ;;  %v213_v19 = vmul.f32 %v7470_v34, %v10084_v41 }
 0x457   : > { %3352 = vperm.xlu1 %5628, %v7299_v43   ;;  %v7444_v35 = vpop.permute.xlu1 %2994  ;;  %v7461_v43 = vpop.permute.xlu0 %799 }
 0x458   : > { %10073 = vst [vmem:[#allocation342_spill] sm:$0xff] %v7444_v35 }
 0x45b   : > { %5629 = vset.pattern.permute.xlu1 %v9720_v0  ;;  %v7449_v56 = vpop.permute.xlu1 %2999 }
 0x45c   : > { %10074 = vst [vmem:[#allocation343_spill] sm:$0xff] %v7449_v56  ;;  %3380 = vperm.xlu1 %5629, %v7324_v26   ;;  %v5714_v56 = vld [vmem:[%s5897_s28 + $0x31] sm:$0xf] }
 0x460   : > { %3385 = vperm.xlu1 %5629, %v5320_v11   ;;  %v7455_v32 = vpop.permute.xlu1 %3021 }
 0x461   : > { %10075 = vst [vmem:[#allocation344_spill] sm:$0xff] %v7455_v32  ;;  %v210_v32 = vmul.f32 %v7470_v34, %v6632_v29 }
 0x463   : > { %v214_v55 = vadd.f32 %v7479_v47, %v210_v32  ;;  %v268_v32 = vmul.f32 %v7497_v1, %v10085_v36 }
 0x464   : > { %5630 = vset.pattern.permute.xlu1 %v9706_v50  ;;  %v7464_v35 = vpop.permute.xlu1 %3029 }
 0x465   : > { %10077 = vst [vmem:[#allocation346_spill] sm:$0xff] %v7464_v35  ;;  %3407 = vperm.xlu1 %5630, %v5714_v56   ;;  %v7484_v56 = vld [vmem:[%s9629_s1 + $0x1] ss:$0 sm:$0xff]  ;;  %v7486_v35 = vpop.permute.xlu0 %811 }
 0x466   : > { %10081 = vst [vmem:[#allocation350_spill] sm:$0xff] %v7484_v56  ;;  %v239_v29 = vmul.f32 %v7484_v56, %v7301_v2  ;;  %v242_v36 = vmul.f32 %v7484_v56, %v7326_v16 }
 0x468   : > { %v7474_v7 = vpop.permute.xlu1 %3033  ;;  %v243_v37 = vadd.f32 %v239_v29, %v214_v55  ;;  %v211_v55 = vmul.f32 %v7470_v34, %v6637_v42  ;;  %v10092_v34 = vld [vmem:[#allocation24_spill] sm:$0xff] }
 0x469   : > { %10079 = vst [vmem:[#allocation348_spill] sm:$0xff] %v7474_v7  ;;  %3415 = vperm.xlu1 %5630, %v5320_v11   ;;  %v7499_v45 = vpop.permute.xlu0 %900 }
 0x46a   : > { %v272_v29 = vadd.f32 %v268_v32, %v243_v37  ;;  %v215_v17 = vadd.f32 %v7479_v47, %v211_v55  ;;  %v10090_v37 = vld [vmem:[#allocation10_spill] sm:$0xff]  ;;  %v269_v55 = vmul.f32 %v7497_v1, %v10093_v12 }
 0x46b   : > { %v240_v16 = vmul.f32 %v7484_v56, %v10090_v37  ;;  %v10091_v32 = vld [vmem:[#allocation18_spill] sm:$0xff]  ;;  %v10107_v56 = vld [vmem:[#allocation40_spill] sm:$0xff] }
 0x46d   : > { %3419 = vperm.xlu1 %5630, %v5715_v59   ;;  %v7492_v7 = vpop.permute.xlu1 %3054  ;;  %v7511_v59 = vld [vmem:[%s9629_s1 + $0x4] ss:$0 sm:$0xff]  ;;  %v7527_v23 = vpop.permute.xlu0 %993 }
 0x46e   : > { %10082 = vst [vmem:[#allocation351_spill] sm:$0xff] %v7492_v7  ;;  %10087 = vst [vmem:[#allocation14_spill] sm:$0xff] %v7511_v59  ;;  %v307_v41 = vmul.f32 %v7511_v59, %v6643_v3  ;;  %v217_v7 = vadd.f32 %v7479_v47, %v213_v19  ;;  %v271_v19 = vmul.f32 %v7497_v1, %v10091_v32  ;;  %v10100_v1 = vld [vmem:[#allocation28_spill] sm:$0xff] }
 0x470   : > { %v246_v3 = vadd.f32 %v242_v36, %v217_v7 }
 0x471   : > { %5631 = vset.pattern.permute.xlu1 %v9714_v46  ;;  %v7506_v2 = vpop.permute.xlu1 %3058  ;;  %v7552_v12 = vpop.permute.xlu0 %1005 }
 0x472   : > { %10086 = vst [vmem:[#allocation7_spill] sm:$0xff] %v7506_v2  ;;  %3440 = vperm.xlu1 %5631, %v7324_v26   ;;  %v7524_v2 = vld [vmem:[%s9629_s1 + $0x5] ss:$0 sm:$0xff]  ;;  %v311_v26 = vadd.f32 %v307_v41, %v272_v29  ;;  %v244_v41 = vadd.f32 %v240_v16, %v215_v17  ;;  %v10096_v29 = vld [vmem:[#allocation8_spill] sm:$0xff]  ;;  %v275_v37 = vadd.f32 %v271_v19, %v246_v3  ;;  %v7560_v17 = vld [vmem:[%s9629_s1 + $0x8] ss:$0 sm:$0xff] }
 0x473   : > { %10088 = vst [vmem:[#allocation353_spill] sm:$0xff] %v7524_v2  ;;  %v336_v30 = vmul.f32 %v7524_v2, %v10092_v34  ;;  %v310_v34 = vmul.f32 %v7511_v59, %v6653_v22  ;;  %10097 = vst [vmem:[#allocation24_spill] sm:$0xff] %v7560_v17  ;;  %v337_v19 = vmul.f32 %v7524_v2, %v7354_v51 }
 0x474   : > { %v273_v16 = vadd.f32 %v269_v55, %v244_v41  ;;  %v339_v47 = vmul.f32 %v7524_v2, %v10100_v1  ;;  %v10101_v55 = vld [vmem:[#allocation35_spill] sm:$0xff] }
 0x475   : > { %v340_v32 = vadd.f32 %v336_v30, %v311_v26  ;;  %v314_v22 = vadd.f32 %v310_v34, %v275_v37  ;;  %v10099_v30 = vld [vmem:[#allocation20_spill] sm:$0xff]  ;;  %v404_v41 = vmul.f32 %v7560_v17, %v10101_v55  ;;  %v7585_v37 = vld [vmem:[%s9629_s1 + $0x9] ss:$0 sm:$0xff] }
 0x476   : > { %3444 = vperm.xlu1 %5631, %v5320_v11   ;;  %v7529_v42 = vpop.permute.xlu1 %3086  ;;  %v7542_v11 = vld [vmem:[%s9629_s1 + $0x6] ss:$0 sm:$0xff]  ;;  %v308_v26 = vmul.f32 %v7511_v59, %v10099_v30  ;;  %10103 = vst [vmem:[#allocation8_spill] sm:$0xff] %v7585_v37  ;;  %v7587_v30 = vpop.permute.xlu0 %1094  ;;  %v433_v1 = vmul.f32 %v7585_v37, %v7366_v25  ;;  %v7598_v59 = vld [vmem:[%s9629_s1 + $0xa] ss:$0 sm:$0xff] }
 0x477   : > { %10089 = vst [vmem:[#allocation354_spill] sm:$0xff] %v7529_v42  ;;  %10094 = vst [vmem:[#allocation10_spill] sm:$0xff] %v7542_v11  ;;  %v365_v36 = vmul.f32 %v7542_v11, %v10096_v29  ;;  %v7555_v42 = vld [vmem:[%s5897_s28 + $0x69] sm:$0xf]  ;;  %v7565_v29 = vld [vmem:[%s5897_s28 + $0x120] sm:$0xf]  ;;  %v343_v2 = vadd.f32 %v339_v47, %v314_v22 }
 0x478   : > { %3891 = vperm.xlu0 %5676, %v7565_v29  }
 0x479   : > { %v369_v3 = vadd.f32 %v365_v36, %v340_v32  ;;  %v10102_v36 = vld [vmem:[#allocation9_spill] sm:$0xff]  ;;  %v312_v32 = vadd.f32 %v308_v26, %v273_v16  ;;  %v10105_v16 = vld [vmem:[#allocation31_spill] sm:$0xff] }
 0x47a   : > { %5632 = vset.pattern.permute.xlu1 %v9720_v0  ;;  %v7545_v7 = vpop.permute.xlu1 %3096  ;;  %v368_v34 = vmul.f32 %v7542_v11, %v10102_v36  ;;  %v7603_v26 = vld [vmem:[%s5897_s28 + $0xb1] sm:$0xf] }
 0x47b   : > { %10095 = vst [vmem:[#allocation18_spill] sm:$0xff] %v7545_v7  ;;  %3471 = vperm.xlu1 %5632, %v7352_v33   ;;  %v408_v51 = vadd.f32 %v404_v41, %v369_v3  ;;  %v341_v36 = vadd.f32 %v337_v19, %v312_v32  ;;  %v366_v3 = vmul.f32 %v7542_v11, %v10105_v16  ;;  %v7611_v32 = vpop.permute.xlu0 %1187 }
 0x47c   : > { %v372_v25 = vadd.f32 %v368_v34, %v343_v2  ;;  %v405_v19 = vmul.f32 %v7560_v17, %v6659_v40  ;;  %v407_v16 = vmul.f32 %v7560_v17, %v10107_v56  ;;  %v7621_v34 = vld [vmem:[%s9629_s1 + $0xc] ss:$0 sm:$0xff] }
 0x47d   : > { %v437_v47 = vadd.f32 %v433_v1, %v408_v51  ;;  %v370_v41 = vadd.f32 %v366_v3, %v341_v36  ;;  %v10108_v51 = vld [vmem:[#allocation51_spill] sm:$0xff]  ;;  %v501_v40 = vmul.f32 %v7621_v34, %v6666_v44  ;;  %v7639_v44 = vld [vmem:[%s9629_s1 + $0xd] ss:$0 sm:$0xff] }
 0x47e   : > { %v7562_v7 = vpop.permute.xlu1 %3101  ;;  %v462_v2 = vmul.f32 %v7598_v59, %v10108_v51  ;;  %v7624_v1 = vld [vmem:[%s5897_s28 + $0xd1] sm:$0xf]  ;;  %v411_v3 = vadd.f32 %v407_v16, %v372_v25  ;;  %v5391_v25 = vld [vmem:[%s5897_s28 + $0xe9] sm:$0xf] }
 0x47f   : > { %10098 = vst [vmem:[#allocation6_spill] sm:$0xff] %v7562_v7  ;;  %3481 = vperm.xlu1 %5632, %v7555_v42   ;;  %v7578_v7 = vld [vmem:[%s5897_s28 + $0x138] sm:$0xf]  ;;  %10109 = vst [vmem:[#allocation35_spill] sm:$0xff] %v7624_v1  ;;  %v409_v56 = vadd.f32 %v405_v19, %v370_v41  ;;  %v10112_v19 = vld [vmem:[#allocation11_spill] sm:$0xff] }
 0x480   : > { %3903 = vperm.xlu0 %5676, %v7578_v7   ;;  %v466_v36 = vadd.f32 %v462_v2, %v437_v47  ;;  %v7641_v47 = vpop.permute.xlu0 %1199  ;;  %v463_v41 = vmul.f32 %v7598_v59, %v10112_v19 }
 0x483   : > { %3486 = vperm.xlu1 %5632, %v7364_v39   ;;  %v7592_v55 = vpop.permute.xlu1 %3122 }
 0x484   : > { %10104 = vst [vmem:[#allocation20_spill] sm:$0xff] %v7592_v55  ;;  %3991 = vperm.xlu0 %5676, %v7603_v26   ;;  %v5716_v55 = vld [vmem:[%s5897_s28 + $0x61] sm:$0xf] }
 0x487   : > { %5633 = vset.pattern.permute.xlu1 %v9706_v50  ;;  %v7606_v22 = vpop.permute.xlu1 %3126 }
 0x488   : > { %10106 = vst [vmem:[#allocation28_spill] sm:$0xff] %v7606_v22  ;;  %3507 = vperm.xlu1 %5633, %v5716_v55   ;;  %v436_v55 = vmul.f32 %v7585_v37, %v7391_v8  ;;  %4083 = vperm.xlu0 %5676, %v7624_v1   ;;  %v10111_v22 = vld [vmem:[#allocation45_spill] sm:$0xff]  ;;  %v505_v8 = vadd.f32 %v501_v40, %v466_v36  ;;  %v7657_v40 = vld [vmem:[%s9629_s1 + $0xe] ss:$0 sm:$0xff] }
 0x489   : > { %v434_v17 = vmul.f32 %v7585_v37, %v10111_v22  ;;  %v10114_v22 = vld [vmem:[#allocation57_spill] sm:$0xff]  ;;  %v10115_v37 = vld [vmem:[#allocation68_spill] sm:$0xff]  ;;  %10116 = vst [vmem:[#allocation40_spill] sm:$0xff] %v7657_v40 }
 0x48a   : > { %v440_v16 = vadd.f32 %v436_v55, %v411_v3  ;;  %v465_v1 = vmul.f32 %v7598_v59, %v10114_v22  ;;  %v530_v11 = vmul.f32 %v7639_v44, %v10115_v37  ;;  %v5399_v36 = vld [vmem:[%s5897_s28 + $0x101] sm:$0xf]  ;;  %v504_v55 = vmul.f32 %v7621_v34, %v6671_v53  ;;  %v7664_v22 = vpop.permute.xlu0 %1287  ;;  %v5408_v53 = vld [vmem:[%s5897_s28 + $0x148] sm:$0xf] }
 0x48b   : > { %v438_v2 = vadd.f32 %v434_v17, %v409_v56  ;;  %v10117_v17 = vld [vmem:[#allocation13_spill] sm:$0xff] }
 0x48c   : > { %3511 = vperm.xlu1 %5633, %v7555_v42   ;;  %v7632_v51 = vpop.permute.xlu1 %3147  ;;  %4095 = vperm.xlu0 %5676, %v5391_v25   ;;  %v559_v3 = vmul.f32 %v7657_v40, %v10117_v17  ;;  %v469_v56 = vadd.f32 %v465_v1, %v440_v16  ;;  %v534_v25 = vadd.f32 %v530_v11, %v505_v8  ;;  %v7674_v17 = vld [vmem:[%s9629_s1 + $0x10] ss:$0 sm:$0xff] }
 0x48d   : > { %10110 = vst [vmem:[#allocation9_spill] sm:$0xff] %v7632_v51  ;;  %v467_v19 = vadd.f32 %v463_v41, %v438_v2  ;;  %10120 = vst [vmem:[#allocation45_spill] sm:$0xff] %v7674_v17  ;;  %v531_v16 = vmul.f32 %v7639_v44, %v7419_v28  ;;  %v10121_v41 = vld [vmem:[#allocation74_spill] sm:$0xff]  ;;  %v5411_v28 = vld [vmem:[%s5897_s28 + $0x160] sm:$0xf] }
 0x48e   : > { %v508_v1 = vadd.f32 %v504_v55, %v469_v56  ;;  %v563_v11 = vadd.f32 %v559_v3, %v534_v25  ;;  %v533_v2 = vmul.f32 %v7639_v44, %v10121_v41  ;;  %v7689_v3 = vld [vmem:[%s9629_s1 + $0x11] ss:$0 sm:$0xff] }
 0x48f   : > { %v10124_v55 = vld [vmem:[#allocation15_spill] sm:$0xff] }
 0x490   : > { %5634 = vset.pattern.permute.xlu1 %v9714_v46  ;;  %v7647_v51 = vpop.permute.xlu1 %3155  ;;  %4183 = vperm.xlu0 %5676, %v5399_v36   ;;  %v562_v56 = vmul.f32 %v7657_v40, %v10124_v55 }
 0x491   : > { %10113 = vst [vmem:[#allocation31_spill] sm:$0xff] %v7647_v51  ;;  %3532 = vperm.xlu1 %5634, %v7352_v33   ;;  %v10119_v33 = vld [vmem:[#allocation61_spill] sm:$0xff] }
 0x492   : > { %v502_v51 = vmul.f32 %v7621_v34, %v10119_v33 }
 0x494   : > { %v7666_v37 = vpop.permute.xlu1 %3159  ;;  %4276 = vperm.xlu0 %5676, %v5408_v53   ;;  %v506_v8 = vadd.f32 %v502_v51, %v467_v19  ;;  %v7691_v51 = vpop.permute.xlu0 %1379  ;;  %v626_v19 = vmul.f32 %v7689_v3, %v7431_v58 }
 0x495   : > { %10118 = vst [vmem:[#allocation51_spill] sm:$0xff] %v7666_v37  ;;  %3540 = vperm.xlu1 %5634, %v7555_v42   ;;  %v10122_v42 = vld [vmem:[#allocation84_spill] sm:$0xff] }
 0x496   : > { %v597_v36 = vmul.f32 %v7674_v17, %v10122_v42  ;;  %v535_v53 = vadd.f32 %v531_v16, %v506_v8  ;;  %v7704_v42 = vld [vmem:[%s9629_s1 + $0x12] ss:$0 sm:$0xff]  ;;  %v598_v8 = vmul.f32 %v7674_v17, %v6677_v54  ;;  %v10128_v37 = vld [vmem:[#allocation100_spill] sm:$0xff] }
 0x497   : > { %v5428_v54 = vld [vmem:[%s5897_s28 + $0x198] sm:$0xf] }
 0x498   : > { %v601_v25 = vadd.f32 %v597_v36, %v563_v11  ;;  %4288 = vperm.xlu0 %5676, %v5411_v28   ;;  %v5419_v11 = vld [vmem:[%s5897_s28 + $0x178] sm:$0xf]  ;;  %v7715_v36 = vpop.permute.xlu0 %1391  ;;  %v10127_v28 = vld [vmem:[#allocation91_spill] sm:$0xff] }
 0x499   : > { %3544 = vperm.xlu1 %5634, %v7364_v39   ;;  %v7684_v33 = vpop.permute.xlu1 %3188  ;;  %v537_v39 = vadd.f32 %v533_v2, %v508_v1  ;;  %v7711_v2 = vld [vmem:[%s5897_s28 + $0xb8] sm:$0xf] }
 0x49a   : > { %10123 = vst [vmem:[#allocation11_spill] sm:$0xff] %v7684_v33  ;;  %v10126_v33 = vld [vmem:[#allocation78_spill] sm:$0xff]  ;;  %v630_v58 = vadd.f32 %v626_v19, %v601_v25 }
 0x49b   : > { %v560_v55 = vmul.f32 %v7657_v40, %v10126_v33  ;;  %v566_v1 = vadd.f32 %v562_v56, %v537_v39  ;;  %v655_v33 = vmul.f32 %v7704_v42, %v10128_v37  ;;  %v7724_v56 = vld [vmem:[%s9629_s1 + $0x14] ss:$0 sm:$0xff] }
 0x49c   : > { %4377 = vperm.xlu0 %5676, %v5419_v11   ;;  %v693_v19 = vmul.f32 %v7724_v56, %v6683_v60  ;;  %v5431_v11 = vld [vmem:[%s5897_s28 + $0x1b0] sm:$0xf]  ;;  %v7742_v40 = vpop.permute.xlu0 %1479 }
 0x49d   : > { %5635 = vset.pattern.permute.xlu1 %v9720_v0  ;;  %v7699_v41 = vpop.permute.xlu1 %3193  ;;  %v564_v16 = vadd.f32 %v560_v55, %v535_v53  ;;  %v659_v39 = vadd.f32 %v655_v33, %v630_v58  ;;  %v629_v55 = vmul.f32 %v7689_v3, %v7446_v48  ;;  %v5717_v58 = vld [vmem:[%s5897_s28 + $0xa8] sm:$0xf]  ;;  %v7753_v33 = vld [vmem:[%s9629_s1 + $0x16] ss:$0 sm:$0xff] }
 0x49e   : > { %10125 = vst [vmem:[#allocation57_spill] sm:$0xff] %v7699_v41  ;;  %3573 = vperm.xlu1 %5635, %v7389_v38   ;;  %v600_v41 = vmul.f32 %v7674_v17, %v10127_v28  ;;  %v10130_v28 = vld [vmem:[#allocation95_spill] sm:$0xff] }
 0x49f   : > { %v602_v37 = vadd.f32 %v598_v8, %v564_v16  ;;  %v627_v17 = vmul.f32 %v7689_v3, %v10130_v28 }
 0x4a0   : > { %v604_v53 = vadd.f32 %v600_v41, %v566_v1  ;;  %4470 = vperm.xlu0 %5676, %v5428_v54   ;;  %v697_v41 = vadd.f32 %v693_v19, %v659_v39  ;;  %v10132_v1 = vld [vmem:[#allocation17_spill] sm:$0xff]  ;;  %v658_v54 = vmul.f32 %v7704_v42, %v6423_v52  ;;  %v5439_v39 = vld [vmem:[%s5897_s28 + $0x1c8] sm:$0xf] }
 0x4a1   : > { %v656_v8 = vmul.f32 %v7704_v42, %v10132_v1  ;;  %v631_v16 = vadd.f32 %v627_v17, %v602_v37  ;;  %v696_v17 = vmul.f32 %v7724_v56, %v6687_v63  ;;  %v10135_v1 = vld [vmem:[#allocation106_spill] sm:$0xff] }
 0x4a2   : > { %3578 = vperm.xlu1 %5635, %v7711_v2   ;;  %v7727_v25 = vpop.permute.xlu1 %3215  ;;  %v633_v48 = vadd.f32 %v629_v55, %v604_v53  ;;  %v10133_v53 = vld [vmem:[#allocation19_spill] sm:$0xff] }
 0x4a3   : > { %10129 = vst [vmem:[#allocation68_spill] sm:$0xff] %v7727_v25  ;;  %v7740_v25 = vld [vmem:[%s9629_s1 + $0x15] ss:$0 sm:$0xff]  ;;  %v751_v55 = vmul.f32 %v7753_v33, %v10133_v53  ;;  %v660_v52 = vadd.f32 %v656_v8, %v631_v16  ;;  %v7775_v53 = vld [vmem:[%s9629_s1 + $0x18] ss:$0 sm:$0xff] }
 0x4a4   : > { %4482 = vperm.xlu0 %5676, %v5431_v11   ;;  %v722_v19 = vmul.f32 %v7740_v25, %v6446_v10  ;;  %v662_v37 = vadd.f32 %v658_v54, %v633_v48  ;;  %v5448_v10 = vld [vmem:[%s5897_s28 + $0x149] sm:$0xf]  ;;  %v5718_v48 = vld [vmem:[%s5897_s28 + $0xc0] sm:$0xf]  ;;  %v723_v8 = vmul.f32 %v7740_v25, %v7453_v14  ;;  %v725_v16 = vmul.f32 %v7740_v25, %v6458_v4 }
 0x4a6   : > { %5636 = vset.pattern.permute.xlu1 %v9706_v50  ;;  %v7745_v60 = vpop.permute.xlu1 %3223  ;;  %v726_v28 = vadd.f32 %v722_v19, %v697_v41  ;;  %v789_v19 = vmul.f32 %v7775_v53, %v6479_v5 }
 0x4a7   : > { %10131 = vst [vmem:[#allocation13_spill] sm:$0xff] %v7745_v60  ;;  %3600 = vperm.xlu1 %5636, %v5717_v58   ;;  %v7767_v58 = vpop.permute.xlu0 %1572  ;;  %v694_v60 = vmul.f32 %v7724_v56, %v10135_v1  ;;  %v10137_v1 = vld [vmem:[#allocation21_spill] sm:$0xff] }
 0x4a8   : > { %4571 = vperm.xlu0 %5676, %v5439_v39   ;;  %v755_v63 = vadd.f32 %v751_v55, %v726_v28  ;;  %v5451_v39 = vld [vmem:[%s5897_s28 + $0x161] sm:$0xf]  ;;  %v754_v55 = vmul.f32 %v7753_v33, %v10137_v1 }
 0x4a9   : > { %v698_v54 = vadd.f32 %v694_v60, %v660_v52  ;;  %v7805_v52 = vld [vmem:[%s9629_s1 + $0x1a] ss:$0 sm:$0xff] }
 0x4aa   : > { %v7762_v11 = vpop.permute.xlu1 %3227 }
 0x4ab   : > { %10134 = vst [vmem:[#allocation61_spill] sm:$0xff] %v7762_v11  ;;  %3608 = vperm.xlu1 %5636, %v7711_v2   ;;  %v700_v11 = vadd.f32 %v696_v17, %v662_v37  ;;  %v7792_v17 = vld [vmem:[%s9629_s1 + $0x19] ss:$0 sm:$0xff]  ;;  %v7794_v60 = vpop.permute.xlu0 %1584  ;;  %v793_v37 = vadd.f32 %v789_v19, %v755_v63  ;;  %v727_v5 = vadd.f32 %v723_v8, %v698_v54  ;;  %v7824_v19 = vld [vmem:[%s9629_s1 + $0x1c] ss:$0 sm:$0xff] }
 0x4ac   : > { %4663 = vperm.xlu0 %5676, %v5448_v10   ;;  %v818_v14 = vmul.f32 %v7792_v17, %v7461_v43  ;;  %v752_v10 = vmul.f32 %v7753_v33, %v6466_v6  ;;  %v5459_v63 = vld [vmem:[%s5897_s28 + $0x179] sm:$0xf]  ;;  %v792_v8 = vmul.f32 %v7775_v53, %v6495_v13  ;;  %v847_v6 = vmul.f32 %v7805_v52, %v6516_v18 }
 0x4ad   : > { %v729_v4 = vadd.f32 %v725_v16, %v700_v11 }
 0x4ae   : > { %v822_v43 = vadd.f32 %v818_v14, %v793_v37  ;;  %v756_v16 = vadd.f32 %v752_v10, %v727_v5  ;;  %v819_v37 = vmul.f32 %v7792_v17, %v6504_v15  ;;  %v850_v15 = vmul.f32 %v7805_v52, %v6528_v20 }
 0x4af   : > { %3612 = vperm.xlu1 %5636, %v5718_v48   ;;  %v7778_v41 = vpop.permute.xlu1 %3248  ;;  %v758_v11 = vadd.f32 %v754_v55, %v729_v4  ;;  %v790_v48 = vmul.f32 %v7775_v53, %v6695_v49  ;;  %v7812_v54 = vpop.permute.xlu0 %1673  ;;  %v5468_v49 = vld [vmem:[%s5897_s28 + $0x199] sm:$0xf]  ;;  %v821_v55 = vmul.f32 %v7792_v17, %v7486_v35  ;;  %v7845_v4 = vld [vmem:[%s5897_s28 + $0xe0] sm:$0xf]  ;;  %v5471_v35 = vld [vmem:[%s5897_s28 + $0x1b1] sm:$0xf] }
 0x4b0   : > { %10136 = vst [vmem:[#allocation74_spill] sm:$0xff] %v7778_v41  ;;  %4675 = vperm.xlu0 %5676, %v5451_v39   ;;  %v886_v39 = vmul.f32 %v7824_v19, %v6703_v57  ;;  %v7840_v57 = vld [vmem:[%s9629_s1 + $0x1d] ss:$0 sm:$0xff]  ;;  %v10209_v41 = vld [vmem:[#allocation86_spill] sm:$0xff] }
 0x4b1   : > { %v796_v1 = vadd.f32 %v792_v8, %v758_v11  ;;  %v794_v13 = vadd.f32 %v790_v48, %v756_v16  ;;  %v915_v16 = vmul.f32 %v7840_v57, %v6553_v24  ;;  %v7860_v8 = vld [vmem:[%s9629_s1 + $0x1e] ss:$0 sm:$0xff]  ;;  %v5719_v24 = vld [vmem:[%s5897_s28 + $0x1a1] sm:$0xf] }
 0x4b3   : > { %5637 = vset.pattern.permute.xlu1 %v9714_v46  ;;  %v7799_v28 = vpop.permute.xlu1 %3252  ;;  %v7842_v14 = vpop.permute.xlu0 %1766  ;;  %v825_v10 = vadd.f32 %v821_v55, %v796_v1  ;;  %v823_v11 = vadd.f32 %v819_v37, %v794_v13  ;;  %v887_v37 = vmul.f32 %v7824_v19, %v6536_v21 }
 0x4b4   : > { %10138 = vst [vmem:[#allocation84_spill] sm:$0xff] %v7799_v28  ;;  %3633 = vperm.xlu1 %5637, %v7389_v38   ;;  %4763 = vperm.xlu0 %5676, %v5459_v63   ;;  %v10141_v63 = vld [vmem:[#allocation23_spill] sm:$0xff] }
 0x4b7   : > { %v7867_v55 = vpop.permute.xlu0 %1778 }
 0x4b8   : > { %3637 = vperm.xlu1 %5637, %v7711_v2   ;;  %v7815_v38 = vpop.permute.xlu1 %3279  ;;  %v851_v2 = vadd.f32 %v847_v6, %v822_v43  ;;  %4855 = vperm.xlu0 %5676, %v5468_v49   ;;  %v848_v43 = vmul.f32 %v7805_v52, %v10141_v63  ;;  %v10143_v6 = vld [vmem:[#allocation25_spill] sm:$0xff]  ;;  %v916_v63 = vmul.f32 %v7840_v57, %v7499_v45 }
 0x4b9   : > { %10139 = vst [vmem:[#allocation15_spill] sm:$0xff] %v7815_v38  ;;  %v944_v49 = vmul.f32 %v7860_v8, %v10143_v6  ;;  %v10146_v6 = vld [vmem:[#allocation27_spill] sm:$0xff] }
 0x4ba   : > { %v890_v5 = vadd.f32 %v886_v39, %v851_v2  ;;  %v889_v39 = vmul.f32 %v7824_v19, %v6711_v31  ;;  %v854_v2 = vadd.f32 %v850_v15, %v825_v10  ;;  %v852_v20 = vadd.f32 %v848_v43, %v823_v11  ;;  %v7878_v31 = vld [vmem:[%s9629_s1 + $0x20] ss:$0 sm:$0xff]  ;;  %v7892_v15 = vld [vmem:[%s9629_s1 + $0x21] ss:$0 sm:$0xff] }
 0x4bb   : > { %v918_v43 = vmul.f32 %v7840_v57, %v6565_v9  ;;  %v983_v11 = vmul.f32 %v7878_v31, %v6583_v27  ;;  %v947_v45 = vmul.f32 %v7860_v8, %v10146_v6  ;;  %v1012_v9 = vmul.f32 %v7892_v15, %v7527_v23  ;;  %v7918_v6 = vld [vmem:[%s9629_s1 + $0x24] ss:$0 sm:$0xff] }
 0x4bc   : > { %5638 = vset.pattern.permute.xlu1 %v9720_v0  ;;  %v7832_v18 = vpop.permute.xlu1 %3289  ;;  %4867 = vperm.xlu0 %5676, %v5471_v35   ;;  %v919_v1 = vadd.f32 %v915_v16, %v890_v5  ;;  %v893_v35 = vadd.f32 %v889_v39, %v854_v2  ;;  %v891_v10 = vadd.f32 %v887_v37, %v852_v20  ;;  %v5720_v16 = vld [vmem:[%s5897_s28 + $0xd8] sm:$0xf]  ;;  %v7902_v2 = vld [vmem:[%s9629_s1 + $0x22] ss:$0 sm:$0xff] }
 0x4bd   : > { %10140 = vst [vmem:[#allocation78_spill] sm:$0xff] %v7832_v18  ;;  %3665 = vperm.xlu1 %5638, %v7417_v62  }
 0x4be   : > { %v948_v5 = vadd.f32 %v944_v49, %v919_v1  ;;  %v922_v39 = vadd.f32 %v918_v43, %v893_v35  ;;  %v920_v27 = vadd.f32 %v916_v63, %v891_v10  ;;  %v10147_v1 = vld [vmem:[#allocation137_spill] sm:$0xff]  ;;  %v10150_v35 = vld [vmem:[#allocation144_spill] sm:$0xff]  ;;  %v10151_v63 = vld [vmem:[#allocation151_spill] sm:$0xff] }
 0x4bf   : > { %v945_v20 = vmul.f32 %v7860_v8, %v10147_v1  ;;  %v986_v10 = vmul.f32 %v7878_v31, %v10150_v35  ;;  %v1041_v43 = vmul.f32 %v7902_v2, %v10151_v63  ;;  %v7933_v63 = vld [vmem:[%s9629_s1 + $0x25] ss:$0 sm:$0xff] }
 0x4c0   : > { %v7850_v48 = vpop.permute.xlu1 %3294  ;;  %5679 = vset.pattern.permute.xlu0 %v9714_v46  ;;  %v987_v49 = vadd.f32 %v983_v11, %v948_v5  ;;  %v10149_v5 = vld [vmem:[#allocation166_spill] sm:$0xff] }
 0x4c1   : > { %10142 = vst [vmem:[#allocation91_spill] sm:$0xff] %v7850_v48  ;;  %3675 = vperm.xlu1 %5638, %v7845_v4   ;;  %4888 = vperm.xlu0 %5679, %v5719_v24   ;;  %v984_v11 = vmul.f32 %v7878_v31, %v10149_v5  ;;  %v949_v23 = vadd.f32 %v945_v20, %v920_v27  ;;  %v10154_v5 = vld [vmem:[#allocation147_spill] sm:$0xff] }
 0x4c2   : > { %v1016_v37 = vadd.f32 %v1012_v9, %v987_v49  ;;  %v1015_v27 = vmul.f32 %v7892_v15, %v7552_v12  ;;  %v1013_v35 = vmul.f32 %v7892_v15, %v10154_v5  ;;  %v10159_v5 = vld [vmem:[#allocation30_spill] sm:$0xff] }
 0x4c3   : > { %v988_v20 = vadd.f32 %v984_v11, %v949_v23  ;;  %v10158_v23 = vld [vmem:[#allocation157_spill] sm:$0xff] }
 0x4c4   : > { %v1045_v9 = vadd.f32 %v1041_v43, %v1016_v37  ;;  %v10156_v37 = vld [vmem:[#allocation29_spill] sm:$0xff] }
 0x4c5   : > { %3680 = vperm.xlu1 %5638, %v7429_v61   ;;  %v7871_v13 = vpop.permute.xlu1 %3315  ;;  %v1042_v12 = vmul.f32 %v7902_v2, %v10156_v37  ;;  %v7947_v43 = vld [vmem:[%s9629_s1 + $0x26] ss:$0 sm:$0xff]  ;;  %v10162_v37 = vld [vmem:[#allocation155_spill] sm:$0xff] }
 0x4c6   : > { %10144 = vst [vmem:[#allocation100_spill] sm:$0xff] %v7871_v13  ;;  %v5721_v13 = vld [vmem:[%s5897_s28 + $0xf8] sm:$0xf] }
 0x4c9   : > { %5639 = vset.pattern.permute.xlu1 %v9706_v50  ;;  %v7887_v21 = vpop.permute.xlu1 %3319 }
 0x4ca   : > { %10145 = vst [vmem:[#allocation95_spill] sm:$0xff] %v7887_v21  ;;  %3701 = vperm.xlu1 %5639, %v5720_v16   ;;  %v951_v16 = vadd.f32 %v947_v45, %v922_v39  ;;  %v10153_v45 = vld [vmem:[#allocation168_spill] sm:$0xff] }
 0x4cb   : > { %v1080_v49 = vmul.f32 %v7918_v6, %v10153_v45 }
 0x4cc   : > { %v990_v39 = vadd.f32 %v986_v10, %v951_v16  ;;  %v1017_v16 = vadd.f32 %v1013_v35, %v988_v20  ;;  %v1109_v10 = vmul.f32 %v7933_v63, %v10158_v23  ;;  %v7961_v23 = vld [vmem:[%s9629_s1 + $0x28] ss:$0 sm:$0xff] }
 0x4cd   : > { %v1084_v21 = vadd.f32 %v1080_v49, %v1045_v9  ;;  %v1138_v49 = vmul.f32 %v7947_v43, %v10159_v5  ;;  %v10160_v9 = vld [vmem:[#allocation170_spill] sm:$0xff] }
 0x4ce   : > { %3705 = vperm.xlu1 %5639, %v7845_v4   ;;  %v7907_v24 = vpop.permute.xlu1 %3340  ;;  %v1019_v45 = vadd.f32 %v1015_v27, %v990_v39  ;;  %v1046_v35 = vadd.f32 %v1042_v12, %v1017_v16  ;;  %v10165_v12 = vld [vmem:[#allocation159_spill] sm:$0xff] }
 0x4cf   : > { %10148 = vst [vmem:[#allocation17_spill] sm:$0xff] %v7907_v24  ;;  %v1113_v27 = vadd.f32 %v1109_v10, %v1084_v21  ;;  %v1112_v16 = vmul.f32 %v7933_v63, %v10165_v12  ;;  %v10166_v10 = vld [vmem:[#allocation162_spill] sm:$0xff] }
 0x4d1   : > { %v1142_v18 = vadd.f32 %v1138_v49, %v1113_v27  ;;  %v7977_v49 = vld [vmem:[%s9629_s1 + $0x29] ss:$0 sm:$0xff] }
 0x4d2   : > { %5640 = vset.pattern.permute.xlu1 %v9714_v46  ;;  %v7921_v1 = vpop.permute.xlu1 %3348 }
 0x4d3   : > { %10152 = vst [vmem:[#allocation19_spill] sm:$0xff] %v7921_v1  ;;  %3726 = vperm.xlu1 %5640, %v7417_v62   ;;  %v10157_v62 = vld [vmem:[#allocation154_spill] sm:$0xff] }
 0x4d4   : > { %v1044_v11 = vmul.f32 %v7902_v2, %v10157_v62  ;;  %v1081_v62 = vmul.f32 %v7918_v6, %v10162_v37  ;;  %v5360_v37 = vld [vmem:[%s5897_s28 + $0x108] sm:$0xf] }
 0x4d6   : > { %v7935_v1 = vpop.permute.xlu1 %3352  ;;  %v1048_v39 = vadd.f32 %v1044_v11, %v1019_v45  ;;  %v1085_v21 = vadd.f32 %v1081_v62, %v1046_v35  ;;  %v10164_v11 = vld [vmem:[#allocation345_spill] sm:$0xff] }
 0x4d7   : > { %10155 = vst [vmem:[#allocation106_spill] sm:$0xff] %v7935_v1  ;;  %3734 = vperm.xlu1 %5640, %v7845_v4   ;;  %v1083_v4 = vmul.f32 %v7918_v6, %v10160_v9  ;;  %v1177_v9 = vmul.f32 %v7961_v23, %v10166_v10  ;;  %v7988_v10 = vld [vmem:[%s9629_s1 + $0x2a] ss:$0 sm:$0xff] }
 0x4d9   : > { %v1087_v5 = vadd.f32 %v1083_v4, %v1048_v39  ;;  %v10167_v4 = vld [vmem:[#allocation32_spill] sm:$0xff]  ;;  %v1181_v27 = vadd.f32 %v1177_v9, %v1142_v18 }
 0x4da   : > { %v1141_v39 = vmul.f32 %v7947_v43, %v10167_v4  ;;  %v10170_v18 = vld [vmem:[#allocation172_spill] sm:$0xff] }
 0x4db   : > { %3738 = vperm.xlu1 %5640, %v7429_v61   ;;  %v7954_v20 = vpop.permute.xlu1 %3380  ;;  %v1110_v61 = vmul.f32 %v7933_v63, %v7587_v30  ;;  %v1206_v30 = vmul.f32 %v7977_v49, %v7611_v32  ;;  %v1116_v35 = vadd.f32 %v1112_v16, %v1087_v5  ;;  %v1178_v9 = vmul.f32 %v7961_v23, %v10170_v18  ;;  %v10172_v5 = vld [vmem:[#allocation164_spill] sm:$0xff] }
 0x4dc   : > { %10161 = vst [vmem:[#allocation21_spill] sm:$0xff] %v7954_v20 }
 0x4dd   : > { %v1114_v62 = vadd.f32 %v1110_v61, %v1085_v21  ;;  %v1210_v28 = vadd.f32 %v1206_v30, %v1181_v27  ;;  %v1145_v4 = vadd.f32 %v1141_v39, %v1116_v35  ;;  %v1180_v21 = vmul.f32 %v7961_v23, %v10172_v5  ;;  %v10173_v61 = vld [vmem:[#allocation169_spill] sm:$0xff]  ;;  %v10174_v39 = vld [vmem:[#allocation174_spill] sm:$0xff] }
 0x4de   : > { %v1235_v16 = vmul.f32 %v7988_v10, %v10173_v61  ;;  %v1209_v35 = vmul.f32 %v7977_v49, %v7641_v47  ;;  %v10176_v5 = vld [vmem:[#allocation165_spill] sm:$0xff]  ;;  %v8018_v61 = vld [vmem:[%s9629_s1 + $0x2d] ss:$0 sm:$0xff] }
 0x4df   : > { %5641 = vset.pattern.permute.xlu1 %v9720_v0  ;;  %v7964_v45 = vpop.permute.xlu1 %3385  ;;  %v1184_v30 = vadd.f32 %v1180_v21, %v1145_v4  ;;  %v10178_v21 = vld [vmem:[#allocation173_spill] sm:$0xff] }
 0x4e0   : > { %10163 = vst [vmem:[#allocation23_spill] sm:$0xff] %v7964_v45  ;;  %3767 = vperm.xlu1 %5641, %v10164_v11   ;;  %v10169_v45 = vld [vmem:[#allocation160_spill] sm:$0xff]  ;;  %v1239_v27 = vadd.f32 %v1235_v16, %v1210_v28  ;;  %v1238_v47 = vmul.f32 %v7988_v10, %v10178_v21  ;;  %v5722_v16 = vld [vmem:[%s5897_s28 + $0x110] sm:$0xf] }
 0x4e1   : > { %v1139_v20 = vmul.f32 %v7947_v43, %v10169_v45  ;;  %v8005_v45 = vld [vmem:[%s9629_s1 + $0x2c] ss:$0 sm:$0xff] }
 0x4e3   : > { %v1143_v1 = vadd.f32 %v1139_v20, %v1114_v62  ;;  %v1273_v20 = vmul.f32 %v8005_v45, %v10174_v39  ;;  %v10177_v39 = vld [vmem:[#allocation34_spill] sm:$0xff] }
 0x4e4   : > { %3772 = vperm.xlu1 %5641, %v5360_v37   ;;  %v7983_v12 = vpop.permute.xlu1 %3407  ;;  %v1236_v28 = vmul.f32 %v7988_v10, %v10177_v39 }
 0x4e5   : > { %10168 = vst [vmem:[#allocation25_spill] sm:$0xff] %v7983_v12  ;;  %v1182_v62 = vadd.f32 %v1178_v9, %v1143_v1  ;;  %v1213_v12 = vadd.f32 %v1209_v35, %v1184_v30  ;;  %v10179_v1 = vld [vmem:[#allocation44_spill] sm:$0xff] }
 0x4e6   : > { %v1302_v9 = vmul.f32 %v8018_v61, %v10179_v1  ;;  %v10182_v30 = vld [vmem:[#allocation176_spill] sm:$0xff]  ;;  %v10184_v1 = vld [vmem:[#allocation175_spill] sm:$0xff] }
 0x4e7   : > { %v1276_v35 = vmul.f32 %v8005_v45, %v10182_v30 }
 0x4e8   : > { %5642 = vset.pattern.permute.xlu1 %v9706_v50  ;;  %v7995_v32 = vpop.permute.xlu1 %3415 }
 0x4e9   : > { %10171 = vst [vmem:[#allocation27_spill] sm:$0xff] %v7995_v32  ;;  %3794 = vperm.xlu1 %5642, %v5721_v13   ;;  %v1207_v13 = vmul.f32 %v7977_v49, %v10176_v5  ;;  %v1277_v32 = vadd.f32 %v1273_v20, %v1239_v27  ;;  %v10181_v20 = vld [vmem:[#allocation36_spill] sm:$0xff] }
 0x4eb   : > { %v1211_v4 = vadd.f32 %v1207_v13, %v1182_v62  ;;  %v1242_v62 = vadd.f32 %v1238_v47, %v1213_v12  ;;  %v1306_v13 = vadd.f32 %v1302_v9, %v1277_v32  ;;  %v1303_v12 = vmul.f32 %v8018_v61, %v7664_v22  ;;  %v10185_v32 = vld [vmem:[#allocation50_spill] sm:$0xff]  ;;  %v8058_v9 = vld [vmem:[%s9629_s1 + $0x31] ss:$0 sm:$0xff] }
 0x4ec   : > { %v8011_v18 = vpop.permute.xlu1 %3419  ;;  %v1398_v22 = vmul.f32 %v8058_v9, %v7691_v51 }
 0x4ed   : > { %10175 = vst [vmem:[#allocation137_spill] sm:$0xff] %v8011_v18  ;;  %3802 = vperm.xlu1 %5642, %v5360_v37   ;;  %v8032_v18 = vld [vmem:[%s9629_s1 + $0x2e] ss:$0 sm:$0xff]  ;;  %v1240_v39 = vadd.f32 %v1236_v28, %v1211_v4  ;;  %v1305_v28 = vmul.f32 %v8018_v61, %v10185_v32  ;;  %v10186_v4 = vld [vmem:[#allocation59_spill] sm:$0xff] }
 0x4ee   : > { %v1331_v27 = vmul.f32 %v8032_v18, %v10181_v20  ;;  %v1280_v20 = vadd.f32 %v1276_v35, %v1242_v62 }
 0x4f0   : > { %v1335_v48 = vadd.f32 %v1331_v27, %v1306_v13  ;;  %v10188_v27 = vld [vmem:[#allocation39_spill] sm:$0xff]  ;;  %v1309_v13 = vadd.f32 %v1305_v28, %v1280_v20 }
 0x4f1   : > { %3806 = vperm.xlu1 %5642, %v5722_v16   ;;  %v8027_v5 = vpop.permute.xlu1 %3440  ;;  %v1274_v16 = vmul.f32 %v8005_v45, %v10184_v1  ;;  %v1334_v35 = vmul.f32 %v8032_v18, %v10188_v27  ;;  %v8069_v1 = vld [vmem:[%s9629_s1 + $0x32] ss:$0 sm:$0xff] }
 0x4f2   : > { %10180 = vst [vmem:[#allocation166_spill] sm:$0xff] %v8027_v5  ;;  %v8046_v5 = vld [vmem:[%s9629_s1 + $0x30] ss:$0 sm:$0xff]  ;;  %10189 = vst [vmem:[#allocation168_spill] sm:$0xff] %v8069_v1 }
 0x4f3   : > { %v1278_v30 = vadd.f32 %v1274_v16, %v1240_v39  ;;  %v1369_v47 = vmul.f32 %v8046_v5, %v10186_v4  ;;  %v10190_v16 = vld [vmem:[#allocation53_spill] sm:$0xff]  ;;  %v1338_v27 = vadd.f32 %v1334_v35, %v1309_v13 }
 0x4f4   : > { %v10197_v35 = vld [vmem:[#allocation41_spill] sm:$0xff] }
 0x4f5   : > { %5643 = vset.pattern.permute.xlu1 %v9714_v46  ;;  %v8039_v21 = vpop.permute.xlu1 %3444  ;;  %v1373_v62 = vadd.f32 %v1369_v47, %v1335_v48  ;;  %v1307_v39 = vadd.f32 %v1303_v12, %v1278_v30  ;;  %v10192_v48 = vld [vmem:[#allocation178_spill] sm:$0xff]  ;;  %v5370_v30 = vld [vmem:[%s5897_s28 + $0x130] sm:$0xf]  ;;  %v10194_v47 = vld [vmem:[#allocation77_spill] sm:$0xff] }
 0x4f6   : > { %10183 = vst [vmem:[#allocation144_spill] sm:$0xff] %v8039_v21  ;;  %3827 = vperm.xlu1 %5643, %v10164_v11   ;;  %v1370_v51 = vmul.f32 %v8046_v5, %v10192_v48  ;;  %v10193_v12 = vld [vmem:[#allocation66_spill] sm:$0xff]  ;;  %v1427_v21 = vmul.f32 %v8069_v1, %v10194_v47 }
 0x4f7   : > { %v1402_v4 = vadd.f32 %v1398_v22, %v1373_v62  ;;  %v1372_v28 = vmul.f32 %v8046_v5, %v10193_v12  ;;  %v10198_v12 = vld [vmem:[#allocation69_spill] sm:$0xff] }
 0x4f8   : > { %v1399_v47 = vmul.f32 %v8058_v9, %v10198_v12 }
 0x4f9   : > { %v1431_v13 = vadd.f32 %v1427_v21, %v1402_v4  ;;  %v1376_v48 = vadd.f32 %v1372_v28, %v1338_v27  ;;  %v10201_v4 = vld [vmem:[#allocation42_spill] sm:$0xff]  ;;  %v10203_v28 = vld [vmem:[#allocation93_spill] sm:$0xff] }
 0x4fa   : > { %3831 = vperm.xlu1 %5643, %v5360_v37   ;;  %v8060_v11 = vpop.permute.xlu1 %3471  ;;  %v1332_v37 = vmul.f32 %v8032_v18, %v10190_v16  ;;  %v8087_v16 = vld [vmem:[%s9629_s1 + $0x34] ss:$0 sm:$0xff] }
 0x4fb   : > { %10187 = vst [vmem:[#allocation151_spill] sm:$0xff] %v8060_v11  ;;  %10195 = vst [vmem:[#allocation29_spill] sm:$0xff] %v8087_v16  ;;  %v1465_v22 = vmul.f32 %v8087_v16, %v10197_v35 }
 0x4fc   : > { %v1336_v20 = vadd.f32 %v1332_v37, %v1307_v39  ;;  %v1401_v39 = vmul.f32 %v8058_v9, %v7715_v36  ;;  %v1428_v36 = vmul.f32 %v8069_v1, %v10201_v4 }
 0x4fd   : > { %v1469_v11 = vadd.f32 %v1465_v22, %v1431_v13  ;;  %v8114_v22 = vld [vmem:[%s9629_s1 + $0x36] ss:$0 sm:$0xff]  ;;  %v10205_v13 = vld [vmem:[#allocation46_spill] sm:$0xff] }
 0x4fe   : > { %5644 = vset.pattern.permute.xlu1 %v9720_v0  ;;  %v8074_v32 = vpop.permute.xlu1 %3481  ;;  %v1374_v37 = vadd.f32 %v1370_v51, %v1336_v20  ;;  %v10202_v51 = vld [vmem:[#allocation83_spill] sm:$0xff]  ;;  %10204 = vst [vmem:[#allocation170_spill] sm:$0xff] %v8114_v22 }
 0x4ff   : > { %10191 = vst [vmem:[#allocation147_spill] sm:$0xff] %v8074_v32  ;;  %3859 = vperm.xlu1 %5644, %v7565_v29   ;;  %v8100_v32 = vld [vmem:[%s9629_s1 + $0x35] ss:$0 sm:$0xff]  ;;  %v1430_v20 = vmul.f32 %v8069_v1, %v10202_v51  ;;  %v5723_v51 = vld [vmem:[%s5897_s28 + $0x128] sm:$0xf] }
 0x500   : > { %10199 = vst [vmem:[#allocation157_spill] sm:$0xff] %v8100_v32  ;;  %v1403_v27 = vadd.f32 %v1399_v47, %v1374_v37  ;;  %v1494_v35 = vmul.f32 %v8100_v32, %v10203_v28  ;;  %v8127_v28 = vld [vmem:[%s9629_s1 + $0x38] ss:$0 sm:$0xff]  ;;  %v10246_v1 = vld [vmem:[#allocation211_spill] sm:$0xff] }
 0x501   : > { %10208 = vst [vmem:[#allocation345_spill] sm:$0xff] %v8127_v28 }
 0x502   : > { %v8089_v62 = vpop.permute.xlu1 %3486  ;;  %v1498_v4 = vadd.f32 %v1494_v35, %v1469_v11  ;;  %v1432_v47 = vadd.f32 %v1428_v36, %v1403_v27  ;;  %v1495_v11 = vmul.f32 %v8100_v32, %v7742_v40  ;;  %v10211_v36 = vld [vmem:[#allocation193_spill] sm:$0xff] }
 0x503   : > { %10196 = vst [vmem:[#allocation154_spill] sm:$0xff] %v8089_v62  ;;  %3869 = vperm.xlu1 %5644, %v5370_v30   ;;  %v1405_v62 = vadd.f32 %v1401_v39, %v1376_v48  ;;  %v1523_v48 = vmul.f32 %v8114_v22, %v10205_v13  ;;  %v10206_v39 = vld [vmem:[#allocation179_spill] sm:$0xff]  ;;  %v1466_v13 = vmul.f32 %v8087_v16, %v10209_v41  ;;  %v10214_v41 = vld [vmem:[#allocation49_spill] sm:$0xff] }
 0x504   : > { %v1468_v12 = vmul.f32 %v8087_v16, %v10206_v39  ;;  %v1497_v27 = vmul.f32 %v8100_v32, %v10211_v36  ;;  %v10217_v36 = vld [vmem:[#allocation101_spill] sm:$0xff]  ;;  %v10231_v16 = vld [vmem:[#allocation203_spill] sm:$0xff] }
 0x505   : > { %v1527_v38 = vadd.f32 %v1523_v48, %v1498_v4  ;;  %v1470_v39 = vadd.f32 %v1466_v13, %v1432_v47  ;;  %v8155_v13 = vld [vmem:[%s9629_s1 + $0x3a] ss:$0 sm:$0xff] }
 0x506   : > { %10216 = vst [vmem:[#allocation160_spill] sm:$0xff] %v8155_v13 }
 0x507   : > { %3874 = vperm.xlu1 %5644, %v7578_v7   ;;  %v8103_v21 = vpop.permute.xlu1 %3507  ;;  %v1499_v4 = vadd.f32 %v1495_v11, %v1470_v39  ;;  %v10220_v11 = vld [vmem:[#allocation201_spill] sm:$0xff] }
 0x508   : > { %10200 = vst [vmem:[#allocation30_spill] sm:$0xff] %v8103_v21  ;;  %v1434_v21 = vadd.f32 %v1430_v20, %v1405_v62  ;;  %v10212_v20 = vld [vmem:[#allocation198_spill] sm:$0xff] }
 0x509   : > { %v1562_v35 = vmul.f32 %v8127_v28, %v10212_v20  ;;  %v1524_v20 = vmul.f32 %v8114_v22, %v10217_v36 }
 0x50a   : > { %v1472_v24 = vadd.f32 %v1468_v12, %v1434_v21  ;;  %v1526_v21 = vmul.f32 %v8114_v22, %v10214_v41  ;;  %v10218_v41 = vld [vmem:[#allocation180_spill] sm:$0xff] }
 0x50b   : > { %5645 = vset.pattern.permute.xlu1 %v9706_v50  ;;  %v8121_v37 = vpop.permute.xlu1 %3511  ;;  %v1566_v48 = vadd.f32 %v1562_v35, %v1527_v38 }
 0x50c   : > { %10207 = vst [vmem:[#allocation155_spill] sm:$0xff] %v8121_v37  ;;  %3895 = vperm.xlu1 %5645, %v5723_v51   ;;  %v8142_v51 = vld [vmem:[%s9629_s1 + $0x39] ss:$0 sm:$0xff]  ;;  %v1501_v12 = vadd.f32 %v1497_v27, %v1472_v24  ;;  %v1528_v24 = vadd.f32 %v1524_v20, %v1499_v4  ;;  %v1565_v27 = vmul.f32 %v8127_v28, %v10220_v11  ;;  %v10222_v37 = vld [vmem:[#allocation5_spill] sm:$0xff] }
 0x50d   : > { %10213 = vst [vmem:[#allocation162_spill] sm:$0xff] %v8142_v51  ;;  %v1591_v40 = vmul.f32 %v8142_v51, %v7767_v58  ;;  %v1563_v58 = vmul.f32 %v8127_v28, %v10218_v41  ;;  %v1594_v36 = vmul.f32 %v8142_v51, %v7794_v60  ;;  %v10225_v20 = vld [vmem:[#allocation12_spill] sm:$0xff]  ;;  %v10226_v41 = vld [vmem:[#allocation350_spill] sm:$0xff] }
 0x50e   : > { %v1530_v35 = vadd.f32 %v1526_v21, %v1501_v12  ;;  %v8172_v21 = vld [vmem:[%s9629_s1 + $0x3c] ss:$0 sm:$0xff]  ;;  %v241_v11 = vmul.f32 %v10226_v41, %v10225_v20  ;;  %v8191_v60 = vld [vmem:[%s9629_s1 + $0x3d] ss:$0 sm:$0xff] }
 0x50f   : > { %v1595_v38 = vadd.f32 %v1591_v40, %v1566_v48  ;;  %v10224_v48 = vld [vmem:[#allocation181_spill] sm:$0xff]  ;;  %v10230_v28 = vld [vmem:[#allocation352_spill] sm:$0xff] }
 0x510   : > { %3899 = vperm.xlu1 %5645, %v5370_v30   ;;  %v8133_v62 = vpop.permute.xlu1 %3532  ;;  %v1659_v40 = vmul.f32 %v8172_v21, %v10224_v48  ;;  %v1569_v4 = vadd.f32 %v1565_v27, %v1530_v35  ;;  %v10234_v48 = vld [vmem:[#allocation52_spill] sm:$0xff] }
 0x511   : > { %10210 = vst [vmem:[#allocation159_spill] sm:$0xff] %v8133_v62  ;;  %v10223_v62 = vld [vmem:[#allocation347_spill] sm:$0xff] }
 0x512   : > { %v212_v32 = vmul.f32 %v10223_v62, %v10222_v37  ;;  %v10228_v62 = vld [vmem:[#allocation349_spill] sm:$0xff]  ;;  %v1598_v35 = vadd.f32 %v1594_v36, %v1569_v4 }
 0x513   : > { %v10239_v4 = vld [vmem:[#allocation353_spill] sm:$0xff] }
 0x514   : > { %5646 = vset.pattern.permute.xlu1 %v9714_v46  ;;  %v8149_v47 = vpop.permute.xlu1 %3540 }
 0x515   : > { %10215 = vst [vmem:[#allocation32_spill] sm:$0xff] %v8149_v47  ;;  %3920 = vperm.xlu1 %5646, %v7565_v29   ;;  %v10221_v29 = vld [vmem:[#allocation206_spill] sm:$0xff] }
 0x516   : > { %v1620_v47 = vmul.f32 %v8155_v13, %v10221_v29  ;;  %v216_v29 = vadd.f32 %v10228_v62, %v212_v32  ;;  %v1621_v32 = vmul.f32 %v8155_v13, %v10234_v48 }
 0x518   : > { %v8161_v39 = vpop.permute.xlu1 %3544  ;;  %v1624_v12 = vadd.f32 %v1620_v47, %v1595_v38  ;;  %v1592_v47 = vmul.f32 %v8142_v51, %v10231_v16  ;;  %v10236_v16 = vld [vmem:[#allocation213_spill] sm:$0xff] }
 0x519   : > { %10219 = vst [vmem:[#allocation172_spill] sm:$0xff] %v8161_v39  ;;  %3928 = vperm.xlu1 %5646, %v5370_v30   ;;  %v1567_v30 = vadd.f32 %v1563_v58, %v1528_v24  ;;  %v10229_v39 = vld [vmem:[#allocation16_spill] sm:$0xff]  ;;  %v245_v58 = vadd.f32 %v241_v11, %v216_v29  ;;  %v10232_v24 = vld [vmem:[#allocation22_spill] sm:$0xff]  ;;  %v1688_v41 = vmul.f32 %v8191_v60, %v10236_v16 }
 0x51a   : > { %v270_v22 = vmul.f32 %v10230_v28, %v10229_v39  ;;  %v1663_v38 = vadd.f32 %v1659_v40, %v1624_v12  ;;  %v10235_v28 = vld [vmem:[#allocation210_spill] sm:$0xff]  ;;  %v8209_v11 = vld [vmem:[%s9629_s1 + $0x3e] ss:$0 sm:$0xff] }
 0x51b   : > { %v1596_v20 = vadd.f32 %v1592_v47, %v1567_v30  ;;  %v1623_v39 = vmul.f32 %v8155_v13, %v10235_v28  ;;  %v10238_v12 = vld [vmem:[#allocation26_spill] sm:$0xff]  ;;  %v10240_v30 = vld [vmem:[#allocation55_spill] sm:$0xff]  ;;  %v8217_v28 = vld [vmem:[%s5897_s28 + $0xb9] sm:$0xf] }
 0x51c   : > { %v274_v40 = vadd.f32 %v270_v22, %v245_v58  ;;  %v338_v36 = vmul.f32 %v10239_v4, %v10238_v12  ;;  %v1717_v29 = vmul.f32 %v8209_v11, %v10240_v30  ;;  %v10241_v47 = vld [vmem:[#allocation182_spill] sm:$0xff]  ;;  %v1692_v48 = vadd.f32 %v1688_v41, %v1663_v38  ;;  %v10242_v58 = vld [vmem:[#allocation33_spill] sm:$0xff]  ;;  %v10245_v13 = vld [vmem:[#allocation24_spill] sm:$0xff] }
 0x51d   : > { %3932 = vperm.xlu1 %5646, %v7578_v7   ;;  %v8181_v37 = vpop.permute.xlu1 %3573  ;;  %v10233_v7 = vld [vmem:[#allocation14_spill] sm:$0xff]  ;;  %v1625_v4 = vadd.f32 %v1621_v32, %v1596_v20  ;;  %v8226_v30 = vld [vmem:[%s9629_s1 + $0x40] ss:$0 sm:$0xff]  ;;  %v10247_v20 = vld [vmem:[#allocation48_spill] sm:$0xff] }
 0x51e   : > { %10227 = vst [vmem:[#allocation164_spill] sm:$0xff] %v8181_v37  ;;  %v309_v27 = vmul.f32 %v10233_v7, %v10232_v24  ;;  %v1662_v24 = vmul.f32 %v8172_v21, %v10241_v47  ;;  %v1627_v7 = vadd.f32 %v1623_v39, %v1598_v35  ;;  %v10243_v16 = vld [vmem:[#allocation10_spill] sm:$0xff]  ;;  %v1660_v35 = vmul.f32 %v8172_v21, %v10246_v1  ;;  %v10248_v41 = vld [vmem:[#allocation8_spill] sm:$0xff] }
 0x51f   : > { %v367_v12 = vmul.f32 %v10243_v16, %v10242_v58  ;;  %v10244_v37 = vld [vmem:[#allocation38_spill] sm:$0xff]  ;;  %v1721_v39 = vadd.f32 %v1717_v29, %v1692_v48 }
 0x520   : > { %v313_v22 = vadd.f32 %v309_v27, %v274_v40  ;;  %v406_v51 = vmul.f32 %v10245_v13, %v10244_v37  ;;  %v1666_v27 = vadd.f32 %v1662_v24, %v1627_v7  ;;  %v435_v40 = vmul.f32 %v10248_v41, %v10247_v20  ;;  %v10251_v16 = vld [vmem:[#allocation54_spill] sm:$0xff] }
 0x521   : > { %5647 = vset.pattern.permute.xlu1 %v9720_v0  ;;  %v8202_v62 = vpop.permute.xlu1 %3578  ;;  %v1664_v13 = vadd.f32 %v1660_v35, %v1625_v4  ;;  %v1689_v37 = vmul.f32 %v8191_v60, %v7812_v54  ;;  %v464_v24 = vmul.f32 %v7598_v59, %v10251_v16  ;;  %v10253_v54 = vld [vmem:[#allocation58_spill] sm:$0xff]  ;;  %v10254_v35 = vld [vmem:[#allocation65_spill] sm:$0xff]  ;;  %v10259_v16 = vld [vmem:[#allocation183_spill] sm:$0xff] }
 0x522   : > { %10237 = vst [vmem:[#allocation169_spill] sm:$0xff] %v8202_v62  ;;  %3960 = vperm.xlu1 %5647, %v7603_v26   ;;  %v342_v62 = vadd.f32 %v338_v36, %v313_v22  ;;  %v10249_v36 = vld [vmem:[#allocation87_spill] sm:$0xff]  ;;  %v10250_v22 = vld [vmem:[#allocation220_spill] sm:$0xff]  ;;  %v1720_v7 = vmul.f32 %v8209_v11, %v10253_v54  ;;  %v5724_v4 = vld [vmem:[%s5897_s28 + $0xa9] sm:$0xf] }
 0x523   : > { %v1691_v47 = vmul.f32 %v8191_v60, %v10249_v36  ;;  %v1756_v1 = vmul.f32 %v8226_v30, %v10250_v22  ;;  %v1693_v20 = vadd.f32 %v1689_v37, %v1664_v13  ;;  %v8261_v36 = vld [vmem:[%s9629_s1 + $0x42] ss:$0 sm:$0xff]  ;;  %v10255_v22 = vld [vmem:[#allocation71_spill] sm:$0xff]  ;;  %v10258_v37 = vld [vmem:[#allocation40_spill] sm:$0xff] }
 0x524   : > { %v371_v32 = vadd.f32 %v367_v12, %v342_v62  ;;  %v8246_v62 = vld [vmem:[%s9629_s1 + $0x41] ss:$0 sm:$0xff] }
 0x525   : > { %v1760_v48 = vadd.f32 %v1756_v1, %v1721_v39  ;;  %v1785_v12 = vmul.f32 %v8246_v62, %v7842_v14  ;;  %v532_v39 = vmul.f32 %v7639_v44, %v10255_v22  ;;  %v10256_v1 = vld [vmem:[#allocation216_spill] sm:$0xff]  ;;  %v10257_v13 = vld [vmem:[#allocation81_spill] sm:$0xff] }
 0x526   : > { %3965 = vperm.xlu1 %5647, %v8217_v28   ;;  %v8231_v38 = vpop.permute.xlu1 %3600  ;;  %v410_v58 = vadd.f32 %v406_v51, %v371_v32  ;;  %v1695_v51 = vadd.f32 %v1691_v47, %v1666_v27  ;;  %v503_v32 = vmul.f32 %v7621_v34, %v10254_v35  ;;  %v1718_v14 = vmul.f32 %v8209_v11, %v10256_v1 }
 0x527   : > { %v1789_v47 = vadd.f32 %v1785_v12, %v1760_v48  ;;  %v10262_v48 = vld [vmem:[#allocation88_spill] sm:$0xff]  ;;  %v10263_v12 = vld [vmem:[#allocation45_spill] sm:$0xff] }
 0x528   : > { %v439_v59 = vadd.f32 %v435_v40, %v410_v58  ;;  %v1724_v40 = vadd.f32 %v1720_v7, %v1695_v51  ;;  %v561_v58 = vmul.f32 %v10258_v37, %v10257_v13  ;;  %v1722_v54 = vadd.f32 %v1718_v14, %v1693_v20  ;;  %v8283_v51 = vld [vmem:[%s9629_s1 + $0x44] ss:$0 sm:$0xff] }
 0x529   : > { %v599_v7 = vmul.f32 %v10263_v12, %v10262_v48  ;;  %v1788_v14 = vmul.f32 %v8246_v62, %v7867_v55  ;;  %v5725_v13 = vld [vmem:[%s5897_s28 + $0xc1] sm:$0xf]  ;;  %v10266_v48 = vld [vmem:[#allocation103_spill] sm:$0xff]  ;;  %v8301_v55 = vld [vmem:[%s9629_s1 + $0x45] ss:$0 sm:$0xff] }
 0x52a   : > { %5648 = vset.pattern.permute.xlu1 %v9706_v50  ;;  %v8249_v29 = vpop.permute.xlu1 %3608  ;;  %v468_v41 = vadd.f32 %v464_v24, %v439_v59  ;;  %v1757_v24 = vmul.f32 %v8226_v30, %v10259_v16  ;;  %v10261_v59 = vld [vmem:[#allocation228_spill] sm:$0xff]  ;;  %v657_v12 = vmul.f32 %v7704_v42, %v10266_v48 }
 0x52b   : > { %10252 = vst [vmem:[#allocation174_spill] sm:$0xff] %v8249_v29  ;;  %3987 = vperm.xlu1 %5648, %v5724_v4   ;;  %v10260_v4 = vld [vmem:[#allocation223_spill] sm:$0xff]  ;;  %v1814_v35 = vmul.f32 %v8261_v36, %v10261_v59  ;;  %v10267_v29 = vld [vmem:[#allocation225_spill] sm:$0xff] }
 0x52c   : > { %v507_v34 = vadd.f32 %v503_v32, %v468_v41  ;;  %v1759_v44 = vmul.f32 %v8226_v30, %v10260_v4  ;;  %v10264_v32 = vld [vmem:[#allocation184_spill] sm:$0xff]  ;;  %v1761_v4 = vadd.f32 %v1757_v24, %v1722_v54 }
 0x52d   : > { %v1853_v41 = vmul.f32 %v8283_v51, %v10264_v32  ;;  %v1818_v1 = vadd.f32 %v1814_v35, %v1789_v47  ;;  %v1786_v47 = vmul.f32 %v8246_v62, %v10267_v29  ;;  %v10269_v35 = vld [vmem:[#allocation108_spill] sm:$0xff]  ;;  %v10271_v32 = vld [vmem:[#allocation237_spill] sm:$0xff] }
 0x52e   : > { %v8267_v27 = vpop.permute.xlu1 %3612  ;;  %v536_v22 = vadd.f32 %v532_v39, %v507_v34  ;;  %v1763_v20 = vadd.f32 %v1759_v44, %v1724_v40  ;;  %v10265_v34 = vld [vmem:[#allocation98_spill] sm:$0xff]  ;;  %v695_v42 = vmul.f32 %v7724_v56, %v10269_v35  ;;  %v10270_v29 = vld [vmem:[#allocation232_spill] sm:$0xff] }
 0x52f   : > { %3995 = vperm.xlu1 %5648, %v8217_v28   ;;  %v628_v16 = vmul.f32 %v7689_v3, %v10265_v34  ;;  %v1857_v40 = vadd.f32 %v1853_v41, %v1818_v1  ;;  %v10268_v3 = vld [vmem:[#allocation60_spill] sm:$0xff]  ;;  %v1882_v41 = vmul.f32 %v8301_v55, %v10271_v32  ;;  %v8318_v1 = vld [vmem:[%s9629_s1 + $0x46] ss:$0 sm:$0xff]  ;;  %v8336_v32 = vld [vmem:[%s9629_s1 + $0x48] ss:$0 sm:$0xff] }
 0x530   : > { %v565_v39 = vadd.f32 %v561_v58, %v536_v22  ;;  %v1792_v44 = vadd.f32 %v1788_v14, %v1763_v20  ;;  %v1815_v24 = vmul.f32 %v8261_v36, %v10268_v3  ;;  %v1790_v22 = vadd.f32 %v1786_v47, %v1761_v4  ;;  %v10272_v14 = vld [vmem:[#allocation111_spill] sm:$0xff]  ;;  %v10273_v56 = vld [vmem:[#allocation64_spill] sm:$0xff] }
 0x531   : > { %v1911_v34 = vmul.f32 %v8318_v1, %v10273_v56  ;;  %v10275_v47 = vld [vmem:[#allocation116_spill] sm:$0xff]  ;;  %v10280_v56 = vld [vmem:[#allocation246_spill] sm:$0xff] }
 0x532   : > { %v603_v59 = vadd.f32 %v599_v7, %v565_v39  ;;  %v1817_v7 = vmul.f32 %v8261_v36, %v10270_v29  ;;  %v1868_v39 = vpop.permute.xlu0 %1867  ;;  %v753_v3 = vmul.f32 %v7753_v33, %v10275_v47  ;;  %v1819_v35 = vadd.f32 %v1815_v24, %v1790_v22  ;;  %v10278_v22 = vld [vmem:[#allocation123_spill] sm:$0xff] }
 0x533   : > { %3999 = vperm.xlu1 %5648, %v5725_v13   ;;  %v8290_v37 = vpop.permute.xlu1 %3633  ;;  %v724_v13 = vmul.f32 %v7740_v25, %v10272_v14  ;;  %v10276_v25 = vld [vmem:[#allocation119_spill] sm:$0xff]  ;;  %v10279_v14 = vld [vmem:[#allocation240_spill] sm:$0xff] }
 0x534   : > { %v632_v54 = vadd.f32 %v628_v16, %v603_v59  ;;  %v1821_v4 = vadd.f32 %v1817_v7, %v1792_v44  ;;  %v1886_v59 = vadd.f32 %v1882_v41, %v1857_v40  ;;  %v791_v29 = vmul.f32 %v7775_v53, %v10276_v25  ;;  %v10277_v44 = vld [vmem:[#allocation233_spill] sm:$0xff] }
 0x535   : > { %v1854_v40 = vmul.f32 %v8283_v51, %v10277_v44  ;;  %v1883_v41 = vmul.f32 %v8301_v55, %v1868_v39  ;;  %v8356_v39 = vld [vmem:[%s9629_s1 + $0x49] ss:$0 sm:$0xff]  ;;  %v10284_v44 = vld [vmem:[#allocation131_spill] sm:$0xff] }
 0x536   : > { %v661_v20 = vadd.f32 %v657_v12, %v632_v54  ;;  %v1915_v33 = vadd.f32 %v1911_v34, %v1886_v59  ;;  %v8359_v59 = vld [vmem:[%s5897_s28 + $0xe1] sm:$0xf] }
 0x537   : > { %5649 = vset.pattern.permute.xlu1 %v9714_v46  ;;  %v8304_v58 = vpop.permute.xlu1 %3637  ;;  %v1858_v7 = vadd.f32 %v1854_v40, %v1819_v35 }
 0x538   : > { %4020 = vperm.xlu1 %5649, %v7603_v26   ;;  %v10274_v26 = vld [vmem:[#allocation185_spill] sm:$0xff]  ;;  %v699_v48 = vadd.f32 %v695_v42, %v661_v20  ;;  %v1960_v20 = vpop.permute.xlu0 %1959 }
 0x539   : > { %v1856_v16 = vmul.f32 %v8283_v51, %v10274_v26  ;;  %v1949_v26 = vmul.f32 %v8336_v32, %v10280_v56  ;;  %v1978_v35 = vmul.f32 %v8356_v39, %v1960_v20  ;;  %v1887_v40 = vadd.f32 %v1883_v41, %v1858_v7  ;;  %v10287_v41 = vld [vmem:[#allocation139_spill] sm:$0xff]  ;;  %v10288_v56 = vld [vmem:[#allocation186_spill] sm:$0xff] }
 0x53a   : > { %v728_v54 = vadd.f32 %v724_v13, %v699_v48  ;;  %v1885_v13 = vmul.f32 %v8301_v55, %v10279_v14  ;;  %v10283_v48 = vld [vmem:[#allocation67_spill] sm:$0xff] }
 0x53b   : > { %v1860_v42 = vadd.f32 %v1856_v16, %v1821_v4  ;;  %v10281_v16 = vld [vmem:[#allocation35_spill] sm:$0xff]  ;;  %v10282_v4 = vld [vmem:[#allocation126_spill] sm:$0xff]  ;;  %v1914_v47 = vmul.f32 %v8318_v1, %v10283_v48 }
 0x53c   : > { %4024 = vperm.xlu1 %5649, %v8217_v28   ;;  %v8329_v12 = vpop.permute.xlu1 %3665  ;;  %v757_v24 = vadd.f32 %v753_v3, %v728_v54  ;;  %v820_v28 = vmul.f32 %v7792_v17, %v10278_v22  ;;  %v849_v17 = vmul.f32 %v7805_v52, %v10282_v4  ;;  %v1953_v3 = vadd.f32 %v1949_v26, %v1915_v33  ;;  %v10285_v33 = vld [vmem:[#allocation134_spill] sm:$0xff]  ;;  %v10289_v4 = vld [vmem:[#allocation249_spill] sm:$0xff] }
 0x53d   : > { %v1889_v54 = vadd.f32 %v1885_v13, %v1860_v42  ;;  %v917_v20 = vmul.f32 %v7840_v57, %v10285_v33  ;;  %v10286_v42 = vld [vmem:[#allocation242_spill] sm:$0xff]  ;;  %v946_v13 = vmul.f32 %v7860_v8, %v10287_v41  ;;  %v1950_v26 = vmul.f32 %v8336_v32, %v10288_v56  ;;  %v10295_v56 = vld [vmem:[#allocation153_spill] sm:$0xff] }
 0x53e   : > { %v795_v34 = vadd.f32 %v791_v29, %v757_v24  ;;  %v888_v29 = vmul.f32 %v7824_v19, %v10284_v44  ;;  %v8372_v24 = vld [vmem:[%s9629_s1 + $0x4a] ss:$0 sm:$0xff]  ;;  %v1982_v14 = vadd.f32 %v1978_v35, %v1953_v3  ;;  %v10293_v44 = vld [vmem:[#allocation187_spill] sm:$0xff] }
 0x53f   : > { %v1918_v19 = vadd.f32 %v1914_v47, %v1889_v54  ;;  %v10290_v48 = vld [vmem:[#allocation254_spill] sm:$0xff] }
 0x540   : > { %5650 = vset.pattern.permute.xlu1 %v9720_v0  ;;  %v8344_v53 = vpop.permute.xlu1 %3675  ;;  %v824_v25 = vadd.f32 %v820_v28, %v795_v34  ;;  %v1912_v28 = vmul.f32 %v8318_v1, %v10286_v42  ;;  %v1972_v34 = vpop.permute.xlu0 %1971  ;;  %v2007_v57 = vmul.f32 %v8372_v24, %v10290_v48  ;;  %v10292_v35 = vld [vmem:[#allocation142_spill] sm:$0xff]  ;;  %v10296_v48 = vld [vmem:[#allocation251_spill] sm:$0xff] }
 0x541   : > { %4051 = vperm.xlu1 %5650, %v10281_v16   ;;  %v985_v8 = vmul.f32 %v7878_v31, %v10292_v35  ;;  %v8397_v54 = vld [vmem:[%s9629_s1 + $0x4c] ss:$0 sm:$0xff]  ;;  %v1981_v33 = vmul.f32 %v8356_v39, %v1972_v34  ;;  %v1979_v35 = vmul.f32 %v8356_v39, %v10296_v48 }
 0x542   : > { %v853_v22 = vadd.f32 %v849_v17, %v824_v25  ;;  %v1916_v16 = vadd.f32 %v1912_v28, %v1887_v40  ;;  %v1952_v17 = vmul.f32 %v8336_v32, %v10289_v4  ;;  %v8387_v25 = vld [vmem:[%s5897_s28 + $0xe9] sm:$0xf]  ;;  %v2011_v40 = vadd.f32 %v2007_v57, %v1982_v14  ;;  %v10294_v28 = vld [vmem:[#allocation149_spill] sm:$0xff]  ;;  %v8414_v14 = vld [vmem:[%s9629_s1 + $0x4d] ss:$0 sm:$0xff] }
 0x543   : > { %v1043_v4 = vmul.f32 %v7902_v2, %v10295_v56 }
 0x544   : > { %v8366_v52 = vpop.permute.xlu1 %3680  ;;  %v892_v7 = vadd.f32 %v888_v29, %v853_v22  ;;  %v2045_v29 = vmul.f32 %v8397_v54, %v10293_v44  ;;  %v1956_v22 = vadd.f32 %v1952_v17, %v1918_v19  ;;  %v5727_v19 = vld [vmem:[%s5897_s28 + $0xd9] sm:$0xf]  ;;  %v10300_v44 = vld [vmem:[#allocation261_spill] sm:$0xff] }
 0x545   : > { %4061 = vperm.xlu1 %5650, %v8359_v59   ;;  %v10298_v17 = vld [vmem:[#allocation156_spill] sm:$0xff] }
 0x546   : > { %v921_v3 = vadd.f32 %v917_v20, %v892_v7  ;;  %v1014_v20 = vmul.f32 %v7892_v15, %v10294_v28  ;;  %v1954_v7 = vadd.f32 %v1950_v26, %v1916_v16  ;;  %v2049_v15 = vadd.f32 %v2045_v29, %v2011_v40  ;;  %v10297_v26 = vld [vmem:[#allocation70_spill] sm:$0xff] }
 0x547   : > { %v2008_v16 = vmul.f32 %v8372_v24, %v10297_v26  ;;  %v1082_v57 = vmul.f32 %v7918_v6, %v10298_v17  ;;  %v8428_v28 = vld [vmem:[%s9629_s1 + $0x4e] ss:$0 sm:$0xff]  ;;  %v10304_v26 = vld [vmem:[#allocation161_spill] sm:$0xff]  ;;  %v10305_v17 = vld [vmem:[#allocation163_spill] sm:$0xff] }
 0x548   : > { %v950_v42 = vadd.f32 %v946_v13, %v921_v3  ;;  %v1985_v13 = vadd.f32 %v1981_v33, %v1956_v22  ;;  %v1983_v2 = vadd.f32 %v1979_v35, %v1954_v7  ;;  %v10299_v3 = vld [vmem:[#allocation258_spill] sm:$0xff]  ;;  %v2060_v33 = vpop.permute.xlu0 %2059 }
 0x549   : > { %4066 = vperm.xlu1 %5650, %v8387_v25   ;;  %v8390_v47 = vpop.permute.xlu1 %3701  ;;  %v10301_v40 = vld [vmem:[#allocation158_spill] sm:$0xff] }
 0x54a   : > { %10291 = vst [vmem:[#allocation165_spill] sm:$0xff] %v8390_v47  ;;  %v989_v41 = vadd.f32 %v985_v8, %v950_v42  ;;  %v2010_v8 = vmul.f32 %v8372_v24, %v10299_v3  ;;  %v2074_v42 = vmul.f32 %v8414_v14, %v10300_v44  ;;  %v1111_v22 = vmul.f32 %v7933_v63, %v10301_v40  ;;  %v8446_v44 = vld [vmem:[%s9629_s1 + $0x50] ss:$0 sm:$0xff] }
 0x54b   : > { %v1179_v3 = vmul.f32 %v7961_v23, %v10305_v17  ;;  %v10306_v40 = vld [vmem:[#allocation259_spill] sm:$0xff] }
 0x54c   : > { %v1018_v34 = vadd.f32 %v1014_v20, %v989_v41  ;;  %v10302_v20 = vld [vmem:[#allocation73_spill] sm:$0xff]  ;;  %v10303_v41 = vld [vmem:[#allocation75_spill] sm:$0xff]  ;;  %v2014_v48 = vadd.f32 %v2010_v8, %v1985_v13  ;;  %v2078_v35 = vadd.f32 %v2074_v42, %v2049_v15  ;;  %v2075_v42 = vmul.f32 %v8414_v14, %v2060_v33 }
 0x54d   : > { %5651 = vset.pattern.permute.xlu1 %v9706_v50  ;;  %v8405_v31 = vpop.permute.xlu1 %3705  ;;  %v2103_v7 = vmul.f32 %v8428_v28, %v10302_v20  ;;  %v2048_v56 = vmul.f32 %v8397_v54, %v10303_v41  ;;  %v2046_v20 = vmul.f32 %v8397_v54, %v10306_v40  ;;  %v10310_v40 = vld [vmem:[#allocation171_spill] sm:$0xff] }
 0x54e   : > { %4087 = vperm.xlu1 %5651, %v5727_v19   ;;  %v1047_v29 = vadd.f32 %v1043_v4, %v1018_v34  ;;  %v1140_v4 = vmul.f32 %v7947_v43, %v10304_v26  ;;  %v2012_v34 = vadd.f32 %v2008_v16, %v1983_v2  ;;  %v5728_v43 = vld [vmem:[%s5897_s28 + $0xd1] sm:$0xf] }
 0x54f   : > { %v2052_v13 = vadd.f32 %v2048_v56, %v2014_v48  ;;  %v10307_v2 = vld [vmem:[#allocation167_spill] sm:$0xff]  ;;  %v10312_v48 = vld [vmem:[#allocation76_spill] sm:$0xff] }
 0x550   : > { %v1086_v19 = vadd.f32 %v1082_v57, %v1047_v29  ;;  %v2107_v57 = vadd.f32 %v2103_v7, %v2078_v35  ;;  %v1208_v23 = vmul.f32 %v7977_v49, %v10307_v2  ;;  %v2050_v8 = vadd.f32 %v2046_v20, %v2012_v34  ;;  %v2152_v29 = vpop.permute.xlu0 %2151  ;;  %v8466_v56 = vld [vmem:[%s9629_s1 + $0x51] ss:$0 sm:$0xff] }
 0x551   : > { %v1237_v7 = vmul.f32 %v7988_v10, %v10310_v40  ;;  %v2106_v33 = vmul.f32 %v8428_v28, %v10312_v48  ;;  %v10314_v2 = vld [vmem:[#allocation47_spill] sm:$0xff] }
 0x552   : > { %4091 = vperm.xlu1 %5651, %v8359_v59   ;;  %v8433_v6 = vpop.permute.xlu1 %3726  ;;  %v1115_v63 = vadd.f32 %v1111_v22, %v1086_v19  ;;  %v10308_v22 = vld [vmem:[#allocation264_spill] sm:$0xff]  ;;  %v10309_v19 = vld [vmem:[#allocation267_spill] sm:$0xff]  ;;  %v2079_v20 = vadd.f32 %v2075_v42, %v2050_v8 }
 0x553   : > { %v2077_v41 = vmul.f32 %v8414_v14, %v10308_v22  ;;  %v2141_v26 = vmul.f32 %v8446_v44, %v10309_v19  ;;  %v1304_v22 = vmul.f32 %v8018_v61, %v10314_v2  ;;  %v10318_v42 = vld [vmem:[#allocation188_spill] sm:$0xff]  ;;  %v10319_v61 = vld [vmem:[#allocation269_spill] sm:$0xff] }
 0x554   : > { %v1144_v16 = vadd.f32 %v1140_v4, %v1115_v63  ;;  %v2170_v4 = vmul.f32 %v8466_v56, %v2152_v29  ;;  %v2142_v19 = vmul.f32 %v8446_v44, %v10318_v42  ;;  %v2144_v40 = vmul.f32 %v8446_v44, %v10319_v61  ;;  %v10324_v2 = vld [vmem:[#allocation72_spill] sm:$0xff]  ;;  %v10327_v42 = vld [vmem:[#allocation271_spill] sm:$0xff] }
 0x555   : > { %v2145_v35 = vadd.f32 %v2141_v26, %v2107_v57  ;;  %v2081_v34 = vadd.f32 %v2077_v41, %v2052_v13  ;;  %v10315_v57 = vld [vmem:[#allocation265_spill] sm:$0xff] }
 0x556   : > { %5652 = vset.pattern.permute.xlu1 %v9714_v46  ;;  %v8451_v15 = vpop.permute.xlu1 %3734  ;;  %v1183_v17 = vadd.f32 %v1179_v3, %v1144_v16  ;;  %v10313_v3 = vld [vmem:[#allocation177_spill] sm:$0xff]  ;;  %v2104_v29 = vmul.f32 %v8428_v28, %v10315_v57 }
 0x557   : > { %4112 = vperm.xlu1 %5652, %v5728_v43   ;;  %v1275_v10 = vmul.f32 %v8005_v45, %v10313_v3  ;;  %v8479_v43 = vld [vmem:[%s9629_s1 + $0x52] ss:$0 sm:$0xff]  ;;  %v2174_v13 = vadd.f32 %v2170_v4, %v2145_v35  ;;  %v2110_v41 = vadd.f32 %v2106_v33, %v2081_v34  ;;  %v10321_v33 = vld [vmem:[#allocation62_spill] sm:$0xff]  ;;  %v10322_v4 = vld [vmem:[#allocation189_spill] sm:$0xff] }
 0x558   : > { %v1212_v63 = vadd.f32 %v1208_v23, %v1183_v17  ;;  %v10317_v23 = vld [vmem:[#allocation56_spill] sm:$0xff]  ;;  %v2108_v26 = vadd.f32 %v2104_v29, %v2079_v20  ;;  %v2164_v17 = vpop.permute.xlu0 %2163  ;;  %v1371_v35 = vmul.f32 %v8046_v5, %v10321_v33  ;;  %v1400_v5 = vmul.f32 %v8058_v9, %v10324_v2  ;;  %v8512_v57 = vld [vmem:[%s5897_s28 + $0x101] sm:$0xf]  ;;  %v8516_v29 = vld [vmem:[%s5897_s28 + $0x109] sm:$0xf] }
 0x559   : > { %v1333_v8 = vmul.f32 %v8032_v18, %v10317_v23  ;;  %v8501_v18 = vld [vmem:[%s9629_s1 + $0x54] ss:$0 sm:$0xff]  ;;  %v2148_v3 = vadd.f32 %v2144_v40, %v2110_v41  ;;  %v10326_v41 = vld [vmem:[#allocation168_spill] sm:$0xff]  ;;  %v8532_v40 = vld [vmem:[%s9629_s1 + $0x56] ss:$0 sm:$0xff] }
 0x55a   : > { %v8468_v49 = vpop.permute.xlu1 %3738  ;;  %v1241_v16 = vadd.f32 %v1237_v7, %v1212_v63  ;;  %v10320_v7 = vld [vmem:[#allocation274_spill] sm:$0xff]  ;;  %v2238_v34 = vmul.f32 %v8501_v18, %v10322_v4  ;;  %v10334_v2 = vld [vmem:[#allocation192_spill] sm:$0xff] }
 0x55b   : > { %10311 = vst [vmem:[#allocation34_spill] sm:$0xff] %v8468_v49  ;;  %4120 = vperm.xlu1 %5652, %v8359_v59   ;;  %v2199_v48 = vmul.f32 %v8479_v43, %v10320_v7 }
 0x55c   : > { %v1279_v45 = vadd.f32 %v1275_v10, %v1241_v16  ;;  %v2173_v10 = vmul.f32 %v8466_v56, %v2164_v17  ;;  %v2171_v17 = vmul.f32 %v8466_v56, %v10327_v42 }
 0x55d   : > { %v2203_v63 = vadd.f32 %v2199_v48, %v2174_v13  ;;  %v10325_v13 = vld [vmem:[#allocation80_spill] sm:$0xff]  ;;  %v10329_v48 = vld [vmem:[#allocation90_spill] sm:$0xff] }
 0x55e   : > { %v1429_v23 = vmul.f32 %v10326_v41, %v10325_v13  ;;  %v10335_v13 = vld [vmem:[#allocation157_spill] sm:$0xff] }
 0x55f   : > { %4124 = vperm.xlu1 %5652, %v8387_v25   ;;  %v8486_v59 = vpop.permute.xlu1 %3767  ;;  %v1308_v25 = vadd.f32 %v1304_v22, %v1279_v45  ;;  %v2146_v22 = vadd.f32 %v2142_v19, %v2108_v26  ;;  %v2242_v9 = vadd.f32 %v2238_v34, %v2203_v63  ;;  %v2177_v19 = vadd.f32 %v2173_v10, %v2148_v3  ;;  %v10328_v26 = vld [vmem:[#allocation79_spill] sm:$0xff] }
 0x560   : > { %10316 = vst [vmem:[#allocation173_spill] sm:$0xff] %v8486_v59  ;;  %v2200_v61 = vmul.f32 %v8479_v43, %v10328_v26  ;;  %v10333_v63 = vld [vmem:[#allocation279_spill] sm:$0xff]  ;;  %v1496_v41 = vmul.f32 %v10335_v13, %v10334_v2  ;;  %v10341_v13 = vld [vmem:[#allocation285_spill] sm:$0xff] }
 0x561   : > { %v1337_v16 = vadd.f32 %v1333_v8, %v1308_v25  ;;  %v8525_v8 = vld [vmem:[%s9629_s1 + $0x55] ss:$0 sm:$0xff]  ;;  %v10330_v25 = vld [vmem:[#allocation29_spill] sm:$0xff] }
 0x562   : > { %v1467_v33 = vmul.f32 %v10330_v25, %v10329_v48  ;;  %v2267_v3 = vmul.f32 %v8525_v8, %v10333_v63  ;;  %v8552_v25 = vld [vmem:[%s9629_s1 + $0x58] ss:$0 sm:$0xff] }
 0x563   : > { %5653 = vset.pattern.permute.xlu1 %v9720_v0  ;;  %v8507_v20 = vpop.permute.xlu1 %3772  ;;  %v1375_v45 = vadd.f32 %v1371_v35, %v1337_v16  ;;  %v2175_v35 = vadd.f32 %v2171_v17, %v2146_v22  ;;  %v10332_v16 = vld [vmem:[#allocation276_spill] sm:$0xff]  ;;  %v10337_v22 = vld [vmem:[#allocation190_spill] sm:$0xff] }
 0x564   : > { %10323 = vst [vmem:[#allocation44_spill] sm:$0xff] %v8507_v20  ;;  %4152 = vperm.xlu1 %5653, %v8512_v57   ;;  %v2202_v34 = vmul.f32 %v8479_v43, %v10332_v16  ;;  %v2241_v17 = vmul.f32 %v8501_v18, %v10337_v22  ;;  %v2271_v48 = vadd.f32 %v2267_v3, %v2242_v9  ;;  %v10338_v63 = vld [vmem:[#allocation196_spill] sm:$0xff]  ;;  %v10344_v20 = vld [vmem:[#allocation277_spill] sm:$0xff] }
 0x565   : > { %v1404_v7 = vadd.f32 %v1400_v5, %v1375_v45  ;;  %v2253_v5 = vpop.permute.xlu0 %2252  ;;  %v10336_v45 = vld [vmem:[#allocation82_spill] sm:$0xff]  ;;  %v2204_v59 = vadd.f32 %v2200_v61, %v2175_v35  ;;  %v5730_v22 = vld [vmem:[%s5897_s28 + $0xf9] sm:$0xf] }
 0x566   : > { %v2296_v42 = vmul.f32 %v8532_v40, %v10336_v45  ;;  %v2206_v26 = vadd.f32 %v2202_v34, %v2177_v19  ;;  %v2335_v45 = vmul.f32 %v8552_v25, %v10341_v13  ;;  %v10342_v19 = vld [vmem:[#allocation199_spill] sm:$0xff]  ;;  %v10343_v34 = vld [vmem:[#allocation345_spill] sm:$0xff]  ;;  %v8569_v61 = vld [vmem:[%s9629_s1 + $0x59] ss:$0 sm:$0xff] }
 0x567   : > { %v1433_v10 = vadd.f32 %v1429_v23, %v1404_v7  ;;  %v10339_v23 = vld [vmem:[#allocation170_spill] sm:$0xff]  ;;  %v1564_v3 = vmul.f32 %v10343_v34, %v10342_v19 }
 0x568   : > { %4157 = vperm.xlu1 %5653, %v8516_v29   ;;  %v8537_v4 = vpop.permute.xlu1 %3794  ;;  %v1525_v7 = vmul.f32 %v10339_v23, %v10338_v63  ;;  %v2300_v63 = vadd.f32 %v2296_v42, %v2271_v48  ;;  %v10346_v13 = vld [vmem:[#allocation162_spill] sm:$0xff]  ;;  %v8583_v42 = vld [vmem:[%s9629_s1 + $0x5a] ss:$0 sm:$0xff]  ;;  %v10351_v48 = vld [vmem:[#allocation85_spill] sm:$0xff] }
 0x569   : > { %10331 = vst [vmem:[#allocation36_spill] sm:$0xff] %v8537_v4  ;;  %v1471_v16 = vadd.f32 %v1467_v33, %v1433_v10  ;;  %v2239_v33 = vmul.f32 %v8501_v18, %v10344_v20  ;;  %v2346_v35 = vpop.permute.xlu0 %2345  ;;  %v2245_v10 = vadd.f32 %v2241_v17, %v2206_v26  ;;  %v10348_v19 = vld [vmem:[#allocation282_spill] sm:$0xff]  ;;  %v10350_v26 = vld [vmem:[#allocation160_spill] sm:$0xff] }
 0x56a   : > { %v2270_v20 = vmul.f32 %v8525_v8, %v10348_v19  ;;  %v2339_v34 = vadd.f32 %v2335_v45, %v2300_v63  ;;  %v2364_v47 = vmul.f32 %v8569_v61, %v2346_v35  ;;  %v10353_v63 = vld [vmem:[#allocation37_spill] sm:$0xff]  ;;  %v10354_v19 = vld [vmem:[#allocation287_spill] sm:$0xff] }
 0x56b   : > { %v1500_v9 = vadd.f32 %v1496_v41, %v1471_v16  ;;  %v2268_v41 = vmul.f32 %v8525_v8, %v2253_v5 }
 0x56c   : > { %5654 = vset.pattern.permute.xlu1 %v9706_v50  ;;  %v8557_v2 = vpop.permute.xlu1 %3802 }
 0x56d   : > { %10340 = vst [vmem:[#allocation176_spill] sm:$0xff] %v8557_v2  ;;  %4179 = vperm.xlu1 %5654, %v5730_v22   ;;  %v1529_v23 = vadd.f32 %v1525_v7, %v1500_v9  ;;  %v10345_v2 = vld [vmem:[#allocation204_spill] sm:$0xff]  ;;  %v2243_v22 = vadd.f32 %v2239_v33, %v2204_v59  ;;  %v2299_v7 = vmul.f32 %v8532_v40, %v10351_v48  ;;  %v10356_v48 = vld [vmem:[#allocation214_spill] sm:$0xff] }
 0x56e   : > { %v1593_v49 = vmul.f32 %v10346_v13, %v10345_v2  ;;  %v10349_v59 = vld [vmem:[#allocation208_spill] sm:$0xff]  ;;  %v2274_v2 = vadd.f32 %v2270_v20, %v2245_v10  ;;  %v1661_v13 = vmul.f32 %v8172_v21, %v10353_v63 }
 0x56f   : > { %v1568_v17 = vadd.f32 %v1564_v3, %v1529_v23  ;;  %v1622_v5 = vmul.f32 %v10350_v26, %v10349_v59  ;;  %v10352_v9 = vld [vmem:[#allocation292_spill] sm:$0xff]  ;;  %v2272_v3 = vadd.f32 %v2268_v41, %v2243_v22  ;;  %v2368_v23 = vadd.f32 %v2364_v47, %v2339_v34  ;;  %v5731_v26 = vld [vmem:[%s5897_s28 + $0x111] sm:$0xf] }
 0x570   : > { %v8574_v16 = vpop.permute.xlu1 %3806  ;;  %v2393_v45 = vmul.f32 %v8583_v42, %v10352_v9  ;;  %v8594_v33 = vld [vmem:[%s9629_s1 + $0x5c] ss:$0 sm:$0xff]  ;;  %v2338_v59 = vmul.f32 %v8552_v25, %v10354_v19  ;;  %v1690_v9 = vmul.f32 %v8191_v60, %v10356_v48  ;;  %v2303_v22 = vadd.f32 %v2299_v7, %v2274_v2  ;;  %v10359_v41 = vld [vmem:[#allocation191_spill] sm:$0xff]  ;;  %v10360_v19 = vld [vmem:[#allocation218_spill] sm:$0xff] }
 0x571   : > { %10347 = vst [vmem:[#allocation175_spill] sm:$0xff] %v8574_v16  ;;  %4187 = vperm.xlu1 %5654, %v8516_v29   ;;  %v1597_v35 = vadd.f32 %v1593_v49, %v1568_v17  ;;  %v10357_v16 = vld [vmem:[#allocation283_spill] sm:$0xff]  ;;  %v2358_v49 = vpop.permute.xlu0 %2357  ;;  %v10358_v17 = vld [vmem:[#allocation96_spill] sm:$0xff]  ;;  %v2336_v34 = vmul.f32 %v8552_v25, %v10359_v41  ;;  %v10361_v48 = vld [vmem:[#allocation297_spill] sm:$0xff] }
 0x572   : > { %v2297_v4 = vmul.f32 %v8532_v40, %v10357_v16  ;;  %v2432_v21 = vmul.f32 %v8594_v33, %v10358_v17  ;;  %v2397_v47 = vadd.f32 %v2393_v45, %v2368_v23  ;;  %v8616_v60 = vld [vmem:[%s9629_s1 + $0x5d] ss:$0 sm:$0xff]  ;;  %v2342_v16 = vadd.f32 %v2338_v59, %v2303_v22  ;;  %v10364_v23 = vld [vmem:[#allocation294_spill] sm:$0xff] }
 0x573   : > { %v1626_v20 = vadd.f32 %v1622_v5, %v1597_v35  ;;  %v2367_v35 = vmul.f32 %v8569_v61, %v2358_v49  ;;  %v2461_v7 = vmul.f32 %v8616_v60, %v10361_v48  ;;  %v2396_v59 = vmul.f32 %v8583_v42, %v10364_v23  ;;  %v8634_v49 = vld [vmem:[%s9629_s1 + $0x5e] ss:$0 sm:$0xff]  ;;  %v10365_v22 = vld [vmem:[#allocation226_spill] sm:$0xff]  ;;  %v10372_v23 = vld [vmem:[#allocation295_spill] sm:$0xff] }
 0x574   : > { %v2301_v5 = vadd.f32 %v2297_v4, %v2272_v3  ;;  %v10363_v4 = vld [vmem:[#allocation289_spill] sm:$0xff] }
 0x575   : > { %4191 = vperm.xlu1 %5654, %v5731_v26   ;;  %v8601_v10 = vpop.permute.xlu1 %3827  ;;  %v1665_v63 = vadd.f32 %v1661_v13, %v1626_v20  ;;  %v1719_v26 = vmul.f32 %v8209_v11, %v10360_v19  ;;  %v10362_v13 = vld [vmem:[#allocation221_spill] sm:$0xff]  ;;  %v2365_v3 = vmul.f32 %v8569_v61, %v10363_v4  ;;  %v2436_v20 = vadd.f32 %v2432_v21, %v2397_v47  ;;  %v10366_v21 = vld [vmem:[#allocation230_spill] sm:$0xff] }
 0x576   : > { %10355 = vst [vmem:[#allocation50_spill] sm:$0xff] %v8601_v10  ;;  %v1758_v11 = vmul.f32 %v8226_v30, %v10362_v13  ;;  %v2340_v41 = vadd.f32 %v2336_v34, %v2301_v5  ;;  %v2447_v30 = vpop.permute.xlu0 %2446  ;;  %v1816_v47 = vmul.f32 %v8261_v36, %v10366_v21  ;;  %v10368_v34 = vld [vmem:[#allocation194_spill] sm:$0xff]  ;;  %v10370_v4 = vld [vmem:[#allocation89_spill] sm:$0xff]  ;;  %v10385_v10 = vld [vmem:[#allocation195_spill] sm:$0xff] }
 0x577   : > { %v1694_v45 = vadd.f32 %v1690_v9, %v1665_v63  ;;  %v1787_v9 = vmul.f32 %v8246_v62, %v10365_v22  ;;  %v2371_v63 = vadd.f32 %v2367_v35, %v2342_v16  ;;  %v2465_v19 = vadd.f32 %v2461_v7, %v2436_v20  ;;  %v10369_v35 = vld [vmem:[#allocation303_spill] sm:$0xff]  ;;  %v10373_v22 = vld [vmem:[#allocation300_spill] sm:$0xff] }
 0x578   : > { %v2369_v13 = vadd.f32 %v2365_v3, %v2340_v41  ;;  %v2435_v5 = vmul.f32 %v8594_v33, %v10368_v34  ;;  %v10371_v3 = vld [vmem:[#allocation235_spill] sm:$0xff]  ;;  %v2433_v20 = vmul.f32 %v8594_v33, %v10372_v23  ;;  %v2464_v41 = vmul.f32 %v8616_v60, %v10373_v22  ;;  %v8693_v23 = vld [vmem:[%s9629_s1 + $0x64] ss:$0 sm:$0xff] }
 0x579   : > { %5655 = vset.pattern.permute.xlu1 %v9714_v46  ;;  %v8622_v2 = vpop.permute.xlu1 %3831  ;;  %v1723_v17 = vadd.f32 %v1719_v26, %v1694_v45  ;;  %v10367_v45 = vld [vmem:[#allocation92_spill] sm:$0xff]  ;;  %v2400_v16 = vadd.f32 %v2396_v59, %v2371_v63  ;;  %v10378_v22 = vld [vmem:[#allocation247_spill] sm:$0xff] }
 0x57a   : > { %4212 = vperm.xlu1 %5655, %v8512_v57   ;;  %v8641_v57 = vld [vmem:[%s9629_s1 + $0x60] ss:$0 sm:$0xff]  ;;  %v2490_v62 = vmul.f32 %v8634_v49, %v10367_v45  ;;  %v2540_v59 = vpop.permute.xlu0 %2539  ;;  %v10374_v45 = vld [vmem:[#allocation239_spill] sm:$0xff] }
 0x57b   : > { %v1762_v48 = vadd.f32 %v1758_v11, %v1723_v17  ;;  %v2529_v7 = vmul.f32 %v8641_v57, %v10369_v35  ;;  %v2394_v11 = vmul.f32 %v8583_v42, %v10370_v4  ;;  %v8663_v17 = vld [vmem:[%s9629_s1 + $0x61] ss:$0 sm:$0xff]  ;;  %v2439_v34 = vadd.f32 %v2435_v5, %v2400_v16  ;;  %v8686_v5 = vld [vmem:[%s5897_s28 + $0x158] sm:$0xf] }
 0x57c   : > { %v2494_v63 = vadd.f32 %v2490_v62, %v2465_v19  ;;  %v2558_v4 = vmul.f32 %v8663_v17, %v2540_v59  ;;  %v8680_v19 = vld [vmem:[%s9629_s1 + $0x62] ss:$0 sm:$0xff] }
 0x57d   : > { %v1791_v36 = vadd.f32 %v1787_v9, %v1762_v48  ;;  %v1884_v9 = vmul.f32 %v8301_v55, %v10374_v45  ;;  %v2398_v48 = vadd.f32 %v2394_v11, %v2369_v13  ;;  %v10376_v55 = vld [vmem:[#allocation244_spill] sm:$0xff]  ;;  %v2462_v11 = vmul.f32 %v8616_v60, %v2447_v30  ;;  %v10381_v30 = vld [vmem:[#allocation94_spill] sm:$0xff]  ;;  %v10382_v45 = vld [vmem:[#allocation305_spill] sm:$0xff] }
 0x57e   : > { %4216 = vperm.xlu1 %5655, %v8516_v29   ;;  %v8646_v26 = vpop.permute.xlu1 %3859  ;;  %v1855_v29 = vmul.f32 %v8283_v51, %v10371_v3  ;;  %v2533_v35 = vadd.f32 %v2529_v7, %v2494_v63  ;;  %v8674_v3 = vld [vmem:[%s5897_s28 + $0x148] sm:$0xf]  ;;  %v1913_v13 = vmul.f32 %v8318_v1, %v10376_v55  ;;  %v2468_v16 = vadd.f32 %v2464_v41, %v2439_v34  ;;  %v10377_v7 = vld [vmem:[#allocation309_spill] sm:$0xff]  ;;  %v2552_v55 = vpop.permute.xlu0 %2551 }
 0x57f   : > { %v1820_v21 = vadd.f32 %v1816_v47, %v1791_v36  ;;  %v2437_v62 = vadd.f32 %v2433_v20, %v2398_v48  ;;  %v2587_v36 = vmul.f32 %v8680_v19, %v10377_v7  ;;  %v10379_v63 = vld [vmem:[#allocation301_spill] sm:$0xff]  ;;  %v2493_v41 = vmul.f32 %v8634_v49, %v10381_v30  ;;  %v10386_v30 = vld [vmem:[#allocation256_spill] sm:$0xff] }
 0x580   : > { %v2491_v1 = vmul.f32 %v8634_v49, %v10379_v63  ;;  %v2532_v48 = vmul.f32 %v8641_v57, %v10382_v45  ;;  %v10384_v7 = vld [vmem:[#allocation197_spill] sm:$0xff]  ;;  %v2009_v45 = vmul.f32 %v8372_v24, %v10386_v30  ;;  %v10389_v24 = vld [vmem:[#allocation260_spill] sm:$0xff] }
 0x581   : > { %v1859_v47 = vadd.f32 %v1855_v29, %v1820_v21  ;;  %v1951_v29 = vmul.f32 %v8336_v32, %v10378_v22  ;;  %v2562_v21 = vadd.f32 %v2558_v4, %v2533_v35  ;;  %v2466_v32 = vadd.f32 %v2462_v11, %v2437_v62  ;;  %v10387_v11 = vld [vmem:[#allocation314_spill] sm:$0xff] }
 0x582   : > { %5656 = vset.pattern.permute.xlu1 %v9720_v0  ;;  %v8670_v51 = vpop.permute.xlu1 %3869  ;;  %v2625_v22 = vmul.f32 %v8693_v23, %v10384_v7  ;;  %v2497_v63 = vadd.f32 %v2493_v41, %v2468_v16  ;;  %v2530_v35 = vmul.f32 %v8641_v57, %v10385_v10  ;;  %v2561_v62 = vmul.f32 %v8663_v17, %v2552_v55  ;;  %v10392_v55 = vld [vmem:[#allocation263_spill] sm:$0xff] }
 0x583   : > { %10375 = vst [vmem:[#allocation59_spill] sm:$0xff] %v8670_v51  ;;  %4244 = vperm.xlu1 %5656, %v8674_v3   ;;  %v1888_v59 = vadd.f32 %v1884_v9, %v1859_v47  ;;  %v10383_v9 = vld [vmem:[#allocation252_spill] sm:$0xff]  ;;  %v2495_v51 = vadd.f32 %v2491_v1, %v2466_v32  ;;  %v10390_v1 = vld [vmem:[#allocation307_spill] sm:$0xff] }
 0x584   : > { %v1980_v47 = vmul.f32 %v8356_v39, %v10383_v9  ;;  %v2536_v39 = vadd.f32 %v2532_v48, %v2497_v63  ;;  %v2559_v41 = vmul.f32 %v8663_v17, %v10390_v1  ;;  %v8737_v9 = vld [vmem:[%s9629_s1 + $0x66] ss:$0 sm:$0xff]  ;;  %v2640_v63 = vpop.permute.xlu0 %2639 }
 0x585   : > { %v1917_v34 = vadd.f32 %v1913_v13, %v1888_v59  ;;  %v8717_v13 = vld [vmem:[%s9629_s1 + $0x65] ss:$0 sm:$0xff]  ;;  %v2534_v7 = vadd.f32 %v2530_v35, %v2495_v51  ;;  %v10395_v35 = vld [vmem:[#allocation200_spill] sm:$0xff] }
 0x586   : > { %v8699_v20 = vpop.permute.xlu1 %3874  ;;  %v2654_v16 = vmul.f32 %v8717_v13, %v10387_v11  ;;  %v10393_v11 = vld [vmem:[#allocation266_spill] sm:$0xff] }
 0x587   : > { %10380 = vst [vmem:[#allocation39_spill] sm:$0xff] %v8699_v20  ;;  %4254 = vperm.xlu1 %5656, %v8686_v5   ;;  %v2591_v20 = vadd.f32 %v2587_v36, %v2562_v21  ;;  %v1955_v4 = vadd.f32 %v1951_v29, %v1917_v34  ;;  %v8723_v36 = vld [vmem:[%s5897_s28 + $0x160] sm:$0xf]  ;;  %v2047_v29 = vmul.f32 %v8397_v54, %v10389_v24  ;;  %v10391_v21 = vld [vmem:[#allocation311_spill] sm:$0xff] }
 0x588   : > { %v2590_v48 = vmul.f32 %v8680_v19, %v10391_v21  ;;  %v2565_v54 = vadd.f32 %v2561_v62, %v2536_v39  ;;  %v5734_v24 = vld [vmem:[%s5897_s28 + $0x150] sm:$0xf]  ;;  %v2628_v39 = vmul.f32 %v8693_v23, %v10395_v35  ;;  %v10397_v21 = vld [vmem:[#allocation97_spill] sm:$0xff]  ;;  %v10401_v35 = vld [vmem:[#allocation272_spill] sm:$0xff] }
 0x589   : > { %v1984_v59 = vadd.f32 %v1980_v47, %v1955_v4  ;;  %v2629_v34 = vadd.f32 %v2625_v22, %v2591_v20  ;;  %v2076_v47 = vmul.f32 %v8414_v14, %v10392_v55  ;;  %v8747_v20 = vld [vmem:[%s9629_s1 + $0x68] ss:$0 sm:$0xff]  ;;  %v10394_v14 = vld [vmem:[#allocation99_spill] sm:$0xff] }
 0x58a   : > { %v2683_v51 = vmul.f32 %v8737_v9, %v10394_v14  ;;  %v2594_v62 = vadd.f32 %v2590_v48, %v2565_v54  ;;  %v10400_v48 = vld [vmem:[#allocation316_spill] sm:$0xff] }
 0x58b   : > { %4259 = vperm.xlu1 %5656, %v8723_v36   ;;  %v8726_v10 = vpop.permute.xlu1 %3895  ;;  %v2013_v32 = vadd.f32 %v2009_v45, %v1984_v59  ;;  %v2658_v4 = vadd.f32 %v2654_v16, %v2629_v34  ;;  %v2105_v45 = vmul.f32 %v8428_v28, %v10393_v11  ;;  %v2563_v59 = vadd.f32 %v2559_v41, %v2534_v7  ;;  %v10396_v16 = vld [vmem:[#allocation319_spill] sm:$0xff]  ;;  %v10399_v41 = vld [vmem:[#allocation312_spill] sm:$0xff]  ;;  %v8767_v7 = vld [vmem:[%s9629_s1 + $0x69] ss:$0 sm:$0xff]  ;;  %v2732_v11 = vpop.permute.xlu0 %2731 }
 0x58c   : > { %10388 = vst [vmem:[#allocation53_spill] sm:$0xff] %v8726_v10  ;;  %v2721_v1 = vmul.f32 %v8747_v20, %v10396_v16  ;;  %v2588_v34 = vmul.f32 %v8680_v19, %v10397_v21  ;;  %v2626_v55 = vmul.f32 %v8693_v23, %v10399_v41  ;;  %v2657_v54 = vmul.f32 %v8717_v13, %v10400_v48  ;;  %v8780_v41 = vld [vmem:[%s9629_s1 + $0x6a] ss:$0 sm:$0xff] }
 0x58d   : > { %v2051_v22 = vadd.f32 %v2047_v29, %v2013_v32  ;;  %v10398_v32 = vld [vmem:[#allocation268_spill] sm:$0xff]  ;;  %v2632_v16 = vadd.f32 %v2628_v39, %v2594_v62  ;;  %v8790_v39 = vld [vmem:[%s9629_s1 + $0x6c] ss:$0 sm:$0xff] }
 0x58e   : > { %v2143_v28 = vmul.f32 %v8446_v44, %v10398_v32  ;;  %v2750_v32 = vmul.f32 %v8767_v7, %v2732_v11  ;;  %v10411_v10 = vld [vmem:[#allocation202_spill] sm:$0xff] }
 0x58f   : > { %5657 = vset.pattern.permute.xlu1 %v9706_v50  ;;  %v8742_v30 = vpop.permute.xlu1 %3899  ;;  %v2080_v29 = vadd.f32 %v2076_v47, %v2051_v22  ;;  %v2172_v47 = vmul.f32 %v8466_v56, %v10401_v35  ;;  %v2592_v22 = vadd.f32 %v2588_v34, %v2563_v59  ;;  %v2655_v56 = vmul.f32 %v8717_v13, %v2640_v63  ;;  %v10403_v34 = vld [vmem:[#allocation324_spill] sm:$0xff]  ;;  %v10407_v63 = vld [vmem:[#allocation102_spill] sm:$0xff] }
 0x590   : > { %4280 = vperm.xlu1 %5657, %v5734_v24   ;;  %v2687_v24 = vadd.f32 %v2683_v51, %v2658_v4  ;;  %v10402_v4 = vld [vmem:[#allocation275_spill] sm:$0xff]  ;;  %v2661_v59 = vadd.f32 %v2657_v54, %v2632_v16 }
 0x591   : > { %v2109_v14 = vadd.f32 %v2105_v45, %v2080_v29  ;;  %v2201_v45 = vmul.f32 %v8479_v43, %v10402_v4  ;;  %v2630_v51 = vadd.f32 %v2626_v55, %v2592_v22  ;;  %v2779_v29 = vmul.f32 %v8780_v41, %v10403_v34  ;;  %v10409_v22 = vld [vmem:[#allocation281_spill] sm:$0xff] }
 0x592   : > { %v2725_v21 = vadd.f32 %v2721_v1, %v2687_v24  ;;  %v10404_v1 = vld [vmem:[#allocation278_spill] sm:$0xff]  ;;  %v2686_v55 = vmul.f32 %v8737_v9, %v10407_v63  ;;  %v10410_v4 = vld [vmem:[#allocation205_spill] sm:$0xff]  ;;  %v2722_v63 = vmul.f32 %v8747_v20, %v10411_v10 }
 0x593   : > { %v2147_v48 = vadd.f32 %v2143_v28, %v2109_v14  ;;  %v2240_v11 = vmul.f32 %v8501_v18, %v10404_v1  ;;  %v10405_v28 = vld [vmem:[#allocation317_spill] sm:$0xff]  ;;  %v2269_v18 = vmul.f32 %v8525_v8, %v10409_v22  ;;  %v2659_v16 = vadd.f32 %v2655_v56, %v2630_v51  ;;  %v10417_v22 = vld [vmem:[#allocation290_spill] sm:$0xff] }
 0x594   : > { %4284 = vperm.xlu1 %5657, %v8686_v5   ;;  %v8774_v44 = vpop.permute.xlu1 %3920  ;;  %v2684_v24 = vmul.f32 %v8737_v9, %v10405_v28  ;;  %v2754_v54 = vadd.f32 %v2750_v32, %v2725_v21  ;;  %v10408_v14 = vld [vmem:[#allocation321_spill] sm:$0xff]  ;;  %v2817_v34 = vmul.f32 %v8790_v39, %v10410_v4  ;;  %v2690_v1 = vadd.f32 %v2686_v55, %v2661_v59  ;;  %v10412_v32 = vld [vmem:[#allocation284_spill] sm:$0xff] }
 0x595   : > { %v2176_v62 = vadd.f32 %v2172_v47, %v2147_v48  ;;  %v2724_v35 = vmul.f32 %v8747_v20, %v10408_v14  ;;  %v2744_v48 = vpop.permute.xlu0 %2743  ;;  %v2298_v14 = vmul.f32 %v8532_v40, %v10412_v32  ;;  %v10413_v56 = vld [vmem:[#allocation329_spill] sm:$0xff] }
 0x596   : > { %v2783_v28 = vadd.f32 %v2779_v29, %v2754_v54  ;;  %v2753_v51 = vmul.f32 %v8767_v7, %v2744_v48  ;;  %v10414_v29 = vld [vmem:[#allocation286_spill] sm:$0xff] }
 0x597   : > { %v2205_v47 = vadd.f32 %v2201_v45, %v2176_v62  ;;  %v2728_v45 = vadd.f32 %v2724_v35, %v2690_v1  ;;  %v2337_v40 = vmul.f32 %v8552_v25, %v10414_v29  ;;  %v10415_v62 = vld [vmem:[#allocation322_spill] sm:$0xff]  ;;  %v10423_v29 = vld [vmem:[#allocation296_spill] sm:$0xff] }
 0x598   : > { %5658 = vset.pattern.permute.xlu1 %v9714_v46  ;;  %v8797_v43 = vpop.permute.xlu1 %3928  ;;  %v2821_v54 = vadd.f32 %v2817_v34, %v2783_v28  ;;  %v8832_v35 = vld [vmem:[%s9629_s1 + $0x6e] ss:$0 sm:$0xff]  ;;  %v8842_v34 = vld [vmem:[%s9629_s1 + $0x70] ss:$0 sm:$0xff]  ;;  %v10418_v28 = vld [vmem:[#allocation293_spill] sm:$0xff] }
 0x599   : > { %10406 = vst [vmem:[#allocation178_spill] sm:$0xff] %v8797_v43  ;;  %4305 = vperm.xlu1 %5658, %v8674_v3   ;;  %v2244_v21 = vadd.f32 %v2240_v11, %v2205_v47  ;;  %v2688_v43 = vadd.f32 %v2684_v24, %v2659_v16  ;;  %v8815_v3 = vld [vmem:[%s9629_s1 + $0x6d] ss:$0 sm:$0xff]  ;;  %v2751_v11 = vmul.f32 %v8767_v7, %v10415_v62  ;;  %v2832_v16 = vpop.permute.xlu0 %2831 }
 0x59a   : > { %v2846_v59 = vmul.f32 %v8815_v3, %v10413_v56  ;;  %v10416_v24 = vld [vmem:[#allocation326_spill] sm:$0xff]  ;;  %v2757_v48 = vadd.f32 %v2753_v51, %v2728_v45  ;;  %v10422_v56 = vld [vmem:[#allocation104_spill] sm:$0xff] }
 0x59b   : > { %v2273_v10 = vadd.f32 %v2269_v18, %v2244_v21  ;;  %v2782_v55 = vmul.f32 %v8780_v41, %v10416_v24  ;;  %v2726_v18 = vadd.f32 %v2722_v63, %v2688_v43  ;;  %v2395_v21 = vmul.f32 %v8583_v42, %v10418_v28  ;;  %v10420_v43 = vld [vmem:[#allocation207_spill] sm:$0xff]  ;;  %v10421_v45 = vld [vmem:[#allocation334_spill] sm:$0xff] }
 0x59c   : > { %v8817_v8 = vpop.permute.xlu1 %3932  ;;  %v2850_v25 = vadd.f32 %v2846_v59, %v2821_v54  ;;  %v2820_v63 = vmul.f32 %v8790_v39, %v10420_v43  ;;  %v2914_v51 = vmul.f32 %v8842_v34, %v10421_v45  ;;  %v2780_v59 = vmul.f32 %v8780_v41, %v10422_v56  ;;  %v10424_v42 = vld [vmem:[#allocation327_spill] sm:$0xff]  ;;  %v8876_v45 = vld [vmem:[%s5897_s28 + $0x180] sm:$0xf] }
 0x59d   : > { %4313 = vperm.xlu1 %5658, %v8686_v5   ;;  %v2302_v47 = vadd.f32 %v2298_v14, %v2273_v10  ;;  %v2366_v5 = vmul.f32 %v8569_v61, %v10417_v22  ;;  %v2755_v32 = vadd.f32 %v2751_v11, %v2726_v18  ;;  %v10419_v14 = vld [vmem:[#allocation105_spill] sm:$0xff]  ;;  %v2818_v62 = vmul.f32 %v8790_v39, %v10424_v42  ;;  %v8861_v11 = vld [vmem:[%s9629_s1 + $0x71] ss:$0 sm:$0xff]  ;;  %v2925_v24 = vpop.permute.xlu0 %2924 }
 0x59e   : > { %v2875_v61 = vmul.f32 %v8832_v35, %v10419_v14  ;;  %v2943_v43 = vmul.f32 %v8861_v11, %v2925_v24  ;;  %v2847_v56 = vmul.f32 %v8815_v3, %v2832_v16  ;;  %v10431_v16 = vld [vmem:[#allocation107_spill] sm:$0xff] }
 0x59f   : > { %v2341_v1 = vadd.f32 %v2337_v40, %v2302_v47  ;;  %v2434_v40 = vmul.f32 %v8594_v33, %v10423_v29  ;;  %v10426_v33 = vld [vmem:[#allocation299_spill] sm:$0xff]  ;;  %v10429_v29 = vld [vmem:[#allocation304_spill] sm:$0xff] }
 0x5a0   : > { %v2879_v47 = vadd.f32 %v2875_v61, %v2850_v25  ;;  %v2463_v18 = vmul.f32 %v8616_v60, %v10426_v33  ;;  %v8881_v25 = vld [vmem:[%s9629_s1 + $0x72] ss:$0 sm:$0xff]  ;;  %v10427_v61 = vld [vmem:[#allocation302_spill] sm:$0xff]  ;;  %v2531_v42 = vmul.f32 %v8641_v57, %v10429_v29  ;;  %v10433_v33 = vld [vmem:[#allocation308_spill] sm:$0xff] }
 0x5a1   : > { %4317 = vperm.xlu1 %5658, %v8723_v36   ;;  %v8837_v4 = vpop.permute.xlu1 %3960  ;;  %v2786_v36 = vadd.f32 %v2782_v55, %v2757_v48  ;;  %v2370_v10 = vadd.f32 %v2366_v5, %v2341_v1  ;;  %v10425_v55 = vld [vmem:[#allocation331_spill] sm:$0xff]  ;;  %v2784_v48 = vadd.f32 %v2780_v59, %v2755_v32  ;;  %v8871_v1 = vld [vmem:[%s5897_s28 + $0x178] sm:$0xf]  ;;  %v2492_v60 = vmul.f32 %v8634_v49, %v10427_v61  ;;  %v10435_v29 = vld [vmem:[#allocation209_spill] sm:$0xff] }
 0x5a2   : > { %v2849_v54 = vmul.f32 %v8815_v3, %v10425_v55  ;;  %v2918_v14 = vadd.f32 %v2914_v51, %v2879_v47 }
 0x5a3   : > { %v2399_v5 = vadd.f32 %v2395_v21, %v2370_v10  ;;  %v2824_v28 = vadd.f32 %v2820_v63, %v2786_v36  ;;  %v2822_v32 = vadd.f32 %v2818_v62, %v2784_v48  ;;  %v10428_v10 = vld [vmem:[#allocation339_spill] sm:$0xff]  ;;  %v2878_v62 = vmul.f32 %v8832_v35, %v10431_v16  ;;  %v2937_v48 = vpop.permute.xlu0 %2936 }
 0x5a4   : > { %v2972_v63 = vmul.f32 %v8881_v25, %v10428_v10  ;;  %v8891_v36 = vld [vmem:[%s9629_s1 + $0x74] ss:$0 sm:$0xff]  ;;  %v2947_v55 = vadd.f32 %v2943_v43, %v2918_v14  ;;  %v10436_v14 = vld [vmem:[#allocation310_spill] sm:$0xff] }
 0x5a5   : > { %5659 = vset.pattern.permute.xlu1 %v9720_v0  ;;  %v8866_v22 = vpop.permute.xlu1 %3965  ;;  %v2438_v21 = vadd.f32 %v2434_v40, %v2399_v5  ;;  %v2853_v59 = vadd.f32 %v2849_v54, %v2824_v28  ;;  %v10430_v40 = vld [vmem:[#allocation332_spill] sm:$0xff]  ;;  %v2851_v57 = vadd.f32 %v2847_v56, %v2822_v32  ;;  %v2589_v43 = vmul.f32 %v8680_v19, %v10436_v14  ;;  %v10438_v19 = vld [vmem:[#allocation313_spill] sm:$0xff] }
 0x5a6   : > { %4346 = vperm.xlu1 %5659, %v8871_v1   ;;  %v2876_v24 = vmul.f32 %v8832_v35, %v10430_v40  ;;  %v10432_v54 = vld [vmem:[#allocation336_spill] sm:$0xff]  ;;  %v2976_v10 = vadd.f32 %v2972_v63, %v2947_v55  ;;  %v2915_v40 = vmul.f32 %v8842_v34, %v10435_v29  ;;  %v2946_v56 = vmul.f32 %v8861_v11, %v2937_v48 }
 0x5a7   : > { %v2467_v51 = vadd.f32 %v2463_v18, %v2438_v21  ;;  %v2917_v47 = vmul.f32 %v8842_v34, %v10432_v54  ;;  %v2560_v18 = vmul.f32 %v8663_v17, %v10433_v33  ;;  %v10434_v28 = vld [vmem:[#allocation212_spill] sm:$0xff]  ;;  %v2882_v61 = vadd.f32 %v2878_v62, %v2853_v59  ;;  %v8915_v17 = vld [vmem:[%s9629_s1 + $0x75] ss:$0 sm:$0xff]  ;;  %v10439_v62 = vld [vmem:[#allocation337_spill] sm:$0xff]  ;;  %v3026_v29 = vpop.permute.xlu0 %3025 }
 0x5a8   : > { %v3011_v21 = vmul.f32 %v8891_v36, %v10434_v28  ;;  %v2880_v54 = vadd.f32 %v2876_v24, %v2851_v57  ;;  %v10437_v59 = vld [vmem:[#allocation344_spill] sm:$0xff]  ;;  %v2627_v24 = vmul.f32 %v8693_v23, %v10438_v19  ;;  %v2944_v55 = vmul.f32 %v8861_v11, %v10439_v62  ;;  %v10441_v28 = vld [vmem:[#allocation315_spill] sm:$0xff]  ;;  %v10447_v19 = vld [vmem:[#allocation109_spill] sm:$0xff] }
 0x5a9   : > { %v2496_v5 = vadd.f32 %v2492_v60, %v2467_v51  ;;  %v2921_v32 = vadd.f32 %v2917_v47, %v2882_v61  ;;  %v3040_v63 = vmul.f32 %v8915_v17, %v10437_v59  ;;  %v5736_v51 = vld [vmem:[%s5897_s28 + $0x170] sm:$0xf]  ;;  %v8933_v47 = vld [vmem:[%s9629_s1 + $0x76] ss:$0 sm:$0xff]  ;;  %v2656_v61 = vmul.f32 %v8717_v13, %v10441_v28  ;;  %v10443_v59 = vld [vmem:[#allocation318_spill] sm:$0xff] }
 0x5aa   : > { %4351 = vperm.xlu1 %5659, %v8876_v45   ;;  %v8898_v49 = vpop.permute.xlu1 %3987  ;;  %v3015_v57 = vadd.f32 %v3011_v21, %v2976_v10  ;;  %v8943_v21 = vld [vmem:[%s9629_s1 + $0x78] ss:$0 sm:$0xff]  ;;  %v10444_v13 = vld [vmem:[#allocation110_spill] sm:$0xff]  ;;  %v2973_v62 = vmul.f32 %v8881_v25, %v10447_v19 }
 0x5ab   : > { %v2535_v16 = vadd.f32 %v2531_v42, %v2496_v5  ;;  %v10440_v5 = vld [vmem:[#allocation341_spill] sm:$0xff]  ;;  %v2950_v23 = vadd.f32 %v2946_v56, %v2921_v32 }
 0x5ac   : > { %v2975_v33 = vmul.f32 %v8881_v25, %v10440_v5  ;;  %v3044_v14 = vadd.f32 %v3040_v63, %v3015_v57  ;;  %v10446_v63 = vld [vmem:[#allocation354_spill] sm:$0xff] }
 0x5ad   : > { %v2564_v42 = vadd.f32 %v2560_v18, %v2535_v16  ;;  %v2919_v18 = vadd.f32 %v2915_v40, %v2880_v54  ;;  %v3069_v40 = vmul.f32 %v8933_v47, %v10444_v13  ;;  %v10445_v54 = vld [vmem:[#allocation43_spill] sm:$0xff]  ;;  %v10448_v57 = vld [vmem:[#allocation342_spill] sm:$0xff] }
 0x5ae   : > { %5660 = vset.pattern.permute.xlu1 %v9706_v50  ;;  %v8918_v60 = vpop.permute.xlu1 %3995  ;;  %v3014_v32 = vmul.f32 %v8891_v36, %v10445_v54  ;;  %v2979_v56 = vadd.f32 %v2975_v33, %v2950_v23  ;;  %v10450_v33 = vld [vmem:[#allocation348_spill] sm:$0xff]  ;;  %v10452_v54 = vld [vmem:[#allocation323_spill] sm:$0xff] }
 0x5af   : > { %4373 = vperm.xlu1 %5660, %v5736_v51   ;;  %v2593_v48 = vadd.f32 %v2589_v43, %v2564_v42  ;;  %v2685_v43 = vmul.f32 %v8737_v9, %v10443_v59  ;;  %v2948_v51 = vadd.f32 %v2944_v55, %v2919_v18  ;;  %v3108_v42 = vmul.f32 %v8943_v21, %v10446_v63  ;;  %v8960_v9 = vld [vmem:[%s9629_s1 + $0x79] ss:$0 sm:$0xff]  ;;  %v3119_v55 = vpop.permute.xlu0 %3118  ;;  %v5737_v59 = vld [vmem:[%s5897_s28 + $0x188] sm:$0xf] }
 0x5b0   : > { %v3043_v18 = vmul.f32 %v8915_v17, %v10450_v33  ;;  %v3073_v23 = vadd.f32 %v3069_v40, %v3044_v14  ;;  %v2752_v63 = vmul.f32 %v8767_v7, %v10452_v54  ;;  %v3018_v19 = vadd.f32 %v3014_v32, %v2979_v56  ;;  %v10453_v40 = vld [vmem:[#allocation325_spill] sm:$0xff]  ;;  %v10457_v33 = vld [vmem:[#allocation328_spill] sm:$0xff] }
 0x5b1   : > { %v2631_v10 = vadd.f32 %v2627_v24, %v2593_v48  ;;  %v3012_v24 = vmul.f32 %v8891_v36, %v10448_v57  ;;  %v10449_v48 = vld [vmem:[#allocation320_spill] sm:$0xff]  ;;  %v3041_v14 = vmul.f32 %v8915_v17, %v3026_v29  ;;  %v2781_v7 = vmul.f32 %v8780_v41, %v10453_v40  ;;  %v10454_v56 = vld [vmem:[#allocation9_spill] sm:$0xff] }
 0x5b2   : > { %v8937_v16 = vpop.permute.xlu1 %3999  ;;  %v2723_v28 = vmul.f32 %v8747_v20, %v10449_v48  ;;  %v3112_v57 = vadd.f32 %v3108_v42, %v3073_v23  ;;  %v8975_v20 = vld [vmem:[%s9629_s1 + $0x7a] ss:$0 sm:$0xff]  ;;  %v3047_v32 = vadd.f32 %v3043_v18, %v3018_v19  ;;  %v2819_v41 = vmul.f32 %v8790_v39, %v10457_v33  ;;  %v10458_v23 = vld [vmem:[#allocation6_spill] sm:$0xff]  ;;  %v10465_v33 = vld [vmem:[#allocation335_spill] sm:$0xff] }
 0x5b3   : > { %10442 = vst [vmem:[#allocation66_spill] sm:$0xff] %v8937_v16  ;;  %4381 = vperm.xlu1 %5660, %v8876_v45   ;;  %v2660_v5 = vadd.f32 %v2656_v61, %v2631_v10  ;;  %v2977_v10 = vadd.f32 %v2973_v62, %v2948_v51  ;;  %v3137_v16 = vmul.f32 %v8960_v9, %v3119_v55 }
 0x5b4   : > { %v3166_v42 = vmul.f32 %v8975_v20, %v10454_v56  ;;  %v10460_v56 = vld [vmem:[#allocation330_spill] sm:$0xff] }
 0x5b5   : > { %v2689_v61 = vadd.f32 %v2685_v43, %v2660_v5  ;;  %v3016_v48 = vadd.f32 %v3012_v24, %v2977_v10  ;;  %v8981_v43 = vld [vmem:[%s9629_s1 + $0x7c] ss:$0 sm:$0xff]  ;;  %v10456_v24 = vld [vmem:[#allocation351_spill] sm:$0xff]  ;;  %v3141_v18 = vadd.f32 %v3137_v16, %v3112_v57  ;;  %v9009_v16 = vld [vmem:[%s9629_s1 + $0x7d] ss:$0 sm:$0xff] }
 0x5b6   : > { %v10455_v5 = vld [vmem:[#allocation112_spill] sm:$0xff]  ;;  %v3070_v55 = vmul.f32 %v8933_v47, %v10456_v24  ;;  %v10459_v10 = vld [vmem:[#allocation215_spill] sm:$0xff] }
 0x5b7   : > { %4385 = vperm.xlu1 %5660, %v5737_v59   ;;  %v8967_v13 = vpop.permute.xlu1 %4020  ;;  %v2727_v51 = vadd.f32 %v2723_v28, %v2689_v61  ;;  %v3072_v29 = vmul.f32 %v8933_v47, %v10455_v5  ;;  %v3111_v59 = vmul.f32 %v8943_v21, %v10458_v23  ;;  %v3131_v61 = vpop.permute.xlu0 %3130  ;;  %v3205_v54 = vmul.f32 %v8981_v43, %v10459_v10 }
 0x5b8   : > { %10451 = vst [vmem:[#allocation77_spill] sm:$0xff] %v8967_v13  ;;  %v3045_v19 = vadd.f32 %v3041_v14, %v3016_v48  ;;  %v2848_v5 = vmul.f32 %v8815_v3, %v10460_v56  ;;  %v3170_v13 = vadd.f32 %v3166_v42, %v3141_v18  ;;  %v3140_v39 = vmul.f32 %v8960_v9, %v3131_v61  ;;  %v10462_v14 = vld [vmem:[#allocation333_spill] sm:$0xff]  ;;  %v10466_v18 = vld [vmem:[#allocation51_spill] sm:$0xff] }
 0x5b9   : > { %v2756_v28 = vadd.f32 %v2752_v63, %v2727_v51  ;;  %v3076_v24 = vadd.f32 %v3072_v29, %v3047_v32  ;;  %v2877_v3 = vmul.f32 %v8832_v35, %v10462_v14  ;;  %v10463_v32 = vld [vmem:[#allocation68_spill] sm:$0xff]  ;;  %v3169_v35 = vmul.f32 %v8975_v20, %v10466_v18 }
 0x5ba   : > { %v3074_v51 = vadd.f32 %v3070_v55, %v3045_v19  ;;  %v3234_v42 = vmul.f32 %v9009_v16, %v10463_v32  ;;  %v10464_v29 = vld [vmem:[#allocation20_spill] sm:$0xff]  ;;  %v9055_v32 = vld [vmem:[%s9629_s1 + $0x81] ss:$0 sm:$0xff] }
 0x5bb   : > { %5661 = vset.pattern.permute.xlu1 %v9714_v46  ;;  %v8988_v62 = vpop.permute.xlu1 %4024  ;;  %v2785_v40 = vadd.f32 %v2781_v7, %v2756_v28  ;;  %v3115_v7 = vadd.f32 %v3111_v59, %v3076_v24  ;;  %v3138_v55 = vmul.f32 %v8960_v9, %v10464_v29  ;;  %v9023_v28 = vld [vmem:[%s9629_s1 + $0x7e] ss:$0 sm:$0xff]  ;;  %v3220_v23 = vpop.permute.xlu0 %3219  ;;  %v3209_v59 = vadd.f32 %v3205_v54, %v3170_v13  ;;  %v9043_v13 = vld [vmem:[%s9629_s1 + $0x80] ss:$0 sm:$0xff] }
 0x5bc   : > { %4406 = vperm.xlu1 %5661, %v8871_v1   ;;  %v10461_v1 = vld [vmem:[#allocation63_spill] sm:$0xff]  ;;  %v10469_v14 = vld [vmem:[#allocation340_spill] sm:$0xff]  ;;  %v10471_v29 = vld [vmem:[#allocation113_spill] sm:$0xff] }
 0x5bd   : > { %v3109_v63 = vmul.f32 %v8943_v21, %v10461_v1  ;;  %v2823_v48 = vadd.f32 %v2819_v41, %v2785_v40  ;;  %v2916_v41 = vmul.f32 %v8842_v34, %v10465_v33  ;;  %v10467_v40 = vld [vmem:[#allocation338_spill] sm:$0xff]  ;;  %v3144_v24 = vadd.f32 %v3140_v39, %v3115_v7  ;;  %v9035_v1 = vld [vmem:[%s5897_s28 + $0x198] sm:$0xf] }
 0x5be   : > { %v2945_v56 = vmul.f32 %v8861_v11, %v10467_v40  ;;  %v10468_v34 = vld [vmem:[#allocation114_spill] sm:$0xff]  ;;  %v2974_v11 = vmul.f32 %v8881_v25, %v10469_v14 }
 0x5bf   : > { %v3113_v61 = vadd.f32 %v3109_v63, %v3074_v51  ;;  %v9046_v63 = vld [vmem:[%s5897_s28 + $0x1a8] sm:$0xf]  ;;  %v3173_v39 = vadd.f32 %v3169_v35, %v3144_v24 }
 0x5c0   : > { %4410 = vperm.xlu1 %5661, %v8876_v45   ;;  %v9012_v57 = vpop.permute.xlu1 %4051  ;;  %v2852_v45 = vadd.f32 %v2848_v5, %v2823_v48  ;;  %v3238_v5 = vadd.f32 %v3234_v42, %v3209_v59  ;;  %v3263_v48 = vmul.f32 %v9023_v28, %v10468_v34  ;;  %v3312_v42 = vpop.permute.xlu0 %3311  ;;  %v10475_v59 = vld [vmem:[#allocation343_spill] sm:$0xff] }
 0x5c1   : > { %v3142_v54 = vadd.f32 %v3138_v55, %v3113_v61  ;;  %v10472_v55 = vld [vmem:[#allocation217_spill] sm:$0xff]  ;;  %v3013_v61 = vmul.f32 %v8891_v36, %v10475_v59  ;;  %v3330_v14 = vmul.f32 %v9055_v32, %v3312_v42  ;;  %v10483_v59 = vld [vmem:[#allocation18_spill] sm:$0xff] }
 0x5c2   : > { %v2881_v19 = vadd.f32 %v2877_v3, %v2852_v45  ;;  %v10470_v3 = vld [vmem:[#allocation15_spill] sm:$0xff]  ;;  %v3167_v45 = vmul.f32 %v8975_v20, %v10471_v29  ;;  %v3208_v33 = vmul.f32 %v8981_v43, %v10472_v55  ;;  %v3267_v24 = vadd.f32 %v3263_v48, %v3238_v5  ;;  %v10477_v29 = vld [vmem:[#allocation346_spill] sm:$0xff]  ;;  %v9076_v36 = vld [vmem:[%s9629_s1 + $0x82] ss:$0 sm:$0xff] }
 0x5c3   : > { %v3301_v7 = vmul.f32 %v9043_v13, %v10470_v3  ;;  %v3042_v55 = vmul.f32 %v8915_v17, %v10477_v29  ;;  %v10478_v48 = vld [vmem:[#allocation7_spill] sm:$0xff]  ;;  %v10479_v42 = vld [vmem:[#allocation17_spill] sm:$0xff] }
 0x5c4   : > { %5662 = vset.pattern.permute.xlu1 %v9720_v0  ;;  %v9030_v10 = vpop.permute.xlu1 %4061  ;;  %v2920_v51 = vadd.f32 %v2916_v41, %v2881_v19  ;;  %v10473_v41 = vld [vmem:[#allocation11_spill] sm:$0xff]  ;;  %v10476_v19 = vld [vmem:[#allocation61_spill] sm:$0xff]  ;;  %v3171_v34 = vadd.f32 %v3167_v45, %v3142_v54  ;;  %v3071_v54 = vmul.f32 %v8933_v47, %v10478_v48 }
 0x5c5   : > { %4438 = vperm.xlu1 %5662, %v9035_v1   ;;  %v3206_v18 = vmul.f32 %v8981_v43, %v10473_v41  ;;  %v3237_v40 = vmul.f32 %v9009_v16, %v10476_v19  ;;  %v3212_v41 = vadd.f32 %v3208_v33, %v3173_v39  ;;  %v10481_v39 = vld [vmem:[#allocation115_spill] sm:$0xff]  ;;  %v10482_v33 = vld [vmem:[#allocation74_spill] sm:$0xff]  ;;  %v9096_v47 = vld [vmem:[%s9629_s1 + $0x84] ss:$0 sm:$0xff] }
 0x5c6   : > { %v2949_v35 = vadd.f32 %v2945_v56, %v2920_v51  ;;  %v3235_v51 = vmul.f32 %v9009_v16, %v3220_v23  ;;  %v3264_v23 = vmul.f32 %v9023_v28, %v10482_v33 }
 0x5c7   : > { %v3210_v56 = vadd.f32 %v3206_v18, %v3171_v34  ;;  %v3241_v45 = vadd.f32 %v3237_v40, %v3212_v41  ;;  %v10484_v40 = vld [vmem:[#allocation91_spill] sm:$0xff]  ;;  %v3324_v34 = vpop.permute.xlu0 %3323  ;;  %v10485_v41 = vld [vmem:[#allocation28_spill] sm:$0xff] }
 0x5c8   : > { %v9063_v25 = vpop.permute.xlu1 %4066  ;;  %v2978_v3 = vadd.f32 %v2974_v11, %v2949_v35  ;;  %v3359_v11 = vmul.f32 %v9076_v36, %v10479_v42  ;;  %v9084_v35 = vld [vmem:[%s5897_s28 + $0x1b0] sm:$0xf]  ;;  %v3139_v48 = vmul.f32 %v8960_v9, %v10485_v41 }
 0x5c9   : > { %10474 = vst [vmem:[#allocation41_spill] sm:$0xff] %v9063_v25  ;;  %4448 = vperm.xlu1 %5662, %v9046_v63   ;;  %v3305_v25 = vadd.f32 %v3301_v7, %v3267_v24  ;;  %v3266_v7 = vmul.f32 %v9023_v28, %v10481_v39  ;;  %v3304_v24 = vmul.f32 %v9043_v13, %v10484_v40  ;;  %v9127_v40 = vld [vmem:[%s9629_s1 + $0x86] ss:$0 sm:$0xff] }
 0x5ca   : > { %v3017_v5 = vadd.f32 %v3013_v61, %v2978_v3  ;;  %v3110_v61 = vmul.f32 %v8943_v21, %v10483_v59  ;;  %v3239_v3 = vadd.f32 %v3235_v51, %v3210_v56  ;;  %v5740_v56 = vld [vmem:[%s5897_s28 + $0x1a0] sm:$0xf]  ;;  %v10487_v51 = vld [vmem:[#allocation31_spill] sm:$0xff]  ;;  %v10490_v59 = vld [vmem:[#allocation100_spill] sm:$0xff] }
 0x5cb   : > { %v3334_v19 = vadd.f32 %v3330_v14, %v3305_v25  ;;  %v3270_v42 = vadd.f32 %v3266_v7, %v3241_v45  ;;  %v3333_v25 = vmul.f32 %v9055_v32, %v3324_v34  ;;  %v9113_v14 = vld [vmem:[%s9629_s1 + $0x85] ss:$0 sm:$0xff] }
 0x5cc   : > { %v3046_v18 = vadd.f32 %v3042_v55, %v3017_v5  ;;  %v10486_v55 = vld [vmem:[#allocation222_spill] sm:$0xff]  ;;  %v3268_v21 = vadd.f32 %v3264_v23, %v3239_v3 }
 0x5cd   : > { %4453 = vperm.xlu1 %5662, %v9084_v35   ;;  %v9087_v17 = vpop.permute.xlu1 %4087  ;;  %v3363_v39 = vadd.f32 %v3359_v11, %v3334_v19  ;;  %v3397_v5 = vmul.f32 %v9096_v47, %v10486_v55  ;;  %v3308_v45 = vadd.f32 %v3304_v24, %v3270_v42  ;;  %v10488_v11 = vld [vmem:[#allocation25_spill] sm:$0xff]  ;;  %v3331_v19 = vmul.f32 %v9055_v32, %v10490_v59 }
 0x5ce   : > { %10480 = vst [vmem:[#allocation69_spill] sm:$0xff] %v9087_v17  ;;  %v3075_v29 = vadd.f32 %v3071_v54, %v3046_v18  ;;  %v3168_v54 = vmul.f32 %v8975_v20, %v10487_v51  ;;  %v3426_v7 = vmul.f32 %v9113_v14, %v10488_v11  ;;  %v10489_v18 = vld [vmem:[#allocation219_spill] sm:$0xff]  ;;  %v10492_v20 = vld [vmem:[#allocation106_spill] sm:$0xff]  ;;  %v10494_v51 = vld [vmem:[#allocation13_spill] sm:$0xff] }
 0x5cf   : > { %v3302_v23 = vmul.f32 %v9043_v13, %v10489_v18  ;;  %v3362_v24 = vmul.f32 %v9076_v36, %v10492_v20  ;;  %v3401_v41 = vadd.f32 %v3397_v5, %v3363_v39  ;;  %v3236_v11 = vmul.f32 %v9009_v16, %v10494_v51  ;;  %v10496_v5 = vld [vmem:[#allocation84_spill] sm:$0xff]  ;;  %v10497_v20 = vld [vmem:[#allocation151_spill] sm:$0xff]  ;;  %v9149_v16 = vld [vmem:[%s9629_s1 + $0x89] ss:$0 sm:$0xff] }
 0x5d0   : > { %v3114_v9 = vadd.f32 %v3110_v61, %v3075_v29  ;;  %v10491_v61 = vld [vmem:[#allocation57_spill] sm:$0xff]  ;;  %v3412_v29 = vpop.permute.xlu0 %3411  ;;  %v3337_v18 = vadd.f32 %v3333_v25, %v3308_v45 }
 0x5d1   : > { %5663 = vset.pattern.permute.xlu1 %v9706_v50  ;;  %v9105_v33 = vpop.permute.xlu1 %4091  ;;  %v3207_v3 = vmul.f32 %v8981_v43, %v10491_v61  ;;  %v3306_v42 = vadd.f32 %v3302_v23, %v3268_v21  ;;  %v3430_v59 = vadd.f32 %v3426_v7, %v3401_v41  ;;  %v5333_v43 = vld [vmem:[%s9629_s1 + $0x88] ss:$0 sm:$0xff]  ;;  %v3265_v21 = vmul.f32 %v9023_v28, %v10496_v5  ;;  %v10498_v45 = vld [vmem:[#allocation117_spill] sm:$0xff] }
 0x5d2   : > { %4474 = vperm.xlu1 %5663, %v5740_v56   ;;  %v3143_v34 = vadd.f32 %v3139_v48, %v3114_v9  ;;  %v10495_v48 = vld [vmem:[#allocation118_spill] sm:$0xff]  ;;  %v3366_v23 = vadd.f32 %v3362_v24, %v3337_v18  ;;  %v3360_v7 = vmul.f32 %v9076_v36, %v10498_v45  ;;  %v10502_v51 = vld [vmem:[#allocation137_spill] sm:$0xff] }
 0x5d3   : > { %v3455_v9 = vmul.f32 %v9127_v40, %v10495_v48  ;;  %v3335_v61 = vadd.f32 %v3331_v19, %v3306_v42  ;;  %v10500_v19 = vld [vmem:[#allocation21_spill] sm:$0xff]  ;;  %v10501_v42 = vld [vmem:[#allocation78_spill] sm:$0xff]  ;;  %v3429_v18 = vmul.f32 %v9113_v14, %v10502_v51 }
 0x5d4   : > { %v3172_v56 = vadd.f32 %v3168_v54, %v3143_v34  ;;  %v3493_v54 = vmul.f32 %v5333_v43, %v10497_v20  ;;  %v3504_v25 = vpop.permute.xlu0 %3503  ;;  %v10499_v34 = vld [vmem:[#allocation224_spill] sm:$0xff] }
 0x5d5   : > { %v3400_v41 = vmul.f32 %v9096_v47, %v10499_v34  ;;  %v3459_v48 = vadd.f32 %v3455_v9, %v3430_v59  ;;  %v3364_v5 = vadd.f32 %v3360_v7, %v3335_v61  ;;  %v3522_v20 = vmul.f32 %v9149_v16, %v3504_v25  ;;  %v10503_v34 = vld [vmem:[#allocation95_spill] sm:$0xff] }
 0x5d6   : > { %4478 = vperm.xlu1 %5663, %v9046_v63   ;;  %v9134_v55 = vpop.permute.xlu1 %4112  ;;  %v3211_v39 = vadd.f32 %v3207_v3, %v3172_v56  ;;  %v3398_v3 = vmul.f32 %v9096_v47, %v10500_v19  ;;  %v3303_v56 = vmul.f32 %v9043_v13, %v10501_v42  ;;  %v3332_v19 = vmul.f32 %v9055_v32, %v10503_v34  ;;  %v10506_v32 = vld [vmem:[#allocation120_spill] sm:$0xff] }
 0x5d7   : > { %10493 = vst [vmem:[#allocation42_spill] sm:$0xff] %v9134_v55  ;;  %v3404_v17 = vadd.f32 %v3400_v41, %v3366_v23  ;;  %v3497_v55 = vadd.f32 %v3493_v54, %v3459_v48  ;;  %v3458_v23 = vmul.f32 %v9127_v40, %v10506_v32  ;;  %v10507_v54 = vld [vmem:[#allocation166_spill] sm:$0xff]  ;;  %v10510_v48 = vld [vmem:[#allocation27_spill] sm:$0xff] }
 0x5d8   : > { %v3240_v24 = vadd.f32 %v3236_v11, %v3211_v39  ;;  %v5337_v11 = vld [vmem:[%s9629_s1 + $0x8a] ss:$0 sm:$0xff]  ;;  %v3402_v13 = vadd.f32 %v3398_v3, %v3364_v5  ;;  %v3427_v39 = vmul.f32 %v9113_v14, %v3412_v29  ;;  %v3456_v7 = vmul.f32 %v9127_v40, %v10507_v54  ;;  %v5343_v29 = vld [vmem:[%s9629_s1 + $0x8c] ss:$0 sm:$0xff]  ;;  %v10508_v3 = vld [vmem:[#allocation23_spill] sm:$0xff]  ;;  %v3516_v51 = vpop.permute.xlu0 %3515 }
 0x5d9   : > { %v3433_v61 = vadd.f32 %v3429_v18, %v3404_v17  ;;  %v10509_v17 = vld [vmem:[#allocation154_spill] sm:$0xff]  ;;  %v3428_v5 = vmul.f32 %v9113_v14, %v10510_v48 }
 0x5da   : > { %5664 = vset.pattern.permute.xlu1 %v9714_v46  ;;  %v9158_v28 = vpop.permute.xlu1 %4120  ;;  %v3269_v45 = vadd.f32 %v3265_v21, %v3240_v24  ;;  %v10505_v21 = vld [vmem:[#allocation159_spill] sm:$0xff]  ;;  %v3399_v24 = vmul.f32 %v9096_v47, %v10508_v3  ;;  %v3431_v18 = vadd.f32 %v3427_v39, %v3402_v13  ;;  %v3525_v47 = vmul.f32 %v9149_v16, %v3516_v51  ;;  %v10512_v13 = vld [vmem:[#allocation144_spill] sm:$0xff] }
 0x5db   : > { %4499 = vperm.xlu1 %5664, %v9035_v1   ;;  %v10504_v1 = vld [vmem:[#allocation19_spill] sm:$0xff]  ;;  %v3551_v25 = vmul.f32 %v5337_v11, %v10505_v21  ;;  %v10511_v21 = vld [vmem:[#allocation229_spill] sm:$0xff]  ;;  %v3457_v14 = vmul.f32 %v9127_v40, %v10512_v13  ;;  %v10516_v3 = vld [vmem:[#allocation172_spill] sm:$0xff] }
 0x5dc   : > { %v3307_v59 = vadd.f32 %v3303_v56, %v3269_v45  ;;  %v3361_v9 = vmul.f32 %v9076_v36, %v10504_v1  ;;  %v3526_v36 = vadd.f32 %v3522_v20, %v3497_v55  ;;  %v3496_v56 = vmul.f32 %v5333_v43, %v10509_v17  ;;  %v5345_v55 = vld [vmem:[%s9629_s1 + $0x8d] ss:$0 sm:$0xff] }
 0x5dd   : > { %v3462_v45 = vadd.f32 %v3458_v23, %v3433_v61  ;;  %v5347_v23 = vld [vmem:[%s9629_s1 + $0x8e] ss:$0 sm:$0xff] }
 0x5de   : > { %v9172_v42 = vpop.permute.xlu1 %4124  ;;  %v3336_v41 = vadd.f32 %v3332_v19, %v3307_v59  ;;  %v3555_v34 = vadd.f32 %v3551_v25, %v3526_v36  ;;  %v3590_v19 = vmul.f32 %v5343_v29, %v10511_v21  ;;  %v3460_v59 = vadd.f32 %v3456_v7, %v3431_v18  ;;  %v10514_v25 = vld [vmem:[#allocation30_spill] sm:$0xff]  ;;  %v10515_v7 = vld [vmem:[#allocation147_spill] sm:$0xff]  ;;  %v3605_v36 = vpop.permute.xlu0 %3604 }
 0x5df   : > { %4507 = vperm.xlu1 %5664, %v9046_v63   ;;  %v3500_v39 = vadd.f32 %v3496_v56, %v3462_v45  ;;  %v3523_v32 = vmul.f32 %v9149_v16, %v10514_v25  ;;  %v9213_v56 = vld [vmem:[%s5897_s28 + $0x1c8] sm:$0xf] }
 0x5e0   : > { %v3365_v63 = vadd.f32 %v3361_v9, %v3336_v41  ;;  %v3619_v9 = vmul.f32 %v5345_v55, %v8231_v38  ;;  %v3495_v41 = vmul.f32 %v5333_v43, %v10515_v7  ;;  %v3594_v40 = vadd.f32 %v3590_v19, %v3555_v34  ;;  %v10518_v45 = vld [vmem:[#allocation122_spill] sm:$0xff]  ;;  %v5353_v34 = vld [vmem:[%s9629_s1 + $0x90] ss:$0 sm:$0xff] }
 0x5e1   : > { %v3529_v18 = vadd.f32 %v3525_v47, %v3500_v39  ;;  %v3648_v21 = vmul.f32 %v5347_v23, %v10518_v45  ;;  %v10520_v39 = vld [vmem:[#allocation121_spill] sm:$0xff] }
 0x5e2   : > { %v3403_v20 = vadd.f32 %v3399_v24, %v3365_v63  ;;  %v3554_v24 = vmul.f32 %v5337_v11, %v10516_v3  ;;  %v10517_v63 = vld [vmem:[#allocation155_spill] sm:$0xff]  ;;  %v3698_v47 = vpop.permute.xlu0 %3697  ;;  %v10523_v3 = vld [vmem:[#allocation169_spill] sm:$0xff] }
 0x5e3   : > { %4511 = vperm.xlu1 %5664, %v9084_v35   ;;  %v9191_v1 = vpop.permute.xlu1 %4152  ;;  %v10513_v35 = vld [vmem:[#allocation227_spill] sm:$0xff]  ;;  %v3524_v48 = vmul.f32 %v9149_v16, %v10517_v63  ;;  %v10524_v63 = vld [vmem:[#allocation174_spill] sm:$0xff] }
 0x5e4   : > { %v3494_v61 = vmul.f32 %v5333_v43, %v10513_v35  ;;  %v3432_v54 = vadd.f32 %v3428_v5, %v3403_v20  ;;  %v3623_v5 = vadd.f32 %v3619_v9, %v3594_v40  ;;  %v9219_v43 = vld [vmem:[%s5897_s28 + $0x1d0] sm:$0xf]  ;;  %v10519_v20 = vld [vmem:[#allocation32_spill] sm:$0xff]  ;;  %v3558_v35 = vadd.f32 %v3554_v24, %v3529_v18 }
 0x5e5   : > { %v3553_v13 = vmul.f32 %v5337_v11, %v10519_v20  ;;  %v5355_v16 = vld [vmem:[%s9629_s1 + $0x91] ss:$0 sm:$0xff]  ;;  %v3552_v9 = vmul.f32 %v5337_v11, %v10520_v39  ;;  %v3592_v24 = vmul.f32 %v5343_v29, %v10523_v3  ;;  %v3621_v11 = vmul.f32 %v5345_v55, %v10524_v63  ;;  %v5357_v39 = vld [vmem:[%s9629_s1 + $0x92] ss:$0 sm:$0xff] }
 0x5e6   : > { %v3498_v17 = vadd.f32 %v3494_v61, %v3460_v59  ;;  %v3461_v51 = vadd.f32 %v3457_v14, %v3432_v54  ;;  %v3687_v14 = vmul.f32 %v5353_v34, %v8329_v12  ;;  %v10521_v61 = vld [vmem:[#allocation231_spill] sm:$0xff]  ;;  %v10522_v54 = vld [vmem:[#allocation164_spill] sm:$0xff]  ;;  %v3622_v12 = vmul.f32 %v5345_v55, %v8267_v27 }
 0x5e7   : > { %5665 = vset.pattern.permute.xlu1 %v9720_v0  ;;  %v9210_v38 = vpop.permute.xlu1 %4157  ;;  %v3593_v25 = vmul.f32 %v5343_v29, %v10521_v61  ;;  %v3591_v7 = vmul.f32 %v5343_v29, %v10522_v54  ;;  %v3652_v40 = vadd.f32 %v3648_v21, %v3623_v5  ;;  %v3620_v54 = vmul.f32 %v5345_v55, %v3605_v36  ;;  %v5363_v55 = vld [vmem:[%s9629_s1 + $0x94] ss:$0 sm:$0xff] }
 0x5e8   : > { %4540 = vperm.xlu1 %5665, %v9213_v56   ;;  %v3527_v19 = vadd.f32 %v3523_v32, %v3498_v17  ;;  %v3499_v59 = vadd.f32 %v3495_v41, %v3461_v51  ;;  %v3716_v51 = vmul.f32 %v5355_v16, %v3698_v47  ;;  %v3650_v5 = vmul.f32 %v5347_v23, %v8304_v58 }
 0x5e9   : > { %v3597_v45 = vadd.f32 %v3593_v25, %v3558_v35  ;;  %v3691_v20 = vadd.f32 %v3687_v14, %v3652_v40  ;;  %v3745_v21 = vmul.f32 %v5357_v39, %v8433_v6  ;;  %v3649_v35 = vmul.f32 %v5347_v23, %v8290_v37  ;;  %v3710_v25 = vpop.permute.xlu0 %3709  ;;  %v10526_v37 = vld [vmem:[#allocation236_spill] sm:$0xff] }
 0x5ea   : > { %v3528_v41 = vadd.f32 %v3524_v48, %v3499_v59  ;;  %v3556_v17 = vadd.f32 %v3552_v9, %v3527_v19  ;;  %v5742_v19 = vld [vmem:[%s5897_s28 + $0x1c0] sm:$0xf]  ;;  %v10525_v59 = vld [vmem:[#allocation124_spill] sm:$0xff]  ;;  %v3689_v47 = vmul.f32 %v5353_v34, %v8344_v53  ;;  %v3690_v9 = vmul.f32 %v5353_v34, %v8366_v52  ;;  %v5365_v53 = vld [vmem:[%s9629_s1 + $0x95] ss:$0 sm:$0xff] }
 0x5eb   : > { %v3626_v48 = vadd.f32 %v3622_v12, %v3597_v45  ;;  %v3720_v14 = vadd.f32 %v3716_v51, %v3691_v20  ;;  %v3718_v3 = vmul.f32 %v5355_v16, %v8405_v31  ;;  %v3719_v40 = vmul.f32 %v5355_v16, %v3710_v25  ;;  %v10529_v45 = vld [vmem:[#allocation165_spill] sm:$0xff] }
 0x5ec   : > { %4545 = vperm.xlu1 %5665, %v9219_v43   ;;  %v9234_v32 = vpop.permute.xlu1 %4179  ;;  %v3557_v18 = vadd.f32 %v3553_v13, %v3528_v41  ;;  %v3595_v61 = vadd.f32 %v3591_v7, %v3556_v17  ;;  %v3651_v13 = vmul.f32 %v5347_v23, %v10525_v59  ;;  %v3784_v23 = vmul.f32 %v5363_v55, %v10526_v37  ;;  %v5743_v59 = vld [vmem:[%s5897_s28 + $0x1d8] sm:$0xf] }
 0x5ed   : > { %v3747_v51 = vmul.f32 %v5357_v39, %v8451_v15  ;;  %v3717_v20 = vmul.f32 %v5355_v16, %v10529_v45  ;;  %v10532_v16 = vld [vmem:[#allocation176_spill] sm:$0xff] }
 0x5ee   : > { %v3596_v27 = vadd.f32 %v3592_v24, %v3557_v18  ;;  %v3624_v58 = vadd.f32 %v3620_v54, %v3595_v61  ;;  %v3655_v41 = vadd.f32 %v3651_v13, %v3626_v48  ;;  %v3749_v24 = vadd.f32 %v3745_v21, %v3720_v14  ;;  %v10527_v18 = vld [vmem:[#allocation36_spill] sm:$0xff]  ;;  %v5367_v61 = vld [vmem:[%s9629_s1 + $0x96] ss:$0 sm:$0xff] }
 0x5ef   : > { %v3813_v63 = vmul.f32 %v5365_v53, %v10527_v18  ;;  %v5375_v37 = vld [vmem:[%s9629_s1 + $0x99] ss:$0 sm:$0xff]  ;;  %v10536_v18 = vld [vmem:[#allocation173_spill] sm:$0xff] }
 0x5f0   : > { %5666 = vset.pattern.permute.xlu1 %v9706_v50  ;;  %v9243_v29 = vpop.permute.xlu1 %4187  ;;  %v3625_v36 = vadd.f32 %v3621_v11, %v3596_v27  ;;  %v3653_v12 = vadd.f32 %v3649_v35, %v3624_v58  ;;  %v3694_v17 = vadd.f32 %v3690_v9, %v3655_v41  ;;  %v10528_v11 = vld [vmem:[#allocation234_spill] sm:$0xff]  ;;  %v10533_v9 = vld [vmem:[#allocation127_spill] sm:$0xff]  ;;  %v5373_v58 = vld [vmem:[%s9629_s1 + $0x98] ss:$0 sm:$0xff] }
 0x5f1   : > { %4567 = vperm.xlu1 %5666, %v5742_v19   ;;  %v3688_v31 = vmul.f32 %v5353_v34, %v10528_v11  ;;  %v10530_v27 = vld [vmem:[#allocation34_spill] sm:$0xff]  ;;  %v3788_v19 = vadd.f32 %v3784_v23, %v3749_v24  ;;  %v3799_v34 = vpop.permute.xlu0 %3798  ;;  %v3842_v25 = vmul.f32 %v5367_v61, %v10533_v9  ;;  %v3844_v24 = vmul.f32 %v5367_v61, %v8622_v2  ;;  %v10537_v2 = vld [vmem:[#allocation175_spill] sm:$0xff]  ;;  %v10540_v9 = vld [vmem:[#allocation128_spill] sm:$0xff] }
 0x5f2   : > { %v3654_v6 = vadd.f32 %v3650_v5, %v3625_v36  ;;  %v3748_v48 = vmul.f32 %v5357_v39, %v10530_v27  ;;  %v10531_v5 = vld [vmem:[#allocation44_spill] sm:$0xff]  ;;  %v3723_v35 = vadd.f32 %v3719_v40, %v3694_v17  ;;  %v3881_v23 = vmul.f32 %v5373_v58, %v8646_v26  ;;  %v10534_v40 = vld [vmem:[#allocation125_spill] sm:$0xff]  ;;  %v10535_v17 = vld [vmem:[#allocation238_spill] sm:$0xff] }
 0x5f3   : > { %v3786_v21 = vmul.f32 %v5363_v55, %v10531_v5  ;;  %v3692_v15 = vadd.f32 %v3688_v31, %v3653_v12  ;;  %v3817_v14 = vadd.f32 %v3813_v63, %v3788_v19  ;;  %v3785_v63 = vmul.f32 %v5363_v55, %v10536_v18 }
 0x5f4   : > { %v9255_v7 = vpop.permute.xlu1 %4191  ;;  %v3693_v52 = vadd.f32 %v3689_v47, %v3654_v6  ;;  %v3815_v47 = vmul.f32 %v5365_v53, %v10532_v16  ;;  %v3752_v41 = vadd.f32 %v3748_v48, %v3723_v35  ;;  %v3816_v31 = vmul.f32 %v5365_v53, %v10537_v2  ;;  %v10539_v16 = vld [vmem:[#allocation178_spill] sm:$0xff] }
 0x5f5   : > { %4575 = vperm.xlu1 %5666, %v9219_v43   ;;  %v3721_v6 = vadd.f32 %v3717_v20, %v3692_v15  ;;  %v3892_v45 = vpop.permute.xlu0 %3891  ;;  %v3846_v20 = vadd.f32 %v3842_v25, %v3817_v14  ;;  %v3845_v25 = vmul.f32 %v5367_v61, %v10540_v9  ;;  %v10546_v9 = vld [vmem:[#allocation130_spill] sm:$0xff] }
 0x5f6   : > { %v3722_v54 = vadd.f32 %v3718_v3, %v3693_v52  ;;  %v3746_v52 = vmul.f32 %v5357_v39, %v10534_v40  ;;  %v3910_v48 = vmul.f32 %v5375_v37, %v3892_v45  ;;  %v3912_v39 = vmul.f32 %v5375_v37, %v8742_v30  ;;  %v5383_v30 = vld [vmem:[%s9629_s1 + $0x9c] ss:$0 sm:$0xff] }
 0x5f7   : > { %v3885_v19 = vadd.f32 %v3881_v23, %v3846_v20  ;;  %v9331_v20 = vld [vmem:[%s5897_s28 + $0x159] sm:$0xf] }
 0x5f8   : > { %v3751_v36 = vadd.f32 %v3747_v51, %v3722_v54  ;;  %v3787_v51 = vmul.f32 %v5363_v55, %v10535_v17  ;;  %v10538_v54 = vld [vmem:[#allocation59_spill] sm:$0xff]  ;;  %v3750_v26 = vadd.f32 %v3746_v52, %v3721_v6  ;;  %v5377_v55 = vld [vmem:[%s9629_s1 + $0x9a] ss:$0 sm:$0xff]  ;;  %v10541_v6 = vld [vmem:[#allocation50_spill] sm:$0xff] }
 0x5f9   : > { %4579 = vperm.xlu1 %5666, %v5743_v59   ;;  %v9273_v13 = vpop.permute.xlu1 %4212  ;;  %v3883_v27 = vmul.f32 %v5373_v58, %v10538_v54  ;;  %v3939_v14 = vmul.f32 %v5377_v55, %v8774_v44  ;;  %v9313_v44 = vld [vmem:[%s9629_s1 + $0x9d] ss:$0 sm:$0xff]  ;;  %v3904_v52 = vpop.permute.xlu0 %3903 }
 0x5fa   : > { %v3790_v3 = vadd.f32 %v3786_v21, %v3751_v36  ;;  %v3791_v5 = vadd.f32 %v3787_v51, %v3752_v41  ;;  %v3789_v59 = vadd.f32 %v3785_v63, %v3750_v26  ;;  %v3843_v41 = vmul.f32 %v5367_v61, %v10541_v6  ;;  %v9321_v63 = vld [vmem:[%s5897_s28 + $0x149] sm:$0xf] }
 0x5fb   : > { %v4008_v18 = vmul.f32 %v9313_v44, %v8918_v60  ;;  %v3913_v45 = vmul.f32 %v5375_v37, %v3904_v52  ;;  %v4006_v60 = vmul.f32 %v9313_v44, %v8898_v49  ;;  %v10548_v52 = vld [vmem:[#allocation245_spill] sm:$0xff] }
 0x5fc   : > { %v3819_v11 = vadd.f32 %v3815_v47, %v3790_v3  ;;  %v3820_v35 = vadd.f32 %v3816_v31, %v3791_v5  ;;  %v3941_v47 = vmul.f32 %v5377_v55, %v10539_v16  ;;  %v3914_v3 = vadd.f32 %v3910_v48, %v3885_v19  ;;  %v10544_v48 = vld [vmem:[#allocation241_spill] sm:$0xff] }
 0x5fd   : > { %5667 = vset.pattern.permute.xlu1 %v9714_v46  ;;  %v9286_v12 = vpop.permute.xlu1 %4216  ;;  %v3882_v5 = vmul.f32 %v5373_v58, %v10544_v48  ;;  %v10545_v19 = vld [vmem:[#allocation53_spill] sm:$0xff] }
 0x5fe   : > { %4600 = vperm.xlu1 %5667, %v9213_v56   ;;  %v3848_v21 = vadd.f32 %v3844_v24, %v3819_v11  ;;  %v3814_v56 = vmul.f32 %v5365_v53, %v3799_v34  ;;  %v10542_v53 = vld [vmem:[#allocation39_spill] sm:$0xff]  ;;  %v3979_v24 = vmul.f32 %v5383_v30, %v8866_v22  ;;  %v3849_v17 = vadd.f32 %v3845_v25, %v3820_v35  ;;  %v9327_v22 = vld [vmem:[%s9629_s1 + $0x9e] ss:$0 sm:$0xff] }
 0x5ff   : > { %v3884_v34 = vmul.f32 %v5373_v58, %v10542_v53  ;;  %v3943_v61 = vadd.f32 %v3939_v14, %v3914_v3  ;;  %v10543_v11 = vld [vmem:[#allocation243_spill] sm:$0xff]  ;;  %v4037_v26 = vmul.f32 %v9327_v22, %v8988_v62  ;;  %v9353_v62 = vld [vmem:[%s9629_s1 + $0xa1] ss:$0 sm:$0xff]  ;;  %v3992_v14 = vpop.permute.xlu0 %3991  ;;  %v4035_v25 = vmul.f32 %v9327_v22, %v10546_v9 }
 0x600   : > { %v3887_v36 = vadd.f32 %v3883_v27, %v3848_v21  ;;  %v3818_v23 = vadd.f32 %v3814_v56, %v3789_v59  ;;  %v3977_v2 = vmul.f32 %v5383_v30, %v10543_v11  ;;  %v9341_v21 = vld [vmem:[%s9629_s1 + $0xa0] ss:$0 sm:$0xff]  ;;  %v3942_v56 = vmul.f32 %v5377_v55, %v8817_v8  ;;  %v9369_v3 = vld [vmem:[%s5897_s28 + $0x161] sm:$0xf] }
 0x601   : > { %v3888_v54 = vadd.f32 %v3884_v34, %v3849_v17  ;;  %v4075_v49 = vmul.f32 %v9341_v21, %v9030_v10  ;;  %v4104_v8 = vmul.f32 %v9353_v62, %v9105_v33  ;;  %v9362_v10 = vld [vmem:[%s9629_s1 + $0xa2] ss:$0 sm:$0xff]  ;;  %v4073_v53 = vmul.f32 %v9341_v21, %v9012_v57 }
 0x602   : > { %4604 = vperm.xlu1 %5667, %v9219_v43   ;;  %v9299_v15 = vpop.permute.xlu1 %4244  ;;  %v3916_v43 = vadd.f32 %v3912_v39, %v3887_v36  ;;  %v3847_v31 = vadd.f32 %v3843_v41, %v3818_v23  ;;  %v3911_v39 = vmul.f32 %v5375_v37, %v10545_v19  ;;  %v3981_v35 = vadd.f32 %v3977_v2, %v3943_v61  ;;  %v9379_v61 = vld [vmem:[%s9629_s1 + $0xa4] ss:$0 sm:$0xff]  ;;  %v5746_v19 = vld [vmem:[%s5897_s28 + $0x151] sm:$0xf] }
 0x603   : > { %v3917_v37 = vadd.f32 %v3913_v45, %v3888_v54  ;;  %v3980_v17 = vmul.f32 %v5383_v30, %v10548_v52  ;;  %v3978_v57 = vmul.f32 %v5383_v30, %v8837_v4  ;;  %v4171_v2 = vmul.f32 %v9379_v61, %v9210_v38  ;;  %v4084_v45 = vpop.permute.xlu0 %4083  ;;  %v9397_v38 = vld [vmem:[%s9629_s1 + $0xa6] ss:$0 sm:$0xff]  ;;  %v10554_v52 = vld [vmem:[#allocation250_spill] sm:$0xff] }
 0x604   : > { %v3945_v51 = vadd.f32 %v3941_v47, %v3916_v43  ;;  %v3886_v58 = vadd.f32 %v3882_v5, %v3847_v31  ;;  %v4010_v16 = vadd.f32 %v4006_v60, %v3981_v35  ;;  %v4133_v43 = vmul.f32 %v9362_v10, %v9158_v28 }
 0x605   : > { %v3946_v41 = vadd.f32 %v3942_v56, %v3917_v37  ;;  %v4102_v48 = vmul.f32 %v9353_v62, %v4084_v45  ;;  %v10550_v56 = vld [vmem:[#allocation42_spill] sm:$0xff] }
 0x606   : > { %5668 = vset.pattern.permute.xlu1 %v9720_v0  ;;  %v9316_v40 = vpop.permute.xlu1 %4254  ;;  %v3983_v27 = vadd.f32 %v3979_v24, %v3945_v51  ;;  %v3915_v6 = vadd.f32 %v3911_v39, %v3886_v58  ;;  %v10547_v24 = vld [vmem:[#allocation129_spill] sm:$0xff]  ;;  %v10549_v51 = vld [vmem:[#allocation66_spill] sm:$0xff]  ;;  %v4131_v35 = vmul.f32 %v9362_v10, %v10550_v56 }
 0x607   : > { %4631 = vperm.xlu1 %5668, %v9321_v63   ;;  %v3940_v23 = vmul.f32 %v5377_v55, %v10547_v24  ;;  %v4009_v28 = vmul.f32 %v9313_v44, %v10549_v51  ;;  %v9389_v55 = vld [vmem:[%s9629_s1 + $0xa5] ss:$0 sm:$0xff]  ;;  %v3984_v54 = vadd.f32 %v3980_v17, %v3946_v41  ;;  %v4096_v24 = vpop.permute.xlu0 %4095  ;;  %v4169_v17 = vmul.f32 %v9379_v61, %v10554_v52  ;;  %v5460_v52 = vld [vmem:[%s5897_s28 + $0x181] sm:$0xf] }
 0x608   : > { %v4012_v36 = vadd.f32 %v4008_v18, %v3983_v27  ;;  %v4039_v18 = vadd.f32 %v4035_v25, %v4010_v16  ;;  %v4200_v4 = vmul.f32 %v9389_v55, %v9243_v29  ;;  %v10553_v16 = vld [vmem:[#allocation41_spill] sm:$0xff] }
 0x609   : > { %v3944_v31 = vadd.f32 %v3940_v23, %v3915_v6  ;;  %v4013_v39 = vadd.f32 %v4009_v28, %v3984_v54  ;;  %v9433_v28 = vld [vmem:[%s9629_s1 + $0xaa] ss:$0 sm:$0xff] }
 0x60a   : > { %v9344_v59 = vpop.permute.xlu1 %4259  ;;  %v4041_v47 = vadd.f32 %v4037_v26, %v4012_v36  ;;  %v4077_v27 = vadd.f32 %v4073_v53, %v4039_v18  ;;  %v4007_v26 = vmul.f32 %v9313_v44, %v3992_v14  ;;  %v4229_v36 = vmul.f32 %v9397_v38, %v9286_v12  ;;  %v9411_v44 = vld [vmem:[%s9629_s1 + $0xa8] ss:$0 sm:$0xff]  ;;  %v10552_v14 = vld [vmem:[#allocation77_spill] sm:$0xff]  ;;  %v9422_v12 = vld [vmem:[%s9629_s1 + $0xa9] ss:$0 sm:$0xff] }
 0x60b   : > { %4641 = vperm.xlu1 %5668, %v9331_v20   ;;  %v3982_v5 = vadd.f32 %v3978_v57, %v3944_v31  ;;  %v4036_v37 = vmul.f32 %v9327_v22, %v10552_v14  ;;  %v4268_v25 = vmul.f32 %v9411_v44, %v9316_v40  ;;  %v4198_v57 = vmul.f32 %v9389_v55, %v9234_v32  ;;  %v10555_v18 = vld [vmem:[#allocation248_spill] sm:$0xff]  ;;  %v10556_v31 = vld [vmem:[#allocation69_spill] sm:$0xff] }
 0x60c   : > { %v4079_v34 = vadd.f32 %v4075_v49, %v4041_v47  ;;  %v10551_v49 = vld [vmem:[#allocation132_spill] sm:$0xff]  ;;  %v4076_v47 = vmul.f32 %v9341_v21, %v10553_v16  ;;  %v4103_v45 = vmul.f32 %v9353_v62, %v10556_v31  ;;  %v4134_v32 = vmul.f32 %v9362_v10, %v9172_v42 }
 0x60d   : > { %v4038_v58 = vmul.f32 %v9327_v22, %v10551_v49  ;;  %v4011_v6 = vadd.f32 %v4007_v26, %v3982_v5  ;;  %v4184_v5 = vpop.permute.xlu0 %4183  ;;  %v4266_v42 = vmul.f32 %v9411_v44, %v9299_v15  ;;  %v10559_v49 = vld [vmem:[#allocation253_spill] sm:$0xff]  ;;  %v4201_v14 = vmul.f32 %v9389_v55, %v9255_v7 }
 0x60e   : > { %v4108_v11 = vadd.f32 %v4104_v8, %v4079_v34  ;;  %v4106_v8 = vadd.f32 %v4102_v48, %v4077_v27  ;;  %v4228_v7 = vmul.f32 %v9397_v38, %v9273_v13 }
 0x60f   : > { %4646 = vperm.xlu1 %5668, %v9369_v3   ;;  %v9372_v33 = vpop.permute.xlu1 %4280  ;;  %v4042_v53 = vadd.f32 %v4038_v58, %v4013_v39  ;;  %v4040_v23 = vadd.f32 %v4036_v37, %v4011_v6  ;;  %v4172_v58 = vmul.f32 %v9379_v61, %v10559_v49  ;;  %v10560_v6 = vld [vmem:[#allocation136_spill] sm:$0xff] }
 0x610   : > { %v4137_v60 = vadd.f32 %v4133_v43, %v4108_v11  ;;  %v4135_v34 = vadd.f32 %v4131_v35, %v4106_v8  ;;  %v4074_v11 = vmul.f32 %v9341_v21, %v10555_v18  ;;  %v10562_v18 = vld [vmem:[#allocation255_spill] sm:$0xff]  ;;  %v4296_v31 = vmul.f32 %v9422_v12, %v9372_v33  ;;  %v10563_v33 = vld [vmem:[#allocation138_spill] sm:$0xff] }
 0x611   : > { %v4080_v40 = vadd.f32 %v4076_v47, %v4042_v53  ;;  %v4230_v53 = vmul.f32 %v9397_v38, %v10560_v6 }
 0x612   : > { %v4175_v29 = vadd.f32 %v4171_v2, %v4137_v60  ;;  %v4105_v2 = vmul.f32 %v9353_v62, %v4096_v24  ;;  %v4173_v27 = vadd.f32 %v4169_v17, %v4135_v34  ;;  %v10557_v62 = vld [vmem:[#allocation135_spill] sm:$0xff]  ;;  %v4269_v34 = vmul.f32 %v9411_v44, %v9344_v59 }
 0x613   : > { %5669 = vset.pattern.permute.xlu1 %v9706_v50  ;;  %v4285_v30 = vpop.permute.xlu1 %4284  ;;  %v4227_v56 = vmul.f32 %v9397_v38, %v10557_v62  ;;  %v4325_v62 = vmul.f32 %v9433_v28, %v10563_v33 }
 0x614   : > { %4667 = vperm.xlu1 %5669, %v5746_v19   ;;  %v4204_v9 = vadd.f32 %v4200_v4, %v4175_v29  ;;  %v4297_v43 = vmul.f32 %v9422_v12, %v4285_v30  ;;  %v4078_v30 = vadd.f32 %v4074_v11, %v4040_v23  ;;  %v4109_v26 = vadd.f32 %v4105_v2, %v4080_v40  ;;  %v10558_v29 = vld [vmem:[#allocation133_spill] sm:$0xff]  ;;  %v5425_v2 = vld [vmem:[%s9629_s1 + $0xad] ss:$0 sm:$0xff] }
 0x615   : > { %v4202_v21 = vadd.f32 %v4198_v57, %v4173_v27  ;;  %v10561_v40 = vld [vmem:[#allocation257_spill] sm:$0xff]  ;;  %v4267_v11 = vmul.f32 %v9411_v44, %v10562_v18  ;;  %v5751_v18 = vld [vmem:[%s5897_s28 + $0x1b1] sm:$0xf] }
 0x616   : > { %v4233_v22 = vadd.f32 %v4229_v36, %v4204_v9  ;;  %v4107_v19 = vadd.f32 %v4103_v45, %v4078_v30  ;;  %v4138_v35 = vadd.f32 %v4134_v32, %v4109_v26  ;;  %v4132_v36 = vmul.f32 %v9362_v10, %v10558_v29 }
 0x617   : > { %v4231_v37 = vadd.f32 %v4227_v56, %v4202_v21  ;;  %v10564_v56 = vld [vmem:[#allocation262_spill] sm:$0xff] }
 0x618   : > { %4671 = vperm.xlu1 %5669, %v9331_v20   ;;  %v4306_v41 = vpop.permute.xlu1 %4305  ;;  %v4272_v51 = vadd.f32 %v4268_v25, %v4233_v22  ;;  %v4136_v16 = vadd.f32 %v4132_v36, %v4107_v19  ;;  %v4176_v47 = vadd.f32 %v4172_v58, %v4138_v35  ;;  %v5748_v19 = vld [vmem:[%s5897_s28 + $0x171] sm:$0xf] }
 0x619   : > { %v4270_v8 = vadd.f32 %v4266_v42, %v4231_v37 }
 0x61a   : > { %v4301_v60 = vadd.f32 %v4297_v43, %v4272_v51  ;;  %v4205_v25 = vadd.f32 %v4201_v14, %v4176_v47  ;;  %v5749_v47 = vld [vmem:[%s5897_s28 + $0x189] sm:$0xf] }
 0x61c   : > { %5670 = vset.pattern.permute.xlu1 %v9714_v46  ;;  %v4314_v54 = vpop.permute.xlu1 %4313  ;;  %v4234_v23 = vadd.f32 %v4230_v53, %v4205_v25 }
 0x61d   : > { %v4326_v4 = vmul.f32 %v9433_v28, %v4314_v54  ;;  %4692 = vperm.xlu1 %5670, %v9321_v63   ;;  %v4170_v63 = vmul.f32 %v9379_v61, %v9191_v1  ;;  %v4324_v1 = vmul.f32 %v9433_v28, %v4306_v41  ;;  %v4199_v61 = vmul.f32 %v9389_v55, %v4184_v5  ;;  %v5747_v55 = vld [vmem:[%s5897_s28 + $0x179] sm:$0xf] }
 0x61e   : > { %v4273_v51 = vadd.f32 %v4269_v34, %v4234_v23 }
 0x61f   : > { %v4330_v48 = vadd.f32 %v4326_v4, %v4301_v60  ;;  %v4174_v9 = vadd.f32 %v4170_v63, %v4136_v16  ;;  %v5427_v16 = vld [vmem:[%s9629_s1 + $0xae] ss:$0 sm:$0xff] }
 0x620   : > { %v4318_v39 = vpop.permute.xlu1 %4317 }
 0x621   : > { %4700 = vperm.xlu1 %5670, %v9331_v20   ;;  %v4277_v20 = vpop.permute.xlu0 %4276  ;;  %v4203_v41 = vadd.f32 %v4199_v61, %v4174_v9  ;;  %v4327_v32 = vmul.f32 %v9433_v28, %v4318_v39 }
 0x622   : > { %v4295_v10 = vmul.f32 %v9422_v12, %v4277_v20 }
 0x623   : > { %v4232_v17 = vadd.f32 %v4228_v7, %v4203_v41  ;;  %v5433_v7 = vld [vmem:[%s9629_s1 + $0xb0] ss:$0 sm:$0xff]  ;;  %v5750_v41 = vld [vmem:[%s5897_s28 + $0x199] sm:$0xf] }
 0x624   : > { %v4299_v22 = vadd.f32 %v4295_v10, %v4270_v8 }
 0x625   : > { %4704 = vperm.xlu1 %5670, %v9369_v3   ;;  %v4347_v15 = vpop.permute.xlu1 %4346  ;;  %v5423_v3 = vld [vmem:[%s9629_s1 + $0xac] ss:$0 sm:$0xff]  ;;  %v4289_v59 = vpop.permute.xlu0 %4288  ;;  %v4271_v4 = vadd.f32 %v4267_v11, %v4232_v17 }
 0x626   : > { %v4328_v13 = vadd.f32 %v4324_v1, %v4299_v22  ;;  %v4363_v57 = vmul.f32 %v5423_v3, %v10561_v40  ;;  %v4298_v54 = vmul.f32 %v9422_v12, %v4289_v59  ;;  %v4364_v12 = vmul.f32 %v5423_v3, %v4347_v15  ;;  %v10565_v1 = vld [vmem:[#allocation140_spill] sm:$0xff] }
 0x627   : > { %v4300_v26 = vadd.f32 %v4296_v31, %v4271_v4  ;;  %v4366_v39 = vmul.f32 %v5423_v3, %v10564_v56  ;;  %v4421_v61 = vmul.f32 %v5427_v16, %v10565_v1 }
 0x628   : > { %v4367_v27 = vadd.f32 %v4363_v57, %v4328_v13  ;;  %v4302_v30 = vadd.f32 %v4298_v54, %v4273_v51  ;;  %v10567_v57 = vld [vmem:[#allocation270_spill] sm:$0xff] }
 0x629   : > { %5671 = vset.pattern.permute.xlu1 %v9720_v0  ;;  %v4352_v43 = vpop.permute.xlu1 %4351  ;;  %v4329_v42 = vadd.f32 %v4325_v62, %v4300_v26  ;;  %v4378_v58 = vpop.permute.xlu0 %4377  ;;  %v4461_v51 = vmul.f32 %v5433_v7, %v10567_v57  ;;  %v10571_v57 = vld [vmem:[#allocation145_spill] sm:$0xff] }
 0x62a   : > { %v4365_v24 = vmul.f32 %v5423_v3, %v4352_v43  ;;  %4732 = vperm.xlu1 %5671, %v5747_v55   ;;  %v4393_v37 = vmul.f32 %v5425_v2, %v4378_v58 }
 0x62b   : > { %v4368_v49 = vadd.f32 %v4364_v12, %v4329_v42  ;;  %v10568_v42 = vld [vmem:[#allocation143_spill] sm:$0xff] }
 0x62c   : > { %v4369_v38 = vadd.f32 %v4365_v24, %v4330_v48  ;;  %v4331_v48 = vadd.f32 %v4327_v32, %v4302_v30  ;;  %v5470_v24 = vld [vmem:[%s5897_s28 + $0x1a9] sm:$0xf]  ;;  %v5752_v32 = vld [vmem:[%s5897_s28 + $0x1a1] sm:$0xf]  ;;  %v5437_v30 = vld [vmem:[%s9629_s1 + $0xb2] ss:$0 sm:$0xff] }
 0x62d   : > { %v4397_v8 = vadd.f32 %v4393_v37, %v4368_v49 }
 0x62e   : > { %4737 = vperm.xlu1 %5671, %v5460_v52   ;;  %v4374_v45 = vpop.permute.xlu1 %4373  ;;  %v4370_v36 = vadd.f32 %v4366_v39, %v4331_v48 }
 0x62f   : > { %v4392_v60 = vmul.f32 %v5425_v2, %v4374_v45 }
 0x631   : > { %v4396_v44 = vadd.f32 %v4392_v60, %v4367_v27  ;;  %v4471_v27 = vpop.permute.xlu0 %4470 }
 0x632   : > { %5672 = vset.pattern.permute.xlu1 %v9706_v50  ;;  %v4382_v21 = vpop.permute.xlu1 %4381 }
 0x633   : > { %v4394_v5 = vmul.f32 %v5425_v2, %v4382_v21  ;;  %4759 = vperm.xlu1 %5672, %v5748_v19   ;;  %v4425_v53 = vadd.f32 %v4421_v61, %v4396_v44  ;;  %v10570_v61 = vld [vmem:[#allocation280_spill] sm:$0xff] }
 0x635   : > { %v4398_v35 = vadd.f32 %v4394_v5, %v4369_v38  ;;  %v4483_v19 = vpop.permute.xlu0 %4482 }
 0x636   : > { %v4386_v29 = vpop.permute.xlu1 %4385 }
 0x637   : > { %v4395_v63 = vmul.f32 %v5425_v2, %v4386_v29  ;;  %4767 = vperm.xlu1 %5672, %v5460_v52   ;;  %v4519_v29 = vmul.f32 %v5437_v30, %v10568_v42 }
 0x639   : > { %v4399_v14 = vadd.f32 %v4395_v63, %v4370_v36  ;;  %v5443_v36 = vld [vmem:[%s9629_s1 + $0xb4] ss:$0 sm:$0xff] }
 0x63b   : > { %4771 = vperm.xlu1 %5672, %v5749_v47   ;;  %v4407_v28 = vpop.permute.xlu1 %4406  ;;  %v10569_v47 = vld [vmem:[#allocation273_spill] sm:$0xff] }
 0x63c   : > { %v4422_v15 = vmul.f32 %v5427_v16, %v4407_v28  ;;  %v4557_v28 = vmul.f32 %v5443_v36, %v10569_v47  ;;  %v5463_v47 = vld [vmem:[%s9629_s1 + $0xbc] ss:$0 sm:$0xff] }
 0x63e   : > { %v4426_v20 = vadd.f32 %v4422_v15, %v4397_v8  ;;  %v5445_v8 = vld [vmem:[%s9629_s1 + $0xb5] ss:$0 sm:$0xff] }
 0x63f   : > { %5673 = vset.pattern.permute.xlu1 %v9714_v46  ;;  %v4411_v9 = vpop.permute.xlu1 %4410 }
 0x640   : > { %v4423_v10 = vmul.f32 %v5427_v16, %v4411_v9  ;;  %4792 = vperm.xlu1 %5673, %v5747_v55   ;;  %v10566_v55 = vld [vmem:[#allocation141_spill] sm:$0xff]  ;;  %v4465_v59 = vadd.f32 %v4461_v51, %v4426_v20 }
 0x641   : > { %v4424_v23 = vmul.f32 %v5427_v16, %v10566_v55 }
 0x642   : > { %v4427_v25 = vadd.f32 %v4423_v10, %v4398_v35 }
 0x643   : > { %v4428_v38 = vadd.f32 %v4424_v23, %v4399_v14 }
 0x644   : > { %4796 = vperm.xlu1 %5673, %v5460_v52   ;;  %v4439_v6 = vpop.permute.xlu1 %4438 }
 0x645   : > { %v4460_v3 = vmul.f32 %v5433_v7, %v4439_v6 }
 0x647   : > { %v4464_v34 = vadd.f32 %v4460_v3, %v4425_v53 }
 0x648   : > { %5675 = vset.pattern.permute.xlu1 %v9720_v0  ;;  %v4449_v22 = vpop.permute.xlu1 %4448  ;;  %v5435_v0 = vld [vmem:[%s9629_s1 + $0xb1] ss:$0 sm:$0xff] }
 0x649   : > { %v4462_v43 = vmul.f32 %v5433_v7, %v4449_v22  ;;  %4823 = vperm.xlu1 %5675, %v5750_v41   ;;  %v4489_v4 = vmul.f32 %v5435_v0, %v4471_v27  ;;  %v4492_v33 = vmul.f32 %v5435_v0, %v4483_v19  ;;  %v4572_v22 = vpop.permute.xlu0 %4571 }
 0x64b   : > { %v4466_v13 = vadd.f32 %v4462_v43, %v4427_v25  ;;  %v4493_v26 = vadd.f32 %v4489_v4, %v4464_v34 }
 0x64c   : > { %v4454_v17 = vpop.permute.xlu1 %4453 }
 0x64d   : > { %v4463_v40 = vmul.f32 %v5433_v7, %v4454_v17  ;;  %4833 = vperm.xlu1 %5675, %v5470_v24   ;;  %v4560_v7 = vmul.f32 %v5443_v36, %v10570_v61 }
 0x64f   : > { %v4467_v52 = vadd.f32 %v4463_v40, %v4428_v38 }
 0x651   : > { %4838 = vperm.xlu1 %5675, %v5751_v18   ;;  %v4475_v11 = vpop.permute.xlu1 %4474  ;;  %v4496_v56 = vadd.f32 %v4492_v33, %v4467_v52 }
 0x652   : > { %v4490_v2 = vmul.f32 %v5435_v0, %v4475_v11 }
 0x654   : > { %v4494_v31 = vadd.f32 %v4490_v2, %v4465_v59 }
 0x655   : > { %5677 = vset.pattern.permute.xlu1 %v9706_v50  ;;  %v4479_v45 = vpop.permute.xlu1 %4478 }
 0x656   : > { %v4491_v54 = vmul.f32 %v5435_v0, %v4479_v45  ;;  %4859 = vperm.xlu1 %5677, %v5752_v32   ;;  %v5453_v0 = vld [vmem:[%s9629_s1 + $0xb8] ss:$0 sm:$0xff] }
 0x658   : > { %v4495_v60 = vadd.f32 %v4491_v54, %v4466_v13  ;;  %v10572_v54 = vld [vmem:[#allocation146_spill] sm:$0xff] }
 0x65a   : > { %4863 = vperm.xlu1 %5677, %v5470_v24   ;;  %v4500_v44 = vpop.permute.xlu1 %4499 }
 0x65b   : > { %v4518_v21 = vmul.f32 %v5437_v30, %v4500_v44 }
 0x65d   : > { %v4522_v48 = vadd.f32 %v4518_v21, %v4493_v26 }
 0x65e   : > { %5678 = vset.pattern.permute.xlu1 %v9714_v46  ;;  %v4508_v5 = vpop.permute.xlu1 %4507  ;;  %v4523_v46 = vadd.f32 %v4519_v29, %v4494_v31  ;;  %v5455_v29 = vld [vmem:[%s9629_s1 + $0xb9] ss:$0 sm:$0xff] }
 0x65f   : > { %v4520_v50 = vmul.f32 %v5437_v30, %v4508_v5  ;;  %4884 = vperm.xlu1 %5678, %v5750_v41   ;;  %v4561_v20 = vadd.f32 %v4557_v28, %v4522_v48  ;;  %v4587_v41 = vmul.f32 %v5445_v8, %v4572_v22  ;;  %v10574_v28 = vld [vmem:[#allocation148_spill] sm:$0xff] }
 0x661   : > { %v4524_v62 = vadd.f32 %v4520_v50, %v4495_v60 }
 0x662   : > { %v4512_v12 = vpop.permute.xlu1 %4511 }
 0x663   : > { %v4521_v39 = vmul.f32 %v5437_v30, %v4512_v12  ;;  %4892 = vperm.xlu1 %5678, %v5470_v24   ;;  %v5447_v24 = vld [vmem:[%s9629_s1 + $0xb6] ss:$0 sm:$0xff]  ;;  %v4664_v12 = vpop.permute.xlu0 %4663 }
 0x664   : > { %v4615_v51 = vmul.f32 %v5447_v24, %v10571_v57  ;;  %v4618_v32 = vmul.f32 %v5447_v24, %v10572_v54  ;;  %v5477_v57 = vld [vmem:[%s9629_s1 + $0xc2] ss:$0 sm:$0xff] }
 0x665   : > { %v4525_v35 = vadd.f32 %v4521_v39, %v4496_v56 }
 0x667   : > { %4896 = vperm.xlu1 %5678, %v5751_v18   ;;  %v4541_v63 = vpop.permute.xlu1 %4540  ;;  %v4564_v3 = vadd.f32 %v4560_v7, %v4525_v35  ;;  %v4676_v35 = vpop.permute.xlu0 %4675 }
 0x668   : > { %v4558_v49 = vmul.f32 %v5443_v36, %v4541_v63 }
 0x66a   : > { %v4562_v58 = vadd.f32 %v4558_v49, %v4523_v46 }
 0x66b   : > { %v4546_v14 = vpop.permute.xlu1 %4545  ;;  %v4764_v46 = vpop.permute.xlu0 %4763 }
 0x66c   : > { %v4559_v37 = vmul.f32 %v5443_v36, %v4546_v14  ;;  %v4591_v23 = vadd.f32 %v4587_v41, %v4562_v58  ;;  %v10573_v36 = vld [vmem:[#allocation288_spill] sm:$0xff] }
 0x66d   : > { %v4654_v63 = vmul.f32 %v5453_v0, %v10573_v36 }
 0x66e   : > { %v4563_v16 = vadd.f32 %v4559_v37, %v4524_v62  ;;  %v5457_v37 = vld [vmem:[%s9629_s1 + $0xba] ss:$0 sm:$0xff] }
 0x670   : > { %v4568_v15 = vpop.permute.xlu1 %4567 }
 0x671   : > { %v4586_v9 = vmul.f32 %v5445_v8, %v4568_v15  ;;  %v4856_v15 = vpop.permute.xlu0 %4855 }
 0x673   : > { %v4590_v10 = vadd.f32 %v4586_v9, %v4561_v20 }
 0x674   : > { %v4576_v25 = vpop.permute.xlu1 %4575 }
 0x675   : > { %v4588_v1 = vmul.f32 %v5445_v8, %v4576_v25  ;;  %v4619_v11 = vadd.f32 %v4615_v51, %v4590_v10  ;;  %v4682_v25 = vmul.f32 %v5455_v29, %v4664_v12  ;;  %v9549_v22 = vpop.permute.xlu0 %4867 }
 0x677   : > { %v4592_v6 = vadd.f32 %v4588_v1, %v4563_v16  ;;  %v5465_v1 = vld [vmem:[%s9629_s1 + $0xbd] ss:$0 sm:$0xff] }
 0x678   : > { %v4580_v53 = vpop.permute.xlu1 %4579 }
 0x679   : > { %v4589_v34 = vmul.f32 %v5445_v8, %v4580_v53  ;;  %v4712_v8 = vmul.f32 %v5457_v37, %v10574_v28  ;;  %v5467_v53 = vld [vmem:[%s9629_s1 + $0xbe] ss:$0 sm:$0xff]  ;;  %v4889_v51 = vpop.permute.xlu0 %4888 }
 0x67b   : > { %v4593_v43 = vadd.f32 %v4589_v34, %v4564_v3  ;;  %v4779_v34 = vmul.f32 %v5465_v1, %v4764_v46 }
 0x67d   : > { %v4601_v55 = vpop.permute.xlu1 %4600  ;;  %v4622_v4 = vadd.f32 %v4618_v32, %v4593_v43 }
 0x67e   : > { %v4616_v13 = vmul.f32 %v5447_v24, %v4601_v55 }
 0x680   : > { %v4620_v17 = vadd.f32 %v4616_v13, %v4591_v23  ;;  %v10575_v23 = vld [vmem:[#allocation291_spill] sm:$0xff] }
 0x681   : > { %v4605_v38 = vpop.permute.xlu1 %4604  ;;  %v4749_v13 = vmul.f32 %v5463_v47, %v10575_v23 }
 0x682   : > { %v4617_v40 = vmul.f32 %v5447_v24, %v4605_v38  ;;  %v4658_v14 = vadd.f32 %v4654_v63, %v4620_v17  ;;  %v5473_v17 = vld [vmem:[%s9629_s1 + $0xc0] ss:$0 sm:$0xff] }
 0x684   : > { %v4621_v52 = vadd.f32 %v4617_v40, %v4592_v6 }
 0x686   : > { %v4632_v18 = vpop.permute.xlu1 %4631 }
 0x687   : > { %v4653_v59 = vmul.f32 %v5453_v0, %v4632_v18 }
 0x689   : > { %v4657_v2 = vadd.f32 %v4653_v59, %v4619_v11  ;;  %v10576_v59 = vld [vmem:[#allocation306_spill] sm:$0xff] }
 0x68a   : > { %v4642_v31 = vpop.permute.xlu1 %4641 }
 0x68b   : > { %v4655_v45 = vmul.f32 %v5453_v0, %v4642_v31  ;;  %v4686_v3 = vadd.f32 %v4682_v25, %v4657_v2  ;;  %v4846_v2 = vmul.f32 %v5473_v17, %v10576_v59 }
 0x68d   : > { %v9530_v27 = vadd.f32 %v4655_v45, %v4621_v52  ;;  %v5475_v45 = vld [vmem:[%s9629_s1 + $0xc1] ss:$0 sm:$0xff] }
 0x68e   : > { %v4647_v60 = vpop.permute.xlu1 %4646  ;;  %v4874_v28 = vmul.f32 %v5475_v45, %v4856_v15 }
 0x68f   : > { %v4656_v30 = vmul.f32 %v5453_v0, %v4647_v60  ;;  %v4685_v0 = vmul.f32 %v5455_v29, %v4676_v35 }
 0x691   : > { %v4660_v44 = vadd.f32 %v4656_v30, %v4622_v4  ;;  %v4904_v4 = vmul.f32 %v5477_v57, %v4889_v51 }
 0x693   : > { %v4668_v26 = vpop.permute.xlu1 %4667  ;;  %v4689_v54 = vadd.f32 %v4685_v0, %v4660_v44 }
 0x694   : > { %v4683_v49 = vmul.f32 %v5455_v29, %v4668_v26 }
 0x696   : > { %v4687_v16 = vadd.f32 %v4683_v49, %v4658_v14 }
 0x697   : > { %v4672_v21 = vpop.permute.xlu1 %4671 }
 0x698   : > { %v4716_v10 = vadd.f32 %v4712_v8, %v4687_v16  ;;  %v4684_v40 = vmul.f32 %v5455_v29, %v4672_v21  ;;  %v10578_v29 = vld [vmem:[#allocation298_spill] sm:$0xff] }
 0x699   : > { %v4752_v36 = vmul.f32 %v5463_v47, %v10578_v29 }
 0x69a   : > { %v4688_v30 = vadd.f32 %v4684_v40, %v9530_v27 }
 0x69c   : > { %v4693_v48 = vpop.permute.xlu1 %4692 }
 0x69d   : > { %v4711_v61 = vmul.f32 %v5457_v37, %v4693_v48 }
 0x69f   : > { %v4715_v41 = vadd.f32 %v4711_v61, %v4686_v3 }
 0x6a0   : > { %v4701_v5 = vpop.permute.xlu1 %4700 }
 0x6a1   : > { %v4753_v11 = vadd.f32 %v4749_v13, %v4715_v41  ;;  %v4713_v31 = vmul.f32 %v5457_v37, %v4701_v5 }
 0x6a3   : > { %v4717_v5 = vadd.f32 %v4713_v31, %v4688_v30 }
 0x6a4   : > { %v4705_v50 = vpop.permute.xlu1 %4704 }
 0x6a5   : > { %v4714_v18 = vmul.f32 %v5457_v37, %v4705_v50  ;;  %v10577_v50 = vld [vmem:[#allocation150_spill] sm:$0xff] }
 0x6a9   : > { %v4733_v19 = vpop.permute.xlu1 %4732 }
 0x6aa   : > { %v4750_v20 = vmul.f32 %v5463_v47, %v4733_v19  ;;  %v4807_v19 = vmul.f32 %v5467_v53, %v10577_v50 }
 0x6ac   : > { %v4754_v7 = vadd.f32 %v4750_v20, %v4716_v10  ;;  %v10579_v20 = vld [vmem:[#allocation152_spill] sm:$0xff] }
 0x6ad   : > { %v4738_v33 = vpop.permute.xlu1 %4737 }
 0x6ae   : > { %v4783_v24 = vadd.f32 %v4779_v34, %v4754_v7  ;;  %v4751_v26 = vmul.f32 %v5463_v47, %v4738_v33 }
 0x6b0   : > { %v4755_v49 = vadd.f32 %v4751_v26, %v4717_v5 }
 0x6b2   : > { %v4760_v62 = vpop.permute.xlu1 %4759 }
 0x6b3   : > { %v4778_v38 = vmul.f32 %v5465_v1, %v4760_v62  ;;  %v4718_v62 = vadd.f32 %v4714_v18, %v4689_v54 }
 0x6b5   : > { %v4782_v32 = vadd.f32 %v4778_v38, %v4753_v11  ;;  %v4756_v33 = vadd.f32 %v4752_v36, %v4718_v62 }
 0x6b6   : > { %v4768_v56 = vpop.permute.xlu1 %4767 }
 0x6b7   : > { %v4780_v35 = vmul.f32 %v5465_v1, %v4768_v56  ;;  %v4811_v63 = vadd.f32 %v4807_v19, %v4782_v32 }
 0x6b9   : > { %v4784_v16 = vadd.f32 %v4780_v35, %v4755_v49 }
 0x6ba   : > { %v4772_v39 = vpop.permute.xlu1 %4771 }
 0x6bb   : > { %v4781_v44 = vmul.f32 %v5465_v1, %v4772_v39 }
 0x6bd   : > { %v4785_v8 = vadd.f32 %v4781_v44, %v4756_v33 }
 0x6bf   : > { %v4793_v42 = vpop.permute.xlu1 %4792 }
 0x6c0   : > { %v4808_v43 = vmul.f32 %v5467_v53, %v4793_v42 }
 0x6c2   : > { %v4812_v52 = vadd.f32 %v4808_v43, %v4783_v24 }
 0x6c3   : > { %v4797_v58 = vpop.permute.xlu1 %4796 }
 0x6c4   : > { %v4850_v21 = vadd.f32 %v4846_v2, %v4812_v52  ;;  %v4809_v14 = vmul.f32 %v5467_v53, %v4797_v58 }
 0x6c6   : > { %v4813_v39 = vadd.f32 %v4809_v14, %v4784_v16 }
 0x6c8   : > { %v4824_v9 = vpop.permute.xlu1 %4823 }
 0x6c9   : > { %v4845_v12 = vmul.f32 %v5473_v17, %v4824_v9  ;;  %v4810_v9 = vmul.f32 %v5467_v53, %v10579_v20  ;;  %v4877_v53 = vmul.f32 %v5475_v45, %v9549_v22 }
 0x6cb   : > { %v4849_v37 = vadd.f32 %v4845_v12, %v4811_v63  ;;  %v4814_v7 = vadd.f32 %v4810_v9, %v4785_v8 }
 0x6cc   : > { %v4834_v6 = vpop.permute.xlu1 %4833 }
 0x6cd   : > { %v4847_v56 = vmul.f32 %v5473_v17, %v4834_v6  ;;  %v4878_v25 = vadd.f32 %v4874_v28, %v4849_v37 }
 0x6cf   : > { %v4851_v61 = vadd.f32 %v4847_v56, %v4813_v39 }
 0x6d0   : > { %v4839_v55 = vpop.permute.xlu1 %4838 }
 0x6d1   : > { %v4848_v10 = vmul.f32 %v5473_v17, %v4839_v55 }
 0x6d3   : > { %v4852_v15 = vadd.f32 %v4848_v10, %v4814_v7 }
 0x6d5   : > { %v4860_v60 = vpop.permute.xlu1 %4859  ;;  %v4881_v55 = vadd.f32 %v4877_v53, %v4852_v15 }
 0x6d6   : > { %v4875_v48 = vmul.f32 %v5475_v45, %v4860_v60 }
 0x6d8   : > { %v4879_v42 = vadd.f32 %v4875_v48, %v4850_v21 }
 0x6d9   : > { %v4864_v46 = vpop.permute.xlu1 %4863 }
 0x6da   : > { %v4908_v27 = vadd.f32 %v4904_v4, %v4879_v42  ;;  %v4876_v58 = vmul.f32 %v5475_v45, %v4864_v46 }
 0x6dc   : > { %4912 = vst [vmem:[%s9568_s9 + $0x4] sm:$0xf] %v4908_v27  ;;  %v4880_v43 = vadd.f32 %v4876_v58, %v4851_v61 }
 0x6de   : > { %v4885_v47 = vpop.permute.xlu1 %4884 }
 0x6df   : > { %v4903_v1 = vmul.f32 %v5477_v57, %v4885_v47 }
 0x6e1   : > { %v4907_v3 = vadd.f32 %v4903_v1, %v4878_v25 }
 0x6e2   : > { %v4893_v34 = vpop.permute.xlu1 %4892 }
 0x6e3   : > { %4911 = vst [vmem:[%s9568_s9] sm:$0xf] %v4907_v3  ;;  %v4905_v6 = vmul.f32 %v5477_v57, %v4893_v34 }
 0x6e5   : > { %v4909_v41 = vadd.f32 %v4905_v6, %v4880_v43 }
 0x6e6   : > { %v4897_v24 = vpop.permute.xlu1 %4896 }
 0x6e7   : > { %4913 = vst [vmem:[%s9568_s9 + $0x8] sm:$0xf] %v4909_v41  ;;  %v4906_v23 = vmul.f32 %v5477_v57, %v4897_v24 }
 0x6e9   : > { %v4910_v13 = vadd.f32 %v4906_v23, %v4881_v55 }
 0x6eb   : > { %4914 = vst [vmem:[%s9568_s9 + $0xc] sm:$0xf] %v4910_v13 }
 0x6ec   : > { %5766 = shalt.err (!%p5763_p3)
}
 0x6ed   : > { %s5767_s28 = scalar_lea.hbm %s9582_s20, 256  ;;  %s5771_s4 = scalar_lea.hbm %s9631_s3, 512 }
 0x6ee   : > { %p5768_p4 = scmp.ne.s32.totalorder %s9582_s20, %s5767_s28  ;;  %p5772_p9 = scmp.lt.u32.totalorder %s9582_s20, %s9631_s3 }
 0x6ef   : > { %p5773_p10 = scmp.lt.u32.totalorder %s5771_s4, %s5767_s28  ;;  %p5775_p12 = scmp.lt.u32.totalorder %s5767_s28, %s9582_s20 }
 0x6f0   : > { %p5769_p7 = pnand %p5768_p4, %p5881_p5 }
 0x6f1   : > { %p5774_p11 = por %p5773_p10, %p5772_p9 }
 0x6f2   : > { %p5770_p8 = pneg %p5769_p7 }
 0x6f3   : > { %p5776_p13 = por %p5775_p12, %p5774_p11 }
 0x6f5   : > { %p5777_p0 = pnand %p5776_p13, %p5770_p8 }
 0x6f7   : > { %5780 = shalt.err (!%p5777_p0)
}
 0x6f8   : > { %s5821_s7 = smov 64   ;;  %s5822_s8 = smov 4  }
 0x6f9   : > { %5485 = dma.vmem_to_hbm [thread:$0]  (%p5881_p5), %s9577_s10, 256, %s9582_s20, %s9587_s24, %s5821_s7, %s5821_s7, %s5822_s8  }
 0x6fa PF: > { %p5491_p1 = scmp.ge.s32.totalorder %s5815_s15, 2  ;;  %s4944_s9 = sand.u32 1, %s5803_s12  }
 0x6fb   : > { %s4945_s11 = scalar_lea.sflag [#allocation3], %s4944_s9 }
 0x6fc   : > { %p5488_p2 = pnand %p5491_p1, %p5885_p6 }
 0x6fe   : > { %5798 = dma.done.wait (!%p5488_p2), %s4945_s11, 256  }
 0x6ff   : > { %5800 = vsyncadd (!%p5488_p2), %s4945_s11, 4294967040  ;;  %p13_p3 = scmp.ge.s32.totalorder %s5868_s18, 4   ;;  %s10580_s12 = smov %s5807_s13 }
 0x700   : > { %s10581_s13 = smov %s5811_s14  ;;  %s10582_s14 = smov %s5879_s21 }
 0x701   : > { %s10583_s15 = smov %s5868_s18  ;;  %15 = sbr.rel (!%p13_p3) target bundleno = 3 (0x3), region = 142 }
 0x708   :  { %4950 = vsyncpa [#allocation3], 1 }
 0x709   :  { %4952 = vsyncpa [#allocation3 + $0x1], 1 }

</bundles_post_ra>
